<compile_context>
chip_gen: v6e
topology: v6e:2x2x1
jax: 0.10.0
libtpu: 0.0.40
codegen_flags: <defaults>
</compile_context>

<pallas_src>
import math

import jax
import jax.numpy as jnp
from jax.experimental import pallas as pl
from jax.experimental.pallas import tpu as pltpu


def _round_up(n, m):
    return (n + m - 1) // m * m


# ----------------------------------------------------------------------------
# Default kernel: weights fully resident in VMEM, one grid step per batch tile.
#   out = relu(x @ W1 + b1) @ W2 + b2
# ----------------------------------------------------------------------------
def _mlp_resident_kernel(x_ref, w1_ref, b1_ref, w2_ref, b2_ref, o_ref):
    x = x_ref[...].astype(jnp.bfloat16)                      # f32 -> bf16 on VPU
    z = jnp.dot(x, w1_ref[...], preferred_element_type=jnp.float32)
    z = jnp.maximum(z + b1_ref[...], 0.0)                    # bias + ReLU in f32
    y = jnp.dot(z.astype(jnp.bfloat16), w2_ref[...],
                preferred_element_type=jnp.float32)
    o_ref[...] = y + b2_ref[...]


# ----------------------------------------------------------------------------
# Fallback kernel (large repr_dim only): stream hidden tiles, f32 accumulator.
# ----------------------------------------------------------------------------
def _mlp_streamed_kernel(x_ref, w1_ref, b1_ref, w2_ref, b2_ref, o_ref, acc_ref):
    h = pl.program_id(1)

    @pl.when(h == 0)
    def _():
        acc_ref[...] = jnp.zeros_like(acc_ref)

    x = x_ref[...].astype(jnp.bfloat16)
    z = jnp.dot(x, w1_ref[...], preferred_element_type=jnp.float32)
    z = jnp.maximum(z + b1_ref[...], 0.0)
    acc_ref[...] += jnp.dot(z.astype(jnp.bfloat16), w2_ref[...],
                            preferred_element_type=jnp.float32)

    @pl.when(h == pl.num_programs(1) - 1)
    def _():
        o_ref[...] = acc_ref[...] + b2_ref[...]


# ----------------------------------------------------------------------------
# One-time parameter preparation (hoists bf16 weight casts out of the
# per-call path; biases kept f32 and reshaped to lane-dense (1, D) rows).
# ----------------------------------------------------------------------------
def prepare_params(params):
    return {
        "w1": params["w1"].astype(jnp.bfloat16),              # (D_in,  D_hid)
        "b1": params["b1"].reshape(1, -1).astype(jnp.float32),  # (1, D_hid)
        "w2": params["w2"].astype(jnp.bfloat16),              # (D_hid, D_out)
        "b2": params["b2"].reshape(1, -1).astype(jnp.float32),  # (1, D_out)
    }


def _pick_tm(Bp):
    """Batch-tile size. v5e: 128 fills its 128-wide MXU. v6e/v7x: 256, but only
    when that still leaves >=2 parallel tiles (so v7x's second TC gets work)."""
    if Bp <= 128:
        return Bp
    wide_mxu = True
    try:
        kind = jax.devices()[0].device_kind.lower()
        wide_mxu = not ("v5" in kind)                         # v5e: 4x128x128 MXU
    except Exception:
        pass
    if wide_mxu and Bp >= 512:
        return 256
    return 128


# ----------------------------------------------------------------------------
# Forward wrapper.  `params` should come from prepare_params() (bf16 weights);
# f32 weights are also accepted and cast here as a fallback.
# ----------------------------------------------------------------------------
def error_corrector_forward(data, params, *, vmem_budget_bytes=24 * 1024 * 1024):
    w1, b1, w2, b2 = params["w1"], params["b1"], params["w2"], params["b2"]
    if w1.dtype != jnp.bfloat16:
        w1 = w1.astype(jnp.bfloat16)
    if w2.dtype != jnp.bfloat16:
        w2 = w2.astype(jnp.bfloat16)
    b1 = b1.reshape(1, -1).astype(jnp.float32)
    b2 = b2.reshape(1, -1).astype(jnp.float32)

    B, D_in = data.shape
    D_hid = w1.shape[1]
    D_out = w2.shape[1]

    # Sublane-legal padded batch and batch tile.
    Bp = _round_up(max(B, 8), 8)
    tm = _pick_tm(Bp)
    Bp = _round_up(Bp, tm)
    x = data if Bp == B else jnp.pad(data, ((0, Bp - B), (0, 0)))
    x = x.astype(jnp.float32)

    compiler_params = pltpu.CompilerParams(
        dimension_semantics=("parallel",),
        vmem_limit_bytes=32 * 1024 * 1024)

    weight_bytes = (D_in * D_hid + D_hid * D_out) * 2         # bf16, resident
    if weight_bytes <= vmem_budget_bytes:
        # ---- Default: weights resident in VMEM, DMA'd once per call. ----
        out = pl.pallas_call(
            _mlp_resident_kernel,
            out_shape=jax.ShapeDtypeStruct((Bp, D_out), jnp.float32),
            grid=(Bp // tm,),
            in_specs=[
                pl.BlockSpec((tm, D_in),    lambda i: (i, 0)),   # x tile
                pl.BlockSpec((D_in, D_hid), lambda i: (0, 0)),   # W1 (resident)
                pl.BlockSpec((1, D_hid),    lambda i: (0, 0)),   # b1 (resident)
                pl.BlockSpec((D_hid, D_out), lambda i: (0, 0)),  # W2 (resident)
                pl.BlockSpec((1, D_out),    lambda i: (0, 0)),   # b2 (resident)
            ],
            out_specs=pl.BlockSpec((tm, D_out), lambda i: (i, 0)),
            compiler_params=compiler_params,
        )(x, w1, b1, w2, b2)
    else:
        # ---- Fallback for large repr_dim (e.g. v7x 64 MiB VMEM): stream ----
        # hidden tiles with a 3-deep weight pipeline and an f32 accumulator.
        th = next(t for t in (1024, 512, 256, 128, D_hid) if D_hid % t == 0)
        grid = (Bp // tm, D_hid // th)
        out = pl.pallas_call(
            _mlp_streamed_kernel,
            out_shape=jax.ShapeDtypeStruct((Bp, D_out), jnp.float32),
            grid=grid,
            in_specs=[
                pl.BlockSpec((tm, D_in), lambda i, h: (i, 0)),
                pl.BlockSpec((D_in, th), lambda i, h: (0, h),
                             pipeline_mode=pl.Buffered(3)),
                pl.BlockSpec((1, th),    lambda i, h: (0, h)),
                pl.BlockSpec((th, D_out), lambda i, h: (h, 0),
                             pipeline_mode=pl.Buffered(3)),
                pl.BlockSpec((1, D_out), lambda i, h: (0, 0)),
            ],
            out_specs=pl.BlockSpec((tm, D_out), lambda i, h: (i, 0)),
            scratch_shapes=[pltpu.VMEM((tm, D_out), jnp.float32)],
            compiler_params=pltpu.CompilerParams(
                dimension_semantics=("parallel", "arbitrary"),
                vmem_limit_bytes=32 * 1024 * 1024),
        )(x, w1, b1, w2, b2)

    return out if Bp == B else out[:B]


# ----------------------------------------------------------------------------
# Deterministic parameter init (PyTorch nn.Linear default: U(-1/sqrt(fan_in),.))
# ----------------------------------------------------------------------------
def init_params(key, repr_dim=512):
    d_in, d_hid, d_out = 2 * repr_dim, 4 * repr_dim, repr_dim
    k1, k2, k3, k4 = jax.random.split(key, 4)
    lim1 = 1.0 / math.sqrt(d_in)
    lim2 = 1.0 / math.sqrt(d_hid)
    return {
        "w1": jax.random.uniform(k1, (d_in, d_hid), jnp.float32, -lim1, lim1),
        "b1": jax.random.uniform(k2, (d_hid,), jnp.float32, -lim1, lim1),
        "w2": jax.random.uniform(k3, (d_hid, d_out), jnp.float32, -lim2, lim2),
        "b2": jax.random.uniform(k4, (d_out,), jnp.float32, -lim2, lim2),
    }


if __name__ == "__main__":
    key = jax.random.PRNGKey(0)
    pkey, xkey = jax.random.split(key)

    repr_dim = 512
    params_f32 = init_params(pkey, repr_dim)
    params = jax.tree.map(jax.block_until_ready, prepare_params(params_f32))

    data = jax.random.normal(xkey, (2, 2 * repr_dim), jnp.float32)

    fwd = jax.jit(error_corrector_forward)
    out = jax.block_until_ready(fwd(data, params))

    # Pure-JAX f32 reference.  Kernel uses bf16 MXU operands with f32
    # accumulation, so compare with a generous tolerance (documented contract).
    ref = (jnp.maximum(data @ params_f32["w1"] + params_f32["b1"], 0.0)
           @ params_f32["w2"] + params_f32["b2"])

    assert out.shape == (2, repr_dim), out.shape
    assert bool(jnp.all(jnp.isfinite(out)))
    assert bool(jnp.allclose(out, ref, rtol=5e-2, atol=5e-2))
    print("KERNEL_OK")
</pallas_src>

<mosaic_0001>
module attributes {stable_mosaic.version = 11 : i64} {
  func.func @_mlp_resident_kernel(%arg0: i32, %arg1: memref<8x1024xf32, #tpu.memory_space<vmem>>, %arg2: memref<1024x2048xbf16, #tpu.memory_space<vmem>>, %arg3: memref<1x2048xf32, #tpu.memory_space<vmem>>, %arg4: memref<2048x512xbf16, #tpu.memory_space<vmem>>, %arg5: memref<1x512xf32, #tpu.memory_space<vmem>>, %arg6: memref<8x512xf32, #tpu.memory_space<vmem>>) attributes {dimension_semantics = [#tpu.dimension_semantics<parallel>], iteration_bounds = array<i64: 1>, scalar_prefetch = 0 : i64, scratch_operands = 0 : i64, tpu.core_type = #tpu.core_type<tc>, window_params = [{transform_indices = @transform_0, window_bounds = array<i64: 8, 1024>}, {pipeline_mode = #tpu.pipeline_mode<synchronous>, transform_indices = @transform_1, window_bounds = array<i64: 1024, 2048>}, {pipeline_mode = #tpu.pipeline_mode<synchronous>, transform_indices = @transform_2, window_bounds = array<i64: 1, 2048>}, {pipeline_mode = #tpu.pipeline_mode<synchronous>, transform_indices = @transform_3, window_bounds = array<i64: 2048, 512>}, {pipeline_mode = #tpu.pipeline_mode<synchronous>, transform_indices = @transform_4, window_bounds = array<i64: 1, 512>}, {transform_indices = @transform_5, window_bounds = array<i64: 8, 512>}]} {
    %c0 = arith.constant 0 : index
    %c0_0 = arith.constant 0 : index
    %0 = vector.load %arg1[%c0, %c0_0] : memref<8x1024xf32, #tpu.memory_space<vmem>>, vector<8x1024xf32>
    %1 = arith.truncf %0 : vector<8x1024xf32> to vector<8x1024xbf16>
    %c0_1 = arith.constant 0 : index
    %c0_2 = arith.constant 0 : index
    %2 = vector.load %arg2[%c0_1, %c0_2] : memref<1024x2048xbf16, #tpu.memory_space<vmem>>, vector<1024x2048xbf16>
    %cst = arith.constant dense<0.000000e+00> : vector<8x2048xf32>
    %3 = tpu.matmul %1, %2, %cst {dimension_numbers = #tpu.dot_dimension_numbers<[1], [0], [0], [1], [0, 0, 1, 1], [], []>} : vector<8x1024xbf16>, vector<1024x2048xbf16>, vector<8x2048xf32> -> vector<8x2048xf32>
    %c0_3 = arith.constant 0 : index
    %c0_4 = arith.constant 0 : index
    %4 = vector.load %arg3[%c0_3, %c0_4] : memref<1x2048xf32, #tpu.memory_space<vmem>>, vector<1x2048xf32>
    %5 = vector.broadcast %4 : vector<1x2048xf32> to vector<8x2048xf32>
    %6 = arith.addf %3, %5 : vector<8x2048xf32>
    %cst_5 = arith.constant 0.000000e+00 : f32
    %7 = vector.broadcast %cst_5 : f32 to vector<8x2048xf32>
    %8 = arith.maximumf %6, %7 : vector<8x2048xf32>
    %9 = arith.truncf %8 : vector<8x2048xf32> to vector<8x2048xbf16>
    %c0_6 = arith.constant 0 : index
    %c0_7 = arith.constant 0 : index
    %10 = vector.load %arg4[%c0_6, %c0_7] : memref<2048x512xbf16, #tpu.memory_space<vmem>>, vector<2048x512xbf16>
    %cst_8 = arith.constant dense<0.000000e+00> : vector<8x512xf32>
    %11 = tpu.matmul %9, %10, %cst_8 {dimension_numbers = #tpu.dot_dimension_numbers<[1], [0], [0], [1], [0, 0, 1, 1], [], []>} : vector<8x2048xbf16>, vector<2048x512xbf16>, vector<8x512xf32> -> vector<8x512xf32>
    %c0_9 = arith.constant 0 : index
    %c0_10 = arith.constant 0 : index
    %12 = vector.load %arg5[%c0_9, %c0_10] : memref<1x512xf32, #tpu.memory_space<vmem>>, vector<1x512xf32>
    %13 = vector.broadcast %12 : vector<1x512xf32> to vector<8x512xf32>
    %14 = arith.addf %11, %13 : vector<8x512xf32>
    %c0_11 = arith.constant 0 : index
    %c0_12 = arith.constant 0 : index
    %15 = vector.load %arg6[%c0_11, %c0_12] : memref<8x512xf32, #tpu.memory_space<vmem>>, vector<8x512xf32>
    tpu.vector_store %arg6[%c0_11, %c0_12], %14 {strides = array<i32>} : memref<8x512xf32, #tpu.memory_space<vmem>>, vector<8x512xf32>,
    return
  }
  func.func @transform_0(%arg0: i32) -> (i32, i32) {
    %c0_i32 = arith.constant 0 : i32
    %c0_i32_0 = arith.constant 0 : i32
    return %arg0, %c0_i32 : i32, i32
  }
  func.func @transform_1(%arg0: i32) -> (i32, i32) {
    %c0_i32 = arith.constant 0 : i32
    %c0_i32_0 = arith.constant 0 : i32
    %c0_i32_1 = arith.constant 0 : i32
    return %c0_i32, %c0_i32_0 : i32, i32
  }
  func.func @transform_2(%arg0: i32) -> (i32, i32) {
    %c0_i32 = arith.constant 0 : i32
    %c0_i32_0 = arith.constant 0 : i32
    %c0_i32_1 = arith.constant 0 : i32
    return %c0_i32, %c0_i32_0 : i32, i32
  }
  func.func @transform_3(%arg0: i32) -> (i32, i32) {
    %c0_i32 = arith.constant 0 : i32
    %c0_i32_0 = arith.constant 0 : i32
    %c0_i32_1 = arith.constant 0 : i32
    return %c0_i32, %c0_i32_0 : i32, i32
  }
  func.func @transform_4(%arg0: i32) -> (i32, i32) {
    %c0_i32 = arith.constant 0 : i32
    %c0_i32_0 = arith.constant 0 : i32
    %c0_i32_1 = arith.constant 0 : i32
    return %c0_i32, %c0_i32_0 : i32, i32
  }
  func.func @transform_5(%arg0: i32) -> (i32, i32) {
    %c0_i32 = arith.constant 0 : i32
    %c0_i32_0 = arith.constant 0 : i32
    return %arg0, %c0_i32 : i32, i32
  }
}

</mosaic_0001>

<bundles_post_ra>
// kernel: error_corrector_forward.1
= control target key start
LH: loop header
LB: loop body
LE: loop exit
PB: predicated region body
PF: predicated region fallthrough
CT: control target
= control target key end

     0   :  { %10 = vsyncpa [#allocation3], 0  ;;  %s14239_s0 = inlined_call_operand.vmem [shape: f32[8,1024], index: 0, kind: input, shape index: {}]   ;;  %s14240_s1 = inlined_call_operand.hbm [shape: bf16[1024,2048], index: 1, kind: input, shape index: {}]   ;;  %s14241_s2 = inlined_call_operand.hbm [shape: f32[1,2048], index: 2, kind: input, shape index: {}]   ;;  %s14242_s3 = inlined_call_operand.hbm [shape: bf16[2048,512], index: 3, kind: input, shape index: {}]   ;;  %s14243_s4 = inlined_call_operand.hbm [shape: f32[1,512], index: 4, kind: input, shape index: {}]   ;;  %s14244_s5 = inlined_call_operand.vmem [shape: f32[8,512], index: 5, kind: output, shape index: {}]  }
   0x1   :  { %11 = vsyncpa [#allocation5], 0 }
   0x2   :  { %12 = vsyncpa [#allocation8], 0  ;;  %s13822_s18 = smov [#allocation4]   ;;  %s13823_s20 = smov [#allocation2]  }
   0x3   :  { %s33_s19 = sshll.u32 %s13822_s18, 4  ;;  %s20_s21 = sshll.u32 %s13823_s20, 4  ;;  %s34_s19 = int_to_ptr.vmem [resolvable:$true] %s33_s19  ;;  %s21_s21 = int_to_ptr.vmem [resolvable:$true] %s20_s21 }
   0x4   :  { %s13744_s22 = scalar_lea.vmem %s34_s19, 256  ;;  %p13749_p1 = scmp.lt.s32.totalorder %s34_s19, %s34_s19 }
   0x5   :  { %p13745_p0 = scmp.ne.s32.totalorder %s34_s19, %s13744_s22  ;;  %p13750_p2 = scmp.lt.s32.totalorder %s13744_s22, %s13744_s22 }
   0x7   :  { %p13751_p3 = por %p13750_p2, %p13749_p1 }
   0x9   :  { %p13752_p4 = pnand %p13751_p3, %p13745_p0 }
   0xb   :  { %13755 = shalt.err (!%p13752_p4)
}
   0xc   :  { %36 = dma.hbm_to_vmem [thread:$0]  %s14241_s2, 256, %s34_s19, [#allocation5]  }
   0xd   :  { %s13764_s25 = scalar_lea.vmem %s21_s21, 131072  ;;  %p13769_p6 = scmp.lt.s32.totalorder %s21_s21, %s21_s21 }
   0xe   :  { %p13765_p5 = scmp.ne.s32.totalorder %s21_s21, %s13764_s25  ;;  %p13770_p7 = scmp.lt.s32.totalorder %s13764_s25, %s13764_s25 }
  0x10   :  { %p13771_p8 = por %p13770_p7, %p13769_p6 }
  0x12   :  { %p13772_p9 = pnand %p13771_p8, %p13765_p5 }
  0x14   :  { %13775 = shalt.err (!%p13772_p9)
}
  0x15   :  { %s13824_s26 = smov 1024   ;;  %s13825_s27 = smov 64  }
  0x16   :  { %26 = dma.hbm_to_vmem [thread:$0]  %s14240_s1, 131072, %s21_s21, [#allocation3], %s13824_s26, %s13824_s26, %s13825_s27  }
  0x17   :  { %s13826_s30 = smov [#allocation6]  }
  0x18   :  { %s42_s6 = sshll.u32 %s13826_s30, 4  ;;  %s43_s6 = int_to_ptr.vmem [resolvable:$true] %s42_s6 }
  0x19   :  { %s13784_s7 = scalar_lea.vmem %s43_s6, 65536  ;;  %p13789_p11 = scmp.lt.s32.totalorder %s43_s6, %s43_s6 }
  0x1a   :  { %p13785_p10 = scmp.ne.s32.totalorder %s43_s6, %s13784_s7  ;;  %p13790_p12 = scmp.lt.s32.totalorder %s13784_s7, %s13784_s7 }
  0x1c   :  { %p13791_p13 = por %p13790_p12, %p13789_p11 }
  0x1e   :  { %p13792_p0 = pnand %p13791_p13, %p13785_p10 }
  0x20   :  { %13795 = shalt.err (!%p13792_p0)
}
  0x21   :  { %s13827_s2 = smov 256   ;;  %s13828_s8 = smov 16  }
  0x22   :  { %48 = dma.hbm_to_vmem [thread:$0]  %s14242_s3, 65536, %s43_s6, [#allocation5], %s13827_s2, %s13827_s2, %s13828_s8  }
  0x23   :  { %s13829_s11 = smov [#allocation7]  }
  0x24   :  { %s55_s12 = sshll.u32 %s13829_s11, 4  ;;  %s56_s12 = int_to_ptr.vmem [resolvable:$true] %s55_s12 }
  0x25   :  { %s13804_s1 = scalar_lea.vmem %s56_s12, 64  ;;  %p13809_p2 = scmp.lt.s32.totalorder %s56_s12, %s56_s12 }
  0x26   :  { %p13805_p1 = scmp.ne.s32.totalorder %s56_s12, %s13804_s1  ;;  %p13810_p3 = scmp.lt.s32.totalorder %s13804_s1, %s13804_s1 }
  0x28   :  { %p13811_p4 = por %p13810_p3, %p13809_p2 }
  0x2a   :  { %p13812_p5 = pnand %p13811_p4, %p13805_p1 }
  0x2c   :  { %13815 = shalt.err (!%p13812_p5)
}
  0x2d   :  { %58 = dma.hbm_to_vmem [thread:$0]  %s14243_s4, 64, %s56_s12, [#allocation8]  }
  0x2e   :  { %13816 = dma.done.wait [#allocation3], 131072  }
  0x2f   :  { %13817 = vsyncadd [#allocation3], 4294836224 }
  0x30   :  { %13818 = dma.done.wait [#allocation5], 65792  }
  0x31   :  { %13819 = vsyncadd [#allocation5], 4294901504 }
  0x32   :  { %13820 = dma.done.wait [#allocation8], 64  }
  0x33   :  { %13821 = vsyncadd [#allocation8], 4294967232  ;;  %v199_v0 = vld [vmem:[#allocation2 + $0x380] sm:$0xff]  ;;  %v72_v53 = vld [vmem:[%s14239_s0 + $0x8] sm:$0xff] }
  0x34   :  { %v207_v1 = vld [vmem:[#allocation2 + $0x3c0] sm:$0xff]  ;;  %v74_v54 = vld [vmem:[%s14239_s0 + $0x18] sm:$0xff]  ;;  %v13878_v58 = vpack.c.bf16 %v72_v53, %v72_v53 }
  0x35   :  { %v455_v2 = vld [vmem:[#allocation2 + $0xb80] sm:$0xff]  ;;  %v11533_v3 = vcombine.high %v199_v0, %v207_v1  ;;  %v11532_v5 = vcombine.low %v199_v0, %v207_v1  ;;  %v13880_v59 = vpack.c.bf16 %v74_v54, %v74_v54 }
  0x36   :  { %v463_v4 = vld [vmem:[#allocation2 + $0xbc0] sm:$0xff]  ;;  %6347 = vmatprep.mubr.bf16.mxu0 %v13878_v58 }
  0x37   :  { %v183_v6 = vld [vmem:[#allocation2 + $0x300] sm:$0xff]  ;;  %v11789_v8 = vcombine.high %v455_v2, %v463_v4  ;;  %v11788_v9 = vcombine.low %v455_v2, %v463_v4  ;;  %6315 = vmatprep.subr.bf16.mxu0 %v11533_v3  ;;  %6388 = vmatprep.mubr.bf16.mxu1 %v13880_v59 }
  0x38   :  { %v191_v7 = vld [vmem:[#allocation2 + $0x340] sm:$0xff]  ;;  %6316 = vmatpush1.bf16.msra.mxu0 %v11532_v5 }
  0x39   :  { %v11517_v10 = vcombine.high %v183_v6, %v191_v7  ;;  %v439_v11 = vld [vmem:[#allocation2 + $0xb00] sm:$0xff]  ;;  %6356 = vmatprep.subr.bf16.mxu1 %v11789_v8  ;;  %v11516_v18 = vcombine.low %v183_v6, %v191_v7 }
  0x3a   :  { %v447_v12 = vld [vmem:[#allocation2 + $0xb40] sm:$0xff]  ;;  %6357 = vmatpush1.bf16.msra.mxu1 %v11788_v9 }
  0x3b   :  { %v167_v13 = vld [vmem:[#allocation2 + $0x280] sm:$0xff]  ;;  %v11773_v14 = vcombine.high %v439_v11, %v447_v12  ;;  %6317 = vmatprep.subr.bf16.mxu0 %v11517_v10  ;;  %v11772_v19 = vcombine.low %v439_v11, %v447_v12 }
  0x3c   :  { %v175_v15 = vld [vmem:[#allocation2 + $0x2c0] sm:$0xff]  ;;  %6318 = vmatpush1.bf16.msra.mxu0 %v11516_v18 }
  0x3d   :  { %v423_v16 = vld [vmem:[#allocation2 + $0xa80] sm:$0xff]  ;;  %v11501_v20 = vcombine.high %v167_v13, %v175_v15  ;;  %6358 = vmatprep.subr.bf16.mxu1 %v11773_v14  ;;  %v11500_v26 = vcombine.low %v167_v13, %v175_v15 }
  0x3e   :  { %v431_v17 = vld [vmem:[#allocation2 + $0xac0] sm:$0xff]  ;;  %6359 = vmatpush1.bf16.msra.mxu1 %v11772_v19 }
  0x3f   :  { %v11757_v21 = vcombine.high %v423_v16, %v431_v17  ;;  %v151_v22 = vld [vmem:[#allocation2 + $0x200] sm:$0xff]  ;;  %6319 = vmatprep.subr.bf16.mxu0 %v11501_v20  ;;  %v11756_v27 = vcombine.low %v423_v16, %v431_v17 }
  0x40   :  { %v159_v23 = vld [vmem:[#allocation2 + $0x240] sm:$0xff]  ;;  %6320 = vmatpush1.bf16.msra.mxu0 %v11500_v26 }
  0x41   :  { %v407_v24 = vld [vmem:[#allocation2 + $0xa00] sm:$0xff]  ;;  %v11485_v28 = vcombine.high %v151_v22, %v159_v23  ;;  %6360 = vmatprep.subr.bf16.mxu1 %v11757_v21  ;;  %v11484_v34 = vcombine.low %v151_v22, %v159_v23 }
  0x42   :  { %v415_v25 = vld [vmem:[#allocation2 + $0xa40] sm:$0xff]  ;;  %6361 = vmatpush1.bf16.msra.mxu1 %v11756_v27 }
  0x43   :  { %v11741_v29 = vcombine.high %v407_v24, %v415_v25  ;;  %v135_v30 = vld [vmem:[#allocation2 + $0x180] sm:$0xff]  ;;  %6321 = vmatprep.subr.bf16.mxu0 %v11485_v28  ;;  %v11740_v35 = vcombine.low %v407_v24, %v415_v25 }
  0x44   :  { %v143_v31 = vld [vmem:[#allocation2 + $0x1c0] sm:$0xff]  ;;  %6322 = vmatpush1.bf16.msra.mxu0 %v11484_v34 }
  0x45   :  { %v391_v32 = vld [vmem:[#allocation2 + $0x980] sm:$0xff]  ;;  %v11469_v36 = vcombine.high %v135_v30, %v143_v31  ;;  %6362 = vmatprep.subr.bf16.mxu1 %v11741_v29  ;;  %v11468_v42 = vcombine.low %v135_v30, %v143_v31 }
  0x46   :  { %v399_v33 = vld [vmem:[#allocation2 + $0x9c0] sm:$0xff]  ;;  %6363 = vmatpush1.bf16.msra.mxu1 %v11740_v35 }
  0x47   :  { %v11725_v37 = vcombine.high %v391_v32, %v399_v33  ;;  %v119_v38 = vld [vmem:[#allocation2 + $0x100] sm:$0xff]  ;;  %6323 = vmatprep.subr.bf16.mxu0 %v11469_v36  ;;  %v11724_v43 = vcombine.low %v391_v32, %v399_v33 }
  0x48   :  { %v127_v39 = vld [vmem:[#allocation2 + $0x140] sm:$0xff]  ;;  %6324 = vmatpush1.bf16.msra.mxu0 %v11468_v42 }
  0x49   :  { %v375_v40 = vld [vmem:[#allocation2 + $0x900] sm:$0xff]  ;;  %v11453_v44 = vcombine.high %v119_v38, %v127_v39  ;;  %6364 = vmatprep.subr.bf16.mxu1 %v11725_v37  ;;  %v11452_v50 = vcombine.low %v119_v38, %v127_v39 }
  0x4a   :  { %v383_v41 = vld [vmem:[#allocation2 + $0x940] sm:$0xff]  ;;  %6365 = vmatpush1.bf16.msra.mxu1 %v11724_v43 }
  0x4b   :  { %v11709_v45 = vcombine.high %v375_v40, %v383_v41  ;;  %v103_v46 = vld [vmem:[#allocation2 + $0x80] sm:$0xff]  ;;  %6325 = vmatprep.subr.bf16.mxu0 %v11453_v44  ;;  %v11708_v51 = vcombine.low %v375_v40, %v383_v41 }
  0x4c   :  { %v111_v47 = vld [vmem:[#allocation2 + $0xc0] sm:$0xff]  ;;  %6326 = vmatpush1.bf16.msra.mxu0 %v11452_v50 }
  0x4d   :  { %v359_v48 = vld [vmem:[#allocation2 + $0x880] sm:$0xff]  ;;  %v11437_v52 = vcombine.high %v103_v46, %v111_v47  ;;  %6366 = vmatprep.subr.bf16.mxu1 %v11709_v45  ;;  %v11436_v62 = vcombine.low %v103_v46, %v111_v47 }
  0x4e   :  { %v367_v49 = vld [vmem:[#allocation2 + $0x8c0] sm:$0xff]  ;;  %6367 = vmatpush1.bf16.msra.mxu1 %v11708_v51 }
  0x4f   :  { %v11693_v55 = vcombine.high %v359_v48, %v367_v49  ;;  %v87_v56 = vld [vmem:[#allocation2] sm:$0xff]  ;;  %6327 = vmatprep.subr.bf16.mxu0 %v11437_v52  ;;  %v11692_v63 = vcombine.low %v359_v48, %v367_v49 }
  0x50   :  { %v95_v57 = vld [vmem:[#allocation2 + $0x40] sm:$0xff]  ;;  %6328 = vmatpush1.bf16.msra.mxu0 %v11436_v62 }
  0x51   :  { %v343_v60 = vld [vmem:[#allocation2 + $0x800] sm:$0xff]  ;;  %v11421_v0 = vcombine.high %v87_v56, %v95_v57  ;;  %6368 = vmatprep.subr.bf16.mxu1 %v11693_v55  ;;  %v11420_v6 = vcombine.low %v87_v56, %v95_v57 }
  0x52   :  { %v351_v61 = vld [vmem:[#allocation2 + $0x840] sm:$0xff]  ;;  %6369 = vmatpush1.bf16.msra.mxu1 %v11692_v63 }
  0x53   :  { %v11677_v1 = vcombine.high %v343_v60, %v351_v61  ;;  %v327_v2 = vld [vmem:[#allocation2 + $0x780] sm:$0xff]  ;;  %6329 = vmatprep.subr.bf16.mxu0 %v11421_v0  ;;  %v11676_v7 = vcombine.low %v343_v60, %v351_v61 }
  0x54   :  { %v335_v3 = vld [vmem:[#allocation2 + $0x7c0] sm:$0xff]  ;;  %6330 = vmatpush1.bf16.msra.mxu0 %v11420_v6 }
  0x55   :  { %v583_v4 = vld [vmem:[#allocation2 + $0xf80] sm:$0xff]  ;;  %v11661_v8 = vcombine.high %v327_v2, %v335_v3  ;;  %6370 = vmatprep.subr.bf16.mxu1 %v11677_v1  ;;  %v11660_v14 = vcombine.low %v327_v2, %v335_v3 }
  0x56   :  { %v591_v5 = vld [vmem:[#allocation2 + $0xfc0] sm:$0xff]  ;;  %6371 = vmatpush1.bf16.msra.mxu1 %v11676_v7 }
  0x57   :  { %v11917_v9 = vcombine.high %v583_v4, %v591_v5  ;;  %v311_v10 = vld [vmem:[#allocation2 + $0x700] sm:$0xff]  ;;  %6331 = vmatprep.subr.bf16.mxu0 %v11661_v8  ;;  %v11916_v15 = vcombine.low %v583_v4, %v591_v5 }
  0x58   :  { %v319_v11 = vld [vmem:[#allocation2 + $0x740] sm:$0xff]  ;;  %6332 = vmatpush2.bf16.msra.mxu0 %v11660_v14 }
  0x59   :  { %v567_v12 = vld [vmem:[#allocation2 + $0xf00] sm:$0xff]  ;;  %v11645_v16 = vcombine.high %v311_v10, %v319_v11  ;;  %6372 = vmatprep.subr.bf16.mxu1 %v11917_v9  ;;  %v11644_v22 = vcombine.low %v311_v10, %v319_v11  ;;  %v73_v11 = vld [vmem:[%s14239_s0 + $0x10] sm:$0xff] }
  0x5a   :  { %v575_v13 = vld [vmem:[#allocation2 + $0xf40] sm:$0xff]  ;;  %6373 = vmatpush2.bf16.msra.mxu1 %v11916_v15 }
  0x5b   :  { %v11901_v17 = vcombine.high %v567_v12, %v575_v13  ;;  %v295_v18 = vld [vmem:[#allocation2 + $0x680] sm:$0xff]  ;;  %6333 = vmatprep.subr.bf16.mxu0 %v11645_v16  ;;  %v11900_v23 = vcombine.low %v567_v12, %v575_v13 }
  0x5c   :  { %v303_v19 = vld [vmem:[#allocation2 + $0x6c0] sm:$0xff]  ;;  %6334 = vmatpush2.bf16.msra.mxu0 %v11644_v22  ;;  %v78_v22 = vld [vmem:[%s14239_s0 + $0x38] sm:$0xff] }
  0x5d   :  { %v551_v20 = vld [vmem:[#allocation2 + $0xe80] sm:$0xff]  ;;  %v11629_v24 = vcombine.high %v295_v18, %v303_v19  ;;  %6374 = vmatprep.subr.bf16.mxu1 %v11901_v17  ;;  %v11628_v30 = vcombine.low %v295_v18, %v303_v19  ;;  %v76_v19 = vld [vmem:[%s14239_s0 + $0x28] sm:$0xff] }
  0x5e   :  { %v559_v21 = vld [vmem:[#allocation2 + $0xec0] sm:$0xff]  ;;  %6375 = vmatpush2.bf16.msra.mxu1 %v11900_v23 }
  0x5f   :  { %v11885_v25 = vcombine.high %v551_v20, %v559_v21  ;;  %v279_v26 = vld [vmem:[#allocation2 + $0x600] sm:$0xff]  ;;  %6335 = vmatprep.subr.bf16.mxu0 %v11629_v24  ;;  %v11884_v31 = vcombine.low %v551_v20, %v559_v21  ;;  %v13895_v20 = vpack.c.bf16 %v73_v11, %v73_v11 }
  0x60   :  { %v287_v27 = vld [vmem:[#allocation2 + $0x640] sm:$0xff]  ;;  %6336 = vmatpush2.bf16.msra.mxu0 %v11628_v30 }
  0x61   :  { %v535_v28 = vld [vmem:[#allocation2 + $0xe00] sm:$0xff]  ;;  %v11613_v32 = vcombine.high %v279_v26, %v287_v27  ;;  %6376 = vmatprep.subr.bf16.mxu1 %v11885_v25  ;;  %v11612_v38 = vcombine.low %v279_v26, %v287_v27 }
  0x62   :  { %v543_v29 = vld [vmem:[#allocation2 + $0xe40] sm:$0xff]  ;;  %6377 = vmatpush2.bf16.msra.mxu1 %v11884_v31  ;;  %v13903_v31 = vpack.c.bf16 %v78_v22, %v78_v22 }
  0x63   :  { %v11869_v33 = vcombine.high %v535_v28, %v543_v29  ;;  %v263_v34 = vld [vmem:[#allocation2 + $0x580] sm:$0xff]  ;;  %6337 = vmatprep.subr.bf16.mxu0 %v11613_v32  ;;  %v11868_v39 = vcombine.low %v535_v28, %v543_v29  ;;  %v13900_v28 = vpack.c.bf16 %v76_v19, %v76_v19 }
  0x64   :  { %v271_v35 = vld [vmem:[#allocation2 + $0x5c0] sm:$0xff]  ;;  %6338 = vmatpush2.bf16.msra.mxu0 %v11612_v38 }
  0x65   :  { %v519_v36 = vld [vmem:[#allocation2 + $0xd80] sm:$0xff]  ;;  %v11597_v40 = vcombine.high %v263_v34, %v271_v35  ;;  %6378 = vmatprep.subr.bf16.mxu1 %v11869_v33  ;;  %v11596_v46 = vcombine.low %v263_v34, %v271_v35 }
  0x66   :  { %v527_v37 = vld [vmem:[#allocation2 + $0xdc0] sm:$0xff]  ;;  %6379 = vmatpush2.bf16.msra.mxu1 %v11868_v39 }
  0x67   :  { %v11853_v41 = vcombine.high %v519_v36, %v527_v37  ;;  %v247_v42 = vld [vmem:[#allocation2 + $0x500] sm:$0xff]  ;;  %6339 = vmatprep.subr.bf16.mxu0 %v11597_v40  ;;  %v11852_v47 = vcombine.low %v519_v36, %v527_v37 }
  0x68   :  { %v255_v43 = vld [vmem:[#allocation2 + $0x540] sm:$0xff]  ;;  %6340 = vmatpush2.bf16.msra.mxu0 %v11596_v46 }
  0x69   :  { %v503_v44 = vld [vmem:[#allocation2 + $0xd00] sm:$0xff]  ;;  %v11581_v48 = vcombine.high %v247_v42, %v255_v43  ;;  %6380 = vmatprep.subr.bf16.mxu1 %v11853_v41  ;;  %v11580_v54 = vcombine.low %v247_v42, %v255_v43 }
  0x6a   :  { %v511_v45 = vld [vmem:[#allocation2 + $0xd40] sm:$0xff]  ;;  %6381 = vmatpush2.bf16.msra.mxu1 %v11852_v47 }
  0x6b   :  { %v11837_v49 = vcombine.high %v503_v44, %v511_v45  ;;  %v231_v50 = vld [vmem:[#allocation2 + $0x480] sm:$0xff]  ;;  %6341 = vmatprep.subr.bf16.mxu0 %v11581_v48  ;;  %v11836_v55 = vcombine.low %v503_v44, %v511_v45 }
  0x6c   :  { %v239_v51 = vld [vmem:[#allocation2 + $0x4c0] sm:$0xff]  ;;  %6342 = vmatpush2.bf16.msra.mxu0 %v11580_v54 }
  0x6d   :  { %v487_v52 = vld [vmem:[#allocation2 + $0xc80] sm:$0xff]  ;;  %v11565_v56 = vcombine.high %v231_v50, %v239_v51  ;;  %6382 = vmatprep.subr.bf16.mxu1 %v11837_v49  ;;  %v11564_v0 = vcombine.low %v231_v50, %v239_v51 }
  0x6e   :  { %v495_v53 = vld [vmem:[#allocation2 + $0xcc0] sm:$0xff]  ;;  %6383 = vmatpush2.bf16.msra.mxu1 %v11836_v55 }
  0x6f   :  { %v11821_v57 = vcombine.high %v487_v52, %v495_v53  ;;  %v215_v60 = vld [vmem:[#allocation2 + $0x400] sm:$0xff]  ;;  %6343 = vmatprep.subr.bf16.mxu0 %v11565_v56  ;;  %v11820_v1 = vcombine.low %v487_v52, %v495_v53 }
  0x70   :  { %v223_v61 = vld [vmem:[#allocation2 + $0x440] sm:$0xff]  ;;  %6344 = vmatpush2.bf16.msra.mxu0 %v11564_v0 }
  0x71   :  { %v471_v62 = vld [vmem:[#allocation2 + $0xc00] sm:$0xff]  ;;  %v11549_v2 = vcombine.high %v215_v60, %v223_v61  ;;  %6384 = vmatprep.subr.bf16.mxu1 %v11821_v57  ;;  %v11548_v8 = vcombine.low %v215_v60, %v223_v61 }
  0x72   :  { %v479_v63 = vld [vmem:[#allocation2 + $0xc40] sm:$0xff]  ;;  %6385 = vmatpush2.bf16.msra.mxu1 %v11820_v1 }
  0x73   :  { %v11805_v3 = vcombine.high %v471_v62, %v479_v63  ;;  %v711_v4 = vld [vmem:[#allocation2 + $0x1380] sm:$0xff]  ;;  %6345 = vmatprep.subr.bf16.mxu0 %v11549_v2  ;;  %v11804_v10 = vcombine.low %v471_v62, %v479_v63 }
  0x74   :  { %v719_v5 = vld [vmem:[#allocation2 + $0x13c0] sm:$0xff]  ;;  %6346 = vmatpush2.bf16.msra.mxu0 %v11548_v8 }
  0x75   :  { %v967_v6 = vld [vmem:[#allocation2 + $0x1b80] sm:$0xff]  ;;  %v12045_v12 = vcombine.high %v711_v4, %v719_v5  ;;  %6386 = vmatprep.subr.bf16.mxu1 %v11805_v3  ;;  %v12044_v21 = vcombine.low %v711_v4, %v719_v5 }
  0x76   :  { %v975_v7 = vld [vmem:[#allocation2 + $0x1bc0] sm:$0xff]  ;;  %6387 = vmatpush2.bf16.msra.mxu1 %v11804_v10 }
  0x77   :  { %v71_v9 = vld [vmem:[%s14239_s0] sm:$0xff]  ;;  %v12301_v13 = vcombine.high %v967_v6, %v975_v7  ;;  %6397 = vmatprep.subr.bf16.mxu0 %v12045_v12  ;;  %v12300_v23 = vcombine.low %v967_v6, %v975_v7 }
  0x78   :  { %v695_v14 = vld [vmem:[#allocation2 + $0x1300] sm:$0xff]  ;;  %v13890_v16 = vpack.c.bf16 %v71_v9, %v71_v9 }
  0x79   :  { %v703_v15 = vld [vmem:[#allocation2 + $0x1340] sm:$0xff]  ;;  %6438 = vmatprep.subr.bf16.mxu1 %v12301_v13  ;;  %6389 = vmatmul.mubr.bf16.vlgmr.msra.gmra.mxu1 %v13895_v20 }
  0x7a   :  { %v951_v17 = vld [vmem:[#allocation2 + $0x1b00] sm:$0xff]  ;;  %v12029_v24 = vcombine.high %v695_v14, %v703_v15  ;;  %6348 = vmatmul.mubr.bf16.vlgmr.msra.gmra.mxu0 %v13890_v16  ;;  %v12028_v32 = vcombine.low %v695_v14, %v703_v15  ;;  %6439 = vmatpush1.bf16.msra.mxu1 %v12300_v23 }
  0x7b   :  { %v959_v18 = vld [vmem:[#allocation2 + $0x1b40] sm:$0xff]  ;;  %6398 = vmatpush1.bf16.msra.mxu0 %v12044_v21  ;;  %6429 = vmatprep.mubr.bf16.mxu0 %v13900_v28 }
  0x7c   :  { %v12285_v25 = vcombine.high %v951_v17, %v959_v18  ;;  %v679_v26 = vld [vmem:[#allocation2 + $0x1280] sm:$0xff]  ;;  %6399 = vmatprep.subr.bf16.mxu0 %v12029_v24  ;;  %v12284_v33 = vcombine.low %v951_v17, %v959_v18  ;;  %6470 = vmatprep.mubr.bf16.mxu1 %v13903_v31 }
  0x7d   :  { %v687_v27 = vld [vmem:[#allocation2 + $0x12c0] sm:$0xff] }
  0x7e   :  { %v935_v29 = vld [vmem:[#allocation2 + $0x1a80] sm:$0xff]  ;;  %v12013_v34 = vcombine.high %v679_v26, %v687_v27  ;;  %6440 = vmatprep.subr.bf16.mxu1 %v12285_v25  ;;  %v12012_v40 = vcombine.low %v679_v26, %v687_v27 }
  0x7f   :  { %v943_v30 = vld [vmem:[#allocation2 + $0x1ac0] sm:$0xff]  ;;  %6400 = vmatpush1.bf16.msra.mxu0 %v12028_v32  ;;  %6441 = vmatpush1.bf16.msra.mxu1 %v12284_v33 }
  0x80   :  { %v663_v35 = vld [vmem:[#allocation2 + $0x1200] sm:$0xff]  ;;  %v12269_v38 = vcombine.high %v935_v29, %v943_v30  ;;  %6401 = vmatprep.subr.bf16.mxu0 %v12013_v34  ;;  %v12268_v41 = vcombine.low %v935_v29, %v943_v30 }
  0x81   :  { %v671_v36 = vld [vmem:[#allocation2 + $0x1240] sm:$0xff] }
  0x82   :  { %v919_v37 = vld [vmem:[#allocation2 + $0x1a00] sm:$0xff]  ;;  %v11997_v42 = vcombine.high %v663_v35, %v671_v36  ;;  %6442 = vmatprep.subr.bf16.mxu1 %v12269_v38  ;;  %v11996_v48 = vcombine.low %v663_v35, %v671_v36 }
  0x83   :  { %v927_v39 = vld [vmem:[#allocation2 + $0x1a40] sm:$0xff]  ;;  %6402 = vmatpush1.bf16.msra.mxu0 %v12012_v40  ;;  %6443 = vmatpush1.bf16.msra.mxu1 %v12268_v41 }
  0x84   :  { %v647_v43 = vld [vmem:[#allocation2 + $0x1180] sm:$0xff]  ;;  %v12253_v46 = vcombine.high %v919_v37, %v927_v39  ;;  %6403 = vmatprep.subr.bf16.mxu0 %v11997_v42  ;;  %v12252_v49 = vcombine.low %v919_v37, %v927_v39 }
  0x85   :  { %v655_v44 = vld [vmem:[#allocation2 + $0x11c0] sm:$0xff] }
  0x86   :  { %v903_v45 = vld [vmem:[#allocation2 + $0x1980] sm:$0xff]  ;;  %v11981_v50 = vcombine.high %v647_v43, %v655_v44  ;;  %6444 = vmatprep.subr.bf16.mxu1 %v12253_v46  ;;  %v11980_v56 = vcombine.low %v647_v43, %v655_v44 }
  0x87   :  { %v911_v47 = vld [vmem:[#allocation2 + $0x19c0] sm:$0xff]  ;;  %6404 = vmatpush1.bf16.msra.mxu0 %v11996_v48  ;;  %6445 = vmatpush1.bf16.msra.mxu1 %v12252_v49 }
  0x88   :  { %v631_v51 = vld [vmem:[#allocation2 + $0x1100] sm:$0xff]  ;;  %v12237_v54 = vcombine.high %v903_v45, %v911_v47  ;;  %6405 = vmatprep.subr.bf16.mxu0 %v11981_v50  ;;  %v12236_v57 = vcombine.low %v903_v45, %v911_v47 }
  0x89   :  { %v639_v52 = vld [vmem:[#allocation2 + $0x1140] sm:$0xff] }
  0x8a   :  { %v887_v53 = vld [vmem:[#allocation2 + $0x1900] sm:$0xff]  ;;  %v11965_v60 = vcombine.high %v631_v51, %v639_v52  ;;  %6446 = vmatprep.subr.bf16.mxu1 %v12237_v54  ;;  %v11964_v2 = vcombine.low %v631_v51, %v639_v52 }
  0x8b   :  { %v895_v55 = vld [vmem:[#allocation2 + $0x1940] sm:$0xff]  ;;  %6406 = vmatpush1.bf16.msra.mxu0 %v11980_v56  ;;  %6447 = vmatpush1.bf16.msra.mxu1 %v12236_v57 }
  0x8c   :  { %v615_v61 = vld [vmem:[#allocation2 + $0x1080] sm:$0xff]  ;;  %v12221_v0 = vcombine.high %v887_v53, %v895_v55  ;;  %6407 = vmatprep.subr.bf16.mxu0 %v11965_v60  ;;  %v12220_v3 = vcombine.low %v887_v53, %v895_v55 }
  0x8d   :  { %v623_v62 = vld [vmem:[#allocation2 + $0x10c0] sm:$0xff] }
  0x8e   :  { %v871_v63 = vld [vmem:[#allocation2 + $0x1880] sm:$0xff]  ;;  %v11949_v4 = vcombine.high %v615_v61, %v623_v62  ;;  %6448 = vmatprep.subr.bf16.mxu1 %v12221_v0  ;;  %v11948_v10 = vcombine.low %v615_v61, %v623_v62 }
  0x8f   :  { %v879_v1 = vld [vmem:[#allocation2 + $0x18c0] sm:$0xff]  ;;  %6408 = vmatpush1.bf16.msra.mxu0 %v11964_v2  ;;  %6449 = vmatpush1.bf16.msra.mxu1 %v12220_v3 }
  0x90   :  { %v599_v5 = vld [vmem:[#allocation2 + $0x1000] sm:$0xff]  ;;  %v12205_v8 = vcombine.high %v871_v63, %v879_v1  ;;  %6409 = vmatprep.subr.bf16.mxu0 %v11949_v4  ;;  %v12204_v11 = vcombine.low %v871_v63, %v879_v1 }
  0x91   :  { %v607_v6 = vld [vmem:[#allocation2 + $0x1040] sm:$0xff] }
  0x92   :  { %v855_v7 = vld [vmem:[#allocation2 + $0x1800] sm:$0xff]  ;;  %v11933_v12 = vcombine.high %v599_v5, %v607_v6  ;;  %6450 = vmatprep.subr.bf16.mxu1 %v12205_v8  ;;  %v11932_v19 = vcombine.low %v599_v5, %v607_v6 }
  0x93   :  { %v863_v9 = vld [vmem:[#allocation2 + $0x1840] sm:$0xff]  ;;  %6410 = vmatpush1.bf16.msra.mxu0 %v11948_v10  ;;  %6451 = vmatpush1.bf16.msra.mxu1 %v12204_v11 }
  0x94   :  { %v839_v13 = vld [vmem:[#allocation2 + $0x1780] sm:$0xff]  ;;  %v12189_v17 = vcombine.high %v855_v7, %v863_v9  ;;  %6411 = vmatprep.subr.bf16.mxu0 %v11933_v12  ;;  %v12188_v21 = vcombine.low %v855_v7, %v863_v9 }
  0x95   :  { %v847_v14 = vld [vmem:[#allocation2 + $0x17c0] sm:$0xff] }
  0x96   :  { %v1095_v15 = vld [vmem:[#allocation2 + $0x1f80] sm:$0xff]  ;;  %v12173_v22 = vcombine.high %v839_v13, %v847_v14  ;;  %6452 = vmatprep.subr.bf16.mxu1 %v12189_v17  ;;  %v12172_v29 = vcombine.low %v839_v13, %v847_v14 }
  0x97   :  { %v1103_v18 = vld [vmem:[#allocation2 + $0x1fc0] sm:$0xff]  ;;  %6412 = vmatpush1.bf16.msra.mxu0 %v11932_v19  ;;  %6453 = vmatpush1.bf16.msra.mxu1 %v12188_v21  ;;  %v200_v21 = vld [vmem:[#allocation2 + $0x388] sm:$0xff] }
  0x98   :  { %v823_v23 = vld [vmem:[#allocation2 + $0x1700] sm:$0xff]  ;;  %v12429_v26 = vcombine.high %v1095_v15, %v1103_v18  ;;  %6413 = vmatprep.subr.bf16.mxu0 %v12173_v22  ;;  %v12428_v30 = vcombine.low %v1095_v15, %v1103_v18  ;;  %v208_v22 = vld [vmem:[#allocation2 + $0x3c8] sm:$0xff] }
  0x99   :  { %v831_v24 = vld [vmem:[#allocation2 + $0x1740] sm:$0xff] }
  0x9a   :  { %v1079_v25 = vld [vmem:[#allocation2 + $0x1f00] sm:$0xff]  ;;  %v12157_v32 = vcombine.high %v823_v23, %v831_v24  ;;  %6454 = vmatprep.subr.bf16.mxu1 %v12429_v26  ;;  %v12156_v38 = vcombine.low %v823_v23, %v831_v24  ;;  %v456_v23 = vld [vmem:[#allocation2 + $0xb88] sm:$0xff] }
  0x9b   :  { %v1087_v27 = vld [vmem:[#allocation2 + $0x1f40] sm:$0xff]  ;;  %6414 = vmatpush2.bf16.msra.mxu0 %v12172_v29  ;;  %6455 = vmatpush2.bf16.msra.mxu1 %v12428_v30  ;;  %v464_v26 = vld [vmem:[#allocation2 + $0xbc8] sm:$0xff] }
  0x9c   :  { %v807_v33 = vld [vmem:[#allocation2 + $0x1680] sm:$0xff]  ;;  %v12413_v36 = vcombine.high %v1079_v25, %v1087_v27  ;;  %6415 = vmatprep.subr.bf16.mxu0 %v12157_v32  ;;  %v12412_v39 = vcombine.low %v1079_v25, %v1087_v27  ;;  %v77_v27 = vld [vmem:[%s14239_s0 + $0x30] sm:$0xff]  ;;  %v11535_v32 = vcombine.high %v200_v21, %v208_v22 }
  0x9d   :  { %v815_v34 = vld [vmem:[#allocation2 + $0x16c0] sm:$0xff] }
  0x9e   :  { %v1063_v35 = vld [vmem:[#allocation2 + $0x1e80] sm:$0xff]  ;;  %v12141_v40 = vcombine.high %v807_v33, %v815_v34  ;;  %6456 = vmatprep.subr.bf16.mxu1 %v12413_v36  ;;  %v12140_v46 = vcombine.low %v807_v33, %v815_v34  ;;  %v184_v33 = vld [vmem:[#allocation2 + $0x308] sm:$0xff]  ;;  %v11791_v36 = vcombine.high %v456_v23, %v464_v26 }
  0x9f   :  { %v1071_v37 = vld [vmem:[#allocation2 + $0x1ec0] sm:$0xff]  ;;  %6416 = vmatpush2.bf16.msra.mxu0 %v12156_v38  ;;  %6457 = vmatpush2.bf16.msra.mxu1 %v12412_v39  ;;  %v192_v34 = vld [vmem:[#allocation2 + $0x348] sm:$0xff]  ;;  %v13916_v39 = vpack.c.bf16 %v77_v27, %v77_v27 }
  0xa0   :  { %v791_v41 = vld [vmem:[#allocation2 + $0x1600] sm:$0xff]  ;;  %v12397_v44 = vcombine.high %v1063_v35, %v1071_v37  ;;  %6417 = vmatprep.subr.bf16.mxu0 %v12141_v40  ;;  %v12396_v47 = vcombine.low %v1063_v35, %v1071_v37  ;;  %v440_v35 = vld [vmem:[#allocation2 + $0xb08] sm:$0xff]  ;;  %v11534_v40 = vcombine.low %v200_v21, %v208_v22 }
  0xa1   :  { %v799_v42 = vld [vmem:[#allocation2 + $0x1640] sm:$0xff]  ;;  %v448_v37 = vld [vmem:[#allocation2 + $0xb48] sm:$0xff] }
  0xa2   :  { %v1047_v43 = vld [vmem:[#allocation2 + $0x1e00] sm:$0xff]  ;;  %v12125_v48 = vcombine.high %v791_v41, %v799_v42  ;;  %6458 = vmatprep.subr.bf16.mxu1 %v12397_v44  ;;  %v12124_v54 = vcombine.low %v791_v41, %v799_v42  ;;  %v11790_v41 = vcombine.low %v456_v23, %v464_v26  ;;  %v11519_v42 = vcombine.high %v184_v33, %v192_v34  ;;  %v176_v44 = vld [vmem:[#allocation2 + $0x2c8] sm:$0xff] }
  0xa3   :  { %v1055_v45 = vld [vmem:[#allocation2 + $0x1e40] sm:$0xff]  ;;  %6418 = vmatpush2.bf16.msra.mxu0 %v12140_v46  ;;  %6459 = vmatpush2.bf16.msra.mxu1 %v12396_v47  ;;  %v424_v46 = vld [vmem:[#allocation2 + $0xa88] sm:$0xff] }
  0xa4   :  { %v775_v49 = vld [vmem:[#allocation2 + $0x1580] sm:$0xff]  ;;  %v12381_v52 = vcombine.high %v1047_v43, %v1055_v45  ;;  %6419 = vmatprep.subr.bf16.mxu0 %v12125_v48  ;;  %v12380_v55 = vcombine.low %v1047_v43, %v1055_v45  ;;  %v168_v43 = vld [vmem:[#allocation2 + $0x288] sm:$0xff]  ;;  %v11775_v45 = vcombine.high %v440_v35, %v448_v37  ;;  %v11518_v48 = vcombine.low %v184_v33, %v192_v34 }
  0xa5   :  { %v783_v50 = vld [vmem:[#allocation2 + $0x15c0] sm:$0xff]  ;;  %v432_v47 = vld [vmem:[#allocation2 + $0xac8] sm:$0xff] }
  0xa6   :  { %v1031_v51 = vld [vmem:[#allocation2 + $0x1d80] sm:$0xff]  ;;  %v12109_v56 = vcombine.high %v775_v49, %v783_v50  ;;  %6460 = vmatprep.subr.bf16.mxu1 %v12381_v52  ;;  %v12108_v0 = vcombine.low %v775_v49, %v783_v50  ;;  %v11774_v49 = vcombine.low %v440_v35, %v448_v37  ;;  %v11503_v50 = vcombine.high %v168_v43, %v176_v44  ;;  %v160_v52 = vld [vmem:[#allocation2 + $0x248] sm:$0xff] }
  0xa7   :  { %v1039_v53 = vld [vmem:[#allocation2 + $0x1dc0] sm:$0xff]  ;;  %6420 = vmatpush2.bf16.msra.mxu0 %v12124_v54  ;;  %6461 = vmatpush2.bf16.msra.mxu1 %v12380_v55  ;;  %v11759_v54 = vcombine.high %v424_v46, %v432_v47  ;;  %v416_v55 = vld [vmem:[#allocation2 + $0xa48] sm:$0xff] }
  0xa8   :  { %v759_v57 = vld [vmem:[#allocation2 + $0x1500] sm:$0xff]  ;;  %v12365_v62 = vcombine.high %v1031_v51, %v1039_v53  ;;  %6421 = vmatprep.subr.bf16.mxu0 %v12109_v56  ;;  %v12364_v1 = vcombine.low %v1031_v51, %v1039_v53  ;;  %v152_v51 = vld [vmem:[#allocation2 + $0x208] sm:$0xff]  ;;  %v11502_v56 = vcombine.low %v168_v43, %v176_v44 }
  0xa9   :  { %v767_v60 = vld [vmem:[#allocation2 + $0x1540] sm:$0xff]  ;;  %v408_v53 = vld [vmem:[#allocation2 + $0xa08] sm:$0xff] }
  0xaa   :  { %v1015_v61 = vld [vmem:[#allocation2 + $0x1d00] sm:$0xff]  ;;  %v12093_v2 = vcombine.high %v759_v57, %v767_v60  ;;  %6462 = vmatprep.subr.bf16.mxu1 %v12365_v62  ;;  %v12092_v8 = vcombine.low %v759_v57, %v767_v60  ;;  %v11758_v57 = vcombine.low %v424_v46, %v432_v47  ;;  %v11487_v60 = vcombine.high %v152_v51, %v160_v52  ;;  %v144_v62 = vld [vmem:[#allocation2 + $0x1c8] sm:$0xff] }
  0xab   :  { %v1023_v63 = vld [vmem:[#allocation2 + $0x1d40] sm:$0xff]  ;;  %6422 = vmatpush2.bf16.msra.mxu0 %v12108_v0  ;;  %6463 = vmatpush2.bf16.msra.mxu1 %v12364_v1  ;;  %v11743_v0 = vcombine.high %v408_v53, %v416_v55  ;;  %v400_v1 = vld [vmem:[#allocation2 + $0x9c8] sm:$0xff] }
  0xac   :  { %v743_v3 = vld [vmem:[#allocation2 + $0x1480] sm:$0xff]  ;;  %v12349_v6 = vcombine.high %v1015_v61, %v1023_v63  ;;  %6423 = vmatprep.subr.bf16.mxu0 %v12093_v2  ;;  %v12348_v9 = vcombine.low %v1015_v61, %v1023_v63  ;;  %v136_v61 = vld [vmem:[#allocation2 + $0x188] sm:$0xff]  ;;  %v11486_v2 = vcombine.low %v152_v51, %v160_v52 }
  0xad   :  { %v751_v4 = vld [vmem:[#allocation2 + $0x14c0] sm:$0xff]  ;;  %v392_v63 = vld [vmem:[#allocation2 + $0x988] sm:$0xff] }
  0xae   :  { %v999_v5 = vld [vmem:[#allocation2 + $0x1c80] sm:$0xff]  ;;  %v12077_v10 = vcombine.high %v743_v3, %v751_v4  ;;  %6464 = vmatprep.subr.bf16.mxu1 %v12349_v6  ;;  %v12076_v17 = vcombine.low %v743_v3, %v751_v4  ;;  %v11742_v3 = vcombine.low %v408_v53, %v416_v55  ;;  %v11471_v4 = vcombine.high %v136_v61, %v144_v62  ;;  %v128_v6 = vld [vmem:[#allocation2 + $0x148] sm:$0xff] }
  0xaf   :  { %v1007_v7 = vld [vmem:[#allocation2 + $0x1cc0] sm:$0xff]  ;;  %6424 = vmatpush2.bf16.msra.mxu0 %v12092_v8  ;;  %6465 = vmatpush2.bf16.msra.mxu1 %v12348_v9  ;;  %v11727_v8 = vcombine.high %v392_v63, %v400_v1  ;;  %v384_v9 = vld [vmem:[#allocation2 + $0x948] sm:$0xff] }
  0xb0   :  { %v727_v11 = vld [vmem:[#allocation2 + $0x1400] sm:$0xff]  ;;  %v12333_v14 = vcombine.high %v999_v5, %v1007_v7  ;;  %6425 = vmatprep.subr.bf16.mxu0 %v12077_v10  ;;  %v12332_v18 = vcombine.low %v999_v5, %v1007_v7  ;;  %v120_v5 = vld [vmem:[#allocation2 + $0x108] sm:$0xff]  ;;  %v11470_v10 = vcombine.low %v136_v61, %v144_v62 }
  0xb1   :  { %v735_v12 = vld [vmem:[#allocation2 + $0x1440] sm:$0xff]  ;;  %v376_v7 = vld [vmem:[#allocation2 + $0x908] sm:$0xff] }
  0xb2   :  { %v983_v13 = vld [vmem:[#allocation2 + $0x1c00] sm:$0xff]  ;;  %v12061_v19 = vcombine.high %v727_v11, %v735_v12  ;;  %6466 = vmatprep.subr.bf16.mxu1 %v12333_v14  ;;  %v12060_v29 = vcombine.low %v727_v11, %v735_v12  ;;  %v11726_v11 = vcombine.low %v392_v63, %v400_v1  ;;  %v11455_v12 = vcombine.high %v120_v5, %v128_v6  ;;  %v112_v14 = vld [vmem:[#allocation2 + $0xc8] sm:$0xff] }
  0xb3   :  { %v991_v15 = vld [vmem:[#allocation2 + $0x1c40] sm:$0xff]  ;;  %6426 = vmatpush2.bf16.msra.mxu0 %v12076_v17  ;;  %6467 = vmatpush2.bf16.msra.mxu1 %v12332_v18  ;;  %v11711_v17 = vcombine.high %v376_v7, %v384_v9  ;;  %v368_v18 = vld [vmem:[#allocation2 + $0x8c8] sm:$0xff]  ;;  %v11710_v21 = vcombine.low %v376_v7, %v384_v9 }
  0xb4   :  { %v12317_v24 = vcombine.high %v983_v13, %v991_v15  ;;  %v75_v25 = vld [vmem:[%s14239_s0 + $0x20] sm:$0xff]  ;;  %6427 = vmatprep.subr.bf16.mxu0 %v12061_v19  ;;  %v12316_v30 = vcombine.low %v983_v13, %v991_v15  ;;  %v104_v13 = vld [vmem:[#allocation2 + $0x88] sm:$0xff]  ;;  %v11454_v19 = vcombine.low %v120_v5, %v128_v6 }
  0xb5   :  { %v13914_v38 = vpack.c.bf16 %v75_v25, %v75_v25  ;;  %v360_v15 = vld [vmem:[#allocation2 + $0x888] sm:$0xff]  ;;  %v11439_v22 = vcombine.high %v104_v13, %v112_v14 }
  0xb6   :  { %6468 = vmatprep.subr.bf16.mxu1 %v12317_v24  ;;  %v88_v23 = vld [vmem:[#allocation2 + $0x8] sm:$0xff]  ;;  %v11695_v26 = vcombine.high %v360_v15, %v368_v18 }
  0xb7   :  { %6428 = vmatpush2.bf16.msra.mxu0 %v12060_v29  ;;  %6469 = vmatpush2.bf16.msra.mxu1 %v12316_v30  ;;  %v96_v24 = vld [vmem:[#allocation2 + $0x48] sm:$0xff]  ;;  %v11438_v29 = vcombine.low %v104_v13, %v112_v14  ;;  %v11694_v30 = vcombine.low %v360_v15, %v368_v18 }
  0xb8   :  { %6479 = vmatprep.subr.bf16.mxu0 %v11535_v32  ;;  %6520 = vmatprep.subr.bf16.mxu1 %v11791_v36  ;;  %v344_v25 = vld [vmem:[#allocation2 + $0x808] sm:$0xff]  ;;  %v11423_v32 = vcombine.high %v88_v23, %v96_v24 }
  0xb9   :  { %v352_v27 = vld [vmem:[#allocation2 + $0x848] sm:$0xff] }
  0xba   :  { %6430 = vmatmul.mubr.bf16.vlgmr.msra.gmra.mxu0 %v13914_v38  ;;  %6471 = vmatmul.mubr.bf16.vlgmr.msra.gmra.mxu1 %v13916_v39  ;;  %v328_v33 = vld [vmem:[#allocation2 + $0x788] sm:$0xff]  ;;  %v11679_v36 = vcombine.high %v344_v25, %v352_v27 }
  0xbb   :  { %6480 = vmatpush1.bf16.msra.mxu0 %v11534_v40  ;;  %6521 = vmatpush1.bf16.msra.mxu1 %v11790_v41  ;;  %v336_v34 = vld [vmem:[#allocation2 + $0x7c8] sm:$0xff]  ;;  %v11422_v40 = vcombine.low %v88_v23, %v96_v24  ;;  %v11678_v41 = vcombine.low %v344_v25, %v352_v27 }
  0xbc   :  { %6481 = vmatprep.subr.bf16.mxu0 %v11519_v42  ;;  %6522 = vmatprep.subr.bf16.mxu1 %v11775_v45  ;;  %v584_v35 = vld [vmem:[#allocation2 + $0xf88] sm:$0xff]  ;;  %v11663_v42 = vcombine.high %v328_v33, %v336_v34 }
  0xbd   :  { %6511 = vmatprep.mubr.bf16.mxu0 %v13878_v58  ;;  %6552 = vmatprep.mubr.bf16.mxu1 %v13880_v59  ;;  %v592_v37 = vld [vmem:[#allocation2 + $0xfc8] sm:$0xff] }
  0xbe   :  { %v312_v43 = vld [vmem:[#allocation2 + $0x708] sm:$0xff]  ;;  %v11919_v46 = vcombine.high %v584_v35, %v592_v37 }
  0xbf   :  { %6482 = vmatpush1.bf16.msra.mxu0 %v11518_v48  ;;  %6523 = vmatpush1.bf16.msra.mxu1 %v11774_v49  ;;  %v320_v44 = vld [vmem:[#allocation2 + $0x748] sm:$0xff]  ;;  %v11662_v48 = vcombine.low %v328_v33, %v336_v34  ;;  %v11918_v49 = vcombine.low %v584_v35, %v592_v37 }
  0xc0   :  { %6483 = vmatprep.subr.bf16.mxu0 %v11503_v50  ;;  %6524 = vmatprep.subr.bf16.mxu1 %v11759_v54  ;;  %v568_v45 = vld [vmem:[#allocation2 + $0xf08] sm:$0xff]  ;;  %v11647_v50 = vcombine.high %v312_v43, %v320_v44 }
  0xc1   :  { %v576_v47 = vld [vmem:[#allocation2 + $0xf48] sm:$0xff] }
  0xc2   :  { %v296_v51 = vld [vmem:[#allocation2 + $0x688] sm:$0xff]  ;;  %v11903_v54 = vcombine.high %v568_v45, %v576_v47 }
  0xc3   :  { %6484 = vmatpush1.bf16.msra.mxu0 %v11502_v56  ;;  %6525 = vmatpush1.bf16.msra.mxu1 %v11758_v57  ;;  %v304_v52 = vld [vmem:[#allocation2 + $0x6c8] sm:$0xff]  ;;  %v11646_v56 = vcombine.low %v312_v43, %v320_v44  ;;  %v11902_v57 = vcombine.low %v568_v45, %v576_v47 }
  0xc4   :  { %6485 = vmatprep.subr.bf16.mxu0 %v11487_v60  ;;  %6526 = vmatprep.subr.bf16.mxu1 %v11743_v0  ;;  %v552_v53 = vld [vmem:[#allocation2 + $0xe88] sm:$0xff]  ;;  %v11631_v60 = vcombine.high %v296_v51, %v304_v52 }
  0xc5   :  { %v560_v55 = vld [vmem:[#allocation2 + $0xec8] sm:$0xff] }
  0xc6   :  { %v280_v61 = vld [vmem:[#allocation2 + $0x608] sm:$0xff]  ;;  %v11887_v0 = vcombine.high %v552_v53, %v560_v55 }
  0xc7   :  { %6486 = vmatpush1.bf16.msra.mxu0 %v11486_v2  ;;  %6527 = vmatpush1.bf16.msra.mxu1 %v11742_v3  ;;  %v288_v62 = vld [vmem:[#allocation2 + $0x648] sm:$0xff]  ;;  %v11630_v2 = vcombine.low %v296_v51, %v304_v52  ;;  %v11886_v3 = vcombine.low %v552_v53, %v560_v55 }
  0xc8   :  { %6487 = vmatprep.subr.bf16.mxu0 %v11471_v4  ;;  %6528 = vmatprep.subr.bf16.mxu1 %v11727_v8  ;;  %v536_v63 = vld [vmem:[#allocation2 + $0xe08] sm:$0xff]  ;;  %v11615_v4 = vcombine.high %v280_v61, %v288_v62 }
  0xc9   :  { %v544_v1 = vld [vmem:[#allocation2 + $0xe48] sm:$0xff] }
  0xca   :  { %v264_v5 = vld [vmem:[#allocation2 + $0x588] sm:$0xff]  ;;  %v11871_v8 = vcombine.high %v536_v63, %v544_v1 }
  0xcb   :  { %6488 = vmatpush1.bf16.msra.mxu0 %v11470_v10  ;;  %6529 = vmatpush1.bf16.msra.mxu1 %v11726_v11  ;;  %v272_v6 = vld [vmem:[#allocation2 + $0x5c8] sm:$0xff]  ;;  %v11614_v10 = vcombine.low %v280_v61, %v288_v62  ;;  %v11870_v11 = vcombine.low %v536_v63, %v544_v1 }
  0xcc   :  { %6489 = vmatprep.subr.bf16.mxu0 %v11455_v12  ;;  %6530 = vmatprep.subr.bf16.mxu1 %v11711_v17  ;;  %v520_v7 = vld [vmem:[#allocation2 + $0xd88] sm:$0xff]  ;;  %v11599_v12 = vcombine.high %v264_v5, %v272_v6 }
  0xcd   :  { %v528_v9 = vld [vmem:[#allocation2 + $0xdc8] sm:$0xff] }
  0xce   :  { %v248_v13 = vld [vmem:[#allocation2 + $0x508] sm:$0xff]  ;;  %v11855_v17 = vcombine.high %v520_v7, %v528_v9 }
  0xcf   :  { %6490 = vmatpush1.bf16.msra.mxu0 %v11454_v19  ;;  %6531 = vmatpush1.bf16.msra.mxu1 %v11710_v21  ;;  %v256_v14 = vld [vmem:[#allocation2 + $0x548] sm:$0xff]  ;;  %v11598_v19 = vcombine.low %v264_v5, %v272_v6  ;;  %v11854_v21 = vcombine.low %v520_v7, %v528_v9 }
  0xd0   :  { %6491 = vmatprep.subr.bf16.mxu0 %v11439_v22  ;;  %6532 = vmatprep.subr.bf16.mxu1 %v11695_v26  ;;  %v504_v15 = vld [vmem:[#allocation2 + $0xd08] sm:$0xff]  ;;  %v11583_v22 = vcombine.high %v248_v13, %v256_v14 }
  0xd1   :  { %v512_v18 = vld [vmem:[#allocation2 + $0xd48] sm:$0xff] }
  0xd2   :  { %v232_v23 = vld [vmem:[#allocation2 + $0x488] sm:$0xff]  ;;  %v11839_v26 = vcombine.high %v504_v15, %v512_v18 }
  0xd3   :  { %6492 = vmatpush1.bf16.msra.mxu0 %v11438_v29  ;;  %6533 = vmatpush1.bf16.msra.mxu1 %v11694_v30  ;;  %v240_v24 = vld [vmem:[#allocation2 + $0x4c8] sm:$0xff]  ;;  %v11582_v29 = vcombine.low %v248_v13, %v256_v14  ;;  %v11838_v30 = vcombine.low %v504_v15, %v512_v18 }
  0xd4   :  { %6493 = vmatprep.subr.bf16.mxu0 %v11423_v32  ;;  %6534 = vmatprep.subr.bf16.mxu1 %v11679_v36  ;;  %v488_v25 = vld [vmem:[#allocation2 + $0xc88] sm:$0xff]  ;;  %v11567_v32 = vcombine.high %v232_v23, %v240_v24 }
  0xd5   :  { %v496_v27 = vld [vmem:[#allocation2 + $0xcc8] sm:$0xff] }
  0xd6   :  { %v216_v33 = vld [vmem:[#allocation2 + $0x408] sm:$0xff]  ;;  %v11823_v36 = vcombine.high %v488_v25, %v496_v27 }
  0xd7   :  { %6494 = vmatpush1.bf16.msra.mxu0 %v11422_v40  ;;  %6535 = vmatpush1.bf16.msra.mxu1 %v11678_v41  ;;  %v224_v34 = vld [vmem:[#allocation2 + $0x448] sm:$0xff]  ;;  %v11566_v40 = vcombine.low %v232_v23, %v240_v24  ;;  %v11822_v41 = vcombine.low %v488_v25, %v496_v27 }
  0xd8   :  { %6495 = vmatprep.subr.bf16.mxu0 %v11663_v42  ;;  %6536 = vmatprep.subr.bf16.mxu1 %v11919_v46  ;;  %v472_v35 = vld [vmem:[#allocation2 + $0xc08] sm:$0xff]  ;;  %v11551_v42 = vcombine.high %v216_v33, %v224_v34 }
  0xd9   :  { %v480_v37 = vld [vmem:[#allocation2 + $0xc48] sm:$0xff] }
  0xda   :  { %v712_v43 = vld [vmem:[#allocation2 + $0x1388] sm:$0xff]  ;;  %v11807_v46 = vcombine.high %v472_v35, %v480_v37 }
  0xdb   :  { %6496 = vmatpush2.bf16.msra.mxu0 %v11662_v48  ;;  %6537 = vmatpush2.bf16.msra.mxu1 %v11918_v49  ;;  %v720_v44 = vld [vmem:[#allocation2 + $0x13c8] sm:$0xff]  ;;  %v11550_v48 = vcombine.low %v216_v33, %v224_v34  ;;  %v11806_v49 = vcombine.low %v472_v35, %v480_v37 }
  0xdc   :  { %6497 = vmatprep.subr.bf16.mxu0 %v11647_v50  ;;  %6538 = vmatprep.subr.bf16.mxu1 %v11903_v54  ;;  %v968_v45 = vld [vmem:[#allocation2 + $0x1b88] sm:$0xff]  ;;  %v12047_v50 = vcombine.high %v712_v43, %v720_v44 }
  0xdd   :  { %v976_v47 = vld [vmem:[#allocation2 + $0x1bc8] sm:$0xff] }
  0xde   :  { %v696_v51 = vld [vmem:[#allocation2 + $0x1308] sm:$0xff]  ;;  %v12303_v54 = vcombine.high %v968_v45, %v976_v47 }
  0xdf   :  { %6498 = vmatpush2.bf16.msra.mxu0 %v11646_v56  ;;  %6539 = vmatpush2.bf16.msra.mxu1 %v11902_v57  ;;  %v704_v52 = vld [vmem:[#allocation2 + $0x1348] sm:$0xff]  ;;  %v12046_v56 = vcombine.low %v712_v43, %v720_v44  ;;  %v12302_v57 = vcombine.low %v968_v45, %v976_v47 }
  0xe0   :  { %6499 = vmatprep.subr.bf16.mxu0 %v11631_v60  ;;  %6540 = vmatprep.subr.bf16.mxu1 %v11887_v0  ;;  %v952_v53 = vld [vmem:[#allocation2 + $0x1b08] sm:$0xff]  ;;  %v12031_v60 = vcombine.high %v696_v51, %v704_v52 }
  0xe1   :  { %v960_v55 = vld [vmem:[#allocation2 + $0x1b48] sm:$0xff] }
  0xe2   :  { %v680_v61 = vld [vmem:[#allocation2 + $0x1288] sm:$0xff]  ;;  %v12287_v0 = vcombine.high %v952_v53, %v960_v55 }
  0xe3   :  { %6500 = vmatpush2.bf16.msra.mxu0 %v11630_v2  ;;  %6541 = vmatpush2.bf16.msra.mxu1 %v11886_v3  ;;  %v688_v62 = vld [vmem:[#allocation2 + $0x12c8] sm:$0xff]  ;;  %v12030_v2 = vcombine.low %v696_v51, %v704_v52  ;;  %v12286_v3 = vcombine.low %v952_v53, %v960_v55 }
  0xe4   :  { %6501 = vmatprep.subr.bf16.mxu0 %v11615_v4  ;;  %6542 = vmatprep.subr.bf16.mxu1 %v11871_v8  ;;  %v936_v63 = vld [vmem:[#allocation2 + $0x1a88] sm:$0xff]  ;;  %v12015_v4 = vcombine.high %v680_v61, %v688_v62 }
  0xe5   :  { %v944_v1 = vld [vmem:[#allocation2 + $0x1ac8] sm:$0xff] }
  0xe6   :  { %v664_v5 = vld [vmem:[#allocation2 + $0x1208] sm:$0xff]  ;;  %v12271_v8 = vcombine.high %v936_v63, %v944_v1 }
  0xe7   :  { %6502 = vmatpush2.bf16.msra.mxu0 %v11614_v10  ;;  %6543 = vmatpush2.bf16.msra.mxu1 %v11870_v11  ;;  %v672_v6 = vld [vmem:[#allocation2 + $0x1248] sm:$0xff]  ;;  %v12014_v10 = vcombine.low %v680_v61, %v688_v62  ;;  %v12270_v11 = vcombine.low %v936_v63, %v944_v1 }
  0xe8   :  { %6503 = vmatprep.subr.bf16.mxu0 %v11599_v12  ;;  %6544 = vmatprep.subr.bf16.mxu1 %v11855_v17  ;;  %v920_v7 = vld [vmem:[#allocation2 + $0x1a08] sm:$0xff]  ;;  %v11999_v12 = vcombine.high %v664_v5, %v672_v6 }
  0xe9   :  { %v928_v9 = vld [vmem:[#allocation2 + $0x1a48] sm:$0xff] }
  0xea   :  { %v648_v13 = vld [vmem:[#allocation2 + $0x1188] sm:$0xff]  ;;  %v12255_v17 = vcombine.high %v920_v7, %v928_v9 }
  0xeb   :  { %6504 = vmatpush2.bf16.msra.mxu0 %v11598_v19  ;;  %6545 = vmatpush2.bf16.msra.mxu1 %v11854_v21  ;;  %v656_v14 = vld [vmem:[#allocation2 + $0x11c8] sm:$0xff]  ;;  %v11998_v19 = vcombine.low %v664_v5, %v672_v6  ;;  %v12254_v21 = vcombine.low %v920_v7, %v928_v9 }
  0xec   :  { %6505 = vmatprep.subr.bf16.mxu0 %v11583_v22  ;;  %6546 = vmatprep.subr.bf16.mxu1 %v11839_v26  ;;  %v904_v15 = vld [vmem:[#allocation2 + $0x1988] sm:$0xff]  ;;  %v11983_v22 = vcombine.high %v648_v13, %v656_v14 }
  0xed   :  { %v912_v18 = vld [vmem:[#allocation2 + $0x19c8] sm:$0xff] }
  0xee   :  { %v632_v23 = vld [vmem:[#allocation2 + $0x1108] sm:$0xff]  ;;  %v12239_v26 = vcombine.high %v904_v15, %v912_v18 }
  0xef   :  { %6506 = vmatpush2.bf16.msra.mxu0 %v11582_v29  ;;  %6547 = vmatpush2.bf16.msra.mxu1 %v11838_v30  ;;  %v640_v24 = vld [vmem:[#allocation2 + $0x1148] sm:$0xff]  ;;  %v11982_v29 = vcombine.low %v648_v13, %v656_v14  ;;  %v12238_v30 = vcombine.low %v904_v15, %v912_v18 }
  0xf0   :  { %6507 = vmatprep.subr.bf16.mxu0 %v11567_v32  ;;  %6548 = vmatprep.subr.bf16.mxu1 %v11823_v36  ;;  %v888_v25 = vld [vmem:[#allocation2 + $0x1908] sm:$0xff]  ;;  %v11967_v32 = vcombine.high %v632_v23, %v640_v24 }
  0xf1   :  { %v896_v27 = vld [vmem:[#allocation2 + $0x1948] sm:$0xff] }
  0xf2   :  { %v616_v33 = vld [vmem:[#allocation2 + $0x1088] sm:$0xff]  ;;  %v12223_v36 = vcombine.high %v888_v25, %v896_v27 }
  0xf3   :  { %6508 = vmatpush2.bf16.msra.mxu0 %v11566_v40  ;;  %6549 = vmatpush2.bf16.msra.mxu1 %v11822_v41  ;;  %v624_v34 = vld [vmem:[#allocation2 + $0x10c8] sm:$0xff]  ;;  %v11966_v40 = vcombine.low %v632_v23, %v640_v24  ;;  %v12222_v41 = vcombine.low %v888_v25, %v896_v27 }
  0xf4   :  { %6509 = vmatprep.subr.bf16.mxu0 %v11551_v42  ;;  %6550 = vmatprep.subr.bf16.mxu1 %v11807_v46  ;;  %v872_v35 = vld [vmem:[#allocation2 + $0x1888] sm:$0xff]  ;;  %v11951_v42 = vcombine.high %v616_v33, %v624_v34 }
  0xf5   :  { %v880_v37 = vld [vmem:[#allocation2 + $0x18c8] sm:$0xff] }
  0xf6   :  { %v600_v43 = vld [vmem:[#allocation2 + $0x1008] sm:$0xff]  ;;  %v12207_v46 = vcombine.high %v872_v35, %v880_v37 }
  0xf7   :  { %6510 = vmatpush2.bf16.msra.mxu0 %v11550_v48  ;;  %6551 = vmatpush2.bf16.msra.mxu1 %v11806_v49  ;;  %v608_v44 = vld [vmem:[#allocation2 + $0x1048] sm:$0xff]  ;;  %v11950_v48 = vcombine.low %v616_v33, %v624_v34  ;;  %v12206_v49 = vcombine.low %v872_v35, %v880_v37 }
  0xf8   :  { %6561 = vmatprep.subr.bf16.mxu0 %v12047_v50  ;;  %6602 = vmatprep.subr.bf16.mxu1 %v12303_v54  ;;  %v856_v45 = vld [vmem:[#allocation2 + $0x1808] sm:$0xff]  ;;  %v11935_v50 = vcombine.high %v600_v43, %v608_v44 }
  0xf9   :  { %v864_v47 = vld [vmem:[#allocation2 + $0x1848] sm:$0xff] }
  0xfa   :  { %6512 = vmatmul.mubr.bf16.vlgmr.msra.gmra.mxu0 %v13890_v16  ;;  %6553 = vmatmul.mubr.bf16.vlgmr.msra.gmra.mxu1 %v13895_v20  ;;  %v840_v51 = vld [vmem:[#allocation2 + $0x1788] sm:$0xff]  ;;  %v12191_v54 = vcombine.high %v856_v45, %v864_v47 }
  0xfb   :  { %6562 = vmatpush1.bf16.msra.mxu0 %v12046_v56  ;;  %6603 = vmatpush1.bf16.msra.mxu1 %v12302_v57  ;;  %v848_v52 = vld [vmem:[#allocation2 + $0x17c8] sm:$0xff]  ;;  %v11934_v56 = vcombine.low %v600_v43, %v608_v44  ;;  %v12190_v57 = vcombine.low %v856_v45, %v864_v47 }
  0xfc   :  { %6563 = vmatprep.subr.bf16.mxu0 %v12031_v60  ;;  %6604 = vmatprep.subr.bf16.mxu1 %v12287_v0  ;;  %v1096_v53 = vld [vmem:[#allocation2 + $0x1f88] sm:$0xff]  ;;  %v12175_v60 = vcombine.high %v840_v51, %v848_v52 }
  0xfd   :  { %6593 = vmatprep.mubr.bf16.mxu0 %v13900_v28  ;;  %6634 = vmatprep.mubr.bf16.mxu1 %v13903_v31  ;;  %v1104_v55 = vld [vmem:[#allocation2 + $0x1fc8] sm:$0xff] }
  0xfe   :  { %v824_v61 = vld [vmem:[#allocation2 + $0x1708] sm:$0xff]  ;;  %v12431_v0 = vcombine.high %v1096_v53, %v1104_v55 }
  0xff   :  { %6564 = vmatpush1.bf16.msra.mxu0 %v12030_v2  ;;  %6605 = vmatpush1.bf16.msra.mxu1 %v12286_v3  ;;  %v832_v62 = vld [vmem:[#allocation2 + $0x1748] sm:$0xff]  ;;  %v12174_v2 = vcombine.low %v840_v51, %v848_v52  ;;  %v12430_v3 = vcombine.low %v1096_v53, %v1104_v55 }
 0x100   :  { %6565 = vmatprep.subr.bf16.mxu0 %v12015_v4  ;;  %6606 = vmatprep.subr.bf16.mxu1 %v12271_v8  ;;  %v1080_v63 = vld [vmem:[#allocation2 + $0x1f08] sm:$0xff]  ;;  %v12159_v4 = vcombine.high %v824_v61, %v832_v62 }
 0x101   :  { %v1088_v1 = vld [vmem:[#allocation2 + $0x1f48] sm:$0xff] }
 0x102   :  { %v808_v5 = vld [vmem:[#allocation2 + $0x1688] sm:$0xff]  ;;  %v12415_v8 = vcombine.high %v1080_v63, %v1088_v1 }
 0x103   :  { %6566 = vmatpush1.bf16.msra.mxu0 %v12014_v10  ;;  %6607 = vmatpush1.bf16.msra.mxu1 %v12270_v11  ;;  %v816_v6 = vld [vmem:[#allocation2 + $0x16c8] sm:$0xff]  ;;  %v12158_v10 = vcombine.low %v824_v61, %v832_v62  ;;  %v12414_v11 = vcombine.low %v1080_v63, %v1088_v1  ;;  %v201_v63 = vld [vmem:[#allocation2 + $0x390] sm:$0xff] }
 0x104   :  { %6567 = vmatprep.subr.bf16.mxu0 %v11999_v12  ;;  %6608 = vmatprep.subr.bf16.mxu1 %v12255_v17  ;;  %v1064_v7 = vld [vmem:[#allocation2 + $0x1e88] sm:$0xff]  ;;  %v12143_v12 = vcombine.high %v808_v5, %v816_v6  ;;  %v457_v1 = vld [vmem:[#allocation2 + $0xb90] sm:$0xff] }
 0x105   :  { %v1072_v9 = vld [vmem:[#allocation2 + $0x1ec8] sm:$0xff] }
 0x106   :  { %v792_v13 = vld [vmem:[#allocation2 + $0x1608] sm:$0xff]  ;;  %v12399_v17 = vcombine.high %v1064_v7, %v1072_v9 }
 0x107   :  { %6568 = vmatpush1.bf16.msra.mxu0 %v11998_v19  ;;  %6609 = vmatpush1.bf16.msra.mxu1 %v12254_v21  ;;  %v800_v14 = vld [vmem:[#allocation2 + $0x1648] sm:$0xff]  ;;  %v12142_v19 = vcombine.low %v808_v5, %v816_v6  ;;  %v12398_v21 = vcombine.low %v1064_v7, %v1072_v9  ;;  %v185_v9 = vld [vmem:[#allocation2 + $0x310] sm:$0xff] }
 0x108   :  { %6569 = vmatprep.subr.bf16.mxu0 %v11983_v22  ;;  %6610 = vmatprep.subr.bf16.mxu1 %v12239_v26  ;;  %v1048_v15 = vld [vmem:[#allocation2 + $0x1e08] sm:$0xff]  ;;  %v12127_v22 = vcombine.high %v792_v13, %v800_v14 }
 0x109   :  { %v1056_v18 = vld [vmem:[#allocation2 + $0x1e48] sm:$0xff] }
 0x10a   :  { %v776_v23 = vld [vmem:[#allocation2 + $0x1588] sm:$0xff]  ;;  %v12383_v26 = vcombine.high %v1048_v15, %v1056_v18 }
 0x10b   :  { %6570 = vmatpush1.bf16.msra.mxu0 %v11982_v29  ;;  %6611 = vmatpush1.bf16.msra.mxu1 %v12238_v30  ;;  %v784_v24 = vld [vmem:[#allocation2 + $0x15c8] sm:$0xff]  ;;  %v12126_v29 = vcombine.low %v792_v13, %v800_v14  ;;  %v12382_v30 = vcombine.low %v1048_v15, %v1056_v18  ;;  %v449_v14 = vld [vmem:[#allocation2 + $0xb50] sm:$0xff] }
 0x10c   :  { %6571 = vmatprep.subr.bf16.mxu0 %v11967_v32  ;;  %6612 = vmatprep.subr.bf16.mxu1 %v12223_v36  ;;  %v1032_v25 = vld [vmem:[#allocation2 + $0x1d88] sm:$0xff]  ;;  %v12111_v32 = vcombine.high %v776_v23, %v784_v24 }
 0x10d   :  { %v1040_v27 = vld [vmem:[#allocation2 + $0x1dc8] sm:$0xff] }
 0x10e   :  { %v760_v33 = vld [vmem:[#allocation2 + $0x1508] sm:$0xff]  ;;  %v12367_v36 = vcombine.high %v1032_v25, %v1040_v27 }
 0x10f   :  { %6572 = vmatpush1.bf16.msra.mxu0 %v11966_v40  ;;  %6613 = vmatpush1.bf16.msra.mxu1 %v12222_v41  ;;  %v768_v34 = vld [vmem:[#allocation2 + $0x1548] sm:$0xff]  ;;  %v12110_v40 = vcombine.low %v776_v23, %v784_v24  ;;  %v12366_v41 = vcombine.low %v1032_v25, %v1040_v27  ;;  %v425_v23 = vld [vmem:[#allocation2 + $0xa90] sm:$0xff] }
 0x110   :  { %6573 = vmatprep.subr.bf16.mxu0 %v11951_v42  ;;  %6614 = vmatprep.subr.bf16.mxu1 %v12207_v46  ;;  %v1016_v35 = vld [vmem:[#allocation2 + $0x1d08] sm:$0xff]  ;;  %v12095_v42 = vcombine.high %v760_v33, %v768_v34 }
 0x111   :  { %v1024_v37 = vld [vmem:[#allocation2 + $0x1d48] sm:$0xff] }
 0x112   :  { %v744_v43 = vld [vmem:[#allocation2 + $0x1488] sm:$0xff]  ;;  %v12351_v46 = vcombine.high %v1016_v35, %v1024_v37 }
 0x113   :  { %6574 = vmatpush1.bf16.msra.mxu0 %v11950_v48  ;;  %6615 = vmatpush1.bf16.msra.mxu1 %v12206_v49  ;;  %v752_v44 = vld [vmem:[#allocation2 + $0x14c8] sm:$0xff]  ;;  %v12094_v48 = vcombine.low %v760_v33, %v768_v34  ;;  %v1115_v49 = vlaneseq }
 0x114   :  { %6575 = vmatprep.subr.bf16.mxu0 %v11935_v50  ;;  %6616 = vmatprep.subr.bf16.mxu1 %v12191_v54  ;;  %v1000_v45 = vld [vmem:[#allocation2 + $0x1c88] sm:$0xff]  ;;  %v12350_v50 = vcombine.low %v1016_v35, %v1024_v37  ;;  %v12079_v51 = vcombine.high %v744_v43, %v752_v44  ;;  %v161_v37 = vld [vmem:[#allocation2 + $0x250] sm:$0xff] }
 0x115   :  { %v1008_v47 = vld [vmem:[#allocation2 + $0x1cc8] sm:$0xff] }
 0x116   :  { %v728_v52 = vld [vmem:[#allocation2 + $0x1408] sm:$0xff]  ;;  %v12335_v55 = vcombine.high %v1000_v45, %v1008_v47  ;;  %v12334_v61 = vcombine.low %v1000_v45, %v1008_v47  ;;  %v417_v45 = vld [vmem:[#allocation2 + $0xa50] sm:$0xff] }
 0x117   :  { %6576 = vmatpush1.bf16.msra.mxu0 %v11934_v56  ;;  %6617 = vmatpush1.bf16.msra.mxu1 %v12190_v57  ;;  %v736_v53 = vld [vmem:[#allocation2 + $0x1448] sm:$0xff]  ;;  %v12078_v57 = vcombine.low %v744_v43, %v752_v44 }
 0x118   :  { %6577 = vmatprep.subr.bf16.mxu0 %v12175_v60  ;;  %6618 = vmatprep.subr.bf16.mxu1 %v12431_v0  ;;  %v984_v54 = vld [vmem:[#allocation2 + $0x1c08] sm:$0xff]  ;;  %v13926_v60 = vshrl.u32 %v1115_v49, 7  ;;  %v12063_v62 = vcombine.high %v728_v52, %v736_v53  ;;  %v209_v0 = vld [vmem:[#allocation2 + $0x3d0] sm:$0xff]  ;;  %v12062_v5 = vcombine.low %v728_v52, %v736_v53 }
 0x119   :  { %v992_v56 = vld [vmem:[#allocation2 + $0x1c48] sm:$0xff]  ;;  %v137_v53 = vld [vmem:[#allocation2 + $0x190] sm:$0xff] }
 0x11a   :  { %v13929_v6 = vsub.s32 0, %v13926_v60  ;;  %v12318_v7 = vcombine.low %v984_v54, %v992_v56  ;;  %v13932_v13 = vsub.s32 1, %v13926_v60 }
 0x11b   :  { %6578 = vmatpush2.bf16.msra.mxu0 %v12174_v2  ;;  %6619 = vmatpush2.bf16.msra.mxu1 %v12430_v3  ;;  %v12319_v2 = vcombine.high %v984_v54, %v992_v56  ;;  %v465_v3 = vld [vmem:[#allocation2 + $0xbd0] sm:$0xff] }
 0x11c   :  { %6579 = vmatprep.subr.bf16.mxu0 %v12159_v4  ;;  %6620 = vmatprep.subr.bf16.mxu1 %v12415_v8  ;;  %v1111_v4 = vld [vmem:[#allocation4] sm:$0xff]  ;;  %v11537_v8 = vcombine.high %v201_v63, %v209_v0  ;;  %v11792_v18 = vcombine.low %v457_v1, %v465_v3  ;;  %v145_v54 = vld [vmem:[#allocation2 + $0x1d0] sm:$0xff] }
 0x11d   :  { %v1118_v15 = vrot.slane %v1111_v4, %v13929_v6  ;;  %v1122_v24 = vrot.slane %v1111_v4, %v13932_v13 }
 0x11f   :  { %6580 = vmatpush2.bf16.msra.mxu0 %v12158_v10  ;;  %6621 = vmatpush2.bf16.msra.mxu1 %v12414_v11  ;;  %v193_v10 = vld [vmem:[#allocation2 + $0x350] sm:$0xff] }
 0x120   :  { %6581 = vmatprep.subr.bf16.mxu0 %v12143_v12  ;;  %6622 = vmatprep.subr.bf16.mxu1 %v12399_v17  ;;  %v441_v11 = vld [vmem:[#allocation2 + $0xb10] sm:$0xff]  ;;  %v11793_v12 = vcombine.high %v457_v1, %v465_v3  ;;  %v11536_v17 = vcombine.low %v201_v63, %v209_v0  ;;  %v11473_v0 = vcombine.high %v137_v53, %v145_v54 }
 0x121   :  { %v11777_v25 = vcombine.high %v441_v11, %v449_v14  ;;  %v11776_v34 = vcombine.low %v441_v11, %v449_v14  ;;  %v121_v1 = vld [vmem:[#allocation2 + $0x110] sm:$0xff] }
 0x122   :  { %v377_v3 = vld [vmem:[#allocation2 + $0x910] sm:$0xff] }
 0x123   :  { %6582 = vmatpush2.bf16.msra.mxu0 %v12142_v19  ;;  %6623 = vmatpush2.bf16.msra.mxu1 %v12398_v21  ;;  %v11521_v19 = vcombine.high %v185_v9, %v193_v10  ;;  %v169_v21 = vld [vmem:[#allocation2 + $0x290] sm:$0xff] }
 0x124   :  { %6583 = vmatprep.subr.bf16.mxu0 %v12127_v22  ;;  %6624 = vmatprep.subr.bf16.mxu1 %v12383_v26  ;;  %v177_v22 = vld [vmem:[#allocation2 + $0x2d0] sm:$0xff] }
 0x125   :  { %v433_v26 = vld [vmem:[#allocation2 + $0xad0] sm:$0xff]  ;;  %v11505_v35 = vcombine.high %v169_v21, %v177_v22  ;;  %v11504_v49 = vcombine.low %v169_v21, %v177_v22 }
 0x126   :  { %v11761_v44 = vcombine.high %v425_v23, %v433_v26  ;;  %v113_v11 = vld [vmem:[#allocation2 + $0xd0] sm:$0xff] }
 0x127   :  { %6584 = vmatpush2.bf16.msra.mxu0 %v12126_v29  ;;  %6625 = vmatpush2.bf16.msra.mxu1 %v12382_v30  ;;  %v89_v21 = vld [vmem:[#allocation2 + $0x10] sm:$0xff] }
 0x128   :  { %6585 = vmatprep.subr.bf16.mxu0 %v12111_v32  ;;  %6626 = vmatprep.subr.bf16.mxu1 %v12367_v36  ;;  %v11520_v32 = vcombine.low %v185_v9, %v193_v10  ;;  %v153_v36 = vld [vmem:[#allocation2 + $0x210] sm:$0xff] }
 0x129   :  { %v11489_v52 = vcombine.high %v153_v36, %v161_v37  ;;  %v105_v10 = vld [vmem:[#allocation2 + $0x90] sm:$0xff] }
 0x12a   :  { %v97_v22 = vld [vmem:[#allocation2 + $0x50] sm:$0xff] }
 0x12b   :  { %6586 = vmatpush2.bf16.msra.mxu0 %v12110_v40  ;;  %6627 = vmatpush2.bf16.msra.mxu1 %v12366_v41  ;;  %v409_v40 = vld [vmem:[#allocation2 + $0xa10] sm:$0xff] }
 0x12c   :  { %6587 = vmatprep.subr.bf16.mxu0 %v12095_v42  ;;  %6628 = vmatprep.subr.bf16.mxu1 %v12351_v46  ;;  %v11744_v63 = vcombine.low %v409_v40, %v417_v45 }
 0x12f   :  { %6588 = vmatpush2.bf16.msra.mxu0 %v12094_v48  ;;  %6629 = vmatpush2.bf16.msra.mxu1 %v12350_v50 }
 0x130   :  { %6589 = vmatprep.subr.bf16.mxu0 %v12079_v51  ;;  %6630 = vmatprep.subr.bf16.mxu1 %v12335_v55  ;;  %v11760_v51 = vcombine.low %v425_v23, %v433_v26  ;;  %v393_v55 = vld [vmem:[#allocation2 + $0x990] sm:$0xff]  ;;  %v11440_v26 = vcombine.low %v105_v10, %v113_v11 }
 0x131   :  { %v345_v23 = vld [vmem:[#allocation2 + $0x810] sm:$0xff] }
 0x133   :  { %6590 = vmatpush2.bf16.msra.mxu0 %v12078_v57  ;;  %6631 = vmatpush2.bf16.msra.mxu1 %v12334_v61  ;;  %v11745_v57 = vcombine.high %v409_v40, %v417_v45  ;;  %v401_v61 = vld [vmem:[#allocation2 + $0x9d0] sm:$0xff] }
 0x134   :  { %6591 = vmatprep.subr.bf16.mxu0 %v12063_v62  ;;  %6632 = vmatprep.subr.bf16.mxu1 %v12319_v2  ;;  %v11488_v62 = vcombine.low %v153_v36, %v161_v37  ;;  %v129_v2 = vld [vmem:[#allocation2 + $0x150] sm:$0xff]  ;;  %v11729_v4 = vcombine.high %v393_v55, %v401_v61  ;;  %v11424_v36 = vcombine.low %v89_v21, %v97_v22 }
 0x135   :  { %v11457_v9 = vcombine.high %v121_v1, %v129_v2 }
 0x137   :  { %6592 = vmatpush2.bf16.msra.mxu0 %v12062_v5  ;;  %6633 = vmatpush2.bf16.msra.mxu1 %v12318_v7  ;;  %v385_v5 = vld [vmem:[#allocation2 + $0x950] sm:$0xff]  ;;  %v11472_v7 = vcombine.low %v137_v53, %v145_v54 }
 0x138   :  { %6643 = vmatprep.subr.bf16.mxu0 %v11537_v8  ;;  %6684 = vmatprep.subr.bf16.mxu1 %v11793_v12  ;;  %v11728_v8 = vcombine.low %v393_v55, %v401_v61  ;;  %v361_v12 = vld [vmem:[#allocation2 + $0x890] sm:$0xff]  ;;  %v11713_v14 = vcombine.high %v377_v3, %v385_v5 }
 0x139   :  { %v6390_v30 = vpop.f32.mrf.mxu1  ;;  %v553_v53 = vld [vmem:[#allocation2 + $0xe90] sm:$0xff] }
 0x13a   :  { %v6349_v27 = vpop.f32.mrf.mxu0  ;;  %6594 = vmatmul.mubr.bf16.vlgmr.msra.gmra.mxu0 %v13914_v38  ;;  %6635 = vmatmul.mubr.bf16.vlgmr.msra.gmra.mxu1 %v13916_v39  ;;  %v561_v55 = vld [vmem:[#allocation2 + $0xed0] sm:$0xff] }
 0x13b   :  { %v6350_v29 = vadd.f32 %v6349_v27, %v1118_v15  ;;  %6644 = vmatpush1.bf16.msra.mxu0 %v11536_v17  ;;  %6685 = vmatpush1.bf16.msra.mxu1 %v11792_v18  ;;  %v6392_v43 = vpop.f32.mrf.mxu1  ;;  %v369_v15 = vld [vmem:[#allocation2 + $0x8d0] sm:$0xff]  ;;  %v11456_v17 = vcombine.low %v121_v1, %v129_v2  ;;  %v11712_v18 = vcombine.low %v377_v3, %v385_v5 }
 0x13c   :  { %v6351_v33 = vpop.f32.mrf.mxu0  ;;  %6645 = vmatprep.subr.bf16.mxu0 %v11521_v19  ;;  %6686 = vmatprep.subr.bf16.mxu1 %v11777_v25  ;;  %v11441_v19 = vcombine.high %v105_v10, %v113_v11  ;;  %v353_v25 = vld [vmem:[#allocation2 + $0x850] sm:$0xff]  ;;  %v11696_v27 = vcombine.low %v361_v12, %v369_v15  ;;  %v11889_v1 = vcombine.high %v553_v53, %v561_v55 }
 0x13d   :  { %v13938_v41 = vadd.f32 %v6390_v30, %v6350_v29  ;;  %v6352_v42 = vadd.f32 %v6351_v33, %v1122_v24  ;;  %6675 = vmatprep.mubr.bf16.mxu0 %v13878_v58  ;;  %6716 = vmatprep.mubr.bf16.mxu1 %v13880_v59  ;;  %v6394_v48 = vpop.f32.mrf.mxu1  ;;  %v11697_v24 = vcombine.high %v361_v12, %v369_v15  ;;  %v329_v30 = vld [vmem:[#allocation2 + $0x790] sm:$0xff] }
 0x13e   :  { %v6353_v46 = vpop.f32.mrf.mxu0  ;;  %v11425_v29 = vcombine.high %v89_v21, %v97_v22  ;;  %v585_v33 = vld [vmem:[#allocation2 + $0xf90] sm:$0xff]  ;;  %v11680_v37 = vcombine.low %v345_v23, %v353_v25 }
 0x13f   :  { %v13942_v47 = vadd.f32 %v6392_v43, %v6352_v42  ;;  %6646 = vmatpush1.bf16.msra.mxu0 %v11520_v32  ;;  %6687 = vmatpush1.bf16.msra.mxu1 %v11776_v34  ;;  %v6395_v56 = vpop.f32.mrf.mxu1  ;;  %v337_v32 = vld [vmem:[#allocation2 + $0x7d0] sm:$0xff]  ;;  %v11681_v34 = vcombine.high %v345_v23, %v353_v25 }
 0x140   :  { %v6354_v50 = vpop.f32.mrf.mxu0  ;;  %6647 = vmatprep.subr.bf16.mxu0 %v11505_v35  ;;  %6688 = vmatprep.subr.bf16.mxu1 %v11761_v44  ;;  %v593_v35 = vld [vmem:[#allocation2 + $0xfd0] sm:$0xff]  ;;  %v11665_v40 = vcombine.high %v329_v30, %v337_v32  ;;  %v11664_v48 = vcombine.low %v329_v30, %v337_v32 }
 0x141   :  { %v313_v42 = vld [vmem:[#allocation2 + $0x710] sm:$0xff]  ;;  %v11921_v45 = vcombine.high %v585_v33, %v593_v35 }
 0x142   :  { %v321_v43 = vld [vmem:[#allocation2 + $0x750] sm:$0xff] }
 0x143   :  { %6648 = vmatpush1.bf16.msra.mxu0 %v11504_v49  ;;  %6689 = vmatpush1.bf16.msra.mxu1 %v11760_v51  ;;  %v569_v44 = vld [vmem:[#allocation2 + $0xf10] sm:$0xff]  ;;  %v11920_v49 = vcombine.low %v585_v33, %v593_v35  ;;  %v11649_v50 = vcombine.high %v313_v42, %v321_v43  ;;  %v11648_v56 = vcombine.low %v313_v42, %v321_v43 }
 0x144   :  { %6649 = vmatprep.subr.bf16.mxu0 %v11489_v52  ;;  %6690 = vmatprep.subr.bf16.mxu1 %v11745_v57  ;;  %v577_v46 = vld [vmem:[#allocation2 + $0xf50] sm:$0xff] }
 0x145   :  { %v297_v51 = vld [vmem:[#allocation2 + $0x690] sm:$0xff]  ;;  %v11905_v54 = vcombine.high %v569_v44, %v577_v46  ;;  %v11904_v57 = vcombine.low %v569_v44, %v577_v46 }
 0x146   :  { %v305_v52 = vld [vmem:[#allocation2 + $0x6d0] sm:$0xff] }
 0x147   :  { %6650 = vmatpush1.bf16.msra.mxu0 %v11488_v62  ;;  %6691 = vmatpush1.bf16.msra.mxu1 %v11744_v63  ;;  %v11633_v61 = vcombine.high %v297_v51, %v305_v52  ;;  %v281_v62 = vld [vmem:[#allocation2 + $0x610] sm:$0xff]  ;;  %v11632_v3 = vcombine.low %v297_v51, %v305_v52 }
 0x148   :  { %6651 = vmatprep.subr.bf16.mxu0 %v11473_v0  ;;  %6692 = vmatprep.subr.bf16.mxu1 %v11729_v4  ;;  %v289_v63 = vld [vmem:[#allocation2 + $0x650] sm:$0xff]  ;;  %v11888_v4 = vcombine.low %v553_v53, %v561_v55 }
 0x149   :  { %v537_v0 = vld [vmem:[#allocation2 + $0xe10] sm:$0xff]  ;;  %v11617_v5 = vcombine.high %v281_v62, %v289_v63  ;;  %v11616_v12 = vcombine.low %v281_v62, %v289_v63 }
 0x14a   :  { %v545_v2 = vld [vmem:[#allocation2 + $0xe50] sm:$0xff] }
 0x14b   :  { %6652 = vmatpush1.bf16.msra.mxu0 %v11472_v7  ;;  %6693 = vmatpush1.bf16.msra.mxu1 %v11728_v8  ;;  %v265_v7 = vld [vmem:[#allocation2 + $0x590] sm:$0xff]  ;;  %v11873_v10 = vcombine.high %v537_v0, %v545_v2 }
 0x14c   :  { %6653 = vmatprep.subr.bf16.mxu0 %v11457_v9  ;;  %6694 = vmatprep.subr.bf16.mxu1 %v11713_v14  ;;  %v273_v8 = vld [vmem:[#allocation2 + $0x5d0] sm:$0xff]  ;;  %v11872_v14 = vcombine.low %v537_v0, %v545_v2 }
 0x14d   :  { %v521_v9 = vld [vmem:[#allocation2 + $0xd90] sm:$0xff]  ;;  %v11601_v15 = vcombine.high %v265_v7, %v273_v8  ;;  %v11600_v23 = vcombine.low %v265_v7, %v273_v8 }
 0x14e   :  { %v529_v11 = vld [vmem:[#allocation2 + $0xdd0] sm:$0xff] }
 0x14f   :  { %6654 = vmatpush1.bf16.msra.mxu0 %v11456_v17  ;;  %6695 = vmatpush1.bf16.msra.mxu1 %v11712_v18  ;;  %v249_v17 = vld [vmem:[#allocation2 + $0x510] sm:$0xff]  ;;  %v11857_v21 = vcombine.high %v521_v9, %v529_v11 }
 0x150   :  { %6655 = vmatprep.subr.bf16.mxu0 %v11441_v19  ;;  %6696 = vmatprep.subr.bf16.mxu1 %v11697_v24  ;;  %v257_v18 = vld [vmem:[#allocation2 + $0x550] sm:$0xff]  ;;  %v11856_v24 = vcombine.low %v521_v9, %v529_v11 }
 0x151   :  { %v505_v19 = vld [vmem:[#allocation2 + $0xd10] sm:$0xff]  ;;  %v11585_v25 = vcombine.high %v249_v17, %v257_v18  ;;  %v11584_v33 = vcombine.low %v249_v17, %v257_v18 }
 0x152   :  { %v513_v22 = vld [vmem:[#allocation2 + $0xd50] sm:$0xff] }
 0x153   :  { %6656 = vmatpush1.bf16.msra.mxu0 %v11440_v26  ;;  %6697 = vmatpush1.bf16.msra.mxu1 %v11696_v27  ;;  %v233_v26 = vld [vmem:[#allocation2 + $0x490] sm:$0xff]  ;;  %v11841_v30 = vcombine.high %v505_v19, %v513_v22 }
 0x154   :  { %6657 = vmatprep.subr.bf16.mxu0 %v11425_v29  ;;  %6698 = vmatprep.subr.bf16.mxu1 %v11681_v34  ;;  %v241_v27 = vld [vmem:[#allocation2 + $0x4d0] sm:$0xff]  ;;  %v11840_v34 = vcombine.low %v505_v19, %v513_v22 }
 0x155   :  { %v489_v29 = vld [vmem:[#allocation2 + $0xc90] sm:$0xff]  ;;  %v11569_v35 = vcombine.high %v233_v26, %v241_v27  ;;  %v11568_v44 = vcombine.low %v233_v26, %v241_v27 }
 0x156   :  { %v497_v32 = vld [vmem:[#allocation2 + $0xcd0] sm:$0xff] }
 0x157   :  { %6658 = vmatpush1.bf16.msra.mxu0 %v11424_v36  ;;  %6699 = vmatpush1.bf16.msra.mxu1 %v11680_v37  ;;  %v217_v36 = vld [vmem:[#allocation2 + $0x410] sm:$0xff]  ;;  %v11825_v42 = vcombine.high %v489_v29, %v497_v32 }
 0x158   :  { %6659 = vmatprep.subr.bf16.mxu0 %v11665_v40  ;;  %6700 = vmatprep.subr.bf16.mxu1 %v11921_v45  ;;  %v225_v37 = vld [vmem:[#allocation2 + $0x450] sm:$0xff]  ;;  %v11824_v45 = vcombine.low %v489_v29, %v497_v32 }
 0x159   :  { %v473_v40 = vld [vmem:[#allocation2 + $0xc10] sm:$0xff]  ;;  %v11553_v46 = vcombine.high %v217_v36, %v225_v37  ;;  %v11552_v53 = vcombine.low %v217_v36, %v225_v37 }
 0x15a   :  { %v481_v43 = vld [vmem:[#allocation2 + $0xc50] sm:$0xff] }
 0x15b   :  { %6660 = vmatpush2.bf16.msra.mxu0 %v11664_v48  ;;  %6701 = vmatpush2.bf16.msra.mxu1 %v11920_v49  ;;  %v713_v48 = vld [vmem:[#allocation2 + $0x1390] sm:$0xff]  ;;  %v11809_v51 = vcombine.high %v473_v40, %v481_v43 }
 0x15c   :  { %6661 = vmatprep.subr.bf16.mxu0 %v11649_v50  ;;  %6702 = vmatprep.subr.bf16.mxu1 %v11905_v54  ;;  %v721_v49 = vld [vmem:[#allocation2 + $0x13d0] sm:$0xff]  ;;  %v11808_v54 = vcombine.low %v473_v40, %v481_v43 }
 0x15d   :  { %v969_v50 = vld [vmem:[#allocation2 + $0x1b90] sm:$0xff]  ;;  %v12049_v55 = vcombine.high %v713_v48, %v721_v49  ;;  %v12048_v0 = vcombine.low %v713_v48, %v721_v49 }
 0x15e   :  { %v977_v52 = vld [vmem:[#allocation2 + $0x1bd0] sm:$0xff] }
 0x15f   :  { %6662 = vmatpush2.bf16.msra.mxu0 %v11648_v56  ;;  %6703 = vmatpush2.bf16.msra.mxu1 %v11904_v57  ;;  %v697_v56 = vld [vmem:[#allocation2 + $0x1310] sm:$0xff]  ;;  %v12305_v62 = vcombine.high %v969_v50, %v977_v52 }
 0x160   :  { %6663 = vmatprep.subr.bf16.mxu0 %v11633_v61  ;;  %6704 = vmatprep.subr.bf16.mxu1 %v11889_v1  ;;  %v705_v57 = vld [vmem:[#allocation2 + $0x1350] sm:$0xff]  ;;  %v12304_v1 = vcombine.low %v969_v50, %v977_v52 }
 0x161   :  { %v953_v61 = vld [vmem:[#allocation2 + $0x1b10] sm:$0xff]  ;;  %v12033_v2 = vcombine.high %v697_v56, %v705_v57 }
 0x162   :  { %v961_v63 = vld [vmem:[#allocation2 + $0x1b50] sm:$0xff] }
 0x163   :  { %6664 = vmatpush2.bf16.msra.mxu0 %v11632_v3  ;;  %6705 = vmatpush2.bf16.msra.mxu1 %v11888_v4  ;;  %v681_v3 = vld [vmem:[#allocation2 + $0x1290] sm:$0xff]  ;;  %v12289_v7 = vcombine.high %v953_v61, %v961_v63 }
 0x164   :  { %6665 = vmatprep.subr.bf16.mxu0 %v11617_v5  ;;  %6706 = vmatprep.subr.bf16.mxu1 %v11873_v10  ;;  %v689_v4 = vld [vmem:[#allocation2 + $0x12d0] sm:$0xff] }
 0x165   :  { %v937_v5 = vld [vmem:[#allocation2 + $0x1a90] sm:$0xff]  ;;  %v12017_v17 = vcombine.high %v681_v3, %v689_v4 }
 0x166   :  { %v945_v8 = vld [vmem:[#allocation2 + $0x1ad0] sm:$0xff] }
 0x167   :  { %6666 = vmatpush2.bf16.msra.mxu0 %v11616_v12  ;;  %6707 = vmatpush2.bf16.msra.mxu1 %v11872_v14  ;;  %v12032_v12 = vcombine.low %v697_v56, %v705_v57  ;;  %v12273_v22 = vcombine.high %v937_v5, %v945_v8  ;;  %v929_v26 = vld [vmem:[#allocation2 + $0x1a50] sm:$0xff] }
 0x168   :  { %6667 = vmatprep.subr.bf16.mxu0 %v11601_v15  ;;  %6708 = vmatprep.subr.bf16.mxu1 %v11857_v21  ;;  %v12288_v15 = vcombine.low %v953_v61, %v961_v63  ;;  %v649_v36 = vld [vmem:[#allocation2 + $0x1190] sm:$0xff] }
 0x169   :  { %v657_v37 = vld [vmem:[#allocation2 + $0x11d0] sm:$0xff] }
 0x16a   :  { %v905_v40 = vld [vmem:[#allocation2 + $0x1990] sm:$0xff]  ;;  %v11984_v52 = vcombine.low %v649_v36, %v657_v37 }
 0x16b   :  { %6668 = vmatpush2.bf16.msra.mxu0 %v11600_v23  ;;  %6709 = vmatpush2.bf16.msra.mxu1 %v11856_v24  ;;  %v665_v23 = vld [vmem:[#allocation2 + $0x1210] sm:$0xff] }
 0x16c   :  { %6669 = vmatprep.subr.bf16.mxu0 %v11585_v25  ;;  %6710 = vmatprep.subr.bf16.mxu1 %v11841_v30  ;;  %v673_v24 = vld [vmem:[#allocation2 + $0x1250] sm:$0xff]  ;;  %v12016_v30 = vcombine.low %v681_v3, %v689_v4 }
 0x16d   :  { %v921_v25 = vld [vmem:[#allocation2 + $0x1a10] sm:$0xff]  ;;  %v12000_v43 = vcombine.low %v665_v23, %v673_v24 }
 0x16e   :  { %v633_v48 = vld [vmem:[#allocation2 + $0x1110] sm:$0xff] }
 0x16f   :  { %6670 = vmatpush2.bf16.msra.mxu0 %v11584_v33  ;;  %6711 = vmatpush2.bf16.msra.mxu1 %v11840_v34  ;;  %v12001_v33 = vcombine.high %v665_v23, %v673_v24  ;;  %v641_v49 = vld [vmem:[#allocation2 + $0x1150] sm:$0xff] }
 0x170   :  { %6671 = vmatprep.subr.bf16.mxu0 %v11569_v35  ;;  %6712 = vmatprep.subr.bf16.mxu1 %v11825_v42  ;;  %v12257_v35 = vcombine.high %v921_v25, %v929_v26  ;;  %v913_v42 = vld [vmem:[#allocation2 + $0x19d0] sm:$0xff]  ;;  %v11968_v63 = vcombine.low %v633_v48, %v641_v49 }
 0x171   :  { %v889_v50 = vld [vmem:[#allocation2 + $0x1910] sm:$0xff] }
 0x172   :  { %v617_v56 = vld [vmem:[#allocation2 + $0x1090] sm:$0xff] }
 0x173   :  { %6672 = vmatpush2.bf16.msra.mxu0 %v11568_v44  ;;  %6713 = vmatpush2.bf16.msra.mxu1 %v11824_v45  ;;  %v12256_v44 = vcombine.low %v921_v25, %v929_v26  ;;  %v11985_v45 = vcombine.high %v649_v36, %v657_v37  ;;  %v625_v57 = vld [vmem:[#allocation2 + $0x10d0] sm:$0xff] }
 0x174   :  { %6673 = vmatprep.subr.bf16.mxu0 %v11553_v46  ;;  %6714 = vmatprep.subr.bf16.mxu1 %v11809_v51  ;;  %v12241_v46 = vcombine.high %v905_v40, %v913_v42  ;;  %v897_v51 = vld [vmem:[#allocation2 + $0x1950] sm:$0xff] }
 0x175   :  { %v873_v61 = vld [vmem:[#allocation2 + $0x1890] sm:$0xff] }
 0x176   :  { %v601_v3 = vld [vmem:[#allocation2 + $0x1010] sm:$0xff] }
 0x177   :  { %6674 = vmatpush2.bf16.msra.mxu0 %v11552_v53  ;;  %6715 = vmatpush2.bf16.msra.mxu1 %v11808_v54  ;;  %v12240_v53 = vcombine.low %v905_v40, %v913_v42  ;;  %v11969_v54 = vcombine.high %v633_v48, %v641_v49  ;;  %v609_v4 = vld [vmem:[#allocation2 + $0x1050] sm:$0xff] }
 0x178   :  { %6725 = vmatprep.subr.bf16.mxu0 %v12049_v55  ;;  %6766 = vmatprep.subr.bf16.mxu1 %v12305_v62  ;;  %v12225_v55 = vcombine.high %v889_v50, %v897_v51  ;;  %v881_v62 = vld [vmem:[#allocation2 + $0x18d0] sm:$0xff] }
 0x179   :  { %v825_v24 = vld [vmem:[#allocation2 + $0x1710] sm:$0xff] }
 0x17a   :  { %v6431_v9 = vpop.f32.mrf.mxu0  ;;  %6676 = vmatmul.mubr.bf16.vlgmr.msra.gmra.mxu0 %v13890_v16  ;;  %v6472_v11 = vpop.f32.mrf.mxu1  ;;  %6717 = vmatmul.mubr.bf16.vlgmr.msra.gmra.mxu1 %v13895_v20  ;;  %v1081_v25 = vld [vmem:[#allocation2 + $0x1f10] sm:$0xff] }
 0x17b   :  { %v6432_v10 = vadd.f32 %v6431_v9, %v13938_v41  ;;  %6726 = vmatpush1.bf16.msra.mxu0 %v12048_v0  ;;  %6767 = vmatpush1.bf16.msra.mxu1 %v12304_v1  ;;  %v12224_v0 = vcombine.low %v889_v50, %v897_v51  ;;  %v11953_v1 = vcombine.high %v617_v56, %v625_v57  ;;  %v1089_v26 = vld [vmem:[#allocation2 + $0x1f50] sm:$0xff] }
 0x17c   :  { %v6433_v14 = vpop.f32.mrf.mxu0  ;;  %6727 = vmatprep.subr.bf16.mxu0 %v12033_v2  ;;  %v6474_v21 = vpop.f32.mrf.mxu1  ;;  %6768 = vmatprep.subr.bf16.mxu1 %v12289_v7  ;;  %v12209_v2 = vcombine.high %v873_v61, %v881_v62  ;;  %v865_v7 = vld [vmem:[#allocation2 + $0x1850] sm:$0xff]  ;;  %v12208_v9 = vcombine.low %v873_v61, %v881_v62  ;;  %v12416_v40 = vcombine.low %v1081_v25, %v1089_v26 }
 0x17d   :  { %v13947_v18 = vadd.f32 %v6472_v11, %v6432_v10  ;;  %v6434_v19 = vadd.f32 %v6433_v14, %v13942_v47  ;;  %6757 = vmatprep.mubr.bf16.mxu0 %v13900_v28  ;;  %6798 = vmatprep.mubr.bf16.mxu1 %v13903_v31  ;;  %v12272_v47 = vcombine.low %v937_v5, %v945_v8  ;;  %v857_v5 = vld [vmem:[#allocation2 + $0x1810] sm:$0xff] }
 0x17e   :  { %v6435_v41 = vpop.f32.mrf.mxu0  ;;  %v6476_v29 = vpop.f32.mrf.mxu1  ;;  %v11952_v8 = vcombine.low %v617_v56, %v625_v57  ;;  %v11937_v10 = vcombine.high %v601_v3, %v609_v4  ;;  %v12193_v11 = vcombine.high %v857_v5, %v865_v7  ;;  %v849_v14 = vld [vmem:[#allocation2 + $0x17d0] sm:$0xff] }
 0x17f   :  { %v13952_v27 = vadd.f32 %v6474_v21, %v6434_v19  ;;  %6728 = vmatpush1.bf16.msra.mxu0 %v12032_v12  ;;  %6769 = vmatpush1.bf16.msra.mxu1 %v12288_v15  ;;  %v841_v12 = vld [vmem:[#allocation2 + $0x1790] sm:$0xff]  ;;  %v11936_v19 = vcombine.low %v601_v3, %v609_v4  ;;  %v12192_v21 = vcombine.low %v857_v5, %v865_v7 }
 0x180   :  { %v6436_v32 = vpop.f32.mrf.mxu0  ;;  %6729 = vmatprep.subr.bf16.mxu0 %v12017_v17  ;;  %v6477_v34 = vpop.f32.mrf.mxu1  ;;  %6770 = vmatprep.subr.bf16.mxu1 %v12273_v22  ;;  %v1097_v15 = vld [vmem:[#allocation2 + $0x1f90] sm:$0xff]  ;;  %v12177_v22 = vcombine.high %v841_v12, %v849_v14  ;;  %v12176_v29 = vcombine.low %v841_v12, %v849_v14 }
 0x181   :  { %v1105_v17 = vld [vmem:[#allocation2 + $0x1fd0] sm:$0xff] }
 0x182   :  { %v12433_v23 = vcombine.high %v1097_v15, %v1105_v17  ;;  %v833_v41 = vld [vmem:[#allocation2 + $0x1750] sm:$0xff] }
 0x183   :  { %6730 = vmatpush1.bf16.msra.mxu0 %v12016_v30  ;;  %6771 = vmatpush1.bf16.msra.mxu1 %v12272_v47  ;;  %v12432_v30 = vcombine.low %v1097_v15, %v1105_v17  ;;  %v12161_v32 = vcombine.high %v825_v24, %v833_v41  ;;  %v12417_v47 = vcombine.high %v1081_v25, %v1089_v26  ;;  %v817_v34 = vld [vmem:[#allocation2 + $0x16d0] sm:$0xff] }
 0x184   :  { %6731 = vmatprep.subr.bf16.mxu0 %v12001_v33  ;;  %6772 = vmatprep.subr.bf16.mxu1 %v12257_v35  ;;  %v809_v33 = vld [vmem:[#allocation2 + $0x1690] sm:$0xff]  ;;  %v12160_v37 = vcombine.low %v825_v24, %v833_v41 }
 0x185   :  { %v1065_v35 = vld [vmem:[#allocation2 + $0x1e90] sm:$0xff]  ;;  %v12145_v42 = vcombine.high %v809_v33, %v817_v34  ;;  %v12144_v49 = vcombine.low %v809_v33, %v817_v34  ;;  %v466_v33 = vld [vmem:[#allocation2 + $0xbd8] sm:$0xff] }
 0x186   :  { %v1073_v36 = vld [vmem:[#allocation2 + $0x1ed0] sm:$0xff] }
 0x187   :  { %6732 = vmatpush1.bf16.msra.mxu0 %v12000_v43  ;;  %6773 = vmatpush1.bf16.msra.mxu1 %v12256_v44  ;;  %v12401_v43 = vcombine.high %v1065_v35, %v1073_v36  ;;  %v793_v44 = vld [vmem:[#allocation2 + $0x1610] sm:$0xff]  ;;  %v12400_v50 = vcombine.low %v1065_v35, %v1073_v36  ;;  %v13955_v35 = vsub.s32 2, %v13926_v60 }
 0x188   :  { %6733 = vmatprep.subr.bf16.mxu0 %v11985_v45  ;;  %6774 = vmatprep.subr.bf16.mxu1 %v12241_v46  ;;  %v801_v45 = vld [vmem:[#allocation2 + $0x1650] sm:$0xff] }
 0x189   :  { %v1049_v46 = vld [vmem:[#allocation2 + $0x1e10] sm:$0xff]  ;;  %v12129_v51 = vcombine.high %v793_v44, %v801_v45  ;;  %v12128_v57 = vcombine.low %v793_v44, %v801_v45  ;;  %v194_v44 = vld [vmem:[#allocation2 + $0x358] sm:$0xff] }
 0x18a   :  { %v1057_v48 = vld [vmem:[#allocation2 + $0x1e50] sm:$0xff]  ;;  %v442_v45 = vld [vmem:[#allocation2 + $0xb18] sm:$0xff] }
 0x18b   :  { %6734 = vmatpush1.bf16.msra.mxu0 %v11984_v52  ;;  %6775 = vmatpush1.bf16.msra.mxu1 %v12240_v53  ;;  %v12385_v52 = vcombine.high %v1049_v46, %v1057_v48  ;;  %v777_v53 = vld [vmem:[#allocation2 + $0x1590] sm:$0xff]  ;;  %v12384_v61 = vcombine.low %v1049_v46, %v1057_v48  ;;  %v450_v46 = vld [vmem:[#allocation2 + $0xb58] sm:$0xff]  ;;  %v13960_v48 = vld [vmem:[#allocation4] sm:$0xff] }
 0x18c   :  { %6735 = vmatprep.subr.bf16.mxu0 %v11969_v54  ;;  %6776 = vmatprep.subr.bf16.mxu1 %v12225_v55  ;;  %v785_v54 = vld [vmem:[#allocation2 + $0x15d0] sm:$0xff] }
 0x18d   :  { %v1033_v55 = vld [vmem:[#allocation2 + $0x1d90] sm:$0xff]  ;;  %v12113_v62 = vcombine.high %v777_v53, %v785_v54  ;;  %v12112_v4 = vcombine.low %v777_v53, %v785_v54  ;;  %v11779_v54 = vcombine.high %v442_v45, %v450_v46 }
 0x18e   :  { %v1041_v56 = vld [vmem:[#allocation2 + $0x1dd0] sm:$0xff] }
 0x18f   :  { %6736 = vmatpush1.bf16.msra.mxu0 %v11968_v63  ;;  %6777 = vmatpush1.bf16.msra.mxu1 %v12224_v0  ;;  %v12369_v63 = vcombine.high %v1033_v55, %v1041_v56  ;;  %v761_v0 = vld [vmem:[#allocation2 + $0x1510] sm:$0xff]  ;;  %v12368_v5 = vcombine.low %v1033_v55, %v1041_v56  ;;  %v170_v55 = vld [vmem:[#allocation2 + $0x298] sm:$0xff] }
 0x190   :  { %6737 = vmatprep.subr.bf16.mxu0 %v11953_v1  ;;  %6778 = vmatprep.subr.bf16.mxu1 %v12209_v2  ;;  %v769_v1 = vld [vmem:[#allocation2 + $0x1550] sm:$0xff]  ;;  %v178_v56 = vld [vmem:[#allocation2 + $0x2d8] sm:$0xff] }
 0x191   :  { %v1017_v2 = vld [vmem:[#allocation2 + $0x1d10] sm:$0xff]  ;;  %v12097_v7 = vcombine.high %v761_v0, %v769_v1  ;;  %v12096_v14 = vcombine.low %v761_v0, %v769_v1 }
 0x192   :  { %v1025_v3 = vld [vmem:[#allocation2 + $0x1d50] sm:$0xff] }
 0x193   :  { %6738 = vmatpush1.bf16.msra.mxu0 %v11952_v8  ;;  %6779 = vmatpush1.bf16.msra.mxu1 %v12208_v9  ;;  %v12353_v8 = vcombine.high %v1017_v2, %v1025_v3  ;;  %v745_v9 = vld [vmem:[#allocation2 + $0x1490] sm:$0xff]  ;;  %v12352_v15 = vcombine.low %v1017_v2, %v1025_v3  ;;  %v11778_v3 = vcombine.low %v442_v45, %v450_v46 }
 0x194   :  { %6739 = vmatprep.subr.bf16.mxu0 %v11937_v10  ;;  %6780 = vmatprep.subr.bf16.mxu1 %v12193_v11  ;;  %v753_v10 = vld [vmem:[#allocation2 + $0x14d0] sm:$0xff] }
 0x195   :  { %v1001_v11 = vld [vmem:[#allocation2 + $0x1c90] sm:$0xff]  ;;  %v12081_v17 = vcombine.high %v745_v9, %v753_v10  ;;  %v12080_v41 = vcombine.low %v745_v9, %v753_v10  ;;  %v154_v10 = vld [vmem:[#allocation2 + $0x218] sm:$0xff] }
 0x196   :  { %v1009_v12 = vld [vmem:[#allocation2 + $0x1cd0] sm:$0xff] }
 0x197   :  { %6740 = vmatpush1.bf16.msra.mxu0 %v11936_v19  ;;  %6781 = vmatpush1.bf16.msra.mxu1 %v12192_v21  ;;  %v12337_v19 = vcombine.high %v1001_v11, %v1009_v12  ;;  %v729_v21 = vld [vmem:[#allocation2 + $0x1410] sm:$0xff]  ;;  %v12336_v25 = vcombine.low %v1001_v11, %v1009_v12  ;;  %v162_v11 = vld [vmem:[#allocation2 + $0x258] sm:$0xff] }
 0x198   :  { %6741 = vmatprep.subr.bf16.mxu0 %v12177_v22  ;;  %6782 = vmatprep.subr.bf16.mxu1 %v12433_v23  ;;  %v737_v22 = vld [vmem:[#allocation2 + $0x1450] sm:$0xff] }
 0x199   :  { %v985_v23 = vld [vmem:[#allocation2 + $0x1c10] sm:$0xff]  ;;  %v12065_v26 = vcombine.high %v729_v21, %v737_v22  ;;  %v12064_v34 = vcombine.low %v729_v21, %v737_v22  ;;  %v11506_v21 = vcombine.low %v170_v55, %v178_v56 }
 0x19a   :  { %v993_v24 = vld [vmem:[#allocation2 + $0x1c50] sm:$0xff] }
 0x19b   :  { %6742 = vmatpush2.bf16.msra.mxu0 %v12176_v29  ;;  %6783 = vmatpush2.bf16.msra.mxu1 %v12432_v30  ;;  %v12321_v29 = vcombine.high %v985_v23, %v993_v24  ;;  %v202_v30 = vld [vmem:[#allocation2 + $0x398] sm:$0xff]  ;;  %v12320_v36 = vcombine.low %v985_v23, %v993_v24  ;;  %v11491_v24 = vcombine.high %v154_v10, %v162_v11 }
 0x19c   :  { %6743 = vmatprep.subr.bf16.mxu0 %v12161_v32  ;;  %6784 = vmatprep.subr.bf16.mxu1 %v12417_v47  ;;  %v210_v32 = vld [vmem:[#allocation2 + $0x3d8] sm:$0xff] }
 0x19d   :  { %v458_v47 = vld [vmem:[#allocation2 + $0xb98] sm:$0xff] }
 0x19f   :  { %6744 = vmatpush2.bf16.msra.mxu0 %v12160_v37  ;;  %6785 = vmatpush2.bf16.msra.mxu1 %v12416_v40  ;;  %v11539_v37 = vcombine.high %v202_v30, %v210_v32  ;;  %v11795_v40 = vcombine.high %v458_v47, %v466_v33 }
 0x1a0   :  { %6745 = vmatprep.subr.bf16.mxu0 %v12145_v42  ;;  %6786 = vmatprep.subr.bf16.mxu1 %v12401_v43  ;;  %v13958_v42 = vsub.s32 3, %v13926_v60  ;;  %v186_v43 = vld [vmem:[#allocation2 + $0x318] sm:$0xff] }
 0x1a1   :  { %v11522_v1 = vcombine.low %v186_v43, %v194_v44 }
 0x1a2   :  { %v1130_v53 = vrot.slane %v13960_v48, %v13958_v42 }
 0x1a3   :  { %6746 = vmatpush2.bf16.msra.mxu0 %v12144_v49  ;;  %6787 = vmatpush2.bf16.msra.mxu1 %v12400_v50  ;;  %v1126_v49 = vrot.slane %v13960_v48, %v13955_v35  ;;  %v11538_v50 = vcombine.low %v202_v30, %v210_v32  ;;  %v394_v30 = vld [vmem:[#allocation2 + $0x998] sm:$0xff] }
 0x1a4   :  { %6747 = vmatprep.subr.bf16.mxu0 %v12129_v51  ;;  %6788 = vmatprep.subr.bf16.mxu1 %v12385_v52  ;;  %v11794_v51 = vcombine.low %v458_v47, %v466_v33  ;;  %v11523_v52 = vcombine.high %v186_v43, %v194_v44  ;;  %v402_v32 = vld [vmem:[#allocation2 + $0x9d8] sm:$0xff]  ;;  %v11490_v47 = vcombine.low %v154_v10, %v162_v11 }
 0x1a5   :  { %v378_v43 = vld [vmem:[#allocation2 + $0x918] sm:$0xff]  ;;  %v11730_v46 = vcombine.low %v394_v30, %v402_v32 }
 0x1a6   :  { %v386_v44 = vld [vmem:[#allocation2 + $0x958] sm:$0xff] }
 0x1a7   :  { %6748 = vmatpush2.bf16.msra.mxu0 %v12128_v57  ;;  %6789 = vmatpush2.bf16.msra.mxu1 %v12384_v61  ;;  %v426_v61 = vld [vmem:[#allocation2 + $0xa98] sm:$0xff] }
 0x1a8   :  { %6749 = vmatprep.subr.bf16.mxu0 %v12113_v62  ;;  %6790 = vmatprep.subr.bf16.mxu1 %v12369_v63  ;;  %v434_v62 = vld [vmem:[#allocation2 + $0xad8] sm:$0xff] }
 0x1a9   :  { %v11763_v9 = vcombine.high %v426_v61, %v434_v62  ;;  %v11762_v23 = vcombine.low %v426_v61, %v434_v62  ;;  %v90_v62 = vld [vmem:[#allocation2 + $0x18] sm:$0xff] }
 0x1aa   :  { %v586_v10 = vld [vmem:[#allocation2 + $0xf98] sm:$0xff] }
 0x1ab   :  { %6750 = vmatpush2.bf16.msra.mxu0 %v12112_v4  ;;  %6791 = vmatpush2.bf16.msra.mxu1 %v12368_v5  ;;  %v11507_v4 = vcombine.high %v170_v55, %v178_v56  ;;  %v11714_v56 = vcombine.low %v378_v43, %v386_v44  ;;  %v594_v11 = vld [vmem:[#allocation2 + $0xfd8] sm:$0xff] }
 0x1ac   :  { %6751 = vmatprep.subr.bf16.mxu0 %v12097_v7  ;;  %6792 = vmatprep.subr.bf16.mxu1 %v12353_v8 }
 0x1af   :  { %6752 = vmatpush2.bf16.msra.mxu0 %v12096_v14  ;;  %6793 = vmatpush2.bf16.msra.mxu1 %v12352_v15  ;;  %v410_v14 = vld [vmem:[#allocation2 + $0xa18] sm:$0xff] }
 0x1b0   :  { %6753 = vmatprep.subr.bf16.mxu0 %v12081_v17  ;;  %6794 = vmatprep.subr.bf16.mxu1 %v12337_v19  ;;  %v418_v15 = vld [vmem:[#allocation2 + $0xa58] sm:$0xff] }
 0x1b1   :  { %v11746_v33 = vcombine.low %v410_v14, %v418_v15 }
 0x1b3   :  { %6754 = vmatpush2.bf16.msra.mxu0 %v12080_v41  ;;  %6795 = vmatpush2.bf16.msra.mxu1 %v12336_v25  ;;  %v11747_v25 = vcombine.high %v410_v14, %v418_v15 }
 0x1b4   :  { %6755 = vmatprep.subr.bf16.mxu0 %v12065_v26  ;;  %6796 = vmatprep.subr.bf16.mxu1 %v12321_v29  ;;  %v138_v26 = vld [vmem:[#allocation2 + $0x198] sm:$0xff] }
 0x1b5   :  { %v146_v29 = vld [vmem:[#allocation2 + $0x1d8] sm:$0xff] }
 0x1b6   :  { %v11474_v45 = vcombine.low %v138_v26, %v146_v29 }
 0x1b7   :  { %6756 = vmatpush2.bf16.msra.mxu0 %v12064_v34  ;;  %6797 = vmatpush2.bf16.msra.mxu1 %v12320_v36  ;;  %v11475_v34 = vcombine.high %v138_v26, %v146_v29  ;;  %v11731_v36 = vcombine.high %v394_v30, %v402_v32  ;;  %v298_v30 = vld [vmem:[#allocation2 + $0x698] sm:$0xff] }
 0x1b8   :  { %6807 = vmatprep.subr.bf16.mxu0 %v11539_v37  ;;  %6848 = vmatprep.subr.bf16.mxu1 %v11795_v40  ;;  %v122_v37 = vld [vmem:[#allocation2 + $0x118] sm:$0xff] }
 0x1b9   :  { %v130_v40 = vld [vmem:[#allocation2 + $0x158] sm:$0xff] }
 0x1ba   :  { %v6513_v57 = vpop.f32.mrf.mxu0  ;;  %6758 = vmatmul.mubr.bf16.vlgmr.msra.gmra.mxu0 %v13914_v38  ;;  %v6554_v0 = vpop.f32.mrf.mxu1  ;;  %6799 = vmatmul.mubr.bf16.vlgmr.msra.gmra.mxu1 %v13916_v39  ;;  %v11458_v55 = vcombine.low %v122_v37, %v130_v40  ;;  %v306_v32 = vld [vmem:[#allocation2 + $0x6d8] sm:$0xff] }
 0x1bb   :  { %v6514_v63 = vadd.f32 %v6513_v57, %v1126_v49  ;;  %6808 = vmatpush1.bf16.msra.mxu0 %v11538_v50  ;;  %6849 = vmatpush1.bf16.msra.mxu1 %v11794_v51  ;;  %v11459_v49 = vcombine.high %v122_v37, %v130_v40  ;;  %v11715_v50 = vcombine.high %v378_v43, %v386_v44  ;;  %v106_v51 = vld [vmem:[#allocation2 + $0x98] sm:$0xff] }
 0x1bc   :  { %v6515_v2 = vpop.f32.mrf.mxu0  ;;  %6809 = vmatprep.subr.bf16.mxu0 %v11523_v52  ;;  %v6556_v8 = vpop.f32.mrf.mxu1  ;;  %6850 = vmatprep.subr.bf16.mxu1 %v11779_v54  ;;  %v114_v52 = vld [vmem:[#allocation2 + $0xd8] sm:$0xff]  ;;  %v11635_v37 = vcombine.high %v298_v30, %v306_v32 }
 0x1bd   :  { %v13968_v5 = vadd.f32 %v6554_v0, %v6514_v63  ;;  %v6516_v7 = vadd.f32 %v6515_v2, %v1130_v53  ;;  %6839 = vmatprep.mubr.bf16.mxu0 %v13878_v58  ;;  %6880 = vmatprep.mubr.bf16.mxu1 %v13880_v59  ;;  %v362_v53 = vld [vmem:[#allocation2 + $0x898] sm:$0xff]  ;;  %v11443_v57 = vcombine.high %v106_v51, %v114_v52 }
 0x1be   :  { %v6517_v12 = vpop.f32.mrf.mxu0  ;;  %v6558_v19 = vpop.f32.mrf.mxu1  ;;  %v370_v54 = vld [vmem:[#allocation2 + $0x8d8] sm:$0xff]  ;;  %v11442_v2 = vcombine.low %v106_v51, %v114_v52 }
 0x1bf   :  { %v13972_v17 = vadd.f32 %v6556_v8, %v6516_v7  ;;  %6810 = vmatpush1.bf16.msra.mxu0 %v11522_v1  ;;  %6851 = vmatpush1.bf16.msra.mxu1 %v11778_v3  ;;  %v11699_v61 = vcombine.high %v362_v53, %v370_v54  ;;  %v98_v63 = vld [vmem:[#allocation2 + $0x58] sm:$0xff]  ;;  %v11698_v3 = vcombine.low %v362_v53, %v370_v54 }
 0x1c0   :  { %v6518_v22 = vpop.f32.mrf.mxu0  ;;  %6811 = vmatprep.subr.bf16.mxu0 %v11507_v4  ;;  %v6559_v41 = vpop.f32.mrf.mxu1  ;;  %6852 = vmatprep.subr.bf16.mxu1 %v11763_v9  ;;  %v346_v0 = vld [vmem:[#allocation2 + $0x818] sm:$0xff]  ;;  %v11427_v4 = vcombine.high %v90_v62, %v98_v63  ;;  %v11426_v12 = vcombine.low %v90_v62, %v98_v63  ;;  %v11923_v19 = vcombine.high %v586_v10, %v594_v11 }
 0x1c1   :  { %v354_v1 = vld [vmem:[#allocation2 + $0x858] sm:$0xff] }
 0x1c2   :  { %v11683_v7 = vcombine.high %v346_v0, %v354_v1  ;;  %v330_v8 = vld [vmem:[#allocation2 + $0x798] sm:$0xff]  ;;  %v11682_v14 = vcombine.low %v346_v0, %v354_v1 }
 0x1c3   :  { %6812 = vmatpush1.bf16.msra.mxu0 %v11506_v21  ;;  %6853 = vmatpush1.bf16.msra.mxu1 %v11762_v23  ;;  %v338_v9 = vld [vmem:[#allocation2 + $0x7d8] sm:$0xff] }
 0x1c4   :  { %6813 = vmatprep.subr.bf16.mxu0 %v11491_v24  ;;  %6854 = vmatprep.subr.bf16.mxu1 %v11747_v25  ;;  %v11667_v15 = vcombine.high %v330_v8, %v338_v9  ;;  %v314_v21 = vld [vmem:[#allocation2 + $0x718] sm:$0xff]  ;;  %v11666_v41 = vcombine.low %v330_v8, %v338_v9  ;;  %v11922_v25 = vcombine.low %v586_v10, %v594_v11 }
 0x1c5   :  { %v322_v22 = vld [vmem:[#allocation2 + $0x758] sm:$0xff] }
 0x1c6   :  { %v570_v23 = vld [vmem:[#allocation2 + $0xf18] sm:$0xff]  ;;  %v11651_v26 = vcombine.high %v314_v21, %v322_v22 }
 0x1c7   :  { %6814 = vmatpush1.bf16.msra.mxu0 %v11490_v47  ;;  %6855 = vmatpush1.bf16.msra.mxu1 %v11746_v33  ;;  %v578_v24 = vld [vmem:[#allocation2 + $0xf58] sm:$0xff] }
 0x1c8   :  { %6815 = vmatprep.subr.bf16.mxu0 %v11475_v34  ;;  %6856 = vmatprep.subr.bf16.mxu1 %v11731_v36  ;;  %v11907_v29 = vcombine.high %v570_v23, %v578_v24  ;;  %v554_v47 = vld [vmem:[#allocation2 + $0xe98] sm:$0xff]  ;;  %v11650_v34 = vcombine.low %v314_v21, %v322_v22  ;;  %v11906_v36 = vcombine.low %v570_v23, %v578_v24 }
 0x1c9   :  { %v562_v33 = vld [vmem:[#allocation2 + $0xed8] sm:$0xff] }
 0x1ca   :  { %v11891_v40 = vcombine.high %v554_v47, %v562_v33  ;;  %v282_v43 = vld [vmem:[#allocation2 + $0x618] sm:$0xff] }
 0x1cb   :  { %6816 = vmatpush1.bf16.msra.mxu0 %v11474_v45  ;;  %6857 = vmatpush1.bf16.msra.mxu1 %v11730_v46  ;;  %v290_v44 = vld [vmem:[#allocation2 + $0x658] sm:$0xff] }
 0x1cc   :  { %6817 = vmatprep.subr.bf16.mxu0 %v11459_v49  ;;  %6858 = vmatprep.subr.bf16.mxu1 %v11715_v50  ;;  %v538_v45 = vld [vmem:[#allocation2 + $0xe18] sm:$0xff]  ;;  %v11634_v49 = vcombine.low %v298_v30, %v306_v32  ;;  %v11890_v50 = vcombine.low %v554_v47, %v562_v33  ;;  %v11619_v51 = vcombine.high %v282_v43, %v290_v44 }
 0x1cd   :  { %v546_v46 = vld [vmem:[#allocation2 + $0xe58] sm:$0xff] }
 0x1ce   :  { %v11875_v52 = vcombine.high %v538_v45, %v546_v46  ;;  %v266_v53 = vld [vmem:[#allocation2 + $0x598] sm:$0xff] }
 0x1cf   :  { %6818 = vmatpush1.bf16.msra.mxu0 %v11458_v55  ;;  %6859 = vmatpush1.bf16.msra.mxu1 %v11714_v56  ;;  %v274_v54 = vld [vmem:[#allocation2 + $0x5d8] sm:$0xff] }
 0x1d0   :  { %6819 = vmatprep.subr.bf16.mxu0 %v11443_v57  ;;  %6860 = vmatprep.subr.bf16.mxu1 %v11699_v61  ;;  %v522_v55 = vld [vmem:[#allocation2 + $0xd98] sm:$0xff]  ;;  %v11618_v57 = vcombine.low %v282_v43, %v290_v44  ;;  %v11874_v61 = vcombine.low %v538_v45, %v546_v46  ;;  %v11603_v62 = vcombine.high %v266_v53, %v274_v54 }
 0x1d1   :  { %v530_v56 = vld [vmem:[#allocation2 + $0xdd8] sm:$0xff] }
 0x1d2   :  { %v11859_v63 = vcombine.high %v522_v55, %v530_v56  ;;  %v250_v0 = vld [vmem:[#allocation2 + $0x518] sm:$0xff] }
 0x1d3   :  { %6820 = vmatpush1.bf16.msra.mxu0 %v11442_v2  ;;  %6861 = vmatpush1.bf16.msra.mxu1 %v11698_v3  ;;  %v258_v1 = vld [vmem:[#allocation2 + $0x558] sm:$0xff] }
 0x1d4   :  { %6821 = vmatprep.subr.bf16.mxu0 %v11427_v4  ;;  %6862 = vmatprep.subr.bf16.mxu1 %v11683_v7  ;;  %v506_v2 = vld [vmem:[#allocation2 + $0xd18] sm:$0xff]  ;;  %v11602_v4 = vcombine.low %v266_v53, %v274_v54  ;;  %v11858_v7 = vcombine.low %v522_v55, %v530_v56  ;;  %v11587_v8 = vcombine.high %v250_v0, %v258_v1 }
 0x1d5   :  { %v514_v3 = vld [vmem:[#allocation2 + $0xd58] sm:$0xff] }
 0x1d6   :  { %v11843_v9 = vcombine.high %v506_v2, %v514_v3  ;;  %v234_v10 = vld [vmem:[#allocation2 + $0x498] sm:$0xff] }
 0x1d7   :  { %6822 = vmatpush1.bf16.msra.mxu0 %v11426_v12  ;;  %6863 = vmatpush1.bf16.msra.mxu1 %v11682_v14  ;;  %v242_v11 = vld [vmem:[#allocation2 + $0x4d8] sm:$0xff] }
 0x1d8   :  { %6823 = vmatprep.subr.bf16.mxu0 %v11667_v15  ;;  %6864 = vmatprep.subr.bf16.mxu1 %v11923_v19  ;;  %v490_v12 = vld [vmem:[#allocation2 + $0xc98] sm:$0xff]  ;;  %v11586_v15 = vcombine.low %v250_v0, %v258_v1  ;;  %v11842_v19 = vcombine.low %v506_v2, %v514_v3  ;;  %v11571_v21 = vcombine.high %v234_v10, %v242_v11 }
 0x1d9   :  { %v498_v14 = vld [vmem:[#allocation2 + $0xcd8] sm:$0xff] }
 0x1da   :  { %v11827_v22 = vcombine.high %v490_v12, %v498_v14  ;;  %v218_v23 = vld [vmem:[#allocation2 + $0x418] sm:$0xff] }
 0x1db   :  { %6824 = vmatpush2.bf16.msra.mxu0 %v11666_v41  ;;  %6865 = vmatpush2.bf16.msra.mxu1 %v11922_v25  ;;  %v226_v24 = vld [vmem:[#allocation2 + $0x458] sm:$0xff] }
 0x1dc   :  { %6825 = vmatprep.subr.bf16.mxu0 %v11651_v26  ;;  %6866 = vmatprep.subr.bf16.mxu1 %v11907_v29  ;;  %v474_v41 = vld [vmem:[#allocation2 + $0xc18] sm:$0xff]  ;;  %v11570_v26 = vcombine.low %v234_v10, %v242_v11  ;;  %v11826_v29 = vcombine.low %v490_v12, %v498_v14  ;;  %v11555_v30 = vcombine.high %v218_v23, %v226_v24 }
 0x1dd   :  { %v482_v25 = vld [vmem:[#allocation2 + $0xc58] sm:$0xff] }
 0x1de   :  { %v11811_v32 = vcombine.high %v474_v41, %v482_v25  ;;  %v714_v47 = vld [vmem:[#allocation2 + $0x1398] sm:$0xff] }
 0x1df   :  { %6826 = vmatpush2.bf16.msra.mxu0 %v11650_v34  ;;  %6867 = vmatpush2.bf16.msra.mxu1 %v11906_v36  ;;  %v722_v33 = vld [vmem:[#allocation2 + $0x13d8] sm:$0xff] }
 0x1e0   :  { %6827 = vmatprep.subr.bf16.mxu0 %v11635_v37  ;;  %6868 = vmatprep.subr.bf16.mxu1 %v11891_v40  ;;  %v970_v34 = vld [vmem:[#allocation2 + $0x1b98] sm:$0xff]  ;;  %v11554_v37 = vcombine.low %v218_v23, %v226_v24  ;;  %v11810_v40 = vcombine.low %v474_v41, %v482_v25  ;;  %v12051_v43 = vcombine.high %v714_v47, %v722_v33 }
 0x1e1   :  { %v978_v36 = vld [vmem:[#allocation2 + $0x1bd8] sm:$0xff] }
 0x1e2   :  { %v12307_v44 = vcombine.high %v970_v34, %v978_v36  ;;  %v698_v45 = vld [vmem:[#allocation2 + $0x1318] sm:$0xff] }
 0x1e3   :  { %6828 = vmatpush2.bf16.msra.mxu0 %v11634_v49  ;;  %6869 = vmatpush2.bf16.msra.mxu1 %v11890_v50  ;;  %v706_v46 = vld [vmem:[#allocation2 + $0x1358] sm:$0xff] }
 0x1e4   :  { %6829 = vmatprep.subr.bf16.mxu0 %v11619_v51  ;;  %6870 = vmatprep.subr.bf16.mxu1 %v11875_v52  ;;  %v954_v49 = vld [vmem:[#allocation2 + $0x1b18] sm:$0xff]  ;;  %v12050_v51 = vcombine.low %v714_v47, %v722_v33  ;;  %v12306_v52 = vcombine.low %v970_v34, %v978_v36  ;;  %v12035_v53 = vcombine.high %v698_v45, %v706_v46 }
 0x1e5   :  { %v962_v50 = vld [vmem:[#allocation2 + $0x1b58] sm:$0xff]  ;;  %v12034_v1 = vcombine.low %v698_v45, %v706_v46 }
 0x1e6   :  { %v12291_v54 = vcombine.high %v954_v49, %v962_v50  ;;  %v682_v55 = vld [vmem:[#allocation2 + $0x1298] sm:$0xff]  ;;  %v12290_v3 = vcombine.low %v954_v49, %v962_v50 }
 0x1e7   :  { %6830 = vmatpush2.bf16.msra.mxu0 %v11618_v57  ;;  %6871 = vmatpush2.bf16.msra.mxu1 %v11874_v61  ;;  %v690_v56 = vld [vmem:[#allocation2 + $0x12d8] sm:$0xff] }
 0x1e8   :  { %6831 = vmatprep.subr.bf16.mxu0 %v11603_v62  ;;  %6872 = vmatprep.subr.bf16.mxu1 %v11859_v63  ;;  %v938_v61 = vld [vmem:[#allocation2 + $0x1a98] sm:$0xff] }
 0x1e9   :  { %v946_v62 = vld [vmem:[#allocation2 + $0x1ad8] sm:$0xff] }
 0x1ea   :  { %v12275_v10 = vcombine.high %v938_v61, %v946_v62  ;;  %v666_v11 = vld [vmem:[#allocation2 + $0x1218] sm:$0xff] }
 0x1eb   :  { %6832 = vmatpush2.bf16.msra.mxu0 %v11602_v4  ;;  %6873 = vmatpush2.bf16.msra.mxu1 %v11858_v7  ;;  %v12019_v4 = vcombine.high %v682_v55, %v690_v56  ;;  %v674_v12 = vld [vmem:[#allocation2 + $0x1258] sm:$0xff] }
 0x1ec   :  { %6833 = vmatprep.subr.bf16.mxu0 %v11587_v8  ;;  %6874 = vmatprep.subr.bf16.mxu1 %v11843_v9  ;;  %v922_v14 = vld [vmem:[#allocation2 + $0x1a18] sm:$0xff]  ;;  %v12003_v24 = vcombine.high %v666_v11, %v674_v12  ;;  %v12002_v47 = vcombine.low %v666_v11, %v674_v12 }
 0x1ed   :  { %v1098_v11 = vld [vmem:[#allocation2 + $0x1f98] sm:$0xff] }
 0x1ee   :  { %v1106_v12 = vld [vmem:[#allocation2 + $0x1fd8] sm:$0xff] }
 0x1ef   :  { %6834 = vmatpush2.bf16.msra.mxu0 %v11586_v15  ;;  %6875 = vmatpush2.bf16.msra.mxu1 %v11842_v19  ;;  %v930_v15 = vld [vmem:[#allocation2 + $0x1a58] sm:$0xff] }
 0x1f0   :  { %6835 = vmatprep.subr.bf16.mxu0 %v11571_v21  ;;  %6876 = vmatprep.subr.bf16.mxu1 %v11827_v22  ;;  %v12018_v22 = vcombine.low %v682_v55, %v690_v56  ;;  %v12259_v25 = vcombine.high %v922_v14, %v930_v15  ;;  %v12258_v33 = vcombine.low %v922_v14, %v930_v15 }
 0x1f3   :  { %6836 = vmatpush2.bf16.msra.mxu0 %v11570_v26  ;;  %6877 = vmatpush2.bf16.msra.mxu1 %v11826_v29  ;;  %v650_v26 = vld [vmem:[#allocation2 + $0x1198] sm:$0xff] }
 0x1f4   :  { %6837 = vmatprep.subr.bf16.mxu0 %v11555_v30  ;;  %6878 = vmatprep.subr.bf16.mxu1 %v11811_v32  ;;  %v658_v29 = vld [vmem:[#allocation2 + $0x11d8] sm:$0xff] }
 0x1f5   :  { %v906_v30 = vld [vmem:[#allocation2 + $0x1998] sm:$0xff]  ;;  %v11987_v34 = vcombine.high %v650_v26, %v658_v29  ;;  %v11986_v45 = vcombine.low %v650_v26, %v658_v29 }
 0x1f6   :  { %v914_v32 = vld [vmem:[#allocation2 + $0x19d8] sm:$0xff] }
 0x1f7   :  { %6838 = vmatpush2.bf16.msra.mxu0 %v11554_v37  ;;  %6879 = vmatpush2.bf16.msra.mxu1 %v11810_v40  ;;  %v12243_v36 = vcombine.high %v906_v30, %v914_v32  ;;  %v634_v37 = vld [vmem:[#allocation2 + $0x1118] sm:$0xff]  ;;  %v12242_v46 = vcombine.low %v906_v30, %v914_v32 }
 0x1f8   :  { %6889 = vmatprep.subr.bf16.mxu0 %v12051_v43  ;;  %6930 = vmatprep.subr.bf16.mxu1 %v12307_v44  ;;  %v642_v40 = vld [vmem:[#allocation2 + $0x1158] sm:$0xff] }
 0x1f9   :  { %v890_v43 = vld [vmem:[#allocation2 + $0x1918] sm:$0xff]  ;;  %v11971_v49 = vcombine.high %v634_v37, %v642_v40  ;;  %v11970_v55 = vcombine.low %v634_v37, %v642_v40 }
 0x1fa   :  { %v6595_v57 = vpop.f32.mrf.mxu0  ;;  %6840 = vmatmul.mubr.bf16.vlgmr.msra.gmra.mxu0 %v13890_v16  ;;  %v6636_v0 = vpop.f32.mrf.mxu1  ;;  %6881 = vmatmul.mubr.bf16.vlgmr.msra.gmra.mxu1 %v13895_v20  ;;  %v898_v44 = vld [vmem:[#allocation2 + $0x1958] sm:$0xff] }
 0x1fb   :  { %v6596_v63 = vadd.f32 %v6595_v57, %v13968_v5  ;;  %6890 = vmatpush1.bf16.msra.mxu0 %v12050_v51  ;;  %6931 = vmatpush1.bf16.msra.mxu1 %v12306_v52  ;;  %v12227_v50 = vcombine.high %v890_v43, %v898_v44  ;;  %v618_v51 = vld [vmem:[#allocation2 + $0x1098] sm:$0xff]  ;;  %v12226_v56 = vcombine.low %v890_v43, %v898_v44 }
 0x1fc   :  { %v6597_v2 = vpop.f32.mrf.mxu0  ;;  %6891 = vmatprep.subr.bf16.mxu0 %v12035_v53  ;;  %v6638_v9 = vpop.f32.mrf.mxu1  ;;  %6932 = vmatprep.subr.bf16.mxu1 %v12291_v54  ;;  %v626_v52 = vld [vmem:[#allocation2 + $0x10d8] sm:$0xff] }
 0x1fd   :  { %v13977_v7 = vadd.f32 %v6636_v0, %v6596_v63  ;;  %v6598_v8 = vadd.f32 %v6597_v2, %v13972_v17  ;;  %6921 = vmatprep.mubr.bf16.mxu0 %v13900_v28  ;;  %6962 = vmatprep.mubr.bf16.mxu1 %v13903_v31  ;;  %v12274_v17 = vcombine.low %v938_v61, %v946_v62  ;;  %v874_v53 = vld [vmem:[#allocation2 + $0x1898] sm:$0xff] }
 0x1fe   :  { %v6599_v5 = vpop.f32.mrf.mxu0  ;;  %v6640_v21 = vpop.f32.mrf.mxu1  ;;  %v882_v54 = vld [vmem:[#allocation2 + $0x18d8] sm:$0xff]  ;;  %v11955_v57 = vcombine.high %v618_v51, %v626_v52  ;;  %v11954_v2 = vcombine.low %v618_v51, %v626_v52 }
 0x1ff   :  { %v13982_v19 = vadd.f32 %v6638_v9, %v6598_v8  ;;  %6892 = vmatpush1.bf16.msra.mxu0 %v12034_v1  ;;  %6933 = vmatpush1.bf16.msra.mxu1 %v12290_v3  ;;  %v12211_v61 = vcombine.high %v874_v53, %v882_v54  ;;  %v602_v62 = vld [vmem:[#allocation2 + $0x1018] sm:$0xff]  ;;  %v12210_v3 = vcombine.low %v874_v53, %v882_v54 }
 0x200   :  { %v6600_v23 = vpop.f32.mrf.mxu0  ;;  %6893 = vmatprep.subr.bf16.mxu0 %v12019_v4  ;;  %v6641_v41 = vpop.f32.mrf.mxu1  ;;  %6934 = vmatprep.subr.bf16.mxu1 %v12275_v10  ;;  %v610_v63 = vld [vmem:[#allocation2 + $0x1058] sm:$0xff]  ;;  %v12435_v21 = vcombine.high %v1098_v11, %v1106_v12 }
 0x201   :  { %v858_v0 = vld [vmem:[#allocation2 + $0x1818] sm:$0xff]  ;;  %v11939_v4 = vcombine.high %v602_v62, %v610_v63  ;;  %v11938_v5 = vcombine.low %v602_v62, %v610_v63 }
 0x202   :  { %v866_v1 = vld [vmem:[#allocation2 + $0x1858] sm:$0xff] }
 0x203   :  { %6894 = vmatpush1.bf16.msra.mxu0 %v12018_v22  ;;  %6935 = vmatpush1.bf16.msra.mxu1 %v12274_v17  ;;  %v12195_v8 = vcombine.high %v858_v0, %v866_v1  ;;  %v842_v9 = vld [vmem:[#allocation2 + $0x1798] sm:$0xff]  ;;  %v12194_v14 = vcombine.low %v858_v0, %v866_v1 }
 0x204   :  { %6895 = vmatprep.subr.bf16.mxu0 %v12003_v24  ;;  %6936 = vmatprep.subr.bf16.mxu1 %v12259_v25  ;;  %v850_v10 = vld [vmem:[#allocation2 + $0x17d8] sm:$0xff]  ;;  %v12434_v25 = vcombine.low %v1098_v11, %v1106_v12 }
 0x205   :  { %v12179_v15 = vcombine.high %v842_v9, %v850_v10  ;;  %v826_v22 = vld [vmem:[#allocation2 + $0x1718] sm:$0xff]  ;;  %v12178_v41 = vcombine.low %v842_v9, %v850_v10 }
 0x206   :  { %v834_v23 = vld [vmem:[#allocation2 + $0x1758] sm:$0xff] }
 0x207   :  { %6896 = vmatpush1.bf16.msra.mxu0 %v12002_v47  ;;  %6937 = vmatpush1.bf16.msra.mxu1 %v12258_v33  ;;  %v1082_v17 = vld [vmem:[#allocation2 + $0x1f18] sm:$0xff]  ;;  %v12163_v26 = vcombine.high %v826_v22, %v834_v23 }
 0x208   :  { %6897 = vmatprep.subr.bf16.mxu0 %v11987_v34  ;;  %6938 = vmatprep.subr.bf16.mxu1 %v12243_v36  ;;  %v1090_v24 = vld [vmem:[#allocation2 + $0x1f58] sm:$0xff]  ;;  %v12162_v34 = vcombine.low %v826_v22, %v834_v23 }
 0x209   :  { %v12419_v29 = vcombine.high %v1082_v17, %v1090_v24  ;;  %v810_v30 = vld [vmem:[#allocation2 + $0x1698] sm:$0xff]  ;;  %v12418_v36 = vcombine.low %v1082_v17, %v1090_v24 }
 0x20a   :  { %v818_v32 = vld [vmem:[#allocation2 + $0x16d8] sm:$0xff] }
 0x20b   :  { %6898 = vmatpush1.bf16.msra.mxu0 %v11986_v45  ;;  %6939 = vmatpush1.bf16.msra.mxu1 %v12242_v46  ;;  %v1066_v47 = vld [vmem:[#allocation2 + $0x1e98] sm:$0xff]  ;;  %v12147_v37 = vcombine.high %v810_v30, %v818_v32 }
 0x20c   :  { %6899 = vmatprep.subr.bf16.mxu0 %v11971_v49  ;;  %6940 = vmatprep.subr.bf16.mxu1 %v12227_v50  ;;  %v1074_v33 = vld [vmem:[#allocation2 + $0x1ed8] sm:$0xff]  ;;  %v12146_v49 = vcombine.low %v810_v30, %v818_v32 }
 0x20d   :  { %v12403_v40 = vcombine.high %v1066_v47, %v1074_v33  ;;  %v794_v43 = vld [vmem:[#allocation2 + $0x1618] sm:$0xff]  ;;  %v12402_v50 = vcombine.low %v1066_v47, %v1074_v33  ;;  %v203_v47 = vld [vmem:[#allocation2 + $0x3a0] sm:$0xff] }
 0x20e   :  { %v802_v44 = vld [vmem:[#allocation2 + $0x1658] sm:$0xff]  ;;  %v211_v33 = vld [vmem:[#allocation2 + $0x3e0] sm:$0xff] }
 0x20f   :  { %6900 = vmatpush1.bf16.msra.mxu0 %v11970_v55  ;;  %6941 = vmatpush1.bf16.msra.mxu1 %v12226_v56  ;;  %v1050_v45 = vld [vmem:[#allocation2 + $0x1e18] sm:$0xff]  ;;  %v12131_v51 = vcombine.high %v794_v43, %v802_v44 }
 0x210   :  { %6901 = vmatprep.subr.bf16.mxu0 %v11955_v57  ;;  %6942 = vmatprep.subr.bf16.mxu1 %v12211_v61  ;;  %v1058_v46 = vld [vmem:[#allocation2 + $0x1e58] sm:$0xff]  ;;  %v12130_v57 = vcombine.low %v794_v43, %v802_v44  ;;  %v11541_v44 = vcombine.high %v203_v47, %v211_v33 }
 0x211   :  { %v12387_v52 = vcombine.high %v1050_v45, %v1058_v46  ;;  %v778_v53 = vld [vmem:[#allocation2 + $0x1598] sm:$0xff]  ;;  %v12386_v61 = vcombine.low %v1050_v45, %v1058_v46  ;;  %v1137_v46 = vsub.s32 5, %v13926_v60 }
 0x212   :  { %v786_v54 = vld [vmem:[#allocation2 + $0x15d8] sm:$0xff] }
 0x213   :  { %6902 = vmatpush1.bf16.msra.mxu0 %v11954_v2  ;;  %6943 = vmatpush1.bf16.msra.mxu1 %v12210_v3  ;;  %v1034_v55 = vld [vmem:[#allocation2 + $0x1d98] sm:$0xff]  ;;  %v12115_v62 = vcombine.high %v778_v53, %v786_v54 }
 0x214   :  { %6903 = vmatprep.subr.bf16.mxu0 %v11939_v4  ;;  %6944 = vmatprep.subr.bf16.mxu1 %v12195_v8  ;;  %v1042_v56 = vld [vmem:[#allocation2 + $0x1dd8] sm:$0xff]  ;;  %v12114_v4 = vcombine.low %v778_v53, %v786_v54  ;;  %v11540_v54 = vcombine.low %v203_v47, %v211_v33  ;;  %v139_v33 = vld [vmem:[#allocation2 + $0x1a0] sm:$0xff] }
 0x215   :  { %v12371_v63 = vcombine.high %v1034_v55, %v1042_v56  ;;  %v762_v0 = vld [vmem:[#allocation2 + $0x1518] sm:$0xff]  ;;  %v12370_v8 = vcombine.low %v1034_v55, %v1042_v56 }
 0x216   :  { %v770_v1 = vld [vmem:[#allocation2 + $0x1558] sm:$0xff] }
 0x217   :  { %6904 = vmatpush1.bf16.msra.mxu0 %v11938_v5  ;;  %6945 = vmatpush1.bf16.msra.mxu1 %v12194_v14  ;;  %v1018_v2 = vld [vmem:[#allocation2 + $0x1d18] sm:$0xff]  ;;  %v12099_v9 = vcombine.high %v762_v0, %v770_v1 }
 0x218   :  { %6905 = vmatprep.subr.bf16.mxu0 %v12179_v15  ;;  %6946 = vmatprep.subr.bf16.mxu1 %v12435_v21  ;;  %v1026_v3 = vld [vmem:[#allocation2 + $0x1d58] sm:$0xff]  ;;  %v12098_v15 = vcombine.low %v762_v0, %v770_v1  ;;  %v427_v1 = vld [vmem:[#allocation2 + $0xaa0] sm:$0xff] }
 0x219   :  { %v12355_v10 = vcombine.high %v1018_v2, %v1026_v3  ;;  %v746_v11 = vld [vmem:[#allocation2 + $0x1498] sm:$0xff]  ;;  %v12354_v21 = vcombine.low %v1018_v2, %v1026_v3  ;;  %v435_v2 = vld [vmem:[#allocation2 + $0xae0] sm:$0xff] }
 0x21a   :  { %v754_v12 = vld [vmem:[#allocation2 + $0x14d8] sm:$0xff] }
 0x21b   :  { %6906 = vmatpush2.bf16.msra.mxu0 %v12178_v41  ;;  %6947 = vmatpush2.bf16.msra.mxu1 %v12434_v25  ;;  %v1002_v5 = vld [vmem:[#allocation2 + $0x1c98] sm:$0xff]  ;;  %v12083_v22 = vcombine.high %v746_v11, %v754_v12 }
 0x21c   :  { %6907 = vmatprep.subr.bf16.mxu0 %v12163_v26  ;;  %6948 = vmatprep.subr.bf16.mxu1 %v12419_v29  ;;  %v1010_v14 = vld [vmem:[#allocation2 + $0x1cd8] sm:$0xff]  ;;  %v12082_v26 = vcombine.low %v746_v11, %v754_v12 }
 0x21d   :  { %v12339_v23 = vcombine.high %v1002_v5, %v1010_v14  ;;  %v730_v17 = vld [vmem:[#allocation2 + $0x1418] sm:$0xff]  ;;  %v12338_v29 = vcombine.low %v1002_v5, %v1010_v14  ;;  %v11765_v14 = vcombine.high %v427_v1, %v435_v2 }
 0x21e   :  { %v738_v24 = vld [vmem:[#allocation2 + $0x1458] sm:$0xff] }
 0x21f   :  { %6908 = vmatpush2.bf16.msra.mxu0 %v12162_v34  ;;  %6949 = vmatpush2.bf16.msra.mxu1 %v12418_v36  ;;  %v986_v41 = vld [vmem:[#allocation2 + $0x1c18] sm:$0xff]  ;;  %v12067_v30 = vcombine.high %v730_v17, %v738_v24  ;;  %v459_v34 = vld [vmem:[#allocation2 + $0xba0] sm:$0xff] }
 0x220   :  { %6909 = vmatprep.subr.bf16.mxu0 %v12147_v37  ;;  %6950 = vmatprep.subr.bf16.mxu1 %v12403_v40  ;;  %v994_v25 = vld [vmem:[#allocation2 + $0x1c58] sm:$0xff]  ;;  %v467_v36 = vld [vmem:[#allocation2 + $0xbe0] sm:$0xff]  ;;  %v12066_v37 = vcombine.low %v730_v17, %v738_v24  ;;  %v1133_v40 = vsub.s32 4, %v13926_v60 }
 0x221   :  { %v12323_v32 = vcombine.high %v986_v41, %v994_v25  ;;  %v12322_v43 = vcombine.low %v986_v41, %v994_v25  ;;  %v11797_v45 = vcombine.high %v459_v34, %v467_v36  ;;  %v11796_v55 = vcombine.low %v459_v34, %v467_v36  ;;  %v419_v17 = vld [vmem:[#allocation2 + $0xa60] sm:$0xff] }
 0x222   :  { %v1134_v53 = vrot.slane %v13960_v48, %v1133_v40  ;;  %v147_v34 = vld [vmem:[#allocation2 + $0x1e0] sm:$0xff] }
 0x223   :  { %6910 = vmatpush2.bf16.msra.mxu0 %v12146_v49  ;;  %6951 = vmatpush2.bf16.msra.mxu1 %v12402_v50  ;;  %v187_v49 = vld [vmem:[#allocation2 + $0x320] sm:$0xff] }
 0x224   :  { %6911 = vmatprep.subr.bf16.mxu0 %v12131_v51  ;;  %6952 = vmatprep.subr.bf16.mxu1 %v12387_v52  ;;  %v195_v50 = vld [vmem:[#allocation2 + $0x360] sm:$0xff] }
 0x225   :  { %v443_v51 = vld [vmem:[#allocation2 + $0xb20] sm:$0xff]  ;;  %v11525_v56 = vcombine.high %v187_v49, %v195_v50 }
 0x226   :  { %v451_v52 = vld [vmem:[#allocation2 + $0xb60] sm:$0xff] }
 0x227   :  { %6912 = vmatpush2.bf16.msra.mxu0 %v12130_v57  ;;  %6953 = vmatpush2.bf16.msra.mxu1 %v12386_v61  ;;  %v1138_v57 = vrot.slane %v13960_v48, %v1137_v46  ;;  %v11781_v61 = vcombine.high %v443_v51, %v451_v52  ;;  %v395_v36 = vld [vmem:[#allocation2 + $0x9a0] sm:$0xff] }
 0x228   :  { %6913 = vmatprep.subr.bf16.mxu0 %v12115_v62  ;;  %6954 = vmatprep.subr.bf16.mxu1 %v12371_v63  ;;  %v171_v62 = vld [vmem:[#allocation2 + $0x2a0] sm:$0xff] }
 0x229   :  { %v179_v63 = vld [vmem:[#allocation2 + $0x2e0] sm:$0xff] }
 0x22a   :  { %v11509_v11 = vcombine.high %v171_v62, %v179_v63  ;;  %v11508_v25 = vcombine.low %v171_v62, %v179_v63  ;;  %v115_v62 = vld [vmem:[#allocation2 + $0xe0] sm:$0xff] }
 0x22b   :  { %6914 = vmatpush2.bf16.msra.mxu0 %v12114_v4  ;;  %6955 = vmatpush2.bf16.msra.mxu1 %v12370_v8  ;;  %v11524_v8 = vcombine.low %v187_v49, %v195_v50  ;;  %v123_v50 = vld [vmem:[#allocation2 + $0x120] sm:$0xff] }
 0x22c   :  { %6915 = vmatprep.subr.bf16.mxu0 %v12099_v9  ;;  %6956 = vmatprep.subr.bf16.mxu1 %v12355_v10  ;;  %v11780_v10 = vcombine.low %v443_v51, %v451_v52  ;;  %v131_v51 = vld [vmem:[#allocation2 + $0x160] sm:$0xff] }
 0x22d   :  { %v379_v52 = vld [vmem:[#allocation2 + $0x920] sm:$0xff] }
 0x22e   :  { %v363_v63 = vld [vmem:[#allocation2 + $0x8a0] sm:$0xff] }
 0x22f   :  { %6916 = vmatpush2.bf16.msra.mxu0 %v12098_v15  ;;  %6957 = vmatpush2.bf16.msra.mxu1 %v12354_v21  ;;  %v155_v15 = vld [vmem:[#allocation2 + $0x220] sm:$0xff] }
 0x230   :  { %6917 = vmatprep.subr.bf16.mxu0 %v12083_v22  ;;  %6958 = vmatprep.subr.bf16.mxu1 %v12339_v23  ;;  %v163_v21 = vld [vmem:[#allocation2 + $0x260] sm:$0xff] }
 0x231   :  { %v411_v23 = vld [vmem:[#allocation2 + $0xa20] sm:$0xff] }
 0x232   :  { %v11749_v47 = vcombine.high %v411_v23, %v419_v17 }
 0x233   :  { %6918 = vmatpush2.bf16.msra.mxu0 %v12082_v26  ;;  %6959 = vmatpush2.bf16.msra.mxu1 %v12338_v29  ;;  %v11764_v29 = vcombine.low %v427_v1, %v435_v2  ;;  %v11460_v1 = vcombine.low %v123_v50, %v131_v51 }
 0x234   :  { %6919 = vmatprep.subr.bf16.mxu0 %v12067_v30  ;;  %6960 = vmatprep.subr.bf16.mxu1 %v12323_v32  ;;  %v11493_v30 = vcombine.high %v155_v15, %v163_v21 }
 0x237   :  { %6920 = vmatpush2.bf16.msra.mxu0 %v12066_v37  ;;  %6961 = vmatpush2.bf16.msra.mxu1 %v12322_v43  ;;  %v403_v37 = vld [vmem:[#allocation2 + $0x9e0] sm:$0xff]  ;;  %v11492_v43 = vcombine.low %v155_v15, %v163_v21 }
 0x238   :  { %6971 = vmatprep.subr.bf16.mxu0 %v11541_v44  ;;  %7012 = vmatprep.subr.bf16.mxu1 %v11797_v45  ;;  %v11748_v44 = vcombine.low %v411_v23, %v419_v17  ;;  %v11477_v45 = vcombine.high %v139_v33, %v147_v34  ;;  %v11733_v49 = vcombine.high %v395_v36, %v403_v37  ;;  %v331_v21 = vld [vmem:[#allocation2 + $0x7a0] sm:$0xff] }
 0x239   :  { %v587_v23 = vld [vmem:[#allocation2 + $0xfa0] sm:$0xff] }
 0x23a   :  { %v6677_v0 = vpop.f32.mrf.mxu0  ;;  %6922 = vmatmul.mubr.bf16.vlgmr.msra.gmra.mxu0 %v13914_v38  ;;  %v6718_v4 = vpop.f32.mrf.mxu1  ;;  %6963 = vmatmul.mubr.bf16.vlgmr.msra.gmra.mxu1 %v13916_v39  ;;  %v595_v17 = vld [vmem:[#allocation2 + $0xfe0] sm:$0xff] }
 0x23b   :  { %v6678_v3 = vadd.f32 %v6677_v0, %v1134_v53  ;;  %6972 = vmatpush1.bf16.msra.mxu0 %v11540_v54  ;;  %7013 = vmatpush1.bf16.msra.mxu1 %v11796_v55  ;;  %v387_v53 = vld [vmem:[#allocation2 + $0x960] sm:$0xff]  ;;  %v11476_v54 = vcombine.low %v139_v33, %v147_v34  ;;  %v11732_v55 = vcombine.low %v395_v36, %v403_v37 }
 0x23c   :  { %v6679_v9 = vpop.f32.mrf.mxu0  ;;  %6973 = vmatprep.subr.bf16.mxu0 %v11525_v56  ;;  %v6720_v5 = vpop.f32.mrf.mxu1  ;;  %7014 = vmatprep.subr.bf16.mxu1 %v11781_v61  ;;  %v11461_v56 = vcombine.high %v123_v50, %v131_v51  ;;  %v107_v61 = vld [vmem:[#allocation2 + $0xa0] sm:$0xff]  ;;  %v11716_v2 = vcombine.low %v379_v52, %v387_v53  ;;  %v11924_v36 = vcombine.low %v587_v23, %v595_v17 }
 0x23d   :  { %v13994_v48 = vadd.f32 %v6718_v4, %v6678_v3  ;;  %v6680_v12 = vadd.f32 %v6679_v9, %v1138_v57  ;;  %7003 = vmatprep.mubr.bf16.mxu0 %v13878_v58  ;;  %7044 = vmatprep.mubr.bf16.mxu1 %v13880_v59  ;;  %v11717_v57 = vcombine.high %v379_v52, %v387_v53  ;;  %v371_v0 = vld [vmem:[#allocation2 + $0x8e0] sm:$0xff] }
 0x23e   :  { %v6681_v22 = vpop.f32.mrf.mxu0  ;;  %v6722_v41 = vpop.f32.mrf.mxu1  ;;  %v11445_v3 = vcombine.high %v107_v61, %v115_v62  ;;  %v11701_v4 = vcombine.high %v363_v63, %v371_v0  ;;  %v99_v9 = vld [vmem:[#allocation2 + $0x60] sm:$0xff] }
 0x23f   :  { %v13998_v24 = vadd.f32 %v6720_v5, %v6680_v12  ;;  %6974 = vmatpush1.bf16.msra.mxu0 %v11524_v8  ;;  %7015 = vmatpush1.bf16.msra.mxu1 %v11780_v10  ;;  %v91_v8 = vld [vmem:[#allocation2 + $0x20] sm:$0xff]  ;;  %v11444_v12 = vcombine.low %v107_v61, %v115_v62  ;;  %v11700_v5 = vcombine.low %v363_v63, %v371_v0 }
 0x240   :  { %v6682_v26 = vpop.f32.mrf.mxu0  ;;  %6975 = vmatprep.subr.bf16.mxu0 %v11509_v11  ;;  %v6723_v32 = vpop.f32.mrf.mxu1  ;;  %7016 = vmatprep.subr.bf16.mxu1 %v11765_v14  ;;  %v347_v10 = vld [vmem:[#allocation2 + $0x820] sm:$0xff]  ;;  %v11429_v14 = vcombine.high %v91_v8, %v99_v9  ;;  %v11428_v41 = vcombine.low %v91_v8, %v99_v9 }
 0x241   :  { %v355_v11 = vld [vmem:[#allocation2 + $0x860] sm:$0xff] }
 0x242   :  { %v11685_v15 = vcombine.high %v347_v10, %v355_v11  ;;  %v339_v22 = vld [vmem:[#allocation2 + $0x7e0] sm:$0xff] }
 0x243   :  { %6976 = vmatpush1.bf16.msra.mxu0 %v11508_v25  ;;  %7017 = vmatpush1.bf16.msra.mxu1 %v11764_v29  ;;  %v11684_v25 = vcombine.low %v347_v10, %v355_v11  ;;  %v11669_v26 = vcombine.high %v331_v21, %v339_v22  ;;  %v11925_v29 = vcombine.high %v587_v23, %v595_v17  ;;  %v323_v32 = vld [vmem:[#allocation2 + $0x760] sm:$0xff] }
 0x244   :  { %6977 = vmatprep.subr.bf16.mxu0 %v11493_v30  ;;  %7018 = vmatprep.subr.bf16.mxu1 %v11749_v47  ;;  %v315_v30 = vld [vmem:[#allocation2 + $0x720] sm:$0xff]  ;;  %v11668_v34 = vcombine.low %v331_v21, %v339_v22 }
 0x245   :  { %v571_v47 = vld [vmem:[#allocation2 + $0xf20] sm:$0xff]  ;;  %v11653_v37 = vcombine.high %v315_v30, %v323_v32  ;;  %v11652_v51 = vcombine.low %v315_v30, %v323_v32 }
 0x246   :  { %v579_v33 = vld [vmem:[#allocation2 + $0xf60] sm:$0xff] }
 0x247   :  { %6978 = vmatpush1.bf16.msra.mxu0 %v11492_v43  ;;  %7019 = vmatpush1.bf16.msra.mxu1 %v11748_v44  ;;  %v11909_v43 = vcombine.high %v571_v47, %v579_v33  ;;  %v299_v44 = vld [vmem:[#allocation2 + $0x6a0] sm:$0xff]  ;;  %v11908_v52 = vcombine.low %v571_v47, %v579_v33 }
 0x248   :  { %6979 = vmatprep.subr.bf16.mxu0 %v11477_v45  ;;  %7020 = vmatprep.subr.bf16.mxu1 %v11733_v49  ;;  %v307_v45 = vld [vmem:[#allocation2 + $0x6e0] sm:$0xff] }
 0x249   :  { %v555_v49 = vld [vmem:[#allocation2 + $0xea0] sm:$0xff]  ;;  %v11637_v53 = vcombine.high %v299_v44, %v307_v45  ;;  %v11636_v62 = vcombine.low %v299_v44, %v307_v45 }
 0x24a   :  { %v563_v50 = vld [vmem:[#allocation2 + $0xee0] sm:$0xff] }
 0x24b   :  { %6980 = vmatpush1.bf16.msra.mxu0 %v11476_v54  ;;  %7021 = vmatpush1.bf16.msra.mxu1 %v11732_v55  ;;  %v11893_v54 = vcombine.high %v555_v49, %v563_v50  ;;  %v283_v55 = vld [vmem:[#allocation2 + $0x620] sm:$0xff]  ;;  %v11892_v63 = vcombine.low %v555_v49, %v563_v50 }
 0x24c   :  { %6981 = vmatprep.subr.bf16.mxu0 %v11461_v56  ;;  %7022 = vmatprep.subr.bf16.mxu1 %v11717_v57  ;;  %v291_v56 = vld [vmem:[#allocation2 + $0x660] sm:$0xff] }
 0x24d   :  { %v539_v57 = vld [vmem:[#allocation2 + $0xe20] sm:$0xff]  ;;  %v11621_v0 = vcombine.high %v283_v55, %v291_v56  ;;  %v11620_v9 = vcombine.low %v283_v55, %v291_v56 }
 0x24e   :  { %v547_v61 = vld [vmem:[#allocation2 + $0xe60] sm:$0xff] }
 0x24f   :  { %6982 = vmatpush1.bf16.msra.mxu0 %v11460_v1  ;;  %7023 = vmatpush1.bf16.msra.mxu1 %v11716_v2  ;;  %v11877_v1 = vcombine.high %v539_v57, %v547_v61  ;;  %v267_v2 = vld [vmem:[#allocation2 + $0x5a0] sm:$0xff]  ;;  %v11876_v10 = vcombine.low %v539_v57, %v547_v61 }
 0x250   :  { %6983 = vmatprep.subr.bf16.mxu0 %v11445_v3  ;;  %7024 = vmatprep.subr.bf16.mxu1 %v11701_v4  ;;  %v275_v3 = vld [vmem:[#allocation2 + $0x5e0] sm:$0xff] }
 0x251   :  { %v523_v4 = vld [vmem:[#allocation2 + $0xda0] sm:$0xff]  ;;  %v11605_v11 = vcombine.high %v267_v2, %v275_v3  ;;  %v11604_v22 = vcombine.low %v267_v2, %v275_v3 }
 0x252   :  { %v531_v8 = vld [vmem:[#allocation2 + $0xde0] sm:$0xff] }
 0x253   :  { %6984 = vmatpush1.bf16.msra.mxu0 %v11444_v12  ;;  %7025 = vmatpush1.bf16.msra.mxu1 %v11700_v5  ;;  %v11861_v12 = vcombine.high %v523_v4, %v531_v8  ;;  %v251_v5 = vld [vmem:[#allocation2 + $0x520] sm:$0xff]  ;;  %v11860_v23 = vcombine.low %v523_v4, %v531_v8 }
 0x254   :  { %6985 = vmatprep.subr.bf16.mxu0 %v11429_v14  ;;  %7026 = vmatprep.subr.bf16.mxu1 %v11685_v15  ;;  %v259_v14 = vld [vmem:[#allocation2 + $0x560] sm:$0xff] }
 0x255   :  { %v507_v15 = vld [vmem:[#allocation2 + $0xd20] sm:$0xff]  ;;  %v11589_v17 = vcombine.high %v251_v5, %v259_v14  ;;  %v11588_v32 = vcombine.low %v251_v5, %v259_v14 }
 0x256   :  { %v515_v21 = vld [vmem:[#allocation2 + $0xd60] sm:$0xff] }
 0x257   :  { %6986 = vmatpush1.bf16.msra.mxu0 %v11428_v41  ;;  %7027 = vmatpush1.bf16.msra.mxu1 %v11684_v25  ;;  %v11845_v41 = vcombine.high %v507_v15, %v515_v21  ;;  %v235_v25 = vld [vmem:[#allocation2 + $0x4a0] sm:$0xff]  ;;  %v11844_v47 = vcombine.low %v507_v15, %v515_v21 }
 0x258   :  { %6987 = vmatprep.subr.bf16.mxu0 %v11669_v26  ;;  %7028 = vmatprep.subr.bf16.mxu1 %v11925_v29  ;;  %v243_v26 = vld [vmem:[#allocation2 + $0x4e0] sm:$0xff] }
 0x259   :  { %v491_v29 = vld [vmem:[#allocation2 + $0xca0] sm:$0xff]  ;;  %v11573_v33 = vcombine.high %v235_v25, %v243_v26  ;;  %v11572_v45 = vcombine.low %v235_v25, %v243_v26 }
 0x25a   :  { %v499_v30 = vld [vmem:[#allocation2 + $0xce0] sm:$0xff] }
 0x25b   :  { %6988 = vmatpush2.bf16.msra.mxu0 %v11668_v34  ;;  %7029 = vmatpush2.bf16.msra.mxu1 %v11924_v36  ;;  %v11829_v34 = vcombine.high %v491_v29, %v499_v30  ;;  %v219_v36 = vld [vmem:[#allocation2 + $0x420] sm:$0xff]  ;;  %v11828_v49 = vcombine.low %v491_v29, %v499_v30 }
 0x25c   :  { %6989 = vmatprep.subr.bf16.mxu0 %v11653_v37  ;;  %7030 = vmatprep.subr.bf16.mxu1 %v11909_v43  ;;  %v227_v37 = vld [vmem:[#allocation2 + $0x460] sm:$0xff] }
 0x25d   :  { %v475_v43 = vld [vmem:[#allocation2 + $0xc20] sm:$0xff]  ;;  %v11557_v50 = vcombine.high %v219_v36, %v227_v37  ;;  %v11556_v56 = vcombine.low %v219_v36, %v227_v37 }
 0x25e   :  { %v483_v44 = vld [vmem:[#allocation2 + $0xc60] sm:$0xff] }
 0x25f   :  { %6990 = vmatpush2.bf16.msra.mxu0 %v11652_v51  ;;  %7031 = vmatpush2.bf16.msra.mxu1 %v11908_v52  ;;  %v11813_v51 = vcombine.high %v475_v43, %v483_v44  ;;  %v715_v52 = vld [vmem:[#allocation2 + $0x13a0] sm:$0xff]  ;;  %v11812_v57 = vcombine.low %v475_v43, %v483_v44 }
 0x260   :  { %6991 = vmatprep.subr.bf16.mxu0 %v11637_v53  ;;  %7032 = vmatprep.subr.bf16.mxu1 %v11893_v54  ;;  %v723_v53 = vld [vmem:[#allocation2 + $0x13e0] sm:$0xff] }
 0x261   :  { %v971_v54 = vld [vmem:[#allocation2 + $0x1ba0] sm:$0xff]  ;;  %v12053_v61 = vcombine.high %v715_v52, %v723_v53  ;;  %v12052_v3 = vcombine.low %v715_v52, %v723_v53 }
 0x262   :  { %v979_v55 = vld [vmem:[#allocation2 + $0x1be0] sm:$0xff] }
 0x263   :  { %6992 = vmatpush2.bf16.msra.mxu0 %v11636_v62  ;;  %7033 = vmatpush2.bf16.msra.mxu1 %v11892_v63  ;;  %v12309_v62 = vcombine.high %v971_v54, %v979_v55  ;;  %v699_v63 = vld [vmem:[#allocation2 + $0x1320] sm:$0xff]  ;;  %v12308_v4 = vcombine.low %v971_v54, %v979_v55 }
 0x264   :  { %6993 = vmatprep.subr.bf16.mxu0 %v11621_v0  ;;  %7034 = vmatprep.subr.bf16.mxu1 %v11877_v1  ;;  %v707_v0 = vld [vmem:[#allocation2 + $0x1360] sm:$0xff] }
 0x265   :  { %v955_v1 = vld [vmem:[#allocation2 + $0x1b20] sm:$0xff]  ;;  %v12037_v8 = vcombine.high %v699_v63, %v707_v0 }
 0x266   :  { %v963_v2 = vld [vmem:[#allocation2 + $0x1b60] sm:$0xff] }
 0x267   :  { %6994 = vmatpush2.bf16.msra.mxu0 %v11620_v9  ;;  %7035 = vmatpush2.bf16.msra.mxu1 %v11876_v10  ;;  %v12293_v9 = vcombine.high %v955_v1, %v963_v2  ;;  %v683_v10 = vld [vmem:[#allocation2 + $0x12a0] sm:$0xff] }
 0x268   :  { %6995 = vmatprep.subr.bf16.mxu0 %v11605_v11  ;;  %7036 = vmatprep.subr.bf16.mxu1 %v11861_v12  ;;  %v691_v11 = vld [vmem:[#allocation2 + $0x12e0] sm:$0xff] }
 0x269   :  { %v939_v5 = vld [vmem:[#allocation2 + $0x1aa0] sm:$0xff]  ;;  %v12020_v43 = vcombine.low %v683_v10, %v691_v11 }
 0x26a   :  { %v947_v14 = vld [vmem:[#allocation2 + $0x1ae0] sm:$0xff] }
 0x26b   :  { %6996 = vmatpush2.bf16.msra.mxu0 %v11604_v22  ;;  %7037 = vmatpush2.bf16.msra.mxu1 %v11860_v23  ;;  %v12036_v22 = vcombine.low %v699_v63, %v707_v0  ;;  %v12277_v30 = vcombine.high %v939_v5, %v947_v14  ;;  %v659_v52 = vld [vmem:[#allocation2 + $0x11e0] sm:$0xff] }
 0x26c   :  { %6997 = vmatprep.subr.bf16.mxu0 %v11589_v17  ;;  %7038 = vmatprep.subr.bf16.mxu1 %v11845_v41  ;;  %v12292_v17 = vcombine.low %v955_v1, %v963_v2  ;;  %v12021_v41 = vcombine.high %v683_v10, %v691_v11  ;;  %v907_v53 = vld [vmem:[#allocation2 + $0x19a0] sm:$0xff] }
 0x26d   :  { %v915_v54 = vld [vmem:[#allocation2 + $0x19e0] sm:$0xff] }
 0x26e   :  { %v643_v63 = vld [vmem:[#allocation2 + $0x1160] sm:$0xff] }
 0x26f   :  { %6998 = vmatpush2.bf16.msra.mxu0 %v11588_v32  ;;  %7039 = vmatpush2.bf16.msra.mxu1 %v11844_v47  ;;  %v667_v32 = vld [vmem:[#allocation2 + $0x1220] sm:$0xff] }
 0x270   :  { %6999 = vmatprep.subr.bf16.mxu0 %v11573_v33  ;;  %7040 = vmatprep.subr.bf16.mxu1 %v11829_v34  ;;  %v675_v47 = vld [vmem:[#allocation2 + $0x1260] sm:$0xff] }
 0x271   :  { %v923_v33 = vld [vmem:[#allocation2 + $0x1a20] sm:$0xff]  ;;  %v12004_v55 = vcombine.low %v667_v32, %v675_v47 }
 0x272   :  { %v931_v34 = vld [vmem:[#allocation2 + $0x1a60] sm:$0xff] }
 0x273   :  { %7000 = vmatpush2.bf16.msra.mxu0 %v11572_v45  ;;  %7041 = vmatpush2.bf16.msra.mxu1 %v11828_v49  ;;  %v12005_v45 = vcombine.high %v667_v32, %v675_v47  ;;  %v891_v0 = vld [vmem:[#allocation2 + $0x1920] sm:$0xff] }
 0x274   :  { %7001 = vmatprep.subr.bf16.mxu0 %v11557_v50  ;;  %7042 = vmatprep.subr.bf16.mxu1 %v11813_v51  ;;  %v12261_v50 = vcombine.high %v923_v33, %v931_v34  ;;  %v651_v51 = vld [vmem:[#allocation2 + $0x11a0] sm:$0xff] }
 0x275   :  { %v899_v1 = vld [vmem:[#allocation2 + $0x1960] sm:$0xff]  ;;  %v11988_v2 = vcombine.low %v651_v51, %v659_v52 }
 0x276   :  { %v627_v10 = vld [vmem:[#allocation2 + $0x10e0] sm:$0xff] }
 0x277   :  { %7002 = vmatpush2.bf16.msra.mxu0 %v11556_v56  ;;  %7043 = vmatpush2.bf16.msra.mxu1 %v11812_v57  ;;  %v12260_v56 = vcombine.low %v923_v33, %v931_v34  ;;  %v11989_v57 = vcombine.high %v651_v51, %v659_v52  ;;  %v875_v11 = vld [vmem:[#allocation2 + $0x18a0] sm:$0xff] }
 0x278   :  { %7053 = vmatprep.subr.bf16.mxu0 %v12053_v61  ;;  %7094 = vmatprep.subr.bf16.mxu1 %v12309_v62  ;;  %v12245_v61 = vcombine.high %v907_v53, %v915_v54  ;;  %v635_v62 = vld [vmem:[#allocation2 + $0x1120] sm:$0xff] }
 0x279   :  { %v843_v47 = vld [vmem:[#allocation2 + $0x17a0] sm:$0xff] }
 0x27a   :  { %v6759_v12 = vpop.f32.mrf.mxu0  ;;  %7004 = vmatmul.mubr.bf16.vlgmr.msra.gmra.mxu0 %v13890_v16  ;;  %v6800_v21 = vpop.f32.mrf.mxu1  ;;  %7045 = vmatmul.mubr.bf16.vlgmr.msra.gmra.mxu1 %v13895_v20  ;;  %v1099_v33 = vld [vmem:[#allocation2 + $0x1fa0] sm:$0xff] }
 0x27b   :  { %v6760_v15 = vadd.f32 %v6759_v12, %v13994_v48  ;;  %7054 = vmatpush1.bf16.msra.mxu0 %v12052_v3  ;;  %7095 = vmatpush1.bf16.msra.mxu1 %v12308_v4  ;;  %v12244_v3 = vcombine.low %v907_v53, %v915_v54  ;;  %v11973_v4 = vcombine.high %v635_v62, %v643_v63  ;;  %v883_v12 = vld [vmem:[#allocation2 + $0x18e0] sm:$0xff] }
 0x27c   :  { %v6761_v23 = vpop.f32.mrf.mxu0  ;;  %7055 = vmatprep.subr.bf16.mxu0 %v12037_v8  ;;  %v6802_v29 = vpop.f32.mrf.mxu1  ;;  %7096 = vmatprep.subr.bf16.mxu1 %v12293_v9  ;;  %v12229_v8 = vcombine.high %v891_v0, %v899_v1  ;;  %v619_v9 = vld [vmem:[#allocation2 + $0x10a0] sm:$0xff] }
 0x27d   :  { %v14003_v25 = vadd.f32 %v6800_v21, %v6760_v15  ;;  %v6762_v26 = vadd.f32 %v6761_v23, %v13998_v24  ;;  %7085 = vmatprep.mubr.bf16.mxu0 %v13900_v28  ;;  %7126 = vmatprep.mubr.bf16.mxu1 %v13903_v31  ;;  %v12276_v24 = vcombine.low %v939_v5, %v947_v14  ;;  %v611_v23 = vld [vmem:[#allocation2 + $0x1060] sm:$0xff] }
 0x27e   :  { %v6763_v48 = vpop.f32.mrf.mxu0  ;;  %v6804_v37 = vpop.f32.mrf.mxu1  ;;  %v11972_v5 = vcombine.low %v635_v62, %v643_v63  ;;  %v12228_v14 = vcombine.low %v891_v0, %v899_v1  ;;  %v11957_v15 = vcombine.high %v619_v9, %v627_v10  ;;  %v12213_v21 = vcombine.high %v875_v11, %v883_v12  ;;  %v1107_v34 = vld [vmem:[#allocation2 + $0x1fe0] sm:$0xff] }
 0x27f   :  { %v14008_v36 = vadd.f32 %v6802_v29, %v6762_v26  ;;  %7056 = vmatpush1.bf16.msra.mxu0 %v12036_v22  ;;  %7097 = vmatpush1.bf16.msra.mxu1 %v12292_v17  ;;  %v603_v22 = vld [vmem:[#allocation2 + $0x1020] sm:$0xff]  ;;  %v11956_v26 = vcombine.low %v619_v9, %v627_v10  ;;  %v12212_v29 = vcombine.low %v875_v11, %v883_v12 }
 0x280   :  { %v6764_v44 = vpop.f32.mrf.mxu0  ;;  %7057 = vmatprep.subr.bf16.mxu0 %v12021_v41  ;;  %v6805_v49 = vpop.f32.mrf.mxu1  ;;  %7098 = vmatprep.subr.bf16.mxu1 %v12277_v30  ;;  %v859_v17 = vld [vmem:[#allocation2 + $0x1820] sm:$0xff]  ;;  %v11941_v30 = vcombine.high %v603_v22, %v611_v23  ;;  %v11940_v37 = vcombine.low %v603_v22, %v611_v23  ;;  %v12436_v53 = vcombine.low %v1099_v33, %v1107_v34 }
 0x281   :  { %v867_v41 = vld [vmem:[#allocation2 + $0x1860] sm:$0xff] }
 0x282   :  { %v12197_v32 = vcombine.high %v859_v17, %v867_v41  ;;  %v851_v48 = vld [vmem:[#allocation2 + $0x17e0] sm:$0xff] }
 0x283   :  { %7058 = vmatpush1.bf16.msra.mxu0 %v12020_v43  ;;  %7099 = vmatpush1.bf16.msra.mxu1 %v12276_v24  ;;  %v12196_v43 = vcombine.low %v859_v17, %v867_v41  ;;  %v12181_v44 = vcombine.high %v843_v47, %v851_v48  ;;  %v12437_v24 = vcombine.high %v1099_v33, %v1107_v34  ;;  %v835_v49 = vld [vmem:[#allocation2 + $0x1760] sm:$0xff] }
 0x284   :  { %7059 = vmatprep.subr.bf16.mxu0 %v12005_v45  ;;  %7100 = vmatprep.subr.bf16.mxu1 %v12261_v50  ;;  %v827_v45 = vld [vmem:[#allocation2 + $0x1720] sm:$0xff]  ;;  %v12180_v52 = vcombine.low %v843_v47, %v851_v48 }
 0x285   :  { %v1083_v50 = vld [vmem:[#allocation2 + $0x1f20] sm:$0xff]  ;;  %v12165_v54 = vcombine.high %v827_v45, %v835_v49  ;;  %v12164_v63 = vcombine.low %v827_v45, %v835_v49 }
 0x286   :  { %v1091_v51 = vld [vmem:[#allocation2 + $0x1f60] sm:$0xff] }
 0x287   :  { %7060 = vmatpush1.bf16.msra.mxu0 %v12004_v55  ;;  %7101 = vmatpush1.bf16.msra.mxu1 %v12260_v56  ;;  %v12421_v55 = vcombine.high %v1083_v50, %v1091_v51  ;;  %v811_v56 = vld [vmem:[#allocation2 + $0x16a0] sm:$0xff]  ;;  %v12420_v0 = vcombine.low %v1083_v50, %v1091_v51 }
 0x288   :  { %7061 = vmatprep.subr.bf16.mxu0 %v11989_v57  ;;  %7102 = vmatprep.subr.bf16.mxu1 %v12245_v61  ;;  %v819_v57 = vld [vmem:[#allocation2 + $0x16e0] sm:$0xff] }
 0x289   :  { %v1067_v61 = vld [vmem:[#allocation2 + $0x1ea0] sm:$0xff]  ;;  %v12149_v1 = vcombine.high %v811_v56, %v819_v57  ;;  %v12148_v10 = vcombine.low %v811_v56, %v819_v57 }
 0x28a   :  { %v1075_v62 = vld [vmem:[#allocation2 + $0x1ee0] sm:$0xff] }
 0x28b   :  { %7062 = vmatpush1.bf16.msra.mxu0 %v11988_v2  ;;  %7103 = vmatpush1.bf16.msra.mxu1 %v12244_v3  ;;  %v12405_v2 = vcombine.high %v1067_v61, %v1075_v62  ;;  %v795_v3 = vld [vmem:[#allocation2 + $0x1620] sm:$0xff]  ;;  %v12404_v11 = vcombine.low %v1067_v61, %v1075_v62 }
 0x28c   :  { %7063 = vmatprep.subr.bf16.mxu0 %v11973_v4  ;;  %7104 = vmatprep.subr.bf16.mxu1 %v12229_v8  ;;  %v803_v4 = vld [vmem:[#allocation2 + $0x1660] sm:$0xff] }
 0x28d   :  { %v1051_v8 = vld [vmem:[#allocation2 + $0x1e20] sm:$0xff]  ;;  %v12133_v12 = vcombine.high %v795_v3, %v803_v4  ;;  %v12132_v23 = vcombine.low %v795_v3, %v803_v4  ;;  %v468_v3 = vld [vmem:[#allocation2 + $0xbe8] sm:$0xff] }
 0x28e   :  { %v1059_v9 = vld [vmem:[#allocation2 + $0x1e60] sm:$0xff] }
 0x28f   :  { %7064 = vmatpush1.bf16.msra.mxu0 %v11972_v5  ;;  %7105 = vmatpush1.bf16.msra.mxu1 %v12228_v14  ;;  %v12389_v5 = vcombine.high %v1051_v8, %v1059_v9  ;;  %v779_v14 = vld [vmem:[#allocation2 + $0x15a0] sm:$0xff]  ;;  %v12388_v17 = vcombine.low %v1051_v8, %v1059_v9  ;;  %v1141_v8 = vsub.s32 6, %v13926_v60 }
 0x290   :  { %7065 = vmatprep.subr.bf16.mxu0 %v11957_v15  ;;  %7106 = vmatprep.subr.bf16.mxu1 %v12213_v21  ;;  %v787_v15 = vld [vmem:[#allocation2 + $0x15e0] sm:$0xff] }
 0x291   :  { %v1035_v21 = vld [vmem:[#allocation2 + $0x1da0] sm:$0xff]  ;;  %v12117_v41 = vcombine.high %v779_v14, %v787_v15  ;;  %v12116_v48 = vcombine.low %v779_v14, %v787_v15  ;;  %v196_v14 = vld [vmem:[#allocation2 + $0x368] sm:$0xff] }
 0x292   :  { %v1043_v22 = vld [vmem:[#allocation2 + $0x1de0] sm:$0xff]  ;;  %v444_v15 = vld [vmem:[#allocation2 + $0xb28] sm:$0xff] }
 0x293   :  { %7066 = vmatpush1.bf16.msra.mxu0 %v11956_v26  ;;  %7107 = vmatpush1.bf16.msra.mxu1 %v12212_v29  ;;  %v12373_v26 = vcombine.high %v1035_v21, %v1043_v22  ;;  %v763_v29 = vld [vmem:[#allocation2 + $0x1520] sm:$0xff]  ;;  %v12372_v33 = vcombine.low %v1035_v21, %v1043_v22  ;;  %v452_v21 = vld [vmem:[#allocation2 + $0xb68] sm:$0xff] }
 0x294   :  { %7067 = vmatprep.subr.bf16.mxu0 %v11941_v30  ;;  %7108 = vmatprep.subr.bf16.mxu1 %v12197_v32  ;;  %v771_v30 = vld [vmem:[#allocation2 + $0x1560] sm:$0xff] }
 0x295   :  { %v1019_v32 = vld [vmem:[#allocation2 + $0x1d20] sm:$0xff]  ;;  %v12101_v34 = vcombine.high %v763_v29, %v771_v30  ;;  %v12100_v49 = vcombine.low %v763_v29, %v771_v30  ;;  %v11783_v30 = vcombine.high %v444_v15, %v452_v21 }
 0x296   :  { %v1027_v47 = vld [vmem:[#allocation2 + $0x1d60] sm:$0xff] }
 0x297   :  { %7068 = vmatpush1.bf16.msra.mxu0 %v11940_v37  ;;  %7109 = vmatpush1.bf16.msra.mxu1 %v12196_v43  ;;  %v12357_v37 = vcombine.high %v1019_v32, %v1027_v47  ;;  %v747_v43 = vld [vmem:[#allocation2 + $0x14a0] sm:$0xff]  ;;  %v12356_v50 = vcombine.low %v1019_v32, %v1027_v47  ;;  %v172_v32 = vld [vmem:[#allocation2 + $0x2a8] sm:$0xff] }
 0x298   :  { %7069 = vmatprep.subr.bf16.mxu0 %v12181_v44  ;;  %7110 = vmatprep.subr.bf16.mxu1 %v12437_v24  ;;  %v755_v44 = vld [vmem:[#allocation2 + $0x14e0] sm:$0xff]  ;;  %v180_v47 = vld [vmem:[#allocation2 + $0x2e8] sm:$0xff] }
 0x299   :  { %v1003_v24 = vld [vmem:[#allocation2 + $0x1ca0] sm:$0xff]  ;;  %v12085_v51 = vcombine.high %v747_v43, %v755_v44  ;;  %v12084_v57 = vcombine.low %v747_v43, %v755_v44 }
 0x29a   :  { %v1011_v45 = vld [vmem:[#allocation2 + $0x1ce0] sm:$0xff] }
 0x29b   :  { %7070 = vmatpush2.bf16.msra.mxu0 %v12180_v52  ;;  %7111 = vmatpush2.bf16.msra.mxu1 %v12436_v53  ;;  %v12341_v52 = vcombine.high %v1003_v24, %v1011_v45  ;;  %v731_v53 = vld [vmem:[#allocation2 + $0x1420] sm:$0xff]  ;;  %v12340_v61 = vcombine.low %v1003_v24, %v1011_v45  ;;  %v11782_v45 = vcombine.low %v444_v15, %v452_v21 }
 0x29c   :  { %7071 = vmatprep.subr.bf16.mxu0 %v12165_v54  ;;  %7112 = vmatprep.subr.bf16.mxu1 %v12421_v55  ;;  %v739_v54 = vld [vmem:[#allocation2 + $0x1460] sm:$0xff] }
 0x29d   :  { %v987_v55 = vld [vmem:[#allocation2 + $0x1c20] sm:$0xff]  ;;  %v12069_v62 = vcombine.high %v731_v53, %v739_v54  ;;  %v12068_v4 = vcombine.low %v731_v53, %v739_v54  ;;  %v156_v54 = vld [vmem:[#allocation2 + $0x228] sm:$0xff] }
 0x29e   :  { %v995_v56 = vld [vmem:[#allocation2 + $0x1c60] sm:$0xff] }
 0x29f   :  { %7072 = vmatpush2.bf16.msra.mxu0 %v12164_v63  ;;  %7113 = vmatpush2.bf16.msra.mxu1 %v12420_v0  ;;  %v12325_v63 = vcombine.high %v987_v55, %v995_v56  ;;  %v204_v0 = vld [vmem:[#allocation2 + $0x3a8] sm:$0xff]  ;;  %v12324_v9 = vcombine.low %v987_v55, %v995_v56  ;;  %v13733_v22 = vld [vmem:[#allocation4] sm:$0xff] }
 0x2a0   :  { %7073 = vmatprep.subr.bf16.mxu0 %v12149_v1  ;;  %7114 = vmatprep.subr.bf16.mxu1 %v12405_v2  ;;  %v212_v1 = vld [vmem:[#allocation2 + $0x3e8] sm:$0xff] }
 0x2a1   :  { %v460_v2 = vld [vmem:[#allocation2 + $0xba8] sm:$0xff] }
 0x2a2   :  { %v164_v55 = vld [vmem:[#allocation2 + $0x268] sm:$0xff] }
 0x2a3   :  { %7074 = vmatpush2.bf16.msra.mxu0 %v12148_v10  ;;  %7115 = vmatpush2.bf16.msra.mxu1 %v12404_v11  ;;  %v11543_v10 = vcombine.high %v204_v0, %v212_v1  ;;  %v11799_v11 = vcombine.high %v460_v2, %v468_v3  ;;  %v11494_v15 = vcombine.low %v156_v54, %v164_v55 }
 0x2a4   :  { %7075 = vmatprep.subr.bf16.mxu0 %v12133_v12  ;;  %7116 = vmatprep.subr.bf16.mxu1 %v12389_v5  ;;  %v1145_v12 = vsub.s32 7, %v13926_v60  ;;  %v188_v5 = vld [vmem:[#allocation2 + $0x328] sm:$0xff]  ;;  %v13252_v60 = vld [vmem:[#allocation6 + $0xce0] ss:$16 sps:$4 sm:$0xff]  }
 0x2a5   :  { %v11526_v44 = vcombine.low %v188_v5, %v196_v14 }
 0x2a6   :  { %v1146_v29 = vrot.slane %v13733_v22, %v1145_v12 }
 0x2a7   :  { %7076 = vmatpush2.bf16.msra.mxu0 %v12132_v23  ;;  %7117 = vmatpush2.bf16.msra.mxu1 %v12388_v17  ;;  %v1142_v23 = vrot.slane %v13733_v22, %v1141_v8  ;;  %v11542_v17 = vcombine.low %v204_v0, %v212_v1  ;;  %v11510_v0 = vcombine.low %v172_v32, %v180_v47 }
 0x2a8   :  { %7077 = vmatprep.subr.bf16.mxu0 %v12117_v41  ;;  %7118 = vmatprep.subr.bf16.mxu1 %v12373_v26  ;;  %v11798_v41 = vcombine.low %v460_v2, %v468_v3  ;;  %v11527_v26 = vcombine.high %v188_v5, %v196_v14  ;;  %v11495_v3 = vcombine.high %v156_v54, %v164_v55  ;;  %v396_v5 = vld [vmem:[#allocation2 + $0x9a8] sm:$0xff] }
 0x2a9   :  { %v404_v14 = vld [vmem:[#allocation2 + $0x9e8] sm:$0xff] }
 0x2aa   :  { %v356_v54 = vld [vmem:[#allocation2 + $0x868] sm:$0xff] }
 0x2ab   :  { %7078 = vmatpush2.bf16.msra.mxu0 %v12116_v48  ;;  %7119 = vmatpush2.bf16.msra.mxu1 %v12372_v33  ;;  %v428_v33 = vld [vmem:[#allocation2 + $0xaa8] sm:$0xff] }
 0x2ac   :  { %7079 = vmatprep.subr.bf16.mxu0 %v12101_v34  ;;  %7120 = vmatprep.subr.bf16.mxu1 %v12357_v37  ;;  %v436_v34 = vld [vmem:[#allocation2 + $0xae8] sm:$0xff] }
 0x2ad   :  { %v11767_v53 = vcombine.high %v428_v33, %v436_v34  ;;  %v11766_v2 = vcombine.low %v428_v33, %v436_v34  ;;  %v108_v33 = vld [vmem:[#allocation2 + $0xa8] sm:$0xff] }
 0x2ae   :  { %v116_v34 = vld [vmem:[#allocation2 + $0xe8] sm:$0xff] }
 0x2af   :  { %7080 = vmatpush2.bf16.msra.mxu0 %v12100_v49  ;;  %7121 = vmatpush2.bf16.msra.mxu1 %v12356_v50  ;;  %v11511_v49 = vcombine.high %v172_v32, %v180_v47  ;;  %v11734_v32 = vcombine.low %v396_v5, %v404_v14  ;;  %v11446_v55 = vcombine.low %v108_v33, %v116_v34 }
 0x2b0   :  { %7081 = vmatprep.subr.bf16.mxu0 %v12085_v51  ;;  %7122 = vmatprep.subr.bf16.mxu1 %v12341_v52 }
 0x2b3   :  { %7082 = vmatpush2.bf16.msra.mxu0 %v12084_v57  ;;  %7123 = vmatpush2.bf16.msra.mxu1 %v12340_v61  ;;  %v412_v57 = vld [vmem:[#allocation2 + $0xa28] sm:$0xff] }
 0x2b4   :  { %7083 = vmatprep.subr.bf16.mxu0 %v12069_v62  ;;  %7124 = vmatprep.subr.bf16.mxu1 %v12325_v63  ;;  %v420_v61 = vld [vmem:[#allocation2 + $0xa68] sm:$0xff] }
 0x2b5   :  { %v11750_v21 = vcombine.low %v412_v57, %v420_v61 }
 0x2b7   :  { %7084 = vmatpush2.bf16.msra.mxu0 %v12068_v4  ;;  %7125 = vmatpush2.bf16.msra.mxu1 %v12324_v9  ;;  %v11751_v9 = vcombine.high %v412_v57, %v420_v61 }
 0x2b8   :  { %7135 = vmatprep.subr.bf16.mxu0 %v11543_v10  ;;  %7176 = vmatprep.subr.bf16.mxu1 %v11799_v11  ;;  %v140_v10 = vld [vmem:[#allocation2 + $0x1a8] sm:$0xff] }
 0x2b9   :  { %v148_v11 = vld [vmem:[#allocation2 + $0x1e8] sm:$0xff] }
 0x2ba   :  { %v6841_v48 = vpop.f32.mrf.mxu0  ;;  %7086 = vmatmul.mubr.bf16.vlgmr.msra.gmra.mxu0 %v13914_v38  ;;  %v6882_v43 = vpop.f32.mrf.mxu1  ;;  %7127 = vmatmul.mubr.bf16.vlgmr.msra.gmra.mxu1 %v13916_v39  ;;  %v11479_v22 = vcombine.high %v140_v10, %v148_v11 }
 0x2bb   :  { %v6842_v37 = vadd.f32 %v6841_v48, %v1142_v23  ;;  %7136 = vmatpush1.bf16.msra.mxu0 %v11542_v17  ;;  %7177 = vmatpush1.bf16.msra.mxu1 %v11798_v41  ;;  %v11735_v23 = vcombine.high %v396_v5, %v404_v14  ;;  %v124_v17 = vld [vmem:[#allocation2 + $0x128] sm:$0xff] }
 0x2bc   :  { %v6843_v24 = vpop.f32.mrf.mxu0  ;;  %7137 = vmatprep.subr.bf16.mxu0 %v11527_v26  ;;  %v6884_v52 = vpop.f32.mrf.mxu1  ;;  %7178 = vmatprep.subr.bf16.mxu1 %v11783_v30  ;;  %v132_v41 = vld [vmem:[#allocation2 + $0x168] sm:$0xff]  ;;  %v11478_v30 = vcombine.low %v140_v10, %v148_v11 }
 0x2bd   :  { %v14018_v50 = vadd.f32 %v6882_v43, %v6842_v37  ;;  %v6844_v51 = vadd.f32 %v6843_v24, %v1146_v29  ;;  %7167 = vmatprep.mubr.bf16.mxu0 %v13878_v58  ;;  %7208 = vmatprep.mubr.bf16.mxu1 %v13880_v59  ;;  %v380_v26 = vld [vmem:[#allocation2 + $0x928] sm:$0xff]  ;;  %v11463_v47 = vcombine.high %v124_v17, %v132_v41 }
 0x2be   :  { %v6845_v56 = vpop.f32.mrf.mxu0  ;;  %v6886_v63 = vpop.f32.mrf.mxu1  ;;  %v388_v29 = vld [vmem:[#allocation2 + $0x968] sm:$0xff] }
 0x2bf   :  { %v14022_v62 = vadd.f32 %v6884_v52, %v6844_v51  ;;  %7138 = vmatpush1.bf16.msra.mxu0 %v11526_v44  ;;  %7179 = vmatpush1.bf16.msra.mxu1 %v11782_v45  ;;  %v11719_v48 = vcombine.high %v380_v26, %v388_v29  ;;  %v364_v37 = vld [vmem:[#allocation2 + $0x8a8] sm:$0xff]  ;;  %v11462_v44 = vcombine.low %v124_v17, %v132_v41 }
 0x2c0   :  { %v6846_v1 = vpop.f32.mrf.mxu0  ;;  %7139 = vmatprep.subr.bf16.mxu0 %v11511_v49  ;;  %v6887_v4 = vpop.f32.mrf.mxu1  ;;  %7180 = vmatprep.subr.bf16.mxu1 %v11767_v53  ;;  %v372_v43 = vld [vmem:[#allocation2 + $0x8e8] sm:$0xff]  ;;  %v11718_v24 = vcombine.low %v380_v26, %v388_v29  ;;  %v11447_v45 = vcombine.high %v108_v33, %v116_v34 }
 0x2c1   :  { %v11703_v49 = vcombine.high %v364_v37, %v372_v43  ;;  %v92_v51 = vld [vmem:[#allocation2 + $0x28] sm:$0xff]  ;;  %v11702_v56 = vcombine.low %v364_v37, %v372_v43 }
 0x2c2   :  { %v100_v52 = vld [vmem:[#allocation2 + $0x68] sm:$0xff] }
 0x2c3   :  { %7140 = vmatpush1.bf16.msra.mxu0 %v11510_v0  ;;  %7181 = vmatpush1.bf16.msra.mxu1 %v11766_v2  ;;  %v348_v53 = vld [vmem:[#allocation2 + $0x828] sm:$0xff]  ;;  %v11431_v57 = vcombine.high %v92_v51, %v100_v52 }
 0x2c4   :  { %7141 = vmatprep.subr.bf16.mxu0 %v11495_v3  ;;  %7182 = vmatprep.subr.bf16.mxu1 %v11751_v9  ;;  %v11687_v61 = vcombine.high %v348_v53, %v356_v54  ;;  %v332_v63 = vld [vmem:[#allocation2 + $0x7a8] sm:$0xff]  ;;  %v11430_v3 = vcombine.low %v92_v51, %v100_v52  ;;  %v11686_v4 = vcombine.low %v348_v53, %v356_v54 }
 0x2c5   :  { %v340_v0 = vld [vmem:[#allocation2 + $0x7e8] sm:$0xff] }
 0x2c6   :  { %v588_v1 = vld [vmem:[#allocation2 + $0xfa8] sm:$0xff]  ;;  %v11671_v9 = vcombine.high %v332_v63, %v340_v0 }
 0x2c7   :  { %7142 = vmatpush1.bf16.msra.mxu0 %v11494_v15  ;;  %7183 = vmatpush1.bf16.msra.mxu1 %v11750_v21  ;;  %v596_v2 = vld [vmem:[#allocation2 + $0xfe8] sm:$0xff]  ;;  %v11670_v21 = vcombine.low %v332_v63, %v340_v0 }
 0x2c8   :  { %7143 = vmatprep.subr.bf16.mxu0 %v11479_v22  ;;  %7184 = vmatprep.subr.bf16.mxu1 %v11735_v23  ;;  %v11927_v10 = vcombine.high %v588_v1, %v596_v2  ;;  %v316_v11 = vld [vmem:[#allocation2 + $0x728] sm:$0xff]  ;;  %v11926_v22 = vcombine.low %v588_v1, %v596_v2 }
 0x2c9   :  { %v324_v5 = vld [vmem:[#allocation2 + $0x768] sm:$0xff] }
 0x2ca   :  { %v572_v14 = vld [vmem:[#allocation2 + $0xf28] sm:$0xff]  ;;  %v11655_v23 = vcombine.high %v316_v11, %v324_v5 }
 0x2cb   :  { %7144 = vmatpush1.bf16.msra.mxu0 %v11478_v30  ;;  %7185 = vmatpush1.bf16.msra.mxu1 %v11734_v32  ;;  %v580_v15 = vld [vmem:[#allocation2 + $0xf68] sm:$0xff]  ;;  %v11654_v32 = vcombine.low %v316_v11, %v324_v5 }
 0x2cc   :  { %7145 = vmatprep.subr.bf16.mxu0 %v11463_v47  ;;  %7186 = vmatprep.subr.bf16.mxu1 %v11719_v48  ;;  %v11911_v17 = vcombine.high %v572_v14, %v580_v15  ;;  %v300_v41 = vld [vmem:[#allocation2 + $0x6a8] sm:$0xff]  ;;  %v11910_v47 = vcombine.low %v572_v14, %v580_v15 }
 0x2cd   :  { %v308_v26 = vld [vmem:[#allocation2 + $0x6e8] sm:$0xff] }
 0x2ce   :  { %v556_v29 = vld [vmem:[#allocation2 + $0xea8] sm:$0xff]  ;;  %v11639_v48 = vcombine.high %v300_v41, %v308_v26 }
 0x2cf   :  { %7146 = vmatpush1.bf16.msra.mxu0 %v11462_v44  ;;  %7187 = vmatpush1.bf16.msra.mxu1 %v11718_v24  ;;  %v564_v30 = vld [vmem:[#allocation2 + $0xee8] sm:$0xff]  ;;  %v11638_v24 = vcombine.low %v300_v41, %v308_v26 }
 0x2d0   :  { %7147 = vmatprep.subr.bf16.mxu0 %v11447_v45  ;;  %7188 = vmatprep.subr.bf16.mxu1 %v11703_v49  ;;  %v11895_v33 = vcombine.high %v556_v29, %v564_v30  ;;  %v284_v34 = vld [vmem:[#allocation2 + $0x628] sm:$0xff]  ;;  %v11894_v45 = vcombine.low %v556_v29, %v564_v30 }
 0x2d1   :  { %v292_v37 = vld [vmem:[#allocation2 + $0x668] sm:$0xff] }
 0x2d2   :  { %v540_v43 = vld [vmem:[#allocation2 + $0xe28] sm:$0xff]  ;;  %v11623_v49 = vcombine.high %v284_v34, %v292_v37 }
 0x2d3   :  { %7148 = vmatpush1.bf16.msra.mxu0 %v11446_v55  ;;  %7189 = vmatpush1.bf16.msra.mxu1 %v11702_v56  ;;  %v548_v44 = vld [vmem:[#allocation2 + $0xe68] sm:$0xff]  ;;  %v11622_v56 = vcombine.low %v284_v34, %v292_v37 }
 0x2d4   :  { %7149 = vmatprep.subr.bf16.mxu0 %v11431_v57  ;;  %7190 = vmatprep.subr.bf16.mxu1 %v11687_v61  ;;  %v11879_v51 = vcombine.high %v540_v43, %v548_v44  ;;  %v268_v52 = vld [vmem:[#allocation2 + $0x5a8] sm:$0xff]  ;;  %v11878_v57 = vcombine.low %v540_v43, %v548_v44 }
 0x2d5   :  { %v276_v53 = vld [vmem:[#allocation2 + $0x5e8] sm:$0xff] }
 0x2d6   :  { %v524_v54 = vld [vmem:[#allocation2 + $0xda8] sm:$0xff]  ;;  %v11607_v61 = vcombine.high %v268_v52, %v276_v53 }
 0x2d7   :  { %7150 = vmatpush1.bf16.msra.mxu0 %v11430_v3  ;;  %7191 = vmatpush1.bf16.msra.mxu1 %v11686_v4  ;;  %v532_v55 = vld [vmem:[#allocation2 + $0xde8] sm:$0xff]  ;;  %v11606_v4 = vcombine.low %v268_v52, %v276_v53 }
 0x2d8   :  { %7151 = vmatprep.subr.bf16.mxu0 %v11671_v9  ;;  %7192 = vmatprep.subr.bf16.mxu1 %v11927_v10  ;;  %v11863_v63 = vcombine.high %v524_v54, %v532_v55  ;;  %v252_v0 = vld [vmem:[#allocation2 + $0x528] sm:$0xff]  ;;  %v11862_v9 = vcombine.low %v524_v54, %v532_v55 }
 0x2d9   :  { %v260_v1 = vld [vmem:[#allocation2 + $0x568] sm:$0xff] }
 0x2da   :  { %v508_v2 = vld [vmem:[#allocation2 + $0xd28] sm:$0xff]  ;;  %v11591_v10 = vcombine.high %v252_v0, %v260_v1 }
 0x2db   :  { %7152 = vmatpush2.bf16.msra.mxu0 %v11670_v21  ;;  %7193 = vmatpush2.bf16.msra.mxu1 %v11926_v22  ;;  %v516_v3 = vld [vmem:[#allocation2 + $0xd68] sm:$0xff]  ;;  %v11590_v22 = vcombine.low %v252_v0, %v260_v1 }
 0x2dc   :  { %7153 = vmatprep.subr.bf16.mxu0 %v11655_v23  ;;  %7194 = vmatprep.subr.bf16.mxu1 %v11911_v17  ;;  %v11847_v11 = vcombine.high %v508_v2, %v516_v3  ;;  %v236_v5 = vld [vmem:[#allocation2 + $0x4a8] sm:$0xff]  ;;  %v11846_v23 = vcombine.low %v508_v2, %v516_v3 }
 0x2dd   :  { %v244_v14 = vld [vmem:[#allocation2 + $0x4e8] sm:$0xff] }
 0x2de   :  { %v492_v15 = vld [vmem:[#allocation2 + $0xca8] sm:$0xff]  ;;  %v11575_v17 = vcombine.high %v236_v5, %v244_v14 }
 0x2df   :  { %7154 = vmatpush2.bf16.msra.mxu0 %v11654_v32  ;;  %7195 = vmatpush2.bf16.msra.mxu1 %v11910_v47  ;;  %v500_v21 = vld [vmem:[#allocation2 + $0xce8] sm:$0xff]  ;;  %v11574_v47 = vcombine.low %v236_v5, %v244_v14 }
 0x2e0   :  { %7155 = vmatprep.subr.bf16.mxu0 %v11639_v48  ;;  %7196 = vmatprep.subr.bf16.mxu1 %v11895_v33  ;;  %v11831_v41 = vcombine.high %v492_v15, %v500_v21  ;;  %v220_v26 = vld [vmem:[#allocation2 + $0x428] sm:$0xff]  ;;  %v11830_v48 = vcombine.low %v492_v15, %v500_v21 }
 0x2e1   :  { %v228_v29 = vld [vmem:[#allocation2 + $0x468] sm:$0xff] }
 0x2e2   :  { %v476_v30 = vld [vmem:[#allocation2 + $0xc28] sm:$0xff]  ;;  %v11559_v33 = vcombine.high %v220_v26, %v228_v29 }
 0x2e3   :  { %7156 = vmatpush2.bf16.msra.mxu0 %v11638_v24  ;;  %7197 = vmatpush2.bf16.msra.mxu1 %v11894_v45  ;;  %v484_v32 = vld [vmem:[#allocation2 + $0xc68] sm:$0xff]  ;;  %v11558_v45 = vcombine.low %v220_v26, %v228_v29 }
 0x2e4   :  { %7157 = vmatprep.subr.bf16.mxu0 %v11623_v49  ;;  %7198 = vmatprep.subr.bf16.mxu1 %v11879_v51  ;;  %v11815_v34 = vcombine.high %v476_v30, %v484_v32  ;;  %v716_v37 = vld [vmem:[#allocation2 + $0x13a8] sm:$0xff]  ;;  %v11814_v49 = vcombine.low %v476_v30, %v484_v32 }
 0x2e5   :  { %v724_v43 = vld [vmem:[#allocation2 + $0x13e8] sm:$0xff] }
 0x2e6   :  { %v972_v44 = vld [vmem:[#allocation2 + $0x1ba8] sm:$0xff]  ;;  %v12055_v51 = vcombine.high %v716_v37, %v724_v43 }
 0x2e7   :  { %7158 = vmatpush2.bf16.msra.mxu0 %v11622_v56  ;;  %7199 = vmatpush2.bf16.msra.mxu1 %v11878_v57  ;;  %v980_v24 = vld [vmem:[#allocation2 + $0x1be8] sm:$0xff]  ;;  %v12054_v57 = vcombine.low %v716_v37, %v724_v43 }
 0x2e8   :  { %7159 = vmatprep.subr.bf16.mxu0 %v11607_v61  ;;  %7200 = vmatprep.subr.bf16.mxu1 %v11863_v63  ;;  %v12311_v52 = vcombine.high %v972_v44, %v980_v24  ;;  %v700_v53 = vld [vmem:[#allocation2 + $0x1328] sm:$0xff]  ;;  %v12310_v61 = vcombine.low %v972_v44, %v980_v24 }
 0x2e9   :  { %v708_v54 = vld [vmem:[#allocation2 + $0x1368] sm:$0xff] }
 0x2ea   :  { %v956_v55 = vld [vmem:[#allocation2 + $0x1b28] sm:$0xff]  ;;  %v12039_v63 = vcombine.high %v700_v53, %v708_v54  ;;  %v12038_v5 = vcombine.low %v700_v53, %v708_v54 }
 0x2eb   :  { %7160 = vmatpush2.bf16.msra.mxu0 %v11606_v4  ;;  %7201 = vmatpush2.bf16.msra.mxu1 %v11862_v9  ;;  %v964_v56 = vld [vmem:[#allocation2 + $0x1b68] sm:$0xff] }
 0x2ec   :  { %7161 = vmatprep.subr.bf16.mxu0 %v11591_v10  ;;  %7202 = vmatprep.subr.bf16.mxu1 %v11847_v11  ;;  %v12295_v0 = vcombine.high %v956_v55, %v964_v56  ;;  %v684_v1 = vld [vmem:[#allocation2 + $0x12a8] sm:$0xff]  ;;  %v12294_v15 = vcombine.low %v956_v55, %v964_v56 }
 0x2ed   :  { %v692_v2 = vld [vmem:[#allocation2 + $0x12e8] sm:$0xff] }
 0x2ee   :  { %v940_v4 = vld [vmem:[#allocation2 + $0x1aa8] sm:$0xff]  ;;  %v12023_v21 = vcombine.high %v684_v1, %v692_v2 }
 0x2ef   :  { %7162 = vmatpush2.bf16.msra.mxu0 %v11590_v22  ;;  %7203 = vmatpush2.bf16.msra.mxu1 %v11846_v23  ;;  %v948_v9 = vld [vmem:[#allocation2 + $0x1ae8] sm:$0xff] }
 0x2f0   :  { %7163 = vmatprep.subr.bf16.mxu0 %v11575_v17  ;;  %7204 = vmatprep.subr.bf16.mxu1 %v11831_v41  ;;  %v12279_v41 = vcombine.high %v940_v4, %v948_v9  ;;  %v668_v26 = vld [vmem:[#allocation2 + $0x1228] sm:$0xff] }
 0x2f1   :  { %v676_v29 = vld [vmem:[#allocation2 + $0x1268] sm:$0xff] }
 0x2f2   :  { %v924_v30 = vld [vmem:[#allocation2 + $0x1a28] sm:$0xff]  ;;  %v12007_v37 = vcombine.high %v668_v26, %v676_v29 }
 0x2f3   :  { %7164 = vmatpush2.bf16.msra.mxu0 %v11574_v47  ;;  %7205 = vmatpush2.bf16.msra.mxu1 %v11830_v48  ;;  %v932_v32 = vld [vmem:[#allocation2 + $0x1a68] sm:$0xff] }
 0x2f4   :  { %7165 = vmatprep.subr.bf16.mxu0 %v11559_v33  ;;  %7206 = vmatprep.subr.bf16.mxu1 %v11815_v34  ;;  %v12022_v33 = vcombine.low %v684_v1, %v692_v2  ;;  %v12263_v44 = vcombine.high %v924_v30, %v932_v32  ;;  %v652_v24 = vld [vmem:[#allocation2 + $0x11a8] sm:$0xff]  ;;  %v12262_v53 = vcombine.low %v924_v30, %v932_v32 }
 0x2f5   :  { %v636_v56 = vld [vmem:[#allocation2 + $0x1128] sm:$0xff] }
 0x2f7   :  { %7166 = vmatpush2.bf16.msra.mxu0 %v11558_v45  ;;  %7207 = vmatpush2.bf16.msra.mxu1 %v11814_v49  ;;  %v660_v45 = vld [vmem:[#allocation2 + $0x11e8] sm:$0xff] }
 0x2f8   :  { %7217 = vmatprep.subr.bf16.mxu0 %v12055_v51  ;;  %7258 = vmatprep.subr.bf16.mxu1 %v12311_v52  ;;  %v908_v49 = vld [vmem:[#allocation2 + $0x19a8] sm:$0xff]  ;;  %v12006_v52 = vcombine.low %v668_v26, %v676_v29  ;;  %v11991_v54 = vcombine.high %v652_v24, %v660_v45 }
 0x2f9   :  { %v916_v51 = vld [vmem:[#allocation2 + $0x19e8] sm:$0xff] }
 0x2fa   :  { %v6923_v3 = vpop.f32.mrf.mxu0  ;;  %7168 = vmatmul.mubr.bf16.vlgmr.msra.gmra.mxu0 %v13890_v16  ;;  %v6964_v11 = vpop.f32.mrf.mxu1  ;;  %7209 = vmatmul.mubr.bf16.vlgmr.msra.gmra.mxu1 %v13895_v20  ;;  %v12247_v55 = vcombine.high %v908_v49, %v916_v51  ;;  %v12246_v1 = vcombine.low %v908_v49, %v916_v51  ;;  %v868_v26 = vld [vmem:[#allocation2 + $0x1868] sm:$0xff] }
 0x2fb   :  { %v6924_v10 = vadd.f32 %v6923_v3, %v14018_v50  ;;  %7218 = vmatpush1.bf16.msra.mxu0 %v12054_v57  ;;  %7259 = vmatpush1.bf16.msra.mxu1 %v12310_v61  ;;  %v644_v57 = vld [vmem:[#allocation2 + $0x1168] sm:$0xff] }
 0x2fc   :  { %v6925_v14 = vpop.f32.mrf.mxu0  ;;  %7219 = vmatprep.subr.bf16.mxu0 %v12039_v63  ;;  %v6966_v17 = vpop.f32.mrf.mxu1  ;;  %7260 = vmatprep.subr.bf16.mxu1 %v12295_v0  ;;  %v892_v61 = vld [vmem:[#allocation2 + $0x1928] sm:$0xff]  ;;  %v11990_v0 = vcombine.low %v652_v24, %v660_v45  ;;  %v11975_v2 = vcombine.high %v636_v56, %v644_v57 }
 0x2fd   :  { %v14027_v22 = vadd.f32 %v6964_v11, %v6924_v10  ;;  %v6926_v23 = vadd.f32 %v6925_v14, %v14022_v62  ;;  %7249 = vmatprep.mubr.bf16.mxu0 %v13900_v28  ;;  %7290 = vmatprep.mubr.bf16.mxu1 %v13903_v31  ;;  %v12278_v62 = vcombine.low %v940_v4, %v948_v9  ;;  %v900_v63 = vld [vmem:[#allocation2 + $0x1968] sm:$0xff] }
 0x2fe   :  { %v6927_v50 = vpop.f32.mrf.mxu0  ;;  %v6968_v48 = vpop.f32.mrf.mxu1  ;;  %v12231_v3 = vcombine.high %v892_v61, %v900_v63  ;;  %v620_v4 = vld [vmem:[#allocation2 + $0x10a8] sm:$0xff]  ;;  %v12230_v14 = vcombine.low %v892_v61, %v900_v63 }
 0x2ff   :  { %v14032_v47 = vadd.f32 %v6966_v17, %v6926_v23  ;;  %7220 = vmatpush1.bf16.msra.mxu0 %v12038_v5  ;;  %7261 = vmatpush1.bf16.msra.mxu1 %v12294_v15  ;;  %v628_v9 = vld [vmem:[#allocation2 + $0x10e8] sm:$0xff]  ;;  %v11974_v5 = vcombine.low %v636_v56, %v644_v57 }
 0x300   :  { %v6928_v34 = vpop.f32.mrf.mxu0  ;;  %7221 = vmatprep.subr.bf16.mxu0 %v12023_v21  ;;  %v6969_v43 = vpop.f32.mrf.mxu1  ;;  %7262 = vmatprep.subr.bf16.mxu1 %v12279_v41  ;;  %v876_v10 = vld [vmem:[#allocation2 + $0x18a8] sm:$0xff]  ;;  %v11959_v15 = vcombine.high %v620_v4, %v628_v9  ;;  %v11958_v29 = vcombine.low %v620_v4, %v628_v9 }
 0x301   :  { %v884_v11 = vld [vmem:[#allocation2 + $0x18e8] sm:$0xff] }
 0x302   :  { %v12215_v21 = vcombine.high %v876_v10, %v884_v11  ;;  %v604_v23 = vld [vmem:[#allocation2 + $0x1028] sm:$0xff]  ;;  %v12214_v50 = vcombine.low %v876_v10, %v884_v11 }
 0x303   :  { %7222 = vmatpush1.bf16.msra.mxu0 %v12022_v33  ;;  %7263 = vmatpush1.bf16.msra.mxu1 %v12278_v62  ;;  %v612_v17 = vld [vmem:[#allocation2 + $0x1068] sm:$0xff] }
 0x304   :  { %7223 = vmatprep.subr.bf16.mxu0 %v12007_v37  ;;  %7264 = vmatprep.subr.bf16.mxu1 %v12263_v44  ;;  %v860_v41 = vld [vmem:[#allocation2 + $0x1828] sm:$0xff]  ;;  %v11943_v30 = vcombine.high %v604_v23, %v612_v17  ;;  %v11942_v37 = vcombine.low %v604_v23, %v612_v17 }
 0x305   :  { %v12199_v32 = vcombine.high %v860_v41, %v868_v26  ;;  %v844_v48 = vld [vmem:[#allocation2 + $0x17a8] sm:$0xff]  ;;  %v12198_v43 = vcombine.low %v860_v41, %v868_v26 }
 0x306   :  { %v852_v33 = vld [vmem:[#allocation2 + $0x17e8] sm:$0xff] }
 0x307   :  { %7224 = vmatpush1.bf16.msra.mxu0 %v12006_v52  ;;  %7265 = vmatpush1.bf16.msra.mxu1 %v12262_v53  ;;  %v1100_v34 = vld [vmem:[#allocation2 + $0x1fa8] sm:$0xff]  ;;  %v12183_v44 = vcombine.high %v844_v48, %v852_v33  ;;  %v12182_v53 = vcombine.low %v844_v48, %v852_v33 }
 0x308   :  { %7225 = vmatprep.subr.bf16.mxu0 %v11991_v54  ;;  %7266 = vmatprep.subr.bf16.mxu1 %v12247_v55  ;;  %v1108_v62 = vld [vmem:[#allocation2 + $0x1fe8] sm:$0xff] }
 0x309   :  { %v12439_v24 = vcombine.high %v1100_v34, %v1108_v62  ;;  %v828_v45 = vld [vmem:[#allocation2 + $0x1728] sm:$0xff]  ;;  %v12438_v54 = vcombine.low %v1100_v34, %v1108_v62 }
 0x30a   :  { %v836_v49 = vld [vmem:[#allocation2 + $0x1768] sm:$0xff] }
 0x30b   :  { %7226 = vmatpush1.bf16.msra.mxu0 %v11990_v0  ;;  %7267 = vmatpush1.bf16.msra.mxu1 %v12246_v1  ;;  %v1084_v51 = vld [vmem:[#allocation2 + $0x1f28] sm:$0xff]  ;;  %v12167_v55 = vcombine.high %v828_v45, %v836_v49  ;;  %v12166_v1 = vcombine.low %v828_v45, %v836_v49 }
 0x30c   :  { %7227 = vmatprep.subr.bf16.mxu0 %v11975_v2  ;;  %7268 = vmatprep.subr.bf16.mxu1 %v12231_v3  ;;  %v1092_v52 = vld [vmem:[#allocation2 + $0x1f68] sm:$0xff] }
 0x30d   :  { %v12423_v56 = vcombine.high %v1084_v51, %v1092_v52  ;;  %v812_v57 = vld [vmem:[#allocation2 + $0x16a8] sm:$0xff]  ;;  %v12422_v2 = vcombine.low %v1084_v51, %v1092_v52 }
 0x30e   :  { %v820_v61 = vld [vmem:[#allocation2 + $0x16e8] sm:$0xff] }
 0x30f   :  { %7228 = vmatpush1.bf16.msra.mxu0 %v11974_v5  ;;  %7269 = vmatpush1.bf16.msra.mxu1 %v12230_v14  ;;  %v1068_v63 = vld [vmem:[#allocation2 + $0x1ea8] sm:$0xff]  ;;  %v12151_v3 = vcombine.high %v812_v57, %v820_v61  ;;  %v12150_v14 = vcombine.low %v812_v57, %v820_v61 }
 0x310   :  { %7229 = vmatprep.subr.bf16.mxu0 %v11959_v15  ;;  %7270 = vmatprep.subr.bf16.mxu1 %v12215_v21  ;;  %v1076_v0 = vld [vmem:[#allocation2 + $0x1ee8] sm:$0xff] }
 0x311   :  { %v12407_v4 = vcombine.high %v1068_v63, %v1076_v0  ;;  %v796_v9 = vld [vmem:[#allocation2 + $0x1628] sm:$0xff]  ;;  %v12406_v15 = vcombine.low %v1068_v63, %v1076_v0 }
 0x312   :  { %v804_v10 = vld [vmem:[#allocation2 + $0x1668] sm:$0xff] }
 0x313   :  { %7230 = vmatpush1.bf16.msra.mxu0 %v11958_v29  ;;  %7271 = vmatpush1.bf16.msra.mxu1 %v12214_v50  ;;  %v1052_v11 = vld [vmem:[#allocation2 + $0x1e28] sm:$0xff]  ;;  %v12135_v21 = vcombine.high %v796_v9, %v804_v10  ;;  %v12134_v50 = vcombine.low %v796_v9, %v804_v10  ;;  %v205_v10 = vld [vmem:[#allocation2 + $0x3b0] sm:$0xff] }
 0x314   :  { %7231 = vmatprep.subr.bf16.mxu0 %v11943_v30  ;;  %7272 = vmatprep.subr.bf16.mxu1 %v12199_v32  ;;  %v1060_v5 = vld [vmem:[#allocation2 + $0x1e68] sm:$0xff] }
 0x315   :  { %v12391_v23 = vcombine.high %v1052_v11, %v1060_v5  ;;  %v780_v17 = vld [vmem:[#allocation2 + $0x15a8] sm:$0xff]  ;;  %v12390_v30 = vcombine.low %v1052_v11, %v1060_v5  ;;  %v213_v11 = vld [vmem:[#allocation2 + $0x3f0] sm:$0xff] }
 0x316   :  { %v788_v41 = vld [vmem:[#allocation2 + $0x15e8] sm:$0xff]  ;;  %v461_v5 = vld [vmem:[#allocation2 + $0xbb0] sm:$0xff] }
 0x317   :  { %7232 = vmatpush1.bf16.msra.mxu0 %v11942_v37  ;;  %7273 = vmatpush1.bf16.msra.mxu1 %v12198_v43  ;;  %v1036_v26 = vld [vmem:[#allocation2 + $0x1da8] sm:$0xff]  ;;  %v12119_v32 = vcombine.high %v780_v17, %v788_v41  ;;  %v12118_v43 = vcombine.low %v780_v17, %v788_v41  ;;  %v11545_v17 = vcombine.high %v205_v10, %v213_v11 }
 0x318   :  { %7233 = vmatprep.subr.bf16.mxu0 %v12183_v44  ;;  %7274 = vmatprep.subr.bf16.mxu1 %v12439_v24  ;;  %v1044_v29 = vld [vmem:[#allocation2 + $0x1de8] sm:$0xff] }
 0x319   :  { %v12375_v48 = vcombine.high %v1036_v26, %v1044_v29  ;;  %v764_v33 = vld [vmem:[#allocation2 + $0x1528] sm:$0xff]  ;;  %v12374_v44 = vcombine.low %v1036_v26, %v1044_v29  ;;  %v189_v26 = vld [vmem:[#allocation2 + $0x330] sm:$0xff] }
 0x31a   :  { %v772_v34 = vld [vmem:[#allocation2 + $0x1568] sm:$0xff]  ;;  %v197_v29 = vld [vmem:[#allocation2 + $0x370] sm:$0xff] }
 0x31b   :  { %7234 = vmatpush2.bf16.msra.mxu0 %v12182_v53  ;;  %7275 = vmatpush2.bf16.msra.mxu1 %v12438_v54  ;;  %v1020_v62 = vld [vmem:[#allocation2 + $0x1d28] sm:$0xff]  ;;  %v12103_v24 = vcombine.high %v764_v33, %v772_v34  ;;  %v12102_v54 = vcombine.low %v764_v33, %v772_v34  ;;  %v11529_v34 = vcombine.high %v189_v26, %v197_v29 }
 0x31c   :  { %7235 = vmatprep.subr.bf16.mxu0 %v12167_v55  ;;  %7276 = vmatprep.subr.bf16.mxu1 %v12423_v56  ;;  %v1028_v37 = vld [vmem:[#allocation2 + $0x1d68] sm:$0xff] }
 0x31d   :  { %v12359_v45 = vcombine.high %v1020_v62, %v1028_v37  ;;  %v748_v49 = vld [vmem:[#allocation2 + $0x14a8] sm:$0xff]  ;;  %v12358_v55 = vcombine.low %v1020_v62, %v1028_v37 }
 0x31e   :  { %v756_v51 = vld [vmem:[#allocation2 + $0x14e8] sm:$0xff] }
 0x31f   :  { %7236 = vmatpush2.bf16.msra.mxu0 %v12166_v1  ;;  %7277 = vmatpush2.bf16.msra.mxu1 %v12422_v2  ;;  %v1004_v52 = vld [vmem:[#allocation2 + $0x1ca8] sm:$0xff]  ;;  %v12087_v56 = vcombine.high %v748_v49, %v756_v51  ;;  %v12086_v2 = vcombine.low %v748_v49, %v756_v51  ;;  %v437_v49 = vld [vmem:[#allocation2 + $0xaf0] sm:$0xff] }
 0x320   :  { %7237 = vmatprep.subr.bf16.mxu0 %v12151_v3  ;;  %7278 = vmatprep.subr.bf16.mxu1 %v12407_v4  ;;  %v1012_v53 = vld [vmem:[#allocation2 + $0x1ce8] sm:$0xff] }
 0x321   :  { %v12343_v57 = vcombine.high %v1004_v52, %v1012_v53  ;;  %v732_v61 = vld [vmem:[#allocation2 + $0x1428] sm:$0xff]  ;;  %v12342_v3 = vcombine.low %v1004_v52, %v1012_v53  ;;  %v11528_v53 = vcombine.low %v189_v26, %v197_v29  ;;  %v141_v26 = vld [vmem:[#allocation2 + $0x1b0] sm:$0xff] }
 0x322   :  { %v740_v63 = vld [vmem:[#allocation2 + $0x1468] sm:$0xff]  ;;  %v149_v29 = vld [vmem:[#allocation2 + $0x1f0] sm:$0xff] }
 0x323   :  { %7238 = vmatpush2.bf16.msra.mxu0 %v12150_v14  ;;  %7279 = vmatpush2.bf16.msra.mxu1 %v12406_v15  ;;  %v988_v0 = vld [vmem:[#allocation2 + $0x1c28] sm:$0xff]  ;;  %v12071_v4 = vcombine.high %v732_v61, %v740_v63  ;;  %v469_v14 = vld [vmem:[#allocation2 + $0xbf0] sm:$0xff]  ;;  %v12070_v15 = vcombine.low %v732_v61, %v740_v63 }
 0x324   :  { %7239 = vmatprep.subr.bf16.mxu0 %v12135_v21  ;;  %7280 = vmatprep.subr.bf16.mxu1 %v12391_v23  ;;  %v996_v1 = vld [vmem:[#allocation2 + $0x1c68] sm:$0xff]  ;;  %v11801_v41 = vcombine.high %v461_v5, %v469_v14  ;;  %v11800_v33 = vcombine.low %v461_v5, %v469_v14 }
 0x325   :  { %v12327_v9 = vcombine.high %v988_v0, %v996_v1  ;;  %v12326_v21 = vcombine.low %v988_v0, %v996_v1  ;;  %v14034_v23 = vld [vmem:[#allocation4 + $0x8] sm:$0xff]  ;;  %v157_v1 = vld [vmem:[#allocation2 + $0x230] sm:$0xff] }
 0x326   :  { %v1154_v62 = vrot.slane %v14034_v23, %v13932_v13 }
 0x327   :  { %7240 = vmatpush2.bf16.msra.mxu0 %v12134_v50  ;;  %7281 = vmatpush2.bf16.msra.mxu1 %v12390_v30  ;;  %v445_v50 = vld [vmem:[#allocation2 + $0xb30] sm:$0xff] }
 0x328   :  { %7241 = vmatprep.subr.bf16.mxu0 %v12119_v32  ;;  %7282 = vmatprep.subr.bf16.mxu1 %v12375_v48  ;;  %v453_v30 = vld [vmem:[#allocation2 + $0xb70] sm:$0xff]  ;;  %v1150_v32 = vrot.slane %v14034_v23, %v13929_v6  ;;  %v11544_v48 = vcombine.low %v205_v10, %v213_v11 }
 0x329   :  { %v11785_v37 = vcombine.high %v445_v50, %v453_v30 }
 0x32b   :  { %7242 = vmatpush2.bf16.msra.mxu0 %v12118_v43  ;;  %7283 = vmatpush2.bf16.msra.mxu1 %v12374_v44  ;;  %v173_v43 = vld [vmem:[#allocation2 + $0x2b0] sm:$0xff] }
 0x32c   :  { %7243 = vmatprep.subr.bf16.mxu0 %v12103_v24  ;;  %7284 = vmatprep.subr.bf16.mxu1 %v12359_v45  ;;  %v181_v44 = vld [vmem:[#allocation2 + $0x2f0] sm:$0xff] }
 0x32d   :  { %v429_v45 = vld [vmem:[#allocation2 + $0xab0] sm:$0xff]  ;;  %v11512_v5 = vcombine.low %v173_v43, %v181_v44 }
 0x32e   :  { %v11769_v0 = vcombine.high %v429_v45, %v437_v49 }
 0x32f   :  { %7244 = vmatpush2.bf16.msra.mxu0 %v12102_v54  ;;  %7285 = vmatpush2.bf16.msra.mxu1 %v12358_v55  ;;  %v11784_v55 = vcombine.low %v445_v50, %v453_v30  ;;  %v397_v50 = vld [vmem:[#allocation2 + $0x9b0] sm:$0xff] }
 0x330   :  { %7245 = vmatprep.subr.bf16.mxu0 %v12087_v56  ;;  %7286 = vmatprep.subr.bf16.mxu1 %v12343_v57  ;;  %v11513_v56 = vcombine.high %v173_v43, %v181_v44  ;;  %v405_v30 = vld [vmem:[#allocation2 + $0x9f0] sm:$0xff] }
 0x331   :  { %v381_v43 = vld [vmem:[#allocation2 + $0x930] sm:$0xff] }
 0x332   :  { %v389_v44 = vld [vmem:[#allocation2 + $0x970] sm:$0xff] }
 0x333   :  { %7246 = vmatpush2.bf16.msra.mxu0 %v12086_v2  ;;  %7287 = vmatpush2.bf16.msra.mxu1 %v12342_v3  ;;  %v165_v2 = vld [vmem:[#allocation2 + $0x270] sm:$0xff] }
 0x334   :  { %7247 = vmatprep.subr.bf16.mxu0 %v12071_v4  ;;  %7288 = vmatprep.subr.bf16.mxu1 %v12327_v9  ;;  %v413_v4 = vld [vmem:[#allocation2 + $0xa30] sm:$0xff] }
 0x335   :  { %v421_v9 = vld [vmem:[#allocation2 + $0xa70] sm:$0xff] }
 0x337   :  { %7248 = vmatpush2.bf16.msra.mxu0 %v12070_v15  ;;  %7289 = vmatpush2.bf16.msra.mxu1 %v12326_v21  ;;  %v11768_v15 = vcombine.low %v429_v45, %v437_v49  ;;  %v11497_v21 = vcombine.high %v157_v1, %v165_v2  ;;  %v11736_v45 = vcombine.low %v397_v50, %v405_v30 }
 0x338   :  { %7299 = vmatprep.subr.bf16.mxu0 %v11545_v17  ;;  %7340 = vmatprep.subr.bf16.mxu1 %v11801_v41  ;;  %v11753_v41 = vcombine.high %v413_v4, %v421_v9 }
 0x33a   :  { %v7005_v24 = vpop.f32.mrf.mxu0  ;;  %7250 = vmatmul.mubr.bf16.vlgmr.msra.gmra.mxu0 %v13914_v38  ;;  %v7046_v52 = vpop.f32.mrf.mxu1  ;;  %7291 = vmatmul.mubr.bf16.vlgmr.msra.gmra.mxu1 %v13916_v39 }
 0x33b   :  { %v7006_v51 = vadd.f32 %v7005_v24, %v1150_v32  ;;  %7300 = vmatpush1.bf16.msra.mxu0 %v11544_v48  ;;  %7341 = vmatpush1.bf16.msra.mxu1 %v11800_v33  ;;  %v11496_v32 = vcombine.low %v157_v1, %v165_v2  ;;  %v11752_v48 = vcombine.low %v413_v4, %v421_v9  ;;  %v93_v1 = vld [vmem:[#allocation2 + $0x30] sm:$0xff] }
 0x33c   :  { %v7007_v54 = vpop.f32.mrf.mxu0  ;;  %7301 = vmatprep.subr.bf16.mxu0 %v11529_v34  ;;  %v7048_v63 = vpop.f32.mrf.mxu1  ;;  %7342 = vmatprep.subr.bf16.mxu1 %v11785_v37  ;;  %v11481_v33 = vcombine.high %v141_v26, %v149_v29  ;;  %v11737_v34 = vcombine.high %v397_v50, %v405_v30  ;;  %v133_v37 = vld [vmem:[#allocation2 + $0x170] sm:$0xff]  ;;  %v11480_v24 = vcombine.low %v141_v26, %v149_v29 }
 0x33d   :  { %v14042_v57 = vadd.f32 %v7046_v52, %v7006_v51  ;;  %v7008_v61 = vadd.f32 %v7007_v54, %v1154_v62  ;;  %7331 = vmatprep.mubr.bf16.mxu0 %v13878_v58  ;;  %7372 = vmatprep.mubr.bf16.mxu1 %v13880_v59  ;;  %v125_v62 = vld [vmem:[#allocation2 + $0x130] sm:$0xff]  ;;  %v11721_v51 = vcombine.high %v381_v43, %v389_v44 }
 0x33e   :  { %v7009_v3 = vpop.f32.mrf.mxu0  ;;  %v7050_v11 = vpop.f32.mrf.mxu1  ;;  %v11465_v49 = vcombine.high %v125_v62, %v133_v37  ;;  %v109_v52 = vld [vmem:[#allocation2 + $0xb0] sm:$0xff] }
 0x33f   :  { %v14046_v10 = vadd.f32 %v7048_v63, %v7008_v61  ;;  %7302 = vmatpush1.bf16.msra.mxu0 %v11528_v53  ;;  %7343 = vmatpush1.bf16.msra.mxu1 %v11784_v55  ;;  %v117_v53 = vld [vmem:[#allocation2 + $0xf0] sm:$0xff]  ;;  %v11720_v61 = vcombine.low %v381_v43, %v389_v44 }
 0x340   :  { %v7010_v14 = vpop.f32.mrf.mxu0  ;;  %7303 = vmatprep.subr.bf16.mxu0 %v11513_v56  ;;  %v7051_v17 = vpop.f32.mrf.mxu1  ;;  %7344 = vmatprep.subr.bf16.mxu1 %v11769_v0  ;;  %v365_v54 = vld [vmem:[#allocation2 + $0x8b0] sm:$0xff]  ;;  %v11464_v56 = vcombine.low %v125_v62, %v133_v37  ;;  %v11449_v63 = vcombine.high %v109_v52, %v117_v53  ;;  %v11448_v9 = vcombine.low %v109_v52, %v117_v53 }
 0x341   :  { %v373_v55 = vld [vmem:[#allocation2 + $0x8f0] sm:$0xff] }
 0x342   :  { %v11705_v0 = vcombine.high %v365_v54, %v373_v55  ;;  %v101_v2 = vld [vmem:[#allocation2 + $0x70] sm:$0xff]  ;;  %v11704_v11 = vcombine.low %v365_v54, %v373_v55 }
 0x343   :  { %7304 = vmatpush1.bf16.msra.mxu0 %v11512_v5  ;;  %7345 = vmatpush1.bf16.msra.mxu1 %v11768_v15  ;;  %v349_v3 = vld [vmem:[#allocation2 + $0x830] sm:$0xff]  ;;  %v11433_v5 = vcombine.high %v93_v1, %v101_v2  ;;  %v11432_v26 = vcombine.low %v93_v1, %v101_v2 }
 0x344   :  { %7305 = vmatprep.subr.bf16.mxu0 %v11497_v21  ;;  %7346 = vmatprep.subr.bf16.mxu1 %v11753_v41  ;;  %v357_v4 = vld [vmem:[#allocation2 + $0x870] sm:$0xff] }
 0x345   :  { %v11689_v14 = vcombine.high %v349_v3, %v357_v4  ;;  %v333_v15 = vld [vmem:[#allocation2 + $0x7b0] sm:$0xff]  ;;  %v11688_v29 = vcombine.low %v349_v3, %v357_v4 }
 0x346   :  { %v341_v21 = vld [vmem:[#allocation2 + $0x7f0] sm:$0xff] }
 0x347   :  { %7306 = vmatpush1.bf16.msra.mxu0 %v11496_v32  ;;  %7347 = vmatpush1.bf16.msra.mxu1 %v11752_v48  ;;  %v589_v17 = vld [vmem:[#allocation2 + $0xfb0] sm:$0xff]  ;;  %v11673_v50 = vcombine.high %v333_v15, %v341_v21  ;;  %v11672_v62 = vcombine.low %v333_v15, %v341_v21 }
 0x348   :  { %7307 = vmatprep.subr.bf16.mxu0 %v11481_v33  ;;  %7348 = vmatprep.subr.bf16.mxu1 %v11737_v34  ;;  %v597_v41 = vld [vmem:[#allocation2 + $0xff0] sm:$0xff] }
 0x349   :  { %v11929_v30 = vcombine.high %v589_v17, %v597_v41  ;;  %v317_v32 = vld [vmem:[#allocation2 + $0x730] sm:$0xff]  ;;  %v11928_v37 = vcombine.low %v589_v17, %v597_v41 }
 0x34a   :  { %v325_v48 = vld [vmem:[#allocation2 + $0x770] sm:$0xff] }
 0x34b   :  { %7308 = vmatpush1.bf16.msra.mxu0 %v11480_v24  ;;  %7349 = vmatpush1.bf16.msra.mxu1 %v11736_v45  ;;  %v573_v33 = vld [vmem:[#allocation2 + $0xf30] sm:$0xff]  ;;  %v11657_v43 = vcombine.high %v317_v32, %v325_v48  ;;  %v11656_v52 = vcombine.low %v317_v32, %v325_v48 }
 0x34c   :  { %7309 = vmatprep.subr.bf16.mxu0 %v11465_v49  ;;  %7350 = vmatprep.subr.bf16.mxu1 %v11721_v51  ;;  %v581_v34 = vld [vmem:[#allocation2 + $0xf70] sm:$0xff] }
 0x34d   :  { %v11913_v44 = vcombine.high %v573_v33, %v581_v34  ;;  %v301_v24 = vld [vmem:[#allocation2 + $0x6b0] sm:$0xff]  ;;  %v11912_v53 = vcombine.low %v573_v33, %v581_v34 }
 0x34e   :  { %v309_v45 = vld [vmem:[#allocation2 + $0x6f0] sm:$0xff] }
 0x34f   :  { %7310 = vmatpush1.bf16.msra.mxu0 %v11464_v56  ;;  %7351 = vmatpush1.bf16.msra.mxu1 %v11720_v61  ;;  %v557_v49 = vld [vmem:[#allocation2 + $0xeb0] sm:$0xff]  ;;  %v11641_v54 = vcombine.high %v301_v24, %v309_v45  ;;  %v11640_v1 = vcombine.low %v301_v24, %v309_v45 }
 0x350   :  { %7311 = vmatprep.subr.bf16.mxu0 %v11449_v63  ;;  %7352 = vmatprep.subr.bf16.mxu1 %v11705_v0  ;;  %v565_v51 = vld [vmem:[#allocation2 + $0xef0] sm:$0xff] }
 0x351   :  { %v11897_v55 = vcombine.high %v557_v49, %v565_v51  ;;  %v285_v56 = vld [vmem:[#allocation2 + $0x630] sm:$0xff]  ;;  %v11896_v2 = vcombine.low %v557_v49, %v565_v51 }
 0x352   :  { %v293_v61 = vld [vmem:[#allocation2 + $0x670] sm:$0xff] }
 0x353   :  { %7312 = vmatpush1.bf16.msra.mxu0 %v11448_v9  ;;  %7353 = vmatpush1.bf16.msra.mxu1 %v11704_v11  ;;  %v541_v63 = vld [vmem:[#allocation2 + $0xe30] sm:$0xff]  ;;  %v11625_v3 = vcombine.high %v285_v56, %v293_v61  ;;  %v11624_v15 = vcombine.low %v285_v56, %v293_v61 }
 0x354   :  { %7313 = vmatprep.subr.bf16.mxu0 %v11433_v5  ;;  %7354 = vmatprep.subr.bf16.mxu1 %v11689_v14  ;;  %v549_v0 = vld [vmem:[#allocation2 + $0xe70] sm:$0xff] }
 0x355   :  { %v11881_v4 = vcombine.high %v541_v63, %v549_v0  ;;  %v269_v9 = vld [vmem:[#allocation2 + $0x5b0] sm:$0xff]  ;;  %v11880_v21 = vcombine.low %v541_v63, %v549_v0 }
 0x356   :  { %v277_v11 = vld [vmem:[#allocation2 + $0x5f0] sm:$0xff] }
 0x357   :  { %7314 = vmatpush1.bf16.msra.mxu0 %v11432_v26  ;;  %7355 = vmatpush1.bf16.msra.mxu1 %v11688_v29  ;;  %v525_v5 = vld [vmem:[#allocation2 + $0xdb0] sm:$0xff]  ;;  %v11609_v17 = vcombine.high %v269_v9, %v277_v11  ;;  %v11608_v32 = vcombine.low %v269_v9, %v277_v11 }
 0x358   :  { %7315 = vmatprep.subr.bf16.mxu0 %v11673_v50  ;;  %7356 = vmatprep.subr.bf16.mxu1 %v11929_v30  ;;  %v533_v14 = vld [vmem:[#allocation2 + $0xdf0] sm:$0xff] }
 0x359   :  { %v11865_v41 = vcombine.high %v525_v5, %v533_v14  ;;  %v253_v26 = vld [vmem:[#allocation2 + $0x530] sm:$0xff]  ;;  %v11864_v48 = vcombine.low %v525_v5, %v533_v14 }
 0x35a   :  { %v261_v29 = vld [vmem:[#allocation2 + $0x570] sm:$0xff] }
 0x35b   :  { %7316 = vmatpush2.bf16.msra.mxu0 %v11672_v62  ;;  %7357 = vmatpush2.bf16.msra.mxu1 %v11928_v37  ;;  %v509_v50 = vld [vmem:[#allocation2 + $0xd30] sm:$0xff]  ;;  %v11593_v33 = vcombine.high %v253_v26, %v261_v29  ;;  %v11592_v24 = vcombine.low %v253_v26, %v261_v29 }
 0x35c   :  { %7317 = vmatprep.subr.bf16.mxu0 %v11657_v43  ;;  %7358 = vmatprep.subr.bf16.mxu1 %v11913_v44  ;;  %v517_v30 = vld [vmem:[#allocation2 + $0xd70] sm:$0xff] }
 0x35d   :  { %v11849_v34 = vcombine.high %v509_v50, %v517_v30  ;;  %v237_v62 = vld [vmem:[#allocation2 + $0x4b0] sm:$0xff]  ;;  %v11848_v45 = vcombine.low %v509_v50, %v517_v30 }
 0x35e   :  { %v245_v37 = vld [vmem:[#allocation2 + $0x4f0] sm:$0xff] }
 0x35f   :  { %7318 = vmatpush2.bf16.msra.mxu0 %v11656_v52  ;;  %7359 = vmatpush2.bf16.msra.mxu1 %v11912_v53  ;;  %v493_v43 = vld [vmem:[#allocation2 + $0xcb0] sm:$0xff]  ;;  %v11577_v49 = vcombine.high %v237_v62, %v245_v37  ;;  %v11576_v56 = vcombine.low %v237_v62, %v245_v37 }
 0x360   :  { %7319 = vmatprep.subr.bf16.mxu0 %v11641_v54  ;;  %7360 = vmatprep.subr.bf16.mxu1 %v11897_v55  ;;  %v501_v44 = vld [vmem:[#allocation2 + $0xcf0] sm:$0xff] }
 0x361   :  { %v11833_v51 = vcombine.high %v493_v43, %v501_v44  ;;  %v221_v52 = vld [vmem:[#allocation2 + $0x430] sm:$0xff]  ;;  %v11832_v61 = vcombine.low %v493_v43, %v501_v44 }
 0x362   :  { %v229_v53 = vld [vmem:[#allocation2 + $0x470] sm:$0xff] }
 0x363   :  { %7320 = vmatpush2.bf16.msra.mxu0 %v11640_v1  ;;  %7361 = vmatpush2.bf16.msra.mxu1 %v11896_v2  ;;  %v477_v54 = vld [vmem:[#allocation2 + $0xc30] sm:$0xff]  ;;  %v11561_v63 = vcombine.high %v221_v52, %v229_v53  ;;  %v11560_v9 = vcombine.low %v221_v52, %v229_v53 }
 0x364   :  { %7321 = vmatprep.subr.bf16.mxu0 %v11625_v3  ;;  %7362 = vmatprep.subr.bf16.mxu1 %v11881_v4  ;;  %v485_v55 = vld [vmem:[#allocation2 + $0xc70] sm:$0xff] }
 0x365   :  { %v11817_v0 = vcombine.high %v477_v54, %v485_v55  ;;  %v717_v1 = vld [vmem:[#allocation2 + $0x13b0] sm:$0xff]  ;;  %v11816_v11 = vcombine.low %v477_v54, %v485_v55 }
 0x366   :  { %v725_v2 = vld [vmem:[#allocation2 + $0x13f0] sm:$0xff] }
 0x367   :  { %7322 = vmatpush2.bf16.msra.mxu0 %v11624_v15  ;;  %7363 = vmatpush2.bf16.msra.mxu1 %v11880_v21  ;;  %v973_v3 = vld [vmem:[#allocation2 + $0x1bb0] sm:$0xff]  ;;  %v12057_v5 = vcombine.high %v717_v1, %v725_v2  ;;  %v12056_v26 = vcombine.low %v717_v1, %v725_v2 }
 0x368   :  { %7323 = vmatprep.subr.bf16.mxu0 %v11609_v17  ;;  %7364 = vmatprep.subr.bf16.mxu1 %v11865_v41  ;;  %v981_v4 = vld [vmem:[#allocation2 + $0x1bf0] sm:$0xff] }
 0x369   :  { %v12313_v14 = vcombine.high %v973_v3, %v981_v4  ;;  %v701_v15 = vld [vmem:[#allocation2 + $0x1330] sm:$0xff]  ;;  %v12312_v29 = vcombine.low %v973_v3, %v981_v4 }
 0x36a   :  { %v709_v21 = vld [vmem:[#allocation2 + $0x1370] sm:$0xff] }
 0x36b   :  { %7324 = vmatpush2.bf16.msra.mxu0 %v11608_v32  ;;  %7365 = vmatpush2.bf16.msra.mxu1 %v11864_v48  ;;  %v957_v17 = vld [vmem:[#allocation2 + $0x1b30] sm:$0xff]  ;;  %v12041_v50 = vcombine.high %v701_v15, %v709_v21  ;;  %v12040_v44 = vcombine.low %v701_v15, %v709_v21 }
 0x36c   :  { %7325 = vmatprep.subr.bf16.mxu0 %v11593_v33  ;;  %7366 = vmatprep.subr.bf16.mxu1 %v11849_v34  ;;  %v965_v41 = vld [vmem:[#allocation2 + $0x1b70] sm:$0xff] }
 0x36d   :  { %v12297_v30 = vcombine.high %v957_v17, %v965_v41  ;;  %v685_v32 = vld [vmem:[#allocation2 + $0x12b0] sm:$0xff] }
 0x36e   :  { %v693_v48 = vld [vmem:[#allocation2 + $0x12f0] sm:$0xff] }
 0x36f   :  { %7326 = vmatpush2.bf16.msra.mxu0 %v11592_v24  ;;  %7367 = vmatpush2.bf16.msra.mxu1 %v11848_v45  ;;  %v941_v34 = vld [vmem:[#allocation2 + $0x1ab0] sm:$0xff]  ;;  %v12296_v45 = vcombine.low %v957_v17, %v965_v41  ;;  %v12024_v2 = vcombine.low %v685_v32, %v693_v48 }
 0x370   :  { %7327 = vmatprep.subr.bf16.mxu0 %v11577_v49  ;;  %7368 = vmatprep.subr.bf16.mxu1 %v11833_v51  ;;  %v949_v62 = vld [vmem:[#allocation2 + $0x1af0] sm:$0xff]  ;;  %v12025_v49 = vcombine.high %v685_v32, %v693_v48 }
 0x371   :  { %v12281_v54 = vcombine.high %v941_v34, %v949_v62  ;;  %v669_v55 = vld [vmem:[#allocation2 + $0x1230] sm:$0xff] }
 0x372   :  { %v909_v15 = vld [vmem:[#allocation2 + $0x19b0] sm:$0xff] }
 0x373   :  { %7328 = vmatpush2.bf16.msra.mxu0 %v11576_v56  ;;  %7369 = vmatpush2.bf16.msra.mxu1 %v11832_v61  ;;  %v677_v56 = vld [vmem:[#allocation2 + $0x1270] sm:$0xff] }
 0x374   :  { %7329 = vmatprep.subr.bf16.mxu0 %v11561_v63  ;;  %7370 = vmatprep.subr.bf16.mxu1 %v11817_v0  ;;  %v925_v61 = vld [vmem:[#allocation2 + $0x1a30] sm:$0xff]  ;;  %v12009_v4 = vcombine.high %v669_v55, %v677_v56  ;;  %v12008_v17 = vcombine.low %v669_v55, %v677_v56 }
 0x375   :  { %v933_v63 = vld [vmem:[#allocation2 + $0x1a70] sm:$0xff] }
 0x376   :  { %v917_v21 = vld [vmem:[#allocation2 + $0x19f0] sm:$0xff]  ;;  %v12264_v41 = vcombine.low %v925_v61, %v933_v63 }
 0x377   :  { %7330 = vmatpush2.bf16.msra.mxu0 %v11560_v9  ;;  %7371 = vmatpush2.bf16.msra.mxu1 %v11816_v11  ;;  %v12265_v11 = vcombine.high %v925_v61, %v933_v63  ;;  %v893_v32 = vld [vmem:[#allocation2 + $0x1930] sm:$0xff] }
 0x378   :  { %7381 = vmatprep.subr.bf16.mxu0 %v12057_v5  ;;  %7422 = vmatprep.subr.bf16.mxu1 %v12313_v14  ;;  %v653_v5 = vld [vmem:[#allocation2 + $0x11b0] sm:$0xff] }
 0x379   :  { %v661_v14 = vld [vmem:[#allocation2 + $0x11f0] sm:$0xff] }
 0x37a   :  { %v7087_v33 = vpop.f32.mrf.mxu0  ;;  %7332 = vmatmul.mubr.bf16.vlgmr.msra.gmra.mxu0 %v13890_v16  ;;  %v7128_v43 = vpop.f32.mrf.mxu1  ;;  %7373 = vmatmul.mubr.bf16.vlgmr.msra.gmra.mxu1 %v13895_v20  ;;  %v901_v48 = vld [vmem:[#allocation2 + $0x1970] sm:$0xff] }
 0x37b   :  { %v7088_v37 = vadd.f32 %v7087_v33, %v14042_v57  ;;  %7382 = vmatpush1.bf16.msra.mxu0 %v12056_v26  ;;  %7423 = vmatpush1.bf16.msra.mxu1 %v12312_v29  ;;  %v11993_v26 = vcombine.high %v653_v5, %v661_v14  ;;  %v12249_v29 = vcombine.high %v909_v15, %v917_v21  ;;  %v605_v55 = vld [vmem:[#allocation2 + $0x1030] sm:$0xff] }
 0x37c   :  { %v7089_v24 = vpop.f32.mrf.mxu0  ;;  %7383 = vmatprep.subr.bf16.mxu0 %v12041_v50  ;;  %v7130_v53 = vpop.f32.mrf.mxu1  ;;  %7424 = vmatprep.subr.bf16.mxu1 %v12297_v30  ;;  %v637_v50 = vld [vmem:[#allocation2 + $0x1130] sm:$0xff]  ;;  %v11992_v33 = vcombine.low %v653_v5, %v661_v14 }
 0x37d   :  { %v14051_v51 = vadd.f32 %v7128_v43, %v7088_v37  ;;  %v7090_v52 = vadd.f32 %v7089_v24, %v14046_v10  ;;  %7413 = vmatprep.mubr.bf16.mxu0 %v13900_v28  ;;  %7454 = vmatprep.mubr.bf16.mxu1 %v13903_v31  ;;  %v12280_v10 = vcombine.low %v941_v34, %v949_v62  ;;  %v645_v30 = vld [vmem:[#allocation2 + $0x1170] sm:$0xff] }
 0x37e   :  { %v7091_v57 = vpop.f32.mrf.mxu0  ;;  %v7132_v1 = vpop.f32.mrf.mxu1  ;;  %v12248_v34 = vcombine.low %v909_v15, %v917_v21  ;;  %v11977_v62 = vcombine.high %v637_v50, %v645_v30  ;;  %v12233_v37 = vcombine.high %v893_v32, %v901_v48  ;;  %v621_v43 = vld [vmem:[#allocation2 + $0x10b0] sm:$0xff] }
 0x37f   :  { %v14056_v0 = vadd.f32 %v7130_v53, %v7090_v52  ;;  %7384 = vmatpush1.bf16.msra.mxu0 %v12040_v44  ;;  %7425 = vmatpush1.bf16.msra.mxu1 %v12296_v45  ;;  %v629_v44 = vld [vmem:[#allocation2 + $0x10f0] sm:$0xff]  ;;  %v12232_v52 = vcombine.low %v893_v32, %v901_v48 }
 0x380   :  { %v7092_v3 = vpop.f32.mrf.mxu0  ;;  %7385 = vmatprep.subr.bf16.mxu0 %v12025_v49  ;;  %v7133_v9 = vpop.f32.mrf.mxu1  ;;  %7426 = vmatprep.subr.bf16.mxu1 %v12281_v54  ;;  %v877_v24 = vld [vmem:[#allocation2 + $0x18b0] sm:$0xff]  ;;  %v11976_v49 = vcombine.low %v637_v50, %v645_v30  ;;  %v11961_v53 = vcombine.high %v621_v43, %v629_v44  ;;  %v11960_v63 = vcombine.low %v621_v43, %v629_v44 }
 0x381   :  { %v885_v45 = vld [vmem:[#allocation2 + $0x18f0] sm:$0xff] }
 0x382   :  { %v12217_v54 = vcombine.high %v877_v24, %v885_v45  ;;  %v613_v56 = vld [vmem:[#allocation2 + $0x1070] sm:$0xff]  ;;  %v12216_v1 = vcombine.low %v877_v24, %v885_v45 }
 0x383   :  { %7386 = vmatpush1.bf16.msra.mxu0 %v12024_v2  ;;  %7427 = vmatpush1.bf16.msra.mxu1 %v12280_v10  ;;  %v861_v57 = vld [vmem:[#allocation2 + $0x1830] sm:$0xff]  ;;  %v11945_v2 = vcombine.high %v605_v55, %v613_v56  ;;  %v11944_v5 = vcombine.low %v605_v55, %v613_v56 }
 0x384   :  { %7387 = vmatprep.subr.bf16.mxu0 %v12009_v4  ;;  %7428 = vmatprep.subr.bf16.mxu1 %v12265_v11  ;;  %v869_v61 = vld [vmem:[#allocation2 + $0x1870] sm:$0xff] }
 0x385   :  { %v12201_v3 = vcombine.high %v861_v57, %v869_v61  ;;  %v845_v10 = vld [vmem:[#allocation2 + $0x17b0] sm:$0xff]  ;;  %v12200_v14 = vcombine.low %v861_v57, %v869_v61 }
 0x386   :  { %v853_v4 = vld [vmem:[#allocation2 + $0x17f0] sm:$0xff] }
 0x387   :  { %7388 = vmatpush1.bf16.msra.mxu0 %v12008_v17  ;;  %7429 = vmatpush1.bf16.msra.mxu1 %v12264_v41  ;;  %v1101_v9 = vld [vmem:[#allocation2 + $0x1fb0] sm:$0xff]  ;;  %v12185_v15 = vcombine.high %v845_v10, %v853_v4  ;;  %v12184_v50 = vcombine.low %v845_v10, %v853_v4 }
 0x388   :  { %7389 = vmatprep.subr.bf16.mxu0 %v11993_v26  ;;  %7430 = vmatprep.subr.bf16.mxu1 %v12249_v29  ;;  %v1109_v11 = vld [vmem:[#allocation2 + $0x1ff0] sm:$0xff] }
 0x389   :  { %v12441_v21 = vcombine.high %v1101_v9, %v1109_v11  ;;  %v829_v17 = vld [vmem:[#allocation2 + $0x1730] sm:$0xff]  ;;  %v12440_v30 = vcombine.low %v1101_v9, %v1109_v11 }
 0x38a   :  { %v837_v41 = vld [vmem:[#allocation2 + $0x1770] sm:$0xff] }
 0x38b   :  { %7390 = vmatpush1.bf16.msra.mxu0 %v11992_v33  ;;  %7431 = vmatpush1.bf16.msra.mxu1 %v12248_v34  ;;  %v1085_v26 = vld [vmem:[#allocation2 + $0x1f30] sm:$0xff]  ;;  %v12169_v32 = vcombine.high %v829_v17, %v837_v41  ;;  %v12168_v43 = vcombine.low %v829_v17, %v837_v41 }
 0x38c   :  { %7391 = vmatprep.subr.bf16.mxu0 %v11977_v62  ;;  %7432 = vmatprep.subr.bf16.mxu1 %v12233_v37  ;;  %v1093_v29 = vld [vmem:[#allocation2 + $0x1f70] sm:$0xff] }
 0x38d   :  { %v12425_v48 = vcombine.high %v1085_v26, %v1093_v29  ;;  %v813_v33 = vld [vmem:[#allocation2 + $0x16b0] sm:$0xff]  ;;  %v12424_v44 = vcombine.low %v1085_v26, %v1093_v29 }
 0x38e   :  { %v821_v34 = vld [vmem:[#allocation2 + $0x16f0] sm:$0xff] }
 0x38f   :  { %7392 = vmatpush1.bf16.msra.mxu0 %v11976_v49  ;;  %7433 = vmatpush1.bf16.msra.mxu1 %v12232_v52  ;;  %v1069_v62 = vld [vmem:[#allocation2 + $0x1eb0] sm:$0xff]  ;;  %v12153_v24 = vcombine.high %v813_v33, %v821_v34  ;;  %v12152_v55 = vcombine.low %v813_v33, %v821_v34 }
 0x390   :  { %7393 = vmatprep.subr.bf16.mxu0 %v11961_v53  ;;  %7434 = vmatprep.subr.bf16.mxu1 %v12217_v54  ;;  %v1077_v37 = vld [vmem:[#allocation2 + $0x1ef0] sm:$0xff] }
 0x391   :  { %v12409_v45 = vcombine.high %v1069_v62, %v1077_v37  ;;  %v797_v49 = vld [vmem:[#allocation2 + $0x1630] sm:$0xff]  ;;  %v12408_v56 = vcombine.low %v1069_v62, %v1077_v37 }
 0x392   :  { %v805_v52 = vld [vmem:[#allocation2 + $0x1670] sm:$0xff] }
 0x393   :  { %7394 = vmatpush1.bf16.msra.mxu0 %v11960_v63  ;;  %7435 = vmatpush1.bf16.msra.mxu1 %v12216_v1  ;;  %v1053_v53 = vld [vmem:[#allocation2 + $0x1e30] sm:$0xff]  ;;  %v12137_v57 = vcombine.high %v797_v49, %v805_v52  ;;  %v12136_v10 = vcombine.low %v797_v49, %v805_v52 }
 0x394   :  { %7395 = vmatprep.subr.bf16.mxu0 %v11945_v2  ;;  %7436 = vmatprep.subr.bf16.mxu1 %v12201_v3  ;;  %v1061_v54 = vld [vmem:[#allocation2 + $0x1e70] sm:$0xff] }
 0x395   :  { %v12393_v61 = vcombine.high %v1053_v53, %v1061_v54  ;;  %v781_v63 = vld [vmem:[#allocation2 + $0x15b0] sm:$0xff]  ;;  %v12392_v4 = vcombine.low %v1053_v53, %v1061_v54 }
 0x396   :  { %v789_v1 = vld [vmem:[#allocation2 + $0x15f0] sm:$0xff] }
 0x397   :  { %7396 = vmatpush1.bf16.msra.mxu0 %v11944_v5  ;;  %7437 = vmatpush1.bf16.msra.mxu1 %v12200_v14  ;;  %v1037_v2 = vld [vmem:[#allocation2 + $0x1db0] sm:$0xff]  ;;  %v12121_v9 = vcombine.high %v781_v63, %v789_v1  ;;  %v12120_v17 = vcombine.low %v781_v63, %v789_v1 }
 0x398   :  { %7397 = vmatprep.subr.bf16.mxu0 %v12185_v15  ;;  %7438 = vmatprep.subr.bf16.mxu1 %v12441_v21  ;;  %v1045_v3 = vld [vmem:[#allocation2 + $0x1df0] sm:$0xff] }
 0x399   :  { %v12377_v11 = vcombine.high %v1037_v2, %v1045_v3  ;;  %v765_v5 = vld [vmem:[#allocation2 + $0x1530] sm:$0xff]  ;;  %v12376_v41 = vcombine.low %v1037_v2, %v1045_v3 }
 0x39a   :  { %v773_v14 = vld [vmem:[#allocation2 + $0x1570] sm:$0xff] }
 0x39b   :  { %7398 = vmatpush2.bf16.msra.mxu0 %v12184_v50  ;;  %7439 = vmatpush2.bf16.msra.mxu1 %v12440_v30  ;;  %v1021_v15 = vld [vmem:[#allocation2 + $0x1d30] sm:$0xff]  ;;  %v12105_v26 = vcombine.high %v765_v5, %v773_v14  ;;  %v12104_v33 = vcombine.low %v765_v5, %v773_v14  ;;  %v1158_v5 = vrot.slane %v14034_v23, %v13955_v35 }
 0x39c   :  { %7399 = vmatprep.subr.bf16.mxu0 %v12169_v32  ;;  %7440 = vmatprep.subr.bf16.mxu1 %v12425_v48  ;;  %v1029_v21 = vld [vmem:[#allocation2 + $0x1d70] sm:$0xff] }
 0x39d   :  { %v12361_v29 = vcombine.high %v1021_v15, %v1029_v21  ;;  %v749_v50 = vld [vmem:[#allocation2 + $0x14b0] sm:$0xff]  ;;  %v12360_v34 = vcombine.low %v1021_v15, %v1029_v21 }
 0x39e   :  { %v757_v30 = vld [vmem:[#allocation2 + $0x14f0] sm:$0xff] }
 0x39f   :  { %7400 = vmatpush2.bf16.msra.mxu0 %v12168_v43  ;;  %7441 = vmatpush2.bf16.msra.mxu1 %v12424_v44  ;;  %v1005_v32 = vld [vmem:[#allocation2 + $0x1cb0] sm:$0xff]  ;;  %v12089_v62 = vcombine.high %v749_v50, %v757_v30  ;;  %v12088_v49 = vcombine.low %v749_v50, %v757_v30  ;;  %v430_v30 = vld [vmem:[#allocation2 + $0xab8] sm:$0xff] }
 0x3a0   :  { %7401 = vmatprep.subr.bf16.mxu0 %v12153_v24  ;;  %7442 = vmatprep.subr.bf16.mxu1 %v12409_v45  ;;  %v1013_v48 = vld [vmem:[#allocation2 + $0x1cf0] sm:$0xff] }
 0x3a1   :  { %v12345_v37 = vcombine.high %v1005_v32, %v1013_v48  ;;  %v733_v43 = vld [vmem:[#allocation2 + $0x1430] sm:$0xff]  ;;  %v12344_v52 = vcombine.low %v1005_v32, %v1013_v48  ;;  %v438_v32 = vld [vmem:[#allocation2 + $0xaf8] sm:$0xff] }
 0x3a2   :  { %v741_v44 = vld [vmem:[#allocation2 + $0x1470] sm:$0xff] }
 0x3a3   :  { %7402 = vmatpush2.bf16.msra.mxu0 %v12152_v55  ;;  %7443 = vmatpush2.bf16.msra.mxu1 %v12408_v56  ;;  %v989_v24 = vld [vmem:[#allocation2 + $0x1c30] sm:$0xff]  ;;  %v12073_v53 = vcombine.high %v733_v43, %v741_v44  ;;  %v206_v55 = vld [vmem:[#allocation2 + $0x3b8] sm:$0xff]  ;;  %v12072_v63 = vcombine.low %v733_v43, %v741_v44 }
 0x3a4   :  { %7403 = vmatprep.subr.bf16.mxu0 %v12137_v57  ;;  %7444 = vmatprep.subr.bf16.mxu1 %v12393_v61  ;;  %v997_v45 = vld [vmem:[#allocation2 + $0x1c70] sm:$0xff]  ;;  %v214_v56 = vld [vmem:[#allocation2 + $0x3f8] sm:$0xff] }
 0x3a5   :  { %v12329_v54 = vcombine.high %v989_v24, %v997_v45  ;;  %v462_v57 = vld [vmem:[#allocation2 + $0xbb8] sm:$0xff]  ;;  %v12328_v1 = vcombine.low %v989_v24, %v997_v45  ;;  %v11547_v2 = vcombine.high %v206_v55, %v214_v56  ;;  %v11546_v14 = vcombine.low %v206_v55, %v214_v56 }
 0x3a6   :  { %v470_v61 = vld [vmem:[#allocation2 + $0xbf8] sm:$0xff]  ;;  %v11771_v45 = vcombine.high %v430_v30, %v438_v32 }
 0x3a7   :  { %7404 = vmatpush2.bf16.msra.mxu0 %v12136_v10  ;;  %7445 = vmatpush2.bf16.msra.mxu1 %v12392_v4  ;;  %v11803_v3 = vcombine.high %v462_v57, %v470_v61  ;;  %v190_v10 = vld [vmem:[#allocation2 + $0x338] sm:$0xff]  ;;  %v11802_v15 = vcombine.low %v462_v57, %v470_v61 }
 0x3a8   :  { %7405 = vmatprep.subr.bf16.mxu0 %v12121_v9  ;;  %7446 = vmatprep.subr.bf16.mxu1 %v12377_v11  ;;  %v198_v4 = vld [vmem:[#allocation2 + $0x378] sm:$0xff] }
 0x3a9   :  { %v446_v9 = vld [vmem:[#allocation2 + $0xb38] sm:$0xff]  ;;  %v11531_v21 = vcombine.high %v190_v10, %v198_v4 }
 0x3aa   :  { %v454_v11 = vld [vmem:[#allocation2 + $0xb78] sm:$0xff] }
 0x3ab   :  { %7406 = vmatpush2.bf16.msra.mxu0 %v12120_v17  ;;  %7447 = vmatpush2.bf16.msra.mxu1 %v12376_v41  ;;  %v1162_v17 = vrot.slane %v14034_v23, %v13958_v42  ;;  %v11787_v41 = vcombine.high %v446_v9, %v454_v11  ;;  %v422_v55 = vld [vmem:[#allocation2 + $0xa78] sm:$0xff] }
 0x3ac   :  { %7407 = vmatprep.subr.bf16.mxu0 %v12105_v26  ;;  %7448 = vmatprep.subr.bf16.mxu1 %v12361_v29  ;;  %v174_v26 = vld [vmem:[#allocation2 + $0x2b8] sm:$0xff] }
 0x3ad   :  { %v182_v29 = vld [vmem:[#allocation2 + $0x2f8] sm:$0xff] }
 0x3ae   :  { %v11515_v43 = vcombine.high %v174_v26, %v182_v29  ;;  %v11514_v61 = vcombine.low %v174_v26, %v182_v29  ;;  %v390_v26 = vld [vmem:[#allocation2 + $0x978] sm:$0xff] }
 0x3af   :  { %7408 = vmatpush2.bf16.msra.mxu0 %v12104_v33  ;;  %7449 = vmatpush2.bf16.msra.mxu1 %v12360_v34  ;;  %v11530_v34 = vcombine.low %v190_v10, %v198_v4  ;;  %v142_v4 = vld [vmem:[#allocation2 + $0x1b8] sm:$0xff] }
 0x3b0   :  { %7409 = vmatprep.subr.bf16.mxu0 %v12089_v62  ;;  %7450 = vmatprep.subr.bf16.mxu1 %v12345_v37  ;;  %v11786_v37 = vcombine.low %v446_v9, %v454_v11  ;;  %v398_v9 = vld [vmem:[#allocation2 + $0x9b8] sm:$0xff] }
 0x3b1   :  { %v406_v11 = vld [vmem:[#allocation2 + $0x9f8] sm:$0xff] }
 0x3b3   :  { %7410 = vmatpush2.bf16.msra.mxu0 %v12088_v49  ;;  %7451 = vmatpush2.bf16.msra.mxu1 %v12344_v52  ;;  %v158_v49 = vld [vmem:[#allocation2 + $0x238] sm:$0xff] }
 0x3b4   :  { %7411 = vmatprep.subr.bf16.mxu0 %v12073_v53  ;;  %7452 = vmatprep.subr.bf16.mxu1 %v12329_v54  ;;  %v166_v52 = vld [vmem:[#allocation2 + $0x278] sm:$0xff] }
 0x3b5   :  { %v414_v54 = vld [vmem:[#allocation2 + $0xa38] sm:$0xff] }
 0x3b6   :  { %v11755_v10 = vcombine.high %v414_v54, %v422_v55 }
 0x3b7   :  { %7412 = vmatpush2.bf16.msra.mxu0 %v12072_v63  ;;  %7453 = vmatpush2.bf16.msra.mxu1 %v12328_v1  ;;  %v11770_v1 = vcombine.low %v430_v30, %v438_v32 }
 0x3b8   :  { %7463 = vmatprep.subr.bf16.mxu0 %v11547_v2  ;;  %7504 = vmatprep.subr.bf16.mxu1 %v11803_v3  ;;  %v11499_v2 = vcombine.high %v158_v49, %v166_v52 }
 0x3ba   :  { %v7169_v50 = vpop.f32.mrf.mxu0  ;;  %7414 = vmatmul.mubr.bf16.vlgmr.msra.gmra.mxu0 %v13914_v38  ;;  %v7210_v33 = vpop.f32.mrf.mxu1  ;;  %7455 = vmatmul.mubr.bf16.vlgmr.msra.gmra.mxu1 %v13916_v39 }
 0x3bb   :  { %v7170_v48 = vadd.f32 %v7169_v50, %v1158_v5  ;;  %7464 = vmatpush1.bf16.msra.mxu0 %v11546_v14  ;;  %7505 = vmatpush1.bf16.msra.mxu1 %v11802_v15  ;;  %v11498_v5 = vcombine.low %v158_v49, %v166_v52  ;;  %v11739_v15 = vcombine.high %v398_v9, %v406_v11  ;;  %v102_v49 = vld [vmem:[#allocation2 + $0x78] sm:$0xff] }
 0x3bc   :  { %v7171_v62 = vpop.f32.mrf.mxu0  ;;  %7465 = vmatprep.subr.bf16.mxu0 %v11531_v21  ;;  %v7212_v24 = vpop.f32.mrf.mxu1  ;;  %7506 = vmatprep.subr.bf16.mxu1 %v11787_v41  ;;  %v126_v21 = vld [vmem:[#allocation2 + $0x138] sm:$0xff]  ;;  %v11738_v50 = vcombine.low %v398_v9, %v406_v11 }
 0x3bd   :  { %v14064_v23 = vadd.f32 %v7210_v33, %v7170_v48  ;;  %v7172_v44 = vadd.f32 %v7171_v62, %v1162_v17  ;;  %7495 = vmatprep.mubr.bf16.mxu0 %v13878_v58  ;;  %7536 = vmatprep.mubr.bf16.mxu1 %v13880_v59  ;;  %v150_v58 = vld [vmem:[#allocation2 + $0x1f8] sm:$0xff]  ;;  %v11754_v59 = vcombine.low %v414_v54, %v422_v55 }
 0x3be   :  { %v7173_v53 = vpop.f32.mrf.mxu0  ;;  %v7214_v57 = vpop.f32.mrf.mxu1  ;;  %v11483_v14 = vcombine.high %v142_v4, %v150_v58  ;;  %v134_v17 = vld [vmem:[#allocation2 + $0x178] sm:$0xff]  ;;  %v11482_v29 = vcombine.low %v142_v4, %v150_v58 }
 0x3bf   :  { %v14068_v56 = vadd.f32 %v7212_v24, %v7172_v44  ;;  %7466 = vmatpush1.bf16.msra.mxu0 %v11530_v34  ;;  %7507 = vmatpush1.bf16.msra.mxu1 %v11786_v37  ;;  %v382_v41 = vld [vmem:[#allocation2 + $0x938] sm:$0xff]  ;;  %v11467_v30 = vcombine.high %v126_v21, %v134_v17  ;;  %v11466_v37 = vcombine.low %v126_v21, %v134_v17 }
 0x3c0   :  { %v7174_v63 = vpop.f32.mrf.mxu0  ;;  %7467 = vmatprep.subr.bf16.mxu0 %v11515_v43  ;;  %v7215_v3 = vpop.f32.mrf.mxu1  ;;  %7508 = vmatprep.subr.bf16.mxu1 %v11771_v45  ;;  %v11723_v32 = vcombine.high %v382_v41, %v390_v26  ;;  %v110_v48 = vld [vmem:[#allocation2 + $0xb8] sm:$0xff]  ;;  %v11722_v43 = vcombine.low %v382_v41, %v390_v26 }
 0x3c1   :  { %v118_v33 = vld [vmem:[#allocation2 + $0xf8] sm:$0xff] }
 0x3c2   :  { %v366_v34 = vld [vmem:[#allocation2 + $0x8b8] sm:$0xff]  ;;  %v11451_v44 = vcombine.high %v110_v48, %v118_v33  ;;  %v11450_v54 = vcombine.low %v110_v48, %v118_v33 }
 0x3c3   :  { %7468 = vmatpush1.bf16.msra.mxu0 %v11514_v61  ;;  %7509 = vmatpush1.bf16.msra.mxu1 %v11770_v1  ;;  %v374_v62 = vld [vmem:[#allocation2 + $0x8f8] sm:$0xff] }
 0x3c4   :  { %7469 = vmatprep.subr.bf16.mxu0 %v11499_v2  ;;  %7510 = vmatprep.subr.bf16.mxu1 %v11755_v10  ;;  %v11707_v24 = vcombine.high %v366_v34, %v374_v62  ;;  %v94_v45 = vld [vmem:[#allocation2 + $0x38] sm:$0xff]  ;;  %v11706_v55 = vcombine.low %v366_v34, %v374_v62 }
 0x3c5   :  { %v350_v52 = vld [vmem:[#allocation2 + $0x838] sm:$0xff]  ;;  %v11435_v57 = vcombine.high %v94_v45, %v102_v49  ;;  %v11434_v10 = vcombine.low %v94_v45, %v102_v49 }
 0x3c6   :  { %v358_v53 = vld [vmem:[#allocation2 + $0x878] sm:$0xff] }
 0x3c7   :  { %7470 = vmatpush1.bf16.msra.mxu0 %v11498_v5  ;;  %7511 = vmatpush1.bf16.msra.mxu1 %v11754_v59  ;;  %v11691_v61 = vcombine.high %v350_v52, %v358_v53  ;;  %v334_v63 = vld [vmem:[#allocation2 + $0x7b8] sm:$0xff]  ;;  %v11690_v4 = vcombine.low %v350_v52, %v358_v53 }
 0x3c8   :  { %7471 = vmatprep.subr.bf16.mxu0 %v11483_v14  ;;  %7512 = vmatprep.subr.bf16.mxu1 %v11739_v15  ;;  %v342_v1 = vld [vmem:[#allocation2 + $0x7f8] sm:$0xff] }
 0x3c9   :  { %v590_v2 = vld [vmem:[#allocation2 + $0xfb8] sm:$0xff]  ;;  %v11675_v58 = vcombine.high %v334_v63, %v342_v1  ;;  %v11674_v15 = vcombine.low %v334_v63, %v342_v1 }
 0x3ca   :  { %v598_v3 = vld [vmem:[#allocation2 + $0xff8] sm:$0xff] }
 0x3cb   :  { %7472 = vmatpush1.bf16.msra.mxu0 %v11482_v29  ;;  %7513 = vmatpush1.bf16.msra.mxu1 %v11738_v50  ;;  %v11931_v9 = vcombine.high %v590_v2, %v598_v3  ;;  %v318_v11 = vld [vmem:[#allocation2 + $0x738] sm:$0xff]  ;;  %v11930_v21 = vcombine.low %v590_v2, %v598_v3 }
 0x3cc   :  { %7473 = vmatprep.subr.bf16.mxu0 %v11467_v30  ;;  %7514 = vmatprep.subr.bf16.mxu1 %v11723_v32  ;;  %v326_v5 = vld [vmem:[#allocation2 + $0x778] sm:$0xff] }
 0x3cd   :  { %v574_v59 = vld [vmem:[#allocation2 + $0xf38] sm:$0xff]  ;;  %v11659_v17 = vcombine.high %v318_v11, %v326_v5  ;;  %v11658_v32 = vcombine.low %v318_v11, %v326_v5 }
 0x3ce   :  { %v582_v14 = vld [vmem:[#allocation2 + $0xf78] sm:$0xff] }
 0x3cf   :  { %7474 = vmatpush1.bf16.msra.mxu0 %v11466_v37  ;;  %7515 = vmatpush1.bf16.msra.mxu1 %v11722_v43  ;;  %v11915_v41 = vcombine.high %v574_v59, %v582_v14  ;;  %v302_v26 = vld [vmem:[#allocation2 + $0x6b8] sm:$0xff]  ;;  %v11914_v48 = vcombine.low %v574_v59, %v582_v14 }
 0x3d0   :  { %7475 = vmatprep.subr.bf16.mxu0 %v11451_v44  ;;  %7516 = vmatprep.subr.bf16.mxu1 %v11707_v24  ;;  %v310_v29 = vld [vmem:[#allocation2 + $0x6f8] sm:$0xff] }
 0x3d1   :  { %v558_v50 = vld [vmem:[#allocation2 + $0xeb8] sm:$0xff]  ;;  %v11643_v33 = vcombine.high %v302_v26, %v310_v29  ;;  %v11642_v24 = vcombine.low %v302_v26, %v310_v29 }
 0x3d2   :  { %v566_v30 = vld [vmem:[#allocation2 + $0xef8] sm:$0xff] }
 0x3d3   :  { %7476 = vmatpush1.bf16.msra.mxu0 %v11450_v54  ;;  %7517 = vmatpush1.bf16.msra.mxu1 %v11706_v55  ;;  %v11899_v34 = vcombine.high %v558_v50, %v566_v30  ;;  %v286_v62 = vld [vmem:[#allocation2 + $0x638] sm:$0xff]  ;;  %v11898_v45 = vcombine.low %v558_v50, %v566_v30 }
 0x3d4   :  { %7477 = vmatprep.subr.bf16.mxu0 %v11435_v57  ;;  %7518 = vmatprep.subr.bf16.mxu1 %v11691_v61  ;;  %v294_v37 = vld [vmem:[#allocation2 + $0x678] sm:$0xff] }
 0x3d5   :  { %v542_v43 = vld [vmem:[#allocation2 + $0xe38] sm:$0xff]  ;;  %v11627_v49 = vcombine.high %v286_v62, %v294_v37  ;;  %v11626_v61 = vcombine.low %v286_v62, %v294_v37 }
 0x3d6   :  { %v550_v44 = vld [vmem:[#allocation2 + $0xe78] sm:$0xff] }
 0x3d7   :  { %7478 = vmatpush1.bf16.msra.mxu0 %v11434_v10  ;;  %7519 = vmatpush1.bf16.msra.mxu1 %v11690_v4  ;;  %v11883_v52 = vcombine.high %v542_v43, %v550_v44  ;;  %v270_v53 = vld [vmem:[#allocation2 + $0x5b8] sm:$0xff]  ;;  %v11882_v63 = vcombine.low %v542_v43, %v550_v44 }
 0x3d8   :  { %7479 = vmatprep.subr.bf16.mxu0 %v11675_v58  ;;  %7520 = vmatprep.subr.bf16.mxu1 %v11931_v9  ;;  %v278_v54 = vld [vmem:[#allocation2 + $0x5f8] sm:$0xff] }
 0x3d9   :  { %v526_v55 = vld [vmem:[#allocation2 + $0xdb8] sm:$0xff]  ;;  %v11611_v1 = vcombine.high %v270_v53, %v278_v54  ;;  %v11610_v9 = vcombine.low %v270_v53, %v278_v54 }
 0x3da   :  { %v534_v57 = vld [vmem:[#allocation2 + $0xdf8] sm:$0xff] }
 0x3db   :  { %7480 = vmatpush2.bf16.msra.mxu0 %v11674_v15  ;;  %7521 = vmatpush2.bf16.msra.mxu1 %v11930_v21  ;;  %v11867_v2 = vcombine.high %v526_v55, %v534_v57  ;;  %v254_v3 = vld [vmem:[#allocation2 + $0x538] sm:$0xff]  ;;  %v11866_v11 = vcombine.low %v526_v55, %v534_v57 }
 0x3dc   :  { %7481 = vmatprep.subr.bf16.mxu0 %v11659_v17  ;;  %7522 = vmatprep.subr.bf16.mxu1 %v11915_v41  ;;  %v262_v10 = vld [vmem:[#allocation2 + $0x578] sm:$0xff] }
 0x3dd   :  { %v510_v4 = vld [vmem:[#allocation2 + $0xd38] sm:$0xff]  ;;  %v11595_v5 = vcombine.high %v254_v3, %v262_v10  ;;  %v11594_v41 = vcombine.low %v254_v3, %v262_v10 }
 0x3de   :  { %v518_v58 = vld [vmem:[#allocation2 + $0xd78] sm:$0xff] }
 0x3df   :  { %7482 = vmatpush2.bf16.msra.mxu0 %v11658_v32  ;;  %7523 = vmatpush2.bf16.msra.mxu1 %v11914_v48  ;;  %v11851_v59 = vcombine.high %v510_v4, %v518_v58  ;;  %v238_v14 = vld [vmem:[#allocation2 + $0x4b8] sm:$0xff]  ;;  %v11850_v26 = vcombine.low %v510_v4, %v518_v58 }
 0x3e0   :  { %7483 = vmatprep.subr.bf16.mxu0 %v11643_v33  ;;  %7524 = vmatprep.subr.bf16.mxu1 %v11899_v34  ;;  %v246_v15 = vld [vmem:[#allocation2 + $0x4f8] sm:$0xff] }
 0x3e1   :  { %v494_v21 = vld [vmem:[#allocation2 + $0xcb8] sm:$0xff]  ;;  %v11579_v29 = vcombine.high %v238_v14, %v246_v15  ;;  %v11578_v34 = vcombine.low %v238_v14, %v246_v15 }
 0x3e2   :  { %v502_v17 = vld [vmem:[#allocation2 + $0xcf8] sm:$0xff] }
 0x3e3   :  { %7484 = vmatpush2.bf16.msra.mxu0 %v11642_v24  ;;  %7525 = vmatpush2.bf16.msra.mxu1 %v11898_v45  ;;  %v11835_v50 = vcombine.high %v494_v21, %v502_v17  ;;  %v222_v30 = vld [vmem:[#allocation2 + $0x438] sm:$0xff]  ;;  %v11834_v62 = vcombine.low %v494_v21, %v502_v17 }
 0x3e4   :  { %7485 = vmatprep.subr.bf16.mxu0 %v11627_v49  ;;  %7526 = vmatprep.subr.bf16.mxu1 %v11883_v52  ;;  %v230_v32 = vld [vmem:[#allocation2 + $0x478] sm:$0xff] }
 0x3e5   :  { %v478_v48 = vld [vmem:[#allocation2 + $0xc38] sm:$0xff]  ;;  %v11563_v37 = vcombine.high %v222_v30, %v230_v32  ;;  %v11562_v52 = vcombine.low %v222_v30, %v230_v32 }
 0x3e6   :  { %v486_v33 = vld [vmem:[#allocation2 + $0xc78] sm:$0xff] }
 0x3e7   :  { %7486 = vmatpush2.bf16.msra.mxu0 %v11626_v61  ;;  %7527 = vmatpush2.bf16.msra.mxu1 %v11882_v63  ;;  %v11819_v43 = vcombine.high %v478_v48, %v486_v33  ;;  %v718_v44 = vld [vmem:[#allocation2 + $0x13b8] sm:$0xff]  ;;  %v11818_v53 = vcombine.low %v478_v48, %v486_v33 }
 0x3e8   :  { %7487 = vmatprep.subr.bf16.mxu0 %v11611_v1  ;;  %7528 = vmatprep.subr.bf16.mxu1 %v11867_v2  ;;  %v726_v24 = vld [vmem:[#allocation2 + $0x13f8] sm:$0xff] }
 0x3e9   :  { %v974_v45 = vld [vmem:[#allocation2 + $0x1bb8] sm:$0xff]  ;;  %v12059_v54 = vcombine.high %v718_v44, %v726_v24  ;;  %v12058_v2 = vcombine.low %v718_v44, %v726_v24 }
 0x3ea   :  { %v982_v49 = vld [vmem:[#allocation2 + $0x1bf8] sm:$0xff] }
 0x3eb   :  { %7488 = vmatpush2.bf16.msra.mxu0 %v11610_v9  ;;  %7529 = vmatpush2.bf16.msra.mxu1 %v11866_v11  ;;  %v12315_v55 = vcombine.high %v974_v45, %v982_v49  ;;  %v702_v57 = vld [vmem:[#allocation2 + $0x1338] sm:$0xff]  ;;  %v12314_v3 = vcombine.low %v974_v45, %v982_v49 }
 0x3ec   :  { %7489 = vmatprep.subr.bf16.mxu0 %v11595_v5  ;;  %7530 = vmatprep.subr.bf16.mxu1 %v11851_v59  ;;  %v710_v61 = vld [vmem:[#allocation2 + $0x1378] sm:$0xff] }
 0x3ed   :  { %v958_v63 = vld [vmem:[#allocation2 + $0x1b38] sm:$0xff]  ;;  %v12043_v10 = vcombine.high %v702_v57, %v710_v61  ;;  %v12042_v21 = vcombine.low %v702_v57, %v710_v61 }
 0x3ee   :  { %v966_v1 = vld [vmem:[#allocation2 + $0x1b78] sm:$0xff] }
 0x3ef   :  { %7490 = vmatpush2.bf16.msra.mxu0 %v11594_v41  ;;  %7531 = vmatpush2.bf16.msra.mxu1 %v11850_v26  ;;  %v12299_v4 = vcombine.high %v958_v63, %v966_v1  ;;  %v686_v58 = vld [vmem:[#allocation2 + $0x12b8] sm:$0xff]  ;;  %v12298_v41 = vcombine.low %v958_v63, %v966_v1 }
 0x3f0   :  { %7491 = vmatprep.subr.bf16.mxu0 %v11579_v29  ;;  %7532 = vmatprep.subr.bf16.mxu1 %v11835_v50  ;;  %v694_v9 = vld [vmem:[#allocation2 + $0x12f8] sm:$0xff] }
 0x3f1   :  { %v942_v5 = vld [vmem:[#allocation2 + $0x1ab8] sm:$0xff]  ;;  %v12027_v26 = vcombine.high %v686_v58, %v694_v9 }
 0x3f2   :  { %v950_v59 = vld [vmem:[#allocation2 + $0x1af8] sm:$0xff] }
 0x3f3   :  { %7492 = vmatpush2.bf16.msra.mxu0 %v11578_v34  ;;  %7533 = vmatpush2.bf16.msra.mxu1 %v11834_v62  ;;  %v670_v32 = vld [vmem:[#allocation2 + $0x1238] sm:$0xff] }
 0x3f4   :  { %7493 = vmatprep.subr.bf16.mxu0 %v11563_v37  ;;  %7534 = vmatprep.subr.bf16.mxu1 %v11819_v43  ;;  %v678_v48 = vld [vmem:[#allocation2 + $0x1278] sm:$0xff]  ;;  %v12026_v37 = vcombine.low %v686_v58, %v694_v9 }
 0x3f5   :  { %v934_v33 = vld [vmem:[#allocation2 + $0x1a78] sm:$0xff]  ;;  %v12011_v44 = vcombine.high %v670_v32, %v678_v48 }
 0x3f6   :  { %v654_v49 = vld [vmem:[#allocation2 + $0x11b8] sm:$0xff] }
 0x3f7   :  { %7494 = vmatpush2.bf16.msra.mxu0 %v11562_v52  ;;  %7535 = vmatpush2.bf16.msra.mxu1 %v11818_v53  ;;  %v910_v52 = vld [vmem:[#allocation2 + $0x19b8] sm:$0xff] }
 0x3f8   :  { %7545 = vmatprep.subr.bf16.mxu0 %v12059_v54  ;;  %7586 = vmatprep.subr.bf16.mxu1 %v12315_v55  ;;  %v918_v53 = vld [vmem:[#allocation2 + $0x19f8] sm:$0xff]  ;;  %v12010_v54 = vcombine.low %v670_v32, %v678_v48 }
 0x3f9   :  { %v12251_v57 = vcombine.high %v910_v52, %v918_v53  ;;  %v638_v61 = vld [vmem:[#allocation2 + $0x1138] sm:$0xff] }
 0x3fa   :  { %v7251_v11 = vpop.f32.mrf.mxu0  ;;  %7496 = vmatmul.mubr.bf16.vlgmr.msra.gmra.mxu0 %v13890_v16  ;;  %v7292_v15 = vpop.f32.mrf.mxu1  ;;  %7537 = vmatmul.mubr.bf16.vlgmr.msra.gmra.mxu1 %v13895_v20  ;;  %v12283_v16 = vcombine.high %v942_v5, %v950_v59  ;;  %v926_v20 = vld [vmem:[#allocation2 + $0x1a38] sm:$0xff] }
 0x3fb   :  { %v7252_v14 = vadd.f32 %v7251_v11, %v14064_v23  ;;  %7546 = vmatpush1.bf16.msra.mxu0 %v12058_v2  ;;  %7587 = vmatpush1.bf16.msra.mxu1 %v12314_v3  ;;  %v12267_v45 = vcombine.high %v926_v20, %v934_v33  ;;  %v646_v63 = vld [vmem:[#allocation2 + $0x1178] sm:$0xff] }
 0x3fc   :  { %v7253_v17 = vpop.f32.mrf.mxu0  ;;  %7547 = vmatprep.subr.bf16.mxu0 %v12043_v10  ;;  %v7294_v30 = vpop.f32.mrf.mxu1  ;;  %7588 = vmatprep.subr.bf16.mxu1 %v12299_v4  ;;  %v894_v1 = vld [vmem:[#allocation2 + $0x1938] sm:$0xff]  ;;  %v12250_v10 = vcombine.low %v910_v52, %v918_v53  ;;  %v11979_v4 = vcombine.high %v638_v61, %v646_v63 }
 0x3fd   :  { %v14073_v29 = vadd.f32 %v7292_v15, %v7252_v14  ;;  %v7254_v50 = vadd.f32 %v7253_v17, %v14068_v56  ;;  %7577 = vmatprep.mubr.bf16.mxu0 %v13900_v28  ;;  %7618 = vmatprep.mubr.bf16.mxu1 %v13903_v31  ;;  %v12282_v56 = vcombine.low %v942_v5, %v950_v59  ;;  %v662_v28 = vld [vmem:[#allocation2 + $0x11f8] sm:$0xff] }
 0x3fe   :  { %v7255_v23 = vpop.f32.mrf.mxu0  ;;  %v7296_v62 = vpop.f32.mrf.mxu1  ;;  %v12266_v31 = vcombine.low %v926_v20, %v934_v33  ;;  %v11995_v55 = vcombine.high %v654_v49, %v662_v28  ;;  %v902_v2 = vld [vmem:[#allocation2 + $0x1978] sm:$0xff]  ;;  %v11994_v3 = vcombine.low %v654_v49, %v662_v28  ;;  %v11978_v14 = vcombine.low %v638_v61, %v646_v63 }
 0x3ff   :  { %v14078_v34 = vadd.f32 %v7294_v30, %v7254_v50  ;;  %7548 = vmatpush1.bf16.msra.mxu0 %v12042_v21  ;;  %7589 = vmatpush1.bf16.msra.mxu1 %v12298_v41  ;;  %v12235_v58 = vcombine.high %v894_v1, %v902_v2  ;;  %v622_v9 = vld [vmem:[#allocation2 + $0x10b8] sm:$0xff]  ;;  %v12234_v15 = vcombine.low %v894_v1, %v902_v2 }
 0x400   :  { %v7256_v43 = vpop.f32.mrf.mxu0  ;;  %7549 = vmatprep.subr.bf16.mxu0 %v12027_v26  ;;  %v7297_v24 = vpop.f32.mrf.mxu1  ;;  %7590 = vmatprep.subr.bf16.mxu1 %v12283_v16  ;;  %v630_v11 = vld [vmem:[#allocation2 + $0x10f8] sm:$0xff] }
 0x401   :  { %v878_v5 = vld [vmem:[#allocation2 + $0x18b8] sm:$0xff]  ;;  %v11963_v21 = vcombine.high %v622_v9, %v630_v11  ;;  %v11962_v16 = vcombine.low %v622_v9, %v630_v11 }
 0x402   :  { %v886_v59 = vld [vmem:[#allocation2 + $0x18f8] sm:$0xff] }
 0x403   :  { %7550 = vmatpush1.bf16.msra.mxu0 %v12026_v37  ;;  %7591 = vmatpush1.bf16.msra.mxu1 %v12282_v56  ;;  %v12219_v17 = vcombine.high %v878_v5, %v886_v59  ;;  %v606_v41 = vld [vmem:[#allocation2 + $0x1038] sm:$0xff]  ;;  %v12218_v32 = vcombine.low %v878_v5, %v886_v59 }
 0x404   :  { %7551 = vmatprep.subr.bf16.mxu0 %v12011_v44  ;;  %7592 = vmatprep.subr.bf16.mxu1 %v12267_v45  ;;  %v614_v26 = vld [vmem:[#allocation2 + $0x1078] sm:$0xff] }
 0x405   :  { %v862_v50 = vld [vmem:[#allocation2 + $0x1838] sm:$0xff]  ;;  %v11947_v48 = vcombine.high %v606_v41, %v614_v26  ;;  %v11946_v43 = vcombine.low %v606_v41, %v614_v26 }
 0x406   :  { %v870_v30 = vld [vmem:[#allocation2 + $0x1878] sm:$0xff] }
 0x407   :  { %7552 = vmatpush1.bf16.msra.mxu0 %v12010_v54  ;;  %7593 = vmatpush1.bf16.msra.mxu1 %v12266_v31  ;;  %v12203_v23 = vcombine.high %v862_v50, %v870_v30  ;;  %v846_v20 = vld [vmem:[#allocation2 + $0x17b8] sm:$0xff]  ;;  %v12202_v56 = vcombine.low %v862_v50, %v870_v30 }
 0x408   :  { %7553 = vmatprep.subr.bf16.mxu0 %v11995_v55  ;;  %7594 = vmatprep.subr.bf16.mxu1 %v12251_v57  ;;  %v854_v33 = vld [vmem:[#allocation2 + $0x17f8] sm:$0xff] }
 0x409   :  { %v1102_v62 = vld [vmem:[#allocation2 + $0x1fb8] sm:$0xff]  ;;  %v12187_v44 = vcombine.high %v846_v20, %v854_v33  ;;  %v12186_v53 = vcombine.low %v846_v20, %v854_v33 }
 0x40a   :  { %v1110_v37 = vld [vmem:[#allocation2 + $0x1ff8] sm:$0xff] }
 0x40b   :  { %7554 = vmatpush1.bf16.msra.mxu0 %v11994_v3  ;;  %7595 = vmatpush1.bf16.msra.mxu1 %v12250_v10  ;;  %v12443_v24 = vcombine.high %v1102_v62, %v1110_v37  ;;  %v830_v45 = vld [vmem:[#allocation2 + $0x1738] sm:$0xff]  ;;  %v12442_v54 = vcombine.low %v1102_v62, %v1110_v37 }
 0x40c   :  { %7555 = vmatprep.subr.bf16.mxu0 %v11979_v4  ;;  %7596 = vmatprep.subr.bf16.mxu1 %v12235_v58  ;;  %v838_v49 = vld [vmem:[#allocation2 + $0x1778] sm:$0xff] }
 0x40d   :  { %v1086_v28 = vld [vmem:[#allocation2 + $0x1f38] sm:$0xff]  ;;  %v12171_v31 = vcombine.high %v830_v45, %v838_v49  ;;  %v12170_v2 = vcombine.low %v830_v45, %v838_v49 }
 0x40e   :  { %v1094_v52 = vld [vmem:[#allocation2 + $0x1f78] sm:$0xff] }
 0x40f   :  { %7556 = vmatpush1.bf16.msra.mxu0 %v11978_v14  ;;  %7597 = vmatpush1.bf16.msra.mxu1 %v12234_v15  ;;  %v12427_v55 = vcombine.high %v1086_v28, %v1094_v52  ;;  %v814_v57 = vld [vmem:[#allocation2 + $0x16b8] sm:$0xff]  ;;  %v12426_v3 = vcombine.low %v1086_v28, %v1094_v52 }
 0x410   :  { %7557 = vmatprep.subr.bf16.mxu0 %v11963_v21  ;;  %7598 = vmatprep.subr.bf16.mxu1 %v12219_v17  ;;  %v822_v61 = vld [vmem:[#allocation2 + $0x16f8] sm:$0xff] }
 0x411   :  { %v1070_v63 = vld [vmem:[#allocation2 + $0x1eb8] sm:$0xff]  ;;  %v12155_v10 = vcombine.high %v814_v57, %v822_v61  ;;  %v12154_v59 = vcombine.low %v814_v57, %v822_v61 }
 0x412   :  { %v1078_v1 = vld [vmem:[#allocation2 + $0x1ef8] sm:$0xff] }
 0x413   :  { %7558 = vmatpush1.bf16.msra.mxu0 %v11962_v16  ;;  %7599 = vmatpush1.bf16.msra.mxu1 %v12218_v32  ;;  %v12411_v4 = vcombine.high %v1070_v63, %v1078_v1  ;;  %v798_v58 = vld [vmem:[#allocation2 + $0x1638] sm:$0xff]  ;;  %v12410_v14 = vcombine.low %v1070_v63, %v1078_v1 }
 0x414   :  { %7559 = vmatprep.subr.bf16.mxu0 %v11947_v48  ;;  %7600 = vmatprep.subr.bf16.mxu1 %v12203_v23  ;;  %v806_v9 = vld [vmem:[#allocation2 + $0x1678] sm:$0xff] }
 0x415   :  { %v1054_v11 = vld [vmem:[#allocation2 + $0x1e38] sm:$0xff]  ;;  %v12139_v15 = vcombine.high %v798_v58, %v806_v9  ;;  %v12138_v30 = vcombine.low %v798_v58, %v806_v9  ;;  %v12966_v9 = vld [vmem:[#allocation6 + $0xe4] ss:$16 sps:$4 sm:$0xff]  }
 0x416   :  { %v1062_v5 = vld [vmem:[#allocation2 + $0x1e78] sm:$0xff] }
 0x417   :  { %7560 = vmatpush1.bf16.msra.mxu0 %v11946_v43  ;;  %7601 = vmatpush1.bf16.msra.mxu1 %v12202_v56  ;;  %v12395_v21 = vcombine.high %v1054_v11, %v1062_v5  ;;  %v782_v17 = vld [vmem:[#allocation2 + $0x15b8] sm:$0xff]  ;;  %v12394_v16 = vcombine.low %v1054_v11, %v1062_v5  ;;  %v12969_v11 = vld [vmem:[#allocation6 + $0x2e4] ss:$16 sps:$4 sm:$0xff]   ;;  %v7628_v5 = vmax.f32 %v13952_v27, 0.0 }
 0x418   :  { %7561 = vmatprep.subr.bf16.mxu0 %v12187_v44  ;;  %7602 = vmatprep.subr.bf16.mxu1 %v12443_v24  ;;  %v790_v41 = vld [vmem:[#allocation2 + $0x15f8] sm:$0xff] }
 0x419   :  { %v1038_v26 = vld [vmem:[#allocation2 + $0x1db8] sm:$0xff]  ;;  %v12123_v32 = vcombine.high %v782_v17, %v790_v41  ;;  %v12122_v37 = vcombine.low %v782_v17, %v790_v41  ;;  %v12967_v17 = vld [vmem:[#allocation6 + $0x2e0] ss:$16 sps:$4 sm:$0xff]   ;;  %v14090_v27 = vpack.c.bf16 %v7628_v5, %v7628_v5 }
 0x41a   :  { %v1046_v50 = vld [vmem:[#allocation2 + $0x1df8] sm:$0xff]  ;;  %v13006_v5 = vld [vmem:[#allocation6] ss:$16 sps:$4 sm:$0xff]  }
 0x41b   :  { %7562 = vmatpush2.bf16.msra.mxu0 %v12186_v53  ;;  %7603 = vmatpush2.bf16.msra.mxu1 %v12442_v54  ;;  %v12379_v48 = vcombine.high %v1038_v26, %v1046_v50  ;;  %v766_v23 = vld [vmem:[#allocation2 + $0x1538] sm:$0xff]  ;;  %v12378_v43 = vcombine.low %v1038_v26, %v1046_v50  ;;  %v12972_v26 = vld [vmem:[#allocation6 + $0xc4] ss:$16 sps:$4 sm:$0xff]  }
 0x41c   :  { %7563 = vmatprep.subr.bf16.mxu0 %v12171_v31  ;;  %7604 = vmatprep.subr.bf16.mxu1 %v12427_v55  ;;  %v774_v20 = vld [vmem:[#allocation2 + $0x1578] sm:$0xff]  ;;  %v12975_v50 = vld [vmem:[#allocation6 + $0x2c4] ss:$16 sps:$4 sm:$0xff]  }
 0x41d   :  { %v1022_v33 = vld [vmem:[#allocation2 + $0x1d38] sm:$0xff]  ;;  %v12107_v56 = vcombine.high %v766_v23, %v774_v20  ;;  %v12106_v52 = vcombine.low %v766_v23, %v774_v20  ;;  %v12978_v23 = vld [vmem:[#allocation6 + $0xa4] ss:$16 sps:$4 sm:$0xff]  }
 0x41e   :  { %v1030_v62 = vld [vmem:[#allocation2 + $0x1d78] sm:$0xff] }
 0x41f   :  { %7564 = vmatpush2.bf16.msra.mxu0 %v12170_v2  ;;  %7605 = vmatpush2.bf16.msra.mxu1 %v12426_v3  ;;  %v12363_v44 = vcombine.high %v1022_v33, %v1030_v62  ;;  %v750_v24 = vld [vmem:[#allocation2 + $0x14b8] sm:$0xff]  ;;  %v12362_v53 = vcombine.low %v1022_v33, %v1030_v62  ;;  %v12981_v62 = vld [vmem:[#allocation6 + $0x2a4] ss:$16 sps:$4 sm:$0xff]  }
 0x420   :  { %7565 = vmatprep.subr.bf16.mxu0 %v12155_v10  ;;  %7606 = vmatprep.subr.bf16.mxu1 %v12411_v4  ;;  %v758_v45 = vld [vmem:[#allocation2 + $0x14f8] sm:$0xff] }
 0x421   :  { %v1006_v49 = vld [vmem:[#allocation2 + $0x1cb8] sm:$0xff]  ;;  %v12091_v54 = vcombine.high %v750_v24, %v758_v45  ;;  %v12090_v1 = vcombine.low %v750_v24, %v758_v45  ;;  %v12979_v24 = vld [vmem:[#allocation6 + $0x2a0] ss:$16 sps:$4 sm:$0xff]   ;;  %v12984_v45 = vld [vmem:[#allocation6 + $0x84] ss:$16 sps:$4 sm:$0xff]  }
 0x422   :  { %v1014_v28 = vld [vmem:[#allocation2 + $0x1cf8] sm:$0xff] }
 0x423   :  { %7566 = vmatpush2.bf16.msra.mxu0 %v12154_v59  ;;  %7607 = vmatpush2.bf16.msra.mxu1 %v12410_v14  ;;  %v12347_v31 = vcombine.high %v1006_v49, %v1014_v28  ;;  %v734_v55 = vld [vmem:[#allocation2 + $0x1438] sm:$0xff]  ;;  %v12346_v2 = vcombine.low %v1006_v49, %v1014_v28  ;;  %v7630_v59 = vmax.f32 %v13982_v19, 0.0  ;;  %v14082_v14 = vld [vmem:[#allocation4 + $0x8] sm:$0xff]  ;;  %v12987_v28 = vld [vmem:[#allocation6 + $0x284] ss:$16 sps:$4 sm:$0xff]  }
 0x424   :  { %7567 = vmatprep.subr.bf16.mxu0 %v12139_v15  ;;  %7608 = vmatprep.subr.bf16.mxu1 %v12395_v21  ;;  %v742_v57 = vld [vmem:[#allocation2 + $0x1478] sm:$0xff]  ;;  %v1166_v15 = vrot.slane %v14082_v14, %v1133_v40  ;;  %v12964_v21 = vld [vmem:[#allocation6 + $0xe0] ss:$16 sps:$4 sm:$0xff]   ;;  %v1170_v41 = vrot.slane %v14082_v14, %v1137_v46 }
 0x425   :  { %v990_v61 = vld [vmem:[#allocation2 + $0x1c38] sm:$0xff]  ;;  %v12075_v3 = vcombine.high %v734_v55, %v742_v57  ;;  %v12074_v4 = vcombine.low %v734_v55, %v742_v57  ;;  %v12973_v46 = vld [vmem:[#allocation6 + $0x2c0] ss:$16 sps:$4 sm:$0xff]  }
 0x426   :  { %v998_v63 = vld [vmem:[#allocation2 + $0x1c78] sm:$0xff]  ;;  %v12988_v55 = vld [vmem:[#allocation6 + $0x60] ss:$16 sps:$4 sm:$0xff]  }
 0x427   :  { %7568 = vmatpush2.bf16.msra.mxu0 %v12138_v30  ;;  %7609 = vmatpush2.bf16.msra.mxu1 %v12394_v16  ;;  %v12331_v10 = vcombine.high %v990_v61, %v998_v63  ;;  %v12330_v58 = vcombine.low %v990_v61, %v998_v63  ;;  %v14093_v30 = vpack.c.bf16 %v7630_v59, %v7630_v59  ;;  %v12991_v57 = vld [vmem:[#allocation6 + $0x260] ss:$16 sps:$4 sm:$0xff]   ;;  %v12996_v61 = vld [vmem:[#allocation6 + $0x44] ss:$16 sps:$4 sm:$0xff]  }
 0x428   :  { %7569 = vmatprep.subr.bf16.mxu0 %v12123_v32  ;;  %7610 = vmatprep.subr.bf16.mxu1 %v12379_v48  ;;  %v12970_v32 = vld [vmem:[#allocation6 + $0xc0] ss:$16 sps:$4 sm:$0xff]   ;;  %v12999_v63 = vld [vmem:[#allocation6 + $0x244] ss:$16 sps:$4 sm:$0xff]  }
 0x429   :  { %v13009_v59 = vld [vmem:[#allocation6 + $0x200] ss:$16 sps:$4 sm:$0xff]  }
 0x42b   :  { %7570 = vmatpush2.bf16.msra.mxu0 %v12122_v37  ;;  %7611 = vmatpush2.bf16.msra.mxu1 %v12378_v43 }
 0x42c   :  { %7571 = vmatprep.subr.bf16.mxu0 %v12107_v56  ;;  %7612 = vmatprep.subr.bf16.mxu1 %v12363_v44  ;;  %v12976_v56 = vld [vmem:[#allocation6 + $0xa0] ss:$16 sps:$4 sm:$0xff]  }
 0x42f   :  { %7572 = vmatpush2.bf16.msra.mxu0 %v12106_v52  ;;  %7613 = vmatpush2.bf16.msra.mxu1 %v12362_v53  ;;  %v12982_v52 = vld [vmem:[#allocation6 + $0x80] ss:$16 sps:$4 sm:$0xff]  }
 0x430   :  { %7573 = vmatprep.subr.bf16.mxu0 %v12091_v54  ;;  %7614 = vmatprep.subr.bf16.mxu1 %v12347_v31  ;;  %v12985_v53 = vld [vmem:[#allocation6 + $0x280] ss:$16 sps:$4 sm:$0xff]   ;;  %v12990_v54 = vld [vmem:[#allocation6 + $0x64] ss:$16 sps:$4 sm:$0xff]  }
 0x431   :  { %v12993_v31 = vld [vmem:[#allocation6 + $0x264] ss:$16 sps:$4 sm:$0xff]  }
 0x433   :  { %7574 = vmatpush2.bf16.msra.mxu0 %v12090_v1  ;;  %7615 = vmatpush2.bf16.msra.mxu1 %v12346_v2  ;;  %v12994_v1 = vld [vmem:[#allocation6 + $0x40] ss:$16 sps:$4 sm:$0xff]  }
 0x434   :  { %7575 = vmatprep.subr.bf16.mxu0 %v12075_v3  ;;  %7616 = vmatprep.subr.bf16.mxu1 %v12331_v10  ;;  %v12997_v2 = vld [vmem:[#allocation6 + $0x240] ss:$16 sps:$4 sm:$0xff]   ;;  %v13002_v3 = vld [vmem:[#allocation6 + $0x24] ss:$16 sps:$4 sm:$0xff]  }
 0x435   :  { %v13005_v10 = vld [vmem:[#allocation6 + $0x224] ss:$16 sps:$4 sm:$0xff]  }
 0x437   :  { %7576 = vmatpush2.bf16.msra.mxu0 %v12074_v4  ;;  %7617 = vmatpush2.bf16.msra.mxu1 %v12330_v58  ;;  %v13000_v4 = vld [vmem:[#allocation6 + $0x20] ss:$16 sps:$4 sm:$0xff]  }
 0x438   :  { %10753 = vmatprep.subr.bf16.mxu0 %v12966_v9  ;;  %10794 = vmatprep.subr.bf16.mxu1 %v12969_v11  ;;  %v13003_v58 = vld [vmem:[#allocation6 + $0x220] ss:$16 sps:$4 sm:$0xff]   ;;  %v13008_v9 = vld [vmem:[#allocation6 + $0x4] ss:$16 sps:$4 sm:$0xff]  }
 0x439   :  { %v13011_v11 = vld [vmem:[#allocation6 + $0x204] ss:$16 sps:$4 sm:$0xff]  }
 0x43a   :  { %v7333_v19 = vpop.f32.mrf.mxu0  ;;  %7578 = vmatmul.mubr.bf16.vlgmr.msra.gmra.mxu0 %v13914_v38  ;;  %v7374_v40 = vpop.f32.mrf.mxu1  ;;  %7619 = vmatmul.mubr.bf16.vlgmr.msra.gmra.mxu1 %v13916_v39 }
 0x43b   :  { %v7334_v16 = vadd.f32 %v7333_v19, %v1166_v15  ;;  %10754 = vmatpush1.bf16.msra.mxu0 %v12964_v21  ;;  %10785 = vmatprep.mubr.bf16.mxu0 %v14090_v27  ;;  %v13014_v15 = vld [vmem:[#allocation6 + $0x1e4] ss:$16 sps:$4 sm:$0xff]  }
 0x43c   :  { %10795 = vmatpush1.bf16.msra.mxu1 %v12967_v17  ;;  %v7335_v48 = vpop.f32.mrf.mxu0  ;;  %10826 = vmatprep.mubr.bf16.mxu1 %v14093_v30  ;;  %v7376_v33 = vpop.f32.mrf.mxu1  ;;  %v13017_v21 = vld [vmem:[#allocation6 + $0x3e4] ss:$16 sps:$4 sm:$0xff]   ;;  %v13012_v17 = vld [vmem:[#allocation6 + $0x1e0] ss:$16 sps:$4 sm:$0xff]  }
 0x43d   :  { %v14097_v20 = vadd.f32 %v7374_v40, %v7334_v16  ;;  %v7336_v38 = vadd.f32 %v7335_v48, %v1170_v41  ;;  %10755 = vmatprep.subr.bf16.mxu0 %v12972_v26  ;;  %10796 = vmatprep.subr.bf16.mxu1 %v12975_v50  ;;  %v13015_v41 = vld [vmem:[#allocation6 + $0x3e0] ss:$16 sps:$4 sm:$0xff]   ;;  %v13020_v26 = vld [vmem:[#allocation6 + $0x1c4] ss:$16 sps:$4 sm:$0xff]  }
 0x43e   :  { %v7337_v37 = vpop.f32.mrf.mxu0  ;;  %v7378_v39 = vpop.f32.mrf.mxu1  ;;  %v13023_v19 = vld [vmem:[#allocation6 + $0x3c4] ss:$16 sps:$4 sm:$0xff]   ;;  %v13018_v50 = vld [vmem:[#allocation6 + $0x1c0] ss:$16 sps:$4 sm:$0xff]  }
 0x43f   :  { %v14100_v43 = vadd.f32 %v7376_v33, %v7336_v38  ;;  %10756 = vmatpush1.bf16.msra.mxu0 %v12970_v32  ;;  %v13021_v16 = vld [vmem:[#allocation6 + $0x3c0] ss:$16 sps:$4 sm:$0xff]   ;;  %v13026_v40 = vld [vmem:[#allocation6 + $0x1a4] ss:$16 sps:$4 sm:$0xff]  }
 0x440   :  { %10797 = vmatpush1.bf16.msra.mxu1 %v12973_v46  ;;  %v7338_v44 = vpop.f32.mrf.mxu0  ;;  %10757 = vmatprep.subr.bf16.mxu0 %v12978_v23  ;;  %v7379_v49 = vpop.f32.mrf.mxu1  ;;  %v13029_v32 = vld [vmem:[#allocation6 + $0x3a4] ss:$16 sps:$4 sm:$0xff]   ;;  %v13024_v48 = vld [vmem:[#allocation6 + $0x1a0] ss:$16 sps:$4 sm:$0xff]  }
 0x441   :  { %10798 = vmatprep.subr.bf16.mxu1 %v12981_v62  ;;  %v13027_v46 = vld [vmem:[#allocation6 + $0x3a0] ss:$16 sps:$4 sm:$0xff]   ;;  %v13032_v23 = vld [vmem:[#allocation6 + $0x184] ss:$16 sps:$4 sm:$0xff]  }
 0x442   :  { %v13035_v38 = vld [vmem:[#allocation6 + $0x384] ss:$16 sps:$4 sm:$0xff]   ;;  %v13030_v33 = vld [vmem:[#allocation6 + $0x180] ss:$16 sps:$4 sm:$0xff]  }
 0x443   :  { %10758 = vmatpush1.bf16.msra.mxu0 %v12976_v56  ;;  %v13033_v62 = vld [vmem:[#allocation6 + $0x380] ss:$16 sps:$4 sm:$0xff]   ;;  %v13038_v37 = vld [vmem:[#allocation6 + $0x164] ss:$16 sps:$4 sm:$0xff]  }
 0x444   :  { %10799 = vmatpush1.bf16.msra.mxu1 %v12979_v24  ;;  %10759 = vmatprep.subr.bf16.mxu0 %v12984_v45  ;;  %v13041_v39 = vld [vmem:[#allocation6 + $0x364] ss:$16 sps:$4 sm:$0xff]   ;;  %v13036_v56 = vld [vmem:[#allocation6 + $0x160] ss:$16 sps:$4 sm:$0xff]  }
 0x445   :  { %10800 = vmatprep.subr.bf16.mxu1 %v12987_v28  ;;  %v13039_v44 = vld [vmem:[#allocation6 + $0x360] ss:$16 sps:$4 sm:$0xff]   ;;  %v13044_v24 = vld [vmem:[#allocation6 + $0x144] ss:$16 sps:$4 sm:$0xff]  }
 0x446   :  { %v13047_v45 = vld [vmem:[#allocation6 + $0x344] ss:$16 sps:$4 sm:$0xff]   ;;  %v13042_v49 = vld [vmem:[#allocation6 + $0x140] ss:$16 sps:$4 sm:$0xff]  }
 0x447   :  { %10760 = vmatpush1.bf16.msra.mxu0 %v12982_v52  ;;  %v13045_v28 = vld [vmem:[#allocation6 + $0x340] ss:$16 sps:$4 sm:$0xff]   ;;  %v13050_v52 = vld [vmem:[#allocation6 + $0x124] ss:$16 sps:$4 sm:$0xff]  }
 0x448   :  { %10801 = vmatpush1.bf16.msra.mxu1 %v12985_v53  ;;  %10761 = vmatprep.subr.bf16.mxu0 %v12990_v54  ;;  %v13053_v53 = vld [vmem:[#allocation6 + $0x324] ss:$16 sps:$4 sm:$0xff]   ;;  %v13048_v54 = vld [vmem:[#allocation6 + $0x120] ss:$16 sps:$4 sm:$0xff]  }
 0x449   :  { %10802 = vmatprep.subr.bf16.mxu1 %v12993_v31  ;;  %v13051_v31 = vld [vmem:[#allocation6 + $0x320] ss:$16 sps:$4 sm:$0xff]  }
 0x44b   :  { %10762 = vmatpush1.bf16.msra.mxu0 %v12988_v55  ;;  %v13056_v55 = vld [vmem:[#allocation6 + $0x104] ss:$16 sps:$4 sm:$0xff]  }
 0x44c   :  { %10803 = vmatpush1.bf16.msra.mxu1 %v12991_v57  ;;  %10763 = vmatprep.subr.bf16.mxu0 %v12996_v61  ;;  %v13059_v57 = vld [vmem:[#allocation6 + $0x304] ss:$16 sps:$4 sm:$0xff]   ;;  %v13054_v61 = vld [vmem:[#allocation6 + $0x100] ss:$16 sps:$4 sm:$0xff]  }
 0x44d   :  { %10804 = vmatprep.subr.bf16.mxu1 %v12999_v63  ;;  %v7627_v63 = vmax.f32 %v13947_v18, 0.0 }
 0x44f   :  { %10764 = vmatpush1.bf16.msra.mxu0 %v12994_v1  ;;  %v13057_v1 = vld [vmem:[#allocation6 + $0x300] ss:$16 sps:$4 sm:$0xff]  }
 0x450   :  { %10805 = vmatpush1.bf16.msra.mxu1 %v12997_v2  ;;  %10765 = vmatprep.subr.bf16.mxu0 %v13002_v3  ;;  %v13062_v2 = vld [vmem:[#allocation6 + $0x4e4] ss:$16 sps:$4 sm:$0xff]   ;;  %v7629_v3 = vmax.f32 %v13977_v7, 0.0 }
 0x451   :  { %10806 = vmatprep.subr.bf16.mxu1 %v13005_v10  ;;  %v13065_v10 = vld [vmem:[#allocation6 + $0x6e4] ss:$16 sps:$4 sm:$0xff]  }
 0x452   :  { %v14108_v18 = vpack.c.bf16 %v7629_v3, %v7629_v3  ;;  %v13102_v3 = vld [vmem:[#allocation6 + $0x400] ss:$16 sps:$4 sm:$0xff]  }
 0x453   :  { %10766 = vmatpush1.bf16.msra.mxu0 %v13000_v4  ;;  %v7632_v4 = vmax.f32 %v14008_v36, 0.0 }
 0x454   :  { %10807 = vmatpush1.bf16.msra.mxu1 %v13003_v58  ;;  %10767 = vmatprep.subr.bf16.mxu0 %v13008_v9  ;;  %v7634_v58 = vmax.f32 %v14032_v47, 0.0  ;;  %v13060_v9 = vld [vmem:[#allocation6 + $0x4e0] ss:$16 sps:$4 sm:$0xff]  }
 0x455   :  { %10808 = vmatprep.subr.bf16.mxu1 %v13011_v11  ;;  %v14106_v11 = vpack.c.bf16 %v7627_v63, %v7627_v63  ;;  %v13099_v63 = vld [vmem:[#allocation6 + $0x620] ss:$16 sps:$4 sm:$0xff]  }
 0x456   :  { %v14113_v36 = vpack.c.bf16 %v7634_v58, %v7634_v58  ;;  %v13113_v58 = vld [vmem:[#allocation6 + $0x7e4] ss:$16 sps:$4 sm:$0xff]  }
 0x457   :  { %10768 = vmatpush1.bf16.msra.mxu0 %v13006_v5  ;;  %v13063_v5 = vld [vmem:[#allocation6 + $0x6e0] ss:$16 sps:$4 sm:$0xff]  }
 0x458   :  { %10809 = vmatpush1.bf16.msra.mxu1 %v13009_v59  ;;  %10769 = vmatprep.subr.bf16.mxu0 %v13014_v15  ;;  %v13068_v59 = vld [vmem:[#allocation6 + $0x4c4] ss:$16 sps:$4 sm:$0xff]   ;;  %v14110_v15 = vpack.c.bf16 %v7632_v4, %v7632_v4 }
 0x459   :  { %10810 = vmatprep.subr.bf16.mxu1 %v13017_v21  ;;  %v13071_v21 = vld [vmem:[#allocation6 + $0x6c4] ss:$16 sps:$4 sm:$0xff]  }
 0x45a   :  { %v13110_v4 = vld [vmem:[#allocation6 + $0x5e4] ss:$16 sps:$4 sm:$0xff]  }
 0x45b   :  { %10770 = vmatpush2.bf16.msra.mxu0 %v13012_v17 }
 0x45c   :  { %10811 = vmatpush2.bf16.msra.mxu1 %v13015_v41  ;;  %10771 = vmatprep.subr.bf16.mxu0 %v13020_v26  ;;  %v13066_v41 = vld [vmem:[#allocation6 + $0x4c0] ss:$16 sps:$4 sm:$0xff]  }
 0x45d   :  { %10812 = vmatprep.subr.bf16.mxu1 %v13023_v19  ;;  %v13069_v19 = vld [vmem:[#allocation6 + $0x6c0] ss:$16 sps:$4 sm:$0xff]  }
 0x45f   :  { %10772 = vmatpush2.bf16.msra.mxu0 %v13018_v50  ;;  %v13074_v50 = vld [vmem:[#allocation6 + $0x4a4] ss:$16 sps:$4 sm:$0xff]  }
 0x460   :  { %10813 = vmatpush2.bf16.msra.mxu1 %v13021_v16  ;;  %10773 = vmatprep.subr.bf16.mxu0 %v13026_v40 }
 0x461   :  { %10814 = vmatprep.subr.bf16.mxu1 %v13029_v32 }
 0x463   :  { %10774 = vmatpush2.bf16.msra.mxu0 %v13024_v48 }
 0x464   :  { %10815 = vmatpush2.bf16.msra.mxu1 %v13027_v46  ;;  %10775 = vmatprep.subr.bf16.mxu0 %v13032_v23 }
 0x465   :  { %10816 = vmatprep.subr.bf16.mxu1 %v13035_v38  ;;  %v13072_v38 = vld [vmem:[#allocation6 + $0x4a0] ss:$16 sps:$4 sm:$0xff]  }
 0x467   :  { %10776 = vmatpush2.bf16.msra.mxu0 %v13030_v33 }
 0x468   :  { %10817 = vmatpush2.bf16.msra.mxu1 %v13033_v62  ;;  %10777 = vmatprep.subr.bf16.mxu0 %v13038_v37  ;;  %v13075_v62 = vld [vmem:[#allocation6 + $0x6a0] ss:$16 sps:$4 sm:$0xff]   ;;  %v13080_v37 = vld [vmem:[#allocation6 + $0x484] ss:$16 sps:$4 sm:$0xff]  }
 0x469   :  { %10818 = vmatprep.subr.bf16.mxu1 %v13041_v39 }
 0x46b   :  { %10778 = vmatpush2.bf16.msra.mxu0 %v13036_v56  ;;  %v13083_v56 = vld [vmem:[#allocation6 + $0x684] ss:$16 sps:$4 sm:$0xff]  }
 0x46c   :  { %10819 = vmatpush2.bf16.msra.mxu1 %v13039_v44  ;;  %10779 = vmatprep.subr.bf16.mxu0 %v13044_v24  ;;  %v13081_v44 = vld [vmem:[#allocation6 + $0x680] ss:$16 sps:$4 sm:$0xff]   ;;  %v13086_v24 = vld [vmem:[#allocation6 + $0x464] ss:$16 sps:$4 sm:$0xff]  }
 0x46d   :  { %10820 = vmatprep.subr.bf16.mxu1 %v13047_v45  ;;  %v13089_v45 = vld [vmem:[#allocation6 + $0x664] ss:$16 sps:$4 sm:$0xff]  }
 0x46f   :  { %10780 = vmatpush2.bf16.msra.mxu0 %v13042_v49  ;;  %v13084_v49 = vld [vmem:[#allocation6 + $0x460] ss:$16 sps:$4 sm:$0xff]  }
 0x470   :  { %10821 = vmatpush2.bf16.msra.mxu1 %v13045_v28  ;;  %10781 = vmatprep.subr.bf16.mxu0 %v13050_v52  ;;  %v13087_v28 = vld [vmem:[#allocation6 + $0x660] ss:$16 sps:$4 sm:$0xff]   ;;  %v13092_v52 = vld [vmem:[#allocation6 + $0x444] ss:$16 sps:$4 sm:$0xff]  }
 0x471   :  { %10822 = vmatprep.subr.bf16.mxu1 %v13053_v53  ;;  %v13095_v53 = vld [vmem:[#allocation6 + $0x644] ss:$16 sps:$4 sm:$0xff]  }
 0x473   :  { %10782 = vmatpush2.bf16.msra.mxu0 %v13048_v54  ;;  %v13090_v54 = vld [vmem:[#allocation6 + $0x440] ss:$16 sps:$4 sm:$0xff]  }
 0x474   :  { %10823 = vmatpush2.bf16.msra.mxu1 %v13051_v31  ;;  %10783 = vmatprep.subr.bf16.mxu0 %v13056_v55  ;;  %v13093_v31 = vld [vmem:[#allocation6 + $0x640] ss:$16 sps:$4 sm:$0xff]   ;;  %v13098_v55 = vld [vmem:[#allocation6 + $0x424] ss:$16 sps:$4 sm:$0xff]  }
 0x475   :  { %10824 = vmatprep.subr.bf16.mxu1 %v13059_v57  ;;  %v13101_v57 = vld [vmem:[#allocation6 + $0x624] ss:$16 sps:$4 sm:$0xff]  }
 0x477   :  { %10784 = vmatpush2.bf16.msra.mxu0 %v13054_v61  ;;  %v13096_v61 = vld [vmem:[#allocation6 + $0x420] ss:$16 sps:$4 sm:$0xff]  }
 0x478   :  { %10825 = vmatpush2.bf16.msra.mxu1 %v13057_v1  ;;  %10835 = vmatprep.subr.bf16.mxu0 %v13062_v2  ;;  %v13104_v1 = vld [vmem:[#allocation6 + $0x404] ss:$16 sps:$4 sm:$0xff]  }
 0x479   :  { %10876 = vmatprep.subr.bf16.mxu1 %v13065_v10  ;;  %v13107_v2 = vld [vmem:[#allocation6 + $0x604] ss:$16 sps:$4 sm:$0xff]   ;;  %v13105_v10 = vld [vmem:[#allocation6 + $0x600] ss:$16 sps:$4 sm:$0xff]  }
 0x47a   :  { %v7415_v7 = vpop.f32.mrf.mxu0  ;;  %10786 = vmatmul.mubr.bf16.vlgmr.msra.gmra.mxu0 %v14106_v11  ;;  %v7456_v17 = vpop.f32.mrf.mxu1 }
 0x47b   :  { %v7416_v47 = vadd.f32 %v7415_v7, %v14097_v20  ;;  %10827 = vmatmul.mubr.bf16.vlgmr.msra.gmra.mxu1 %v14108_v18  ;;  %10836 = vmatpush1.bf16.msra.mxu0 %v13060_v9  ;;  %v13077_v20 = vld [vmem:[#allocation6 + $0x6a4] ss:$16 sps:$4 sm:$0xff]   ;;  %v13108_v9 = vld [vmem:[#allocation6 + $0x5e0] ss:$16 sps:$4 sm:$0xff]  }
 0x47c   :  { %10867 = vmatprep.mubr.bf16.mxu0 %v14110_v15  ;;  %10877 = vmatpush1.bf16.msra.mxu1 %v13063_v5  ;;  %v7417_v26 = vpop.f32.mrf.mxu0  ;;  %v7458_v32 = vpop.f32.mrf.mxu1  ;;  %v13111_v5 = vld [vmem:[#allocation6 + $0x7e0] ss:$16 sps:$4 sm:$0xff]   ;;  %v13119_v7 = vld [vmem:[#allocation6 + $0x7c4] ss:$16 sps:$4 sm:$0xff]  }
 0x47d   :  { %v14118_v16 = vadd.f32 %v7456_v17, %v7416_v47  ;;  %10908 = vmatprep.mubr.bf16.mxu1 %v14113_v36  ;;  %v7418_v40 = vadd.f32 %v7417_v26, %v14100_v43  ;;  %10837 = vmatprep.subr.bf16.mxu0 %v13068_v59  ;;  %v13078_v43 = vld [vmem:[#allocation6 + $0x480] ss:$16 sps:$4 sm:$0xff]   ;;  %v13116_v59 = vld [vmem:[#allocation6 + $0x5c4] ss:$16 sps:$4 sm:$0xff]  }
 0x47e   :  { %v7419_v48 = vpop.f32.mrf.mxu0  ;;  %10878 = vmatprep.subr.bf16.mxu1 %v13071_v21  ;;  %v7460_v23 = vpop.f32.mrf.mxu1  ;;  %v13114_v21 = vld [vmem:[#allocation6 + $0x5c0] ss:$16 sps:$4 sm:$0xff]   ;;  %v13122_v17 = vld [vmem:[#allocation6 + $0x5a4] ss:$16 sps:$4 sm:$0xff]  }
 0x47f   :  { %v14122_v46 = vadd.f32 %v7458_v32, %v7418_v40  ;;  %10838 = vmatpush1.bf16.msra.mxu0 %v13066_v41  ;;  %v13117_v47 = vld [vmem:[#allocation6 + $0x7c0] ss:$16 sps:$4 sm:$0xff]   ;;  %v13125_v41 = vld [vmem:[#allocation6 + $0x7a4] ss:$16 sps:$4 sm:$0xff]  }
 0x480   :  { %10879 = vmatpush1.bf16.msra.mxu1 %v13069_v19  ;;  %v7420_v33 = vpop.f32.mrf.mxu0  ;;  %10839 = vmatprep.subr.bf16.mxu0 %v13074_v50  ;;  %v7461_v39 = vpop.f32.mrf.mxu1  ;;  %v13120_v26 = vld [vmem:[#allocation6 + $0x5a0] ss:$16 sps:$4 sm:$0xff]   ;;  %v13128_v50 = vld [vmem:[#allocation6 + $0x584] ss:$16 sps:$4 sm:$0xff]  }
 0x481   :  { %10880 = vmatprep.subr.bf16.mxu1 %v13077_v20  ;;  %v13123_v19 = vld [vmem:[#allocation6 + $0x7a0] ss:$16 sps:$4 sm:$0xff]   ;;  %v13131_v40 = vld [vmem:[#allocation6 + $0x784] ss:$16 sps:$4 sm:$0xff]  }
 0x482   :  { %v13126_v32 = vld [vmem:[#allocation6 + $0x580] ss:$16 sps:$4 sm:$0xff]   ;;  %v13134_v48 = vld [vmem:[#allocation6 + $0x564] ss:$16 sps:$4 sm:$0xff]  }
 0x483   :  { %10840 = vmatpush1.bf16.msra.mxu0 %v13072_v38  ;;  %v13129_v20 = vld [vmem:[#allocation6 + $0x780] ss:$16 sps:$4 sm:$0xff]   ;;  %v13137_v23 = vld [vmem:[#allocation6 + $0x764] ss:$16 sps:$4 sm:$0xff]  }
 0x484   :  { %10881 = vmatpush1.bf16.msra.mxu1 %v13075_v62  ;;  %10841 = vmatprep.subr.bf16.mxu0 %v13080_v37  ;;  %v13132_v38 = vld [vmem:[#allocation6 + $0x560] ss:$16 sps:$4 sm:$0xff]   ;;  %v13140_v62 = vld [vmem:[#allocation6 + $0x544] ss:$16 sps:$4 sm:$0xff]  }
 0x485   :  { %10882 = vmatprep.subr.bf16.mxu1 %v13083_v56  ;;  %v13135_v33 = vld [vmem:[#allocation6 + $0x760] ss:$16 sps:$4 sm:$0xff]   ;;  %v13143_v37 = vld [vmem:[#allocation6 + $0x744] ss:$16 sps:$4 sm:$0xff]  }
 0x486   :  { %v13138_v39 = vld [vmem:[#allocation6 + $0x540] ss:$16 sps:$4 sm:$0xff]  }
 0x487   :  { %10842 = vmatpush1.bf16.msra.mxu0 %v13078_v43  ;;  %v13141_v56 = vld [vmem:[#allocation6 + $0x740] ss:$16 sps:$4 sm:$0xff]   ;;  %v13146_v43 = vld [vmem:[#allocation6 + $0x524] ss:$16 sps:$4 sm:$0xff]  }
 0x488   :  { %10883 = vmatpush1.bf16.msra.mxu1 %v13081_v44  ;;  %10843 = vmatprep.subr.bf16.mxu0 %v13086_v24  ;;  %v13149_v44 = vld [vmem:[#allocation6 + $0x724] ss:$16 sps:$4 sm:$0xff]   ;;  %v13144_v24 = vld [vmem:[#allocation6 + $0x520] ss:$16 sps:$4 sm:$0xff]  }
 0x489   :  { %10884 = vmatprep.subr.bf16.mxu1 %v13089_v45  ;;  %v13147_v45 = vld [vmem:[#allocation6 + $0x720] ss:$16 sps:$4 sm:$0xff]  }
 0x48b   :  { %10844 = vmatpush1.bf16.msra.mxu0 %v13084_v49  ;;  %v13152_v49 = vld [vmem:[#allocation6 + $0x504] ss:$16 sps:$4 sm:$0xff]  }
 0x48c   :  { %10885 = vmatpush1.bf16.msra.mxu1 %v13087_v28  ;;  %10845 = vmatprep.subr.bf16.mxu0 %v13092_v52  ;;  %v13155_v28 = vld [vmem:[#allocation6 + $0x704] ss:$16 sps:$4 sm:$0xff]   ;;  %v13150_v52 = vld [vmem:[#allocation6 + $0x500] ss:$16 sps:$4 sm:$0xff]  }
 0x48d   :  { %10886 = vmatprep.subr.bf16.mxu1 %v13095_v53  ;;  %v7631_v53 = vmax.f32 %v14003_v25, 0.0  ;;  %v13159_v25 = vld [vmem:[#allocation6 + $0xae0] ss:$16 sps:$4 sm:$0xff]  }
 0x48f   :  { %10846 = vmatpush1.bf16.msra.mxu0 %v13090_v54  ;;  %v13153_v54 = vld [vmem:[#allocation6 + $0x700] ss:$16 sps:$4 sm:$0xff]  }
 0x490   :  { %10887 = vmatpush1.bf16.msra.mxu1 %v13093_v31  ;;  %10847 = vmatprep.subr.bf16.mxu0 %v13098_v55  ;;  %v13158_v31 = vld [vmem:[#allocation6 + $0x8e4] ss:$16 sps:$4 sm:$0xff]   ;;  %v7633_v55 = vmax.f32 %v14027_v22, 0.0 }
 0x491   :  { %10888 = vmatprep.subr.bf16.mxu1 %v13101_v57  ;;  %v13161_v57 = vld [vmem:[#allocation6 + $0xae4] ss:$16 sps:$4 sm:$0xff]  }
 0x492   :  { %v13164_v22 = vld [vmem:[#allocation6 + $0x8c4] ss:$16 sps:$4 sm:$0xff]  }
 0x493   :  { %10848 = vmatpush1.bf16.msra.mxu0 %v13096_v61  ;;  %v7636_v61 = vmax.f32 %v14056_v0, 0.0 }
 0x494   :  { %10889 = vmatpush1.bf16.msra.mxu1 %v13099_v63  ;;  %10849 = vmatprep.subr.bf16.mxu0 %v13104_v1  ;;  %v7638_v63 = vmax.f32 %v14078_v34, 0.0  ;;  %v1174_v1 = vrot.slane %v14082_v14, %v1141_v8  ;;  %v13167_v34 = vld [vmem:[#allocation6 + $0xac4] ss:$16 sps:$4 sm:$0xff]  }
 0x495   :  { %10890 = vmatprep.subr.bf16.mxu1 %v13107_v2  ;;  %v13156_v2 = vld [vmem:[#allocation6 + $0x8e0] ss:$16 sps:$4 sm:$0xff]  }
 0x497   :  { %10850 = vmatpush1.bf16.msra.mxu0 %v13102_v3  ;;  %v14131_v3 = vpack.c.bf16 %v7631_v53, %v7631_v53  ;;  %v13195_v53 = vld [vmem:[#allocation6 + $0xa20] ss:$16 sps:$4 sm:$0xff]  }
 0x498   :  { %10891 = vmatpush1.bf16.msra.mxu1 %v13105_v10  ;;  %10851 = vmatprep.subr.bf16.mxu0 %v13110_v4  ;;  %v14133_v10 = vpack.c.bf16 %v7633_v55, %v7633_v55  ;;  %v14135_v4 = vpack.c.bf16 %v7636_v61, %v7636_v61  ;;  %v13198_v55 = vld [vmem:[#allocation6 + $0x800] ss:$16 sps:$4 sm:$0xff]   ;;  %v13206_v61 = vld [vmem:[#allocation6 + $0x9e4] ss:$16 sps:$4 sm:$0xff]  }
 0x499   :  { %10892 = vmatprep.subr.bf16.mxu1 %v13113_v58  ;;  %v14138_v58 = vpack.c.bf16 %v7638_v63, %v7638_v63  ;;  %v13209_v63 = vld [vmem:[#allocation6 + $0xbe4] ss:$16 sps:$4 sm:$0xff]  }
 0x49b   :  { %10852 = vmatpush2.bf16.msra.mxu0 %v13108_v9 }
 0x49c   :  { %10893 = vmatpush2.bf16.msra.mxu1 %v13111_v5  ;;  %10853 = vmatprep.subr.bf16.mxu0 %v13116_v59  ;;  %v13162_v5 = vld [vmem:[#allocation6 + $0x8c0] ss:$16 sps:$4 sm:$0xff]  }
 0x49d   :  { %10894 = vmatprep.subr.bf16.mxu1 %v13119_v7  ;;  %v13165_v7 = vld [vmem:[#allocation6 + $0xac0] ss:$16 sps:$4 sm:$0xff]  }
 0x49f   :  { %10854 = vmatpush2.bf16.msra.mxu0 %v13114_v21  ;;  %v13170_v21 = vld [vmem:[#allocation6 + $0x8a4] ss:$16 sps:$4 sm:$0xff]  }
 0x4a0   :  { %10895 = vmatpush2.bf16.msra.mxu1 %v13117_v47  ;;  %10855 = vmatprep.subr.bf16.mxu0 %v13122_v17 }
 0x4a1   :  { %10896 = vmatprep.subr.bf16.mxu1 %v13125_v41  ;;  %v13173_v41 = vld [vmem:[#allocation6 + $0xaa4] ss:$16 sps:$4 sm:$0xff]  }
 0x4a3   :  { %10856 = vmatpush2.bf16.msra.mxu0 %v13120_v26 }
 0x4a4   :  { %10897 = vmatpush2.bf16.msra.mxu1 %v13123_v19  ;;  %10857 = vmatprep.subr.bf16.mxu0 %v13128_v50  ;;  %v13168_v50 = vld [vmem:[#allocation6 + $0x8a0] ss:$16 sps:$4 sm:$0xff]  }
 0x4a5   :  { %10898 = vmatprep.subr.bf16.mxu1 %v13131_v40 }
 0x4a7   :  { %10858 = vmatpush2.bf16.msra.mxu0 %v13126_v32  ;;  %v13171_v32 = vld [vmem:[#allocation6 + $0xaa0] ss:$16 sps:$4 sm:$0xff]  }
 0x4a8   :  { %10899 = vmatpush2.bf16.msra.mxu1 %v13129_v20  ;;  %10859 = vmatprep.subr.bf16.mxu0 %v13134_v48  ;;  %v13176_v20 = vld [vmem:[#allocation6 + $0x884] ss:$16 sps:$4 sm:$0xff]  }
 0x4a9   :  { %10900 = vmatprep.subr.bf16.mxu1 %v13137_v23  ;;  %v13179_v23 = vld [vmem:[#allocation6 + $0xa84] ss:$16 sps:$4 sm:$0xff]  }
 0x4ab   :  { %10860 = vmatpush2.bf16.msra.mxu0 %v13132_v38  ;;  %v13174_v38 = vld [vmem:[#allocation6 + $0x880] ss:$16 sps:$4 sm:$0xff]  }
 0x4ac   :  { %10901 = vmatpush2.bf16.msra.mxu1 %v13135_v33  ;;  %10861 = vmatprep.subr.bf16.mxu0 %v13140_v62  ;;  %v13177_v33 = vld [vmem:[#allocation6 + $0xa80] ss:$16 sps:$4 sm:$0xff]   ;;  %v13182_v62 = vld [vmem:[#allocation6 + $0x864] ss:$16 sps:$4 sm:$0xff]  }
 0x4ad   :  { %10902 = vmatprep.subr.bf16.mxu1 %v13143_v37  ;;  %v13185_v37 = vld [vmem:[#allocation6 + $0xa64] ss:$16 sps:$4 sm:$0xff]  }
 0x4af   :  { %10862 = vmatpush2.bf16.msra.mxu0 %v13138_v39  ;;  %v13180_v39 = vld [vmem:[#allocation6 + $0x860] ss:$16 sps:$4 sm:$0xff]  }
 0x4b0   :  { %10903 = vmatpush2.bf16.msra.mxu1 %v13141_v56  ;;  %10863 = vmatprep.subr.bf16.mxu0 %v13146_v43  ;;  %v13183_v56 = vld [vmem:[#allocation6 + $0xa60] ss:$16 sps:$4 sm:$0xff]   ;;  %v13188_v43 = vld [vmem:[#allocation6 + $0x844] ss:$16 sps:$4 sm:$0xff]  }
 0x4b1   :  { %10904 = vmatprep.subr.bf16.mxu1 %v13149_v44  ;;  %v13191_v44 = vld [vmem:[#allocation6 + $0xa44] ss:$16 sps:$4 sm:$0xff]  }
 0x4b3   :  { %10864 = vmatpush2.bf16.msra.mxu0 %v13144_v24  ;;  %v13186_v24 = vld [vmem:[#allocation6 + $0x840] ss:$16 sps:$4 sm:$0xff]  }
 0x4b4   :  { %10905 = vmatpush2.bf16.msra.mxu1 %v13147_v45  ;;  %10865 = vmatprep.subr.bf16.mxu0 %v13152_v49  ;;  %v13189_v45 = vld [vmem:[#allocation6 + $0xa40] ss:$16 sps:$4 sm:$0xff]   ;;  %v13194_v49 = vld [vmem:[#allocation6 + $0x824] ss:$16 sps:$4 sm:$0xff]  }
 0x4b5   :  { %10906 = vmatprep.subr.bf16.mxu1 %v13155_v28  ;;  %v13197_v28 = vld [vmem:[#allocation6 + $0xa24] ss:$16 sps:$4 sm:$0xff]  }
 0x4b7   :  { %10866 = vmatpush2.bf16.msra.mxu0 %v13150_v52  ;;  %v13192_v52 = vld [vmem:[#allocation6 + $0x820] ss:$16 sps:$4 sm:$0xff]  }
 0x4b8   :  { %10907 = vmatpush2.bf16.msra.mxu1 %v13153_v54  ;;  %10917 = vmatprep.subr.bf16.mxu0 %v13158_v31  ;;  %v13200_v54 = vld [vmem:[#allocation6 + $0x804] ss:$16 sps:$4 sm:$0xff]  }
 0x4b9   :  { %10958 = vmatprep.subr.bf16.mxu1 %v13161_v57  ;;  %v13203_v31 = vld [vmem:[#allocation6 + $0xa04] ss:$16 sps:$4 sm:$0xff]   ;;  %v13201_v57 = vld [vmem:[#allocation6 + $0xa00] ss:$16 sps:$4 sm:$0xff]  }
 0x4ba   :  { %v7497_v0 = vpop.f32.mrf.mxu0  ;;  %10868 = vmatmul.mubr.bf16.vlgmr.msra.gmra.mxu0 %v14131_v3  ;;  %v7538_v8 = vpop.f32.mrf.mxu1 }
 0x4bb   :  { %v7498_v9 = vadd.f32 %v7497_v0, %v1174_v1  ;;  %10909 = vmatmul.mubr.bf16.vlgmr.msra.gmra.mxu1 %v14133_v10  ;;  %10918 = vmatpush1.bf16.msra.mxu0 %v13156_v2  ;;  %v13204_v1 = vld [vmem:[#allocation6 + $0x9e0] ss:$16 sps:$4 sm:$0xff]  }
 0x4bc   :  { %10949 = vmatprep.mubr.bf16.mxu0 %v14135_v4  ;;  %10959 = vmatpush1.bf16.msra.mxu1 %v13159_v25  ;;  %v14142_v59 = vpop.f32.mrf.mxu0  ;;  %v14147_v17 = vpop.f32.mrf.mxu1  ;;  %v13207_v2 = vld [vmem:[#allocation6 + $0xbe0] ss:$16 sps:$4 sm:$0xff]   ;;  %v13212_v25 = vld [vmem:[#allocation6 + $0x9c4] ss:$16 sps:$4 sm:$0xff]  }
 0x4bd   :  { %v14144_v47 = vadd.f32 %v7538_v8, %v7498_v9  ;;  %10990 = vmatprep.mubr.bf16.mxu1 %v14138_v58  ;;  %10919 = vmatprep.subr.bf16.mxu0 %v13164_v22  ;;  %v13215_v22 = vld [vmem:[#allocation6 + $0xbc4] ss:$16 sps:$4 sm:$0xff]   ;;  %v13210_v0 = vld [vmem:[#allocation6 + $0x9c0] ss:$16 sps:$4 sm:$0xff]  }
 0x4be   :  { %v7501_v26 = vpop.f32.mrf.mxu0  ;;  %10960 = vmatprep.subr.bf16.mxu1 %v13167_v34  ;;  %v7542_v19 = vpop.f32.mrf.mxu1  ;;  %v13213_v34 = vld [vmem:[#allocation6 + $0xbc0] ss:$16 sps:$4 sm:$0xff]   ;;  %v13218_v9 = vld [vmem:[#allocation6 + $0x9a4] ss:$16 sps:$4 sm:$0xff]  }
 0x4bf   :  { %10920 = vmatpush1.bf16.msra.mxu0 %v13162_v5  ;;  %v13221_v8 = vld [vmem:[#allocation6 + $0xba4] ss:$16 sps:$4 sm:$0xff]   ;;  %v13216_v5 = vld [vmem:[#allocation6 + $0x9a0] ss:$16 sps:$4 sm:$0xff]  }
 0x4c0   :  { %10961 = vmatpush1.bf16.msra.mxu1 %v13165_v7  ;;  %v7502_v40 = vpop.f32.mrf.mxu0  ;;  %10921 = vmatprep.subr.bf16.mxu0 %v13170_v21  ;;  %v7543_v48 = vpop.f32.mrf.mxu1  ;;  %v13219_v7 = vld [vmem:[#allocation6 + $0xba0] ss:$16 sps:$4 sm:$0xff]   ;;  %v13224_v21 = vld [vmem:[#allocation6 + $0x984] ss:$16 sps:$4 sm:$0xff]  }
 0x4c1   :  { %10962 = vmatprep.subr.bf16.mxu1 %v13173_v41  ;;  %v13227_v41 = vld [vmem:[#allocation6 + $0xb84] ss:$16 sps:$4 sm:$0xff]   ;;  %v13222_v26 = vld [vmem:[#allocation6 + $0x980] ss:$16 sps:$4 sm:$0xff]  }
 0x4c2   :  { %v13225_v19 = vld [vmem:[#allocation6 + $0xb80] ss:$16 sps:$4 sm:$0xff]   ;;  %v13233_v40 = vld [vmem:[#allocation6 + $0xb64] ss:$16 sps:$4 sm:$0xff]  }
 0x4c3   :  { %10922 = vmatpush1.bf16.msra.mxu0 %v13168_v50  ;;  %v13230_v50 = vld [vmem:[#allocation6 + $0x964] ss:$16 sps:$4 sm:$0xff]  }
 0x4c4   :  { %10963 = vmatpush1.bf16.msra.mxu1 %v13171_v32  ;;  %10923 = vmatprep.subr.bf16.mxu0 %v13176_v20  ;;  %v13228_v32 = vld [vmem:[#allocation6 + $0x960] ss:$16 sps:$4 sm:$0xff]   ;;  %v13236_v48 = vld [vmem:[#allocation6 + $0x944] ss:$16 sps:$4 sm:$0xff]  }
 0x4c5   :  { %10964 = vmatprep.subr.bf16.mxu1 %v13179_v23  ;;  %v13231_v20 = vld [vmem:[#allocation6 + $0xb60] ss:$16 sps:$4 sm:$0xff]   ;;  %v13239_v23 = vld [vmem:[#allocation6 + $0xb44] ss:$16 sps:$4 sm:$0xff]  }
 0x4c7   :  { %10924 = vmatpush1.bf16.msra.mxu0 %v13174_v38  ;;  %v13234_v38 = vld [vmem:[#allocation6 + $0x940] ss:$16 sps:$4 sm:$0xff]  }
 0x4c8   :  { %10965 = vmatpush1.bf16.msra.mxu1 %v13177_v33  ;;  %10925 = vmatprep.subr.bf16.mxu0 %v13182_v62  ;;  %v13237_v33 = vld [vmem:[#allocation6 + $0xb40] ss:$16 sps:$4 sm:$0xff]   ;;  %v13242_v62 = vld [vmem:[#allocation6 + $0x924] ss:$16 sps:$4 sm:$0xff]  }
 0x4c9   :  { %10966 = vmatprep.subr.bf16.mxu1 %v13185_v37  ;;  %v13245_v37 = vld [vmem:[#allocation6 + $0xb24] ss:$16 sps:$4 sm:$0xff]  }
 0x4cb   :  { %10926 = vmatpush1.bf16.msra.mxu0 %v13180_v39  ;;  %v13240_v39 = vld [vmem:[#allocation6 + $0x920] ss:$16 sps:$4 sm:$0xff]  }
 0x4cc   :  { %10967 = vmatpush1.bf16.msra.mxu1 %v13183_v56  ;;  %10927 = vmatprep.subr.bf16.mxu0 %v13188_v43  ;;  %v13243_v56 = vld [vmem:[#allocation6 + $0xb20] ss:$16 sps:$4 sm:$0xff]   ;;  %v13248_v43 = vld [vmem:[#allocation6 + $0x904] ss:$16 sps:$4 sm:$0xff]  }
 0x4cd   :  { %10968 = vmatprep.subr.bf16.mxu1 %v13191_v44  ;;  %v13251_v44 = vld [vmem:[#allocation6 + $0xb04] ss:$16 sps:$4 sm:$0xff]  }
 0x4cf   :  { %10928 = vmatpush1.bf16.msra.mxu0 %v13186_v24  ;;  %v1178_v24 = vrot.slane %v14082_v14, %v1145_v12  ;;  %v13255_v12 = vld [vmem:[#allocation6 + $0xee0] ss:$16 sps:$4 sm:$0xff]   ;;  %v13260_v14 = vld [vmem:[#allocation6 + $0xcc4] ss:$16 sps:$4 sm:$0xff]  }
 0x4d0   :  { %10969 = vmatpush1.bf16.msra.mxu1 %v13189_v45  ;;  %10929 = vmatprep.subr.bf16.mxu0 %v13194_v49  ;;  %v13246_v45 = vld [vmem:[#allocation6 + $0x900] ss:$16 sps:$4 sm:$0xff]   ;;  %v7635_v49 = vmax.f32 %v14051_v51, 0.0 }
 0x4d1   :  { %10970 = vmatprep.subr.bf16.mxu1 %v13197_v28  ;;  %v13249_v28 = vld [vmem:[#allocation6 + $0xb00] ss:$16 sps:$4 sm:$0xff]  }
 0x4d3   :  { %10930 = vmatpush1.bf16.msra.mxu0 %v13192_v52  ;;  %v13254_v52 = vld [vmem:[#allocation6 + $0xce4] ss:$16 sps:$4 sm:$0xff]  }
 0x4d4   :  { %10971 = vmatpush1.bf16.msra.mxu1 %v13195_v53  ;;  %10931 = vmatprep.subr.bf16.mxu0 %v13200_v54  ;;  %v7637_v53 = vmax.f32 %v14073_v29, 0.0  ;;  %v13257_v54 = vld [vmem:[#allocation6 + $0xee4] ss:$16 sps:$4 sm:$0xff]  }
 0x4d5   :  { %10972 = vmatprep.subr.bf16.mxu1 %v13203_v31  ;;  %v7640_v31 = vmax.f32 %v14122_v46, 0.0 }
 0x4d6   :  { %v14158_v51 = vpack.c.bf16 %v7637_v53, %v7637_v53  ;;  %v13294_v53 = vld [vmem:[#allocation6 + $0xc00] ss:$16 sps:$4 sm:$0xff]  }
 0x4d7   :  { %10932 = vmatpush1.bf16.msra.mxu0 %v13198_v55  ;;  %v7500_v55 = vadd.f32 %v14142_v59, %v1178_v24  ;;  %v13293_v24 = vld [vmem:[#allocation6 + $0xe24] ss:$16 sps:$4 sm:$0xff]  }
 0x4d8   :  { %10973 = vmatpush1.bf16.msra.mxu1 %v13201_v57  ;;  %10933 = vmatprep.subr.bf16.mxu0 %v13206_v61  ;;  %v14156_v57 = vpack.c.bf16 %v7635_v49, %v7635_v49  ;;  %v13263_v61 = vld [vmem:[#allocation6 + $0xec4] ss:$16 sps:$4 sm:$0xff]   ;;  %v13291_v49 = vld [vmem:[#allocation6 + $0xe20] ss:$16 sps:$4 sm:$0xff]  }
 0x4d9   :  { %10974 = vmatprep.subr.bf16.mxu1 %v13209_v63  ;;  %v14160_v63 = vpack.c.bf16 %v7640_v31, %v7640_v31  ;;  %v7541_v46 = vadd.f32 %v14147_v17, %v7500_v55  ;;  %v13302_v31 = vld [vmem:[#allocation6 + $0xde4] ss:$16 sps:$4 sm:$0xff]  }
 0x4da   :  { %v13305_v55 = vld [vmem:[#allocation6 + $0xfe4] ss:$16 sps:$4 sm:$0xff]  }
 0x4db   :  { %10934 = vmatpush2.bf16.msra.mxu0 %v13204_v1  ;;  %v13258_v1 = vld [vmem:[#allocation6 + $0xcc0] ss:$16 sps:$4 sm:$0xff]  }
 0x4dc   :  { %10975 = vmatpush2.bf16.msra.mxu1 %v13207_v2  ;;  %10935 = vmatprep.subr.bf16.mxu0 %v13212_v25  ;;  %v13261_v25 = vld [vmem:[#allocation6 + $0xec0] ss:$16 sps:$4 sm:$0xff]  }
 0x4dd   :  { %10976 = vmatprep.subr.bf16.mxu1 %v13215_v22  ;;  %v13266_v22 = vld [vmem:[#allocation6 + $0xca4] ss:$16 sps:$4 sm:$0xff]  }
 0x4df   :  { %10936 = vmatpush2.bf16.msra.mxu0 %v13210_v0 }
 0x4e0   :  { %10977 = vmatpush2.bf16.msra.mxu1 %v13213_v34  ;;  %10937 = vmatprep.subr.bf16.mxu0 %v13218_v9  ;;  %v13269_v9 = vld [vmem:[#allocation6 + $0xea4] ss:$16 sps:$4 sm:$0xff]  }
 0x4e1   :  { %10978 = vmatprep.subr.bf16.mxu1 %v13221_v8 }
 0x4e3   :  { %10938 = vmatpush2.bf16.msra.mxu0 %v13216_v5 }
 0x4e4   :  { %10979 = vmatpush2.bf16.msra.mxu1 %v13219_v7  ;;  %10939 = vmatprep.subr.bf16.mxu0 %v13224_v21  ;;  %v13264_v7 = vld [vmem:[#allocation6 + $0xca0] ss:$16 sps:$4 sm:$0xff]  }
 0x4e5   :  { %10980 = vmatprep.subr.bf16.mxu1 %v13227_v41  ;;  %v13267_v41 = vld [vmem:[#allocation6 + $0xea0] ss:$16 sps:$4 sm:$0xff]  }
 0x4e7   :  { %10940 = vmatpush2.bf16.msra.mxu0 %v13222_v26  ;;  %v13272_v26 = vld [vmem:[#allocation6 + $0xc84] ss:$16 sps:$4 sm:$0xff]  }
 0x4e8   :  { %10981 = vmatpush2.bf16.msra.mxu1 %v13225_v19  ;;  %10941 = vmatprep.subr.bf16.mxu0 %v13230_v50 }
 0x4e9   :  { %10982 = vmatprep.subr.bf16.mxu1 %v13233_v40  ;;  %v13275_v40 = vld [vmem:[#allocation6 + $0xe84] ss:$16 sps:$4 sm:$0xff]  }
 0x4eb   :  { %10942 = vmatpush2.bf16.msra.mxu0 %v13228_v32 }
 0x4ec   :  { %10983 = vmatpush2.bf16.msra.mxu1 %v13231_v20  ;;  %10943 = vmatprep.subr.bf16.mxu0 %v13236_v48  ;;  %v13270_v20 = vld [vmem:[#allocation6 + $0xc80] ss:$16 sps:$4 sm:$0xff]  }
 0x4ed   :  { %10984 = vmatprep.subr.bf16.mxu1 %v13239_v23  ;;  %v13273_v48 = vld [vmem:[#allocation6 + $0xe80] ss:$16 sps:$4 sm:$0xff]   ;;  %v13278_v23 = vld [vmem:[#allocation6 + $0xc64] ss:$16 sps:$4 sm:$0xff]  }
 0x4ef   :  { %10944 = vmatpush2.bf16.msra.mxu0 %v13234_v38  ;;  %v13281_v38 = vld [vmem:[#allocation6 + $0xe64] ss:$16 sps:$4 sm:$0xff]  }
 0x4f0   :  { %10985 = vmatpush2.bf16.msra.mxu1 %v13237_v33  ;;  %10945 = vmatprep.subr.bf16.mxu0 %v13242_v62  ;;  %v13276_v33 = vld [vmem:[#allocation6 + $0xc60] ss:$16 sps:$4 sm:$0xff]  }
 0x4f1   :  { %10986 = vmatprep.subr.bf16.mxu1 %v13245_v37  ;;  %v13279_v62 = vld [vmem:[#allocation6 + $0xe60] ss:$16 sps:$4 sm:$0xff]   ;;  %v13284_v37 = vld [vmem:[#allocation6 + $0xc44] ss:$16 sps:$4 sm:$0xff]  }
 0x4f3   :  { %10946 = vmatpush2.bf16.msra.mxu0 %v13240_v39  ;;  %v13287_v39 = vld [vmem:[#allocation6 + $0xe44] ss:$16 sps:$4 sm:$0xff]  }
 0x4f4   :  { %10987 = vmatpush2.bf16.msra.mxu1 %v13243_v56  ;;  %10947 = vmatprep.subr.bf16.mxu0 %v13248_v43  ;;  %v13282_v56 = vld [vmem:[#allocation6 + $0xc40] ss:$16 sps:$4 sm:$0xff]  }
 0x4f5   :  { %10988 = vmatprep.subr.bf16.mxu1 %v13251_v44  ;;  %v13285_v43 = vld [vmem:[#allocation6 + $0xe40] ss:$16 sps:$4 sm:$0xff]   ;;  %v13290_v44 = vld [vmem:[#allocation6 + $0xc24] ss:$16 sps:$4 sm:$0xff]  }
 0x4f7   :  { %10948 = vmatpush2.bf16.msra.mxu0 %v13246_v45  ;;  %v13288_v45 = vld [vmem:[#allocation6 + $0xc20] ss:$16 sps:$4 sm:$0xff]  }
 0x4f8   :  { %10989 = vmatpush2.bf16.msra.mxu1 %v13249_v28  ;;  %10999 = vmatprep.subr.bf16.mxu0 %v13254_v52  ;;  %v13296_v28 = vld [vmem:[#allocation6 + $0xc04] ss:$16 sps:$4 sm:$0xff]  }
 0x4f9   :  { %11040 = vmatprep.subr.bf16.mxu1 %v13257_v54  ;;  %v13299_v52 = vld [vmem:[#allocation6 + $0xe04] ss:$16 sps:$4 sm:$0xff]   ;;  %v13297_v54 = vld [vmem:[#allocation6 + $0xe00] ss:$16 sps:$4 sm:$0xff]  }
 0x4fa   :  { %v14162_v29 = vpop.f32.mrf.mxu0  ;;  %10950 = vmatmul.mubr.bf16.vlgmr.msra.gmra.mxu0 %v14156_v57  ;;  %v14166_v59 = vpop.f32.mrf.mxu1 }
 0x4fb   :  { %10991 = vmatmul.mubr.bf16.vlgmr.msra.gmra.mxu1 %v14158_v51  ;;  %11000 = vmatpush1.bf16.msra.mxu0 %v13252_v60  ;;  %v13300_v60 = vld [vmem:[#allocation6 + $0xde0] ss:$16 sps:$4 sm:$0xff]  }
 0x4fc   :  { %11031 = vmatprep.mubr.bf16.mxu0 %v14160_v63  ;;  %11041 = vmatpush1.bf16.msra.mxu1 %v13255_v12  ;;  %v7581_v2 = vpop.f32.mrf.mxu0  ;;  %v7622_v34 = vpop.f32.mrf.mxu1  ;;  %v13303_v12 = vld [vmem:[#allocation6 + $0xfe0] ss:$16 sps:$4 sm:$0xff]  }
 0x4fd   :  { %v7582_v0 = vadd.f32 %v7581_v2, %v7541_v46  ;;  %11001 = vmatprep.subr.bf16.mxu0 %v13260_v14  ;;  %11042 = vmatprep.subr.bf16.mxu1 %v13263_v61  ;;  %v13308_v14 = vld [vmem:[#allocation6 + $0xdc4] ss:$16 sps:$4 sm:$0xff]   ;;  %v13306_v46 = vld [vmem:[#allocation6 + $0xdc0] ss:$16 sps:$4 sm:$0xff]  }
 0x4fe   :  { %v7583_v8 = vpop.f32.mrf.mxu0  ;;  %v7624_v17 = vpop.f32.mrf.mxu1  ;;  %v13311_v61 = vld [vmem:[#allocation6 + $0xfc4] ss:$16 sps:$4 sm:$0xff]  }
 0x4ff   :  { %v7623_v5 = vadd.f32 %v7622_v34, %v7582_v0  ;;  %11002 = vmatpush1.bf16.msra.mxu0 %v13258_v1  ;;  %v13309_v1 = vld [vmem:[#allocation6 + $0xfc0] ss:$16 sps:$4 sm:$0xff]   ;;  %v13314_v2 = vld [vmem:[#allocation6 + $0xda4] ss:$16 sps:$4 sm:$0xff]  }
 0x500   :  { %11043 = vmatpush1.bf16.msra.mxu1 %v13261_v25  ;;  %v7584_v21 = vpop.f32.mrf.mxu0  ;;  %11003 = vmatprep.subr.bf16.mxu0 %v13266_v22  ;;  %v7625_v50 = vpop.f32.mrf.mxu1  ;;  %v13317_v25 = vld [vmem:[#allocation6 + $0xfa4] ss:$16 sps:$4 sm:$0xff]   ;;  %v13312_v22 = vld [vmem:[#allocation6 + $0xda0] ss:$16 sps:$4 sm:$0xff]  }
 0x501   :  { %v7642_v19 = vmax.f32 %v7623_v5, 0.0  ;;  %11044 = vmatprep.subr.bf16.mxu1 %v13269_v9  ;;  %v13315_v0 = vld [vmem:[#allocation6 + $0xfa0] ss:$16 sps:$4 sm:$0xff]   ;;  %v13320_v34 = vld [vmem:[#allocation6 + $0xd84] ss:$16 sps:$4 sm:$0xff]  }
 0x502   :  { %v13323_v9 = vld [vmem:[#allocation6 + $0xf84] ss:$16 sps:$4 sm:$0xff]   ;;  %v13318_v8 = vld [vmem:[#allocation6 + $0xd80] ss:$16 sps:$4 sm:$0xff]  }
 0x503   :  { %v14170_v32 = vpack.c.bf16 %v7642_v19, %v7642_v19  ;;  %11004 = vmatpush1.bf16.msra.mxu0 %v13264_v7  ;;  %v13321_v5 = vld [vmem:[#allocation6 + $0xf80] ss:$16 sps:$4 sm:$0xff]   ;;  %v13326_v17 = vld [vmem:[#allocation6 + $0xd64] ss:$16 sps:$4 sm:$0xff]  }
 0x504   :  { %11045 = vmatpush1.bf16.msra.mxu1 %v13267_v41  ;;  %11005 = vmatprep.subr.bf16.mxu0 %v13272_v26  ;;  %v13329_v7 = vld [vmem:[#allocation6 + $0xf64] ss:$16 sps:$4 sm:$0xff]   ;;  %v13324_v21 = vld [vmem:[#allocation6 + $0xd60] ss:$16 sps:$4 sm:$0xff]  }
 0x505   :  { %11072 = vmatprep.mubr.bf16.mxu1 %v14170_v32  ;;  %11046 = vmatprep.subr.bf16.mxu1 %v13275_v40  ;;  %v13327_v41 = vld [vmem:[#allocation6 + $0xf60] ss:$16 sps:$4 sm:$0xff]   ;;  %v13332_v26 = vld [vmem:[#allocation6 + $0xd44] ss:$16 sps:$4 sm:$0xff]  }
 0x506   :  { %v13335_v19 = vld [vmem:[#allocation6 + $0xf44] ss:$16 sps:$4 sm:$0xff]   ;;  %v13330_v50 = vld [vmem:[#allocation6 + $0xd40] ss:$16 sps:$4 sm:$0xff]  }
 0x507   :  { %11006 = vmatpush1.bf16.msra.mxu0 %v13270_v20  ;;  %v13333_v40 = vld [vmem:[#allocation6 + $0xf40] ss:$16 sps:$4 sm:$0xff]   ;;  %v13338_v20 = vld [vmem:[#allocation6 + $0xd24] ss:$16 sps:$4 sm:$0xff]  }
 0x508   :  { %11047 = vmatpush1.bf16.msra.mxu1 %v13273_v48  ;;  %11007 = vmatprep.subr.bf16.mxu0 %v13278_v23  ;;  %v7580_v48 = vadd.f32 %v14162_v29, %v14144_v47  ;;  %v13341_v23 = vld [vmem:[#allocation6 + $0xf24] ss:$16 sps:$4 sm:$0xff]   ;;  %v8171_v47 = vld [vmem:[#allocation7] sm:$0xf]  ;;  %v13350_v29 = vld [vmem:[#allocation6 + $0xec] ss:$16 sps:$4 sm:$0xff]  }
 0x509   :  { %11048 = vmatprep.subr.bf16.mxu1 %v13281_v38  ;;  %v13336_v38 = vld [vmem:[#allocation6 + $0xd20] ss:$16 sps:$4 sm:$0xff]  }
 0x50b   :  { %11008 = vmatpush1.bf16.msra.mxu0 %v13276_v33  ;;  %v13339_v33 = vld [vmem:[#allocation6 + $0xf20] ss:$16 sps:$4 sm:$0xff]  }
 0x50c   :  { %11049 = vmatpush1.bf16.msra.mxu1 %v13279_v62  ;;  %11009 = vmatprep.subr.bf16.mxu0 %v13284_v37  ;;  %v13344_v62 = vld [vmem:[#allocation6 + $0xd04] ss:$16 sps:$4 sm:$0xff]   ;;  %v7621_v37 = vadd.f32 %v14166_v59, %v7580_v48  ;;  %v13351_v59 = vld [vmem:[#allocation6 + $0x2e8] ss:$16 sps:$4 sm:$0xff]  }
 0x50d   :  { %11050 = vmatprep.subr.bf16.mxu1 %v13287_v39  ;;  %v13347_v39 = vld [vmem:[#allocation6 + $0xf04] ss:$16 sps:$4 sm:$0xff]   ;;  %v13378_v48 = vld [vmem:[#allocation6 + $0x48] ss:$16 sps:$4 sm:$0xff]  }
 0x50f   :  { %11010 = vmatpush1.bf16.msra.mxu0 %v13282_v56  ;;  %v7639_v56 = vmax.f32 %v14118_v16, 0.0 }
 0x510   :  { %11051 = vmatpush1.bf16.msra.mxu1 %v13285_v43  ;;  %11011 = vmatprep.subr.bf16.mxu0 %v13290_v44  ;;  %v13342_v43 = vld [vmem:[#allocation6 + $0xd00] ss:$16 sps:$4 sm:$0xff]  }
 0x511   :  { %11052 = vmatprep.subr.bf16.mxu1 %v13293_v24  ;;  %v13345_v44 = vld [vmem:[#allocation6 + $0xf00] ss:$16 sps:$4 sm:$0xff]   ;;  %v7641_v24 = vmax.f32 %v7621_v37, 0.0  ;;  %v13387_v37 = vld [vmem:[#allocation6 + $0x228] ss:$16 sps:$4 sm:$0xff]  }
 0x513   :  { %11012 = vmatpush1.bf16.msra.mxu0 %v13288_v45  ;;  %v13353_v45 = vld [vmem:[#allocation6 + $0x2ec] ss:$16 sps:$4 sm:$0xff]   ;;  %v14180_v16 = vpack.c.bf16 %v7641_v24, %v7641_v24  ;;  %v13396_v24 = vld [vmem:[#allocation6 + $0x1e8] ss:$16 sps:$4 sm:$0xff]  }
 0x514   :  { %11053 = vmatpush1.bf16.msra.mxu1 %v13291_v49  ;;  %11013 = vmatprep.subr.bf16.mxu0 %v13296_v28  ;;  %v8176_v49 = vrot.slane %v8171_v47, %v13929_v6  ;;  %v13348_v28 = vld [vmem:[#allocation6 + $0xe8] ss:$16 sps:$4 sm:$0xff]  }
 0x515   :  { %11054 = vmatprep.subr.bf16.mxu1 %v13299_v52  ;;  %v14178_v52 = vpack.c.bf16 %v7639_v56, %v7639_v56  ;;  %v13354_v6 = vld [vmem:[#allocation6 + $0xc8] ss:$16 sps:$4 sm:$0xff]   ;;  %v13395_v56 = vld [vmem:[#allocation6 + $0x20c] ss:$16 sps:$4 sm:$0xff]  }
 0x517   :  { %11014 = vmatpush1.bf16.msra.mxu0 %v13294_v53  ;;  %v8180_v53 = vrot.slane %v8171_v47, %v13932_v13  ;;  %v13398_v47 = vld [vmem:[#allocation6 + $0x1ec] ss:$16 sps:$4 sm:$0xff]  }
 0x518   :  { %11055 = vmatpush1.bf16.msra.mxu1 %v13297_v54  ;;  %11015 = vmatprep.subr.bf16.mxu0 %v13302_v31  ;;  %v13356_v54 = vld [vmem:[#allocation6 + $0xcc] ss:$16 sps:$4 sm:$0xff]  }
 0x519   :  { %11056 = vmatprep.subr.bf16.mxu1 %v13305_v55  ;;  %v13359_v55 = vld [vmem:[#allocation6 + $0x2cc] ss:$16 sps:$4 sm:$0xff]  }
 0x51b   :  { %11016 = vmatpush2.bf16.msra.mxu0 %v13300_v60 }
 0x51c   :  { %11057 = vmatpush2.bf16.msra.mxu1 %v13303_v12  ;;  %11017 = vmatprep.subr.bf16.mxu0 %v13308_v14 }
 0x51d   :  { %11058 = vmatprep.subr.bf16.mxu1 %v13311_v61  ;;  %v13357_v61 = vld [vmem:[#allocation6 + $0x2c8] ss:$16 sps:$4 sm:$0xff]  }
 0x51f   :  { %11018 = vmatpush2.bf16.msra.mxu0 %v13306_v46  ;;  %v13362_v46 = vld [vmem:[#allocation6 + $0xac] ss:$16 sps:$4 sm:$0xff]  }
 0x520   :  { %11059 = vmatpush2.bf16.msra.mxu1 %v13309_v1  ;;  %11019 = vmatprep.subr.bf16.mxu0 %v13314_v2 }
 0x521   :  { %11060 = vmatprep.subr.bf16.mxu1 %v13317_v25  ;;  %v13365_v25 = vld [vmem:[#allocation6 + $0x2ac] ss:$16 sps:$4 sm:$0xff]  }
 0x523   :  { %11020 = vmatpush2.bf16.msra.mxu0 %v13312_v22 }
 0x524   :  { %11061 = vmatpush2.bf16.msra.mxu1 %v13315_v0  ;;  %11021 = vmatprep.subr.bf16.mxu0 %v13320_v34 }
 0x525   :  { %11062 = vmatprep.subr.bf16.mxu1 %v13323_v9  ;;  %v13360_v9 = vld [vmem:[#allocation6 + $0xa8] ss:$16 sps:$4 sm:$0xff]  }
 0x527   :  { %11022 = vmatpush2.bf16.msra.mxu0 %v13318_v8  ;;  %v13363_v8 = vld [vmem:[#allocation6 + $0x2a8] ss:$16 sps:$4 sm:$0xff]  }
 0x528   :  { %11063 = vmatpush2.bf16.msra.mxu1 %v13321_v5  ;;  %11023 = vmatprep.subr.bf16.mxu0 %v13326_v17  ;;  %v13368_v5 = vld [vmem:[#allocation6 + $0x8c] ss:$16 sps:$4 sm:$0xff]  }
 0x529   :  { %11064 = vmatprep.subr.bf16.mxu1 %v13329_v7  ;;  %v13371_v7 = vld [vmem:[#allocation6 + $0x28c] ss:$16 sps:$4 sm:$0xff]  }
 0x52b   :  { %11024 = vmatpush2.bf16.msra.mxu0 %v13324_v21  ;;  %v13369_v21 = vld [vmem:[#allocation6 + $0x288] ss:$16 sps:$4 sm:$0xff]  }
 0x52c   :  { %11065 = vmatpush2.bf16.msra.mxu1 %v13327_v41  ;;  %11025 = vmatprep.subr.bf16.mxu0 %v13332_v26  ;;  %v13374_v41 = vld [vmem:[#allocation6 + $0x6c] ss:$16 sps:$4 sm:$0xff]  }
 0x52d   :  { %11066 = vmatprep.subr.bf16.mxu1 %v13335_v19  ;;  %v13377_v26 = vld [vmem:[#allocation6 + $0x26c] ss:$16 sps:$4 sm:$0xff]   ;;  %v13372_v19 = vld [vmem:[#allocation6 + $0x68] ss:$16 sps:$4 sm:$0xff]  }
 0x52f   :  { %11026 = vmatpush2.bf16.msra.mxu0 %v13330_v50  ;;  %v13375_v50 = vld [vmem:[#allocation6 + $0x268] ss:$16 sps:$4 sm:$0xff]  }
 0x530   :  { %11067 = vmatpush2.bf16.msra.mxu1 %v13333_v40  ;;  %11027 = vmatprep.subr.bf16.mxu0 %v13338_v20  ;;  %v13380_v40 = vld [vmem:[#allocation6 + $0x4c] ss:$16 sps:$4 sm:$0xff]  }
 0x531   :  { %11068 = vmatprep.subr.bf16.mxu1 %v13341_v23  ;;  %v13383_v20 = vld [vmem:[#allocation6 + $0x24c] ss:$16 sps:$4 sm:$0xff]   ;;  %v13381_v23 = vld [vmem:[#allocation6 + $0x248] ss:$16 sps:$4 sm:$0xff]  }
 0x533   :  { %11028 = vmatpush2.bf16.msra.mxu0 %v13336_v38  ;;  %v13386_v38 = vld [vmem:[#allocation6 + $0x2c] ss:$16 sps:$4 sm:$0xff]  }
 0x534   :  { %11069 = vmatpush2.bf16.msra.mxu1 %v13339_v33  ;;  %11029 = vmatprep.subr.bf16.mxu0 %v13344_v62  ;;  %v13389_v33 = vld [vmem:[#allocation6 + $0x22c] ss:$16 sps:$4 sm:$0xff]   ;;  %v13384_v62 = vld [vmem:[#allocation6 + $0x28] ss:$16 sps:$4 sm:$0xff]  }
 0x535   :  { %11070 = vmatprep.subr.bf16.mxu1 %v13347_v39  ;;  %v13392_v39 = vld [vmem:[#allocation6 + $0xc] ss:$16 sps:$4 sm:$0xff]  }
 0x537   :  { %11030 = vmatpush2.bf16.msra.mxu0 %v13342_v43  ;;  %v13390_v43 = vld [vmem:[#allocation6 + $0x8] ss:$16 sps:$4 sm:$0xff]  }
 0x538   :  { %11071 = vmatpush2.bf16.msra.mxu1 %v13345_v44  ;;  %11081 = vmatprep.subr.bf16.mxu0 %v13350_v29  ;;  %v13393_v44 = vld [vmem:[#allocation6 + $0x208] ss:$16 sps:$4 sm:$0xff]   ;;  %v13401_v29 = vld [vmem:[#allocation6 + $0x3ec] ss:$16 sps:$4 sm:$0xff]  }
 0x539   :  { %11122 = vmatprep.subr.bf16.mxu1 %v13353_v45  ;;  %v13399_v45 = vld [vmem:[#allocation6 + $0x3e8] ss:$16 sps:$4 sm:$0xff]  }
 0x53a   :  { %v10787_v31 = vpop.f32.mrf.mxu0  ;;  %11032 = vmatmul.mubr.bf16.vlgmr.msra.gmra.mxu0 %v14178_v52 }
 0x53b   :  { %v10788_v60 = vadd.f32 %v10787_v31, %v8176_v49  ;;  %v10828_v12 = vpop.f32.mrf.mxu1  ;;  %11073 = vmatmul.mubr.bf16.vlgmr.msra.gmra.mxu1 %v14180_v16  ;;  %11082 = vmatpush1.bf16.msra.mxu0 %v13348_v28  ;;  %v13404_v49 = vld [vmem:[#allocation6 + $0x1cc] ss:$16 sps:$4 sm:$0xff]  }
 0x53c   :  { %11113 = vmatprep.mubr.bf16.mxu0 %v14090_v27  ;;  %11123 = vmatpush1.bf16.msra.mxu1 %v13351_v59  ;;  %v10789_v14 = vpop.f32.mrf.mxu0  ;;  %v13407_v28 = vld [vmem:[#allocation6 + $0x3cc] ss:$16 sps:$4 sm:$0xff]   ;;  %v13402_v59 = vld [vmem:[#allocation6 + $0x1c8] ss:$16 sps:$4 sm:$0xff]  }
 0x53d   :  { %v14186_v1 = vadd.f32 %v10828_v12, %v10788_v60  ;;  %11154 = vmatprep.mubr.bf16.mxu1 %v14093_v30  ;;  %v10790_v13 = vadd.f32 %v10789_v14, %v8180_v53  ;;  %v10830_v2 = vpop.f32.mrf.mxu1  ;;  %11083 = vmatprep.subr.bf16.mxu0 %v13356_v54  ;;  %v13366_v30 = vld [vmem:[#allocation6 + $0x88] ss:$16 sps:$4 sm:$0xff]   ;;  %v13410_v54 = vld [vmem:[#allocation6 + $0x1ac] ss:$16 sps:$4 sm:$0xff]  }
 0x53e   :  { %v10791_v22 = vpop.f32.mrf.mxu0  ;;  %11124 = vmatprep.subr.bf16.mxu1 %v13359_v55  ;;  %v13405_v53 = vld [vmem:[#allocation6 + $0x3c8] ss:$16 sps:$4 sm:$0xff]   ;;  %v13413_v31 = vld [vmem:[#allocation6 + $0x3ac] ss:$16 sps:$4 sm:$0xff]  }
 0x53f   :  { %v14189_v0 = vadd.f32 %v10830_v2, %v10790_v13  ;;  %v10832_v34 = vpop.f32.mrf.mxu1  ;;  %11084 = vmatpush1.bf16.msra.mxu0 %v13354_v6  ;;  %v13408_v55 = vld [vmem:[#allocation6 + $0x1a8] ss:$16 sps:$4 sm:$0xff]   ;;  %v13416_v12 = vld [vmem:[#allocation6 + $0x18c] ss:$16 sps:$4 sm:$0xff]  }
 0x540   :  { %11125 = vmatpush1.bf16.msra.mxu1 %v13357_v61  ;;  %v10792_v27 = vpop.f32.mrf.mxu0  ;;  %11085 = vmatprep.subr.bf16.mxu0 %v13362_v46  ;;  %v13411_v60 = vld [vmem:[#allocation6 + $0x3a8] ss:$16 sps:$4 sm:$0xff]   ;;  %v13419_v6 = vld [vmem:[#allocation6 + $0x38c] ss:$16 sps:$4 sm:$0xff]  }
 0x541   :  { %v10833_v17 = vpop.f32.mrf.mxu1  ;;  %11126 = vmatprep.subr.bf16.mxu1 %v13365_v25  ;;  %v13414_v14 = vld [vmem:[#allocation6 + $0x188] ss:$16 sps:$4 sm:$0xff]   ;;  %v13422_v46 = vld [vmem:[#allocation6 + $0x16c] ss:$16 sps:$4 sm:$0xff]  }
 0x542   :  { %v13417_v61 = vld [vmem:[#allocation6 + $0x388] ss:$16 sps:$4 sm:$0xff]   ;;  %v13425_v13 = vld [vmem:[#allocation6 + $0x36c] ss:$16 sps:$4 sm:$0xff]  }
 0x543   :  { %11086 = vmatpush1.bf16.msra.mxu0 %v13360_v9  ;;  %v13420_v2 = vld [vmem:[#allocation6 + $0x168] ss:$16 sps:$4 sm:$0xff]   ;;  %v13428_v22 = vld [vmem:[#allocation6 + $0x14c] ss:$16 sps:$4 sm:$0xff]  }
 0x544   :  { %11127 = vmatpush1.bf16.msra.mxu1 %v13363_v8  ;;  %11087 = vmatprep.subr.bf16.mxu0 %v13368_v5  ;;  %v13423_v25 = vld [vmem:[#allocation6 + $0x368] ss:$16 sps:$4 sm:$0xff]   ;;  %v13431_v34 = vld [vmem:[#allocation6 + $0x34c] ss:$16 sps:$4 sm:$0xff]  }
 0x545   :  { %11128 = vmatprep.subr.bf16.mxu1 %v13371_v7  ;;  %v13426_v9 = vld [vmem:[#allocation6 + $0x148] ss:$16 sps:$4 sm:$0xff]   ;;  %v13434_v8 = vld [vmem:[#allocation6 + $0x12c] ss:$16 sps:$4 sm:$0xff]  }
 0x546   :  { %v13429_v27 = vld [vmem:[#allocation6 + $0x348] ss:$16 sps:$4 sm:$0xff]   ;;  %v13437_v5 = vld [vmem:[#allocation6 + $0x32c] ss:$16 sps:$4 sm:$0xff]  }
 0x547   :  { %11088 = vmatpush1.bf16.msra.mxu0 %v13366_v30  ;;  %v13432_v17 = vld [vmem:[#allocation6 + $0x128] ss:$16 sps:$4 sm:$0xff]   ;;  %v13440_v30 = vld [vmem:[#allocation6 + $0x10c] ss:$16 sps:$4 sm:$0xff]  }
 0x548   :  { %11129 = vmatpush1.bf16.msra.mxu1 %v13369_v21  ;;  %11089 = vmatprep.subr.bf16.mxu0 %v13374_v41  ;;  %v13435_v7 = vld [vmem:[#allocation6 + $0x328] ss:$16 sps:$4 sm:$0xff]   ;;  %v13443_v21 = vld [vmem:[#allocation6 + $0x30c] ss:$16 sps:$4 sm:$0xff]  }
 0x549   :  { %11130 = vmatprep.subr.bf16.mxu1 %v13377_v26  ;;  %v13438_v41 = vld [vmem:[#allocation6 + $0x108] ss:$16 sps:$4 sm:$0xff]  }
 0x54a   :  { %v13441_v26 = vld [vmem:[#allocation6 + $0x308] ss:$16 sps:$4 sm:$0xff]  }
 0x54b   :  { %11090 = vmatpush1.bf16.msra.mxu0 %v13372_v19  ;;  %v13446_v19 = vld [vmem:[#allocation6 + $0x4ec] ss:$16 sps:$4 sm:$0xff]  }
 0x54c   :  { %11131 = vmatpush1.bf16.msra.mxu1 %v13375_v50  ;;  %11091 = vmatprep.subr.bf16.mxu0 %v13380_v40  ;;  %v13449_v50 = vld [vmem:[#allocation6 + $0x6ec] ss:$16 sps:$4 sm:$0xff]   ;;  %v13444_v40 = vld [vmem:[#allocation6 + $0x4e8] ss:$16 sps:$4 sm:$0xff]  }
 0x54d   :  { %11132 = vmatprep.subr.bf16.mxu1 %v13383_v20  ;;  %v13447_v20 = vld [vmem:[#allocation6 + $0x6e8] ss:$16 sps:$4 sm:$0xff]  }
 0x54f   :  { %11092 = vmatpush1.bf16.msra.mxu0 %v13378_v48  ;;  %v13452_v48 = vld [vmem:[#allocation6 + $0x4cc] ss:$16 sps:$4 sm:$0xff]  }
 0x550   :  { %11133 = vmatpush1.bf16.msra.mxu1 %v13381_v23  ;;  %11093 = vmatprep.subr.bf16.mxu0 %v13386_v38  ;;  %v13455_v38 = vld [vmem:[#allocation6 + $0x6cc] ss:$16 sps:$4 sm:$0xff]  }
 0x551   :  { %11134 = vmatprep.subr.bf16.mxu1 %v13389_v33 }
 0x553   :  { %11094 = vmatpush1.bf16.msra.mxu0 %v13384_v62 }
 0x554   :  { %11135 = vmatpush1.bf16.msra.mxu1 %v13387_v37  ;;  %11095 = vmatprep.subr.bf16.mxu0 %v13392_v39  ;;  %v13450_v37 = vld [vmem:[#allocation6 + $0x4c8] ss:$16 sps:$4 sm:$0xff]  }
 0x555   :  { %11136 = vmatprep.subr.bf16.mxu1 %v13395_v56  ;;  %v13453_v56 = vld [vmem:[#allocation6 + $0x6c8] ss:$16 sps:$4 sm:$0xff]  }
 0x557   :  { %11096 = vmatpush1.bf16.msra.mxu0 %v13390_v43  ;;  %v13458_v43 = vld [vmem:[#allocation6 + $0x4ac] ss:$16 sps:$4 sm:$0xff]  }
 0x558   :  { %11137 = vmatpush1.bf16.msra.mxu1 %v13393_v44  ;;  %11097 = vmatprep.subr.bf16.mxu0 %v13398_v47 }
 0x559   :  { %11138 = vmatprep.subr.bf16.mxu1 %v13401_v29 }
 0x55b   :  { %11098 = vmatpush2.bf16.msra.mxu0 %v13396_v24 }
 0x55c   :  { %11139 = vmatpush2.bf16.msra.mxu1 %v13399_v45  ;;  %11099 = vmatprep.subr.bf16.mxu0 %v13404_v49  ;;  %v13459_v49 = vld [vmem:[#allocation6 + $0x6a8] ss:$16 sps:$4 sm:$0xff]  }
 0x55d   :  { %11140 = vmatprep.subr.bf16.mxu1 %v13407_v28  ;;  %v13464_v28 = vld [vmem:[#allocation6 + $0x48c] ss:$16 sps:$4 sm:$0xff]  }
 0x55f   :  { %11100 = vmatpush2.bf16.msra.mxu0 %v13402_v59 }
 0x560   :  { %11141 = vmatpush2.bf16.msra.mxu1 %v13405_v53  ;;  %11101 = vmatprep.subr.bf16.mxu0 %v13410_v54  ;;  %v13465_v53 = vld [vmem:[#allocation6 + $0x688] ss:$16 sps:$4 sm:$0xff]   ;;  %v13470_v54 = vld [vmem:[#allocation6 + $0x46c] ss:$16 sps:$4 sm:$0xff]  }
 0x561   :  { %11142 = vmatprep.subr.bf16.mxu1 %v13413_v31  ;;  %v13473_v31 = vld [vmem:[#allocation6 + $0x66c] ss:$16 sps:$4 sm:$0xff]  }
 0x563   :  { %11102 = vmatpush2.bf16.msra.mxu0 %v13408_v55  ;;  %v13468_v55 = vld [vmem:[#allocation6 + $0x468] ss:$16 sps:$4 sm:$0xff]  }
 0x564   :  { %11143 = vmatpush2.bf16.msra.mxu1 %v13411_v60  ;;  %11103 = vmatprep.subr.bf16.mxu0 %v13416_v12  ;;  %v13471_v60 = vld [vmem:[#allocation6 + $0x668] ss:$16 sps:$4 sm:$0xff]   ;;  %v13476_v12 = vld [vmem:[#allocation6 + $0x44c] ss:$16 sps:$4 sm:$0xff]  }
 0x565   :  { %11144 = vmatprep.subr.bf16.mxu1 %v13419_v6  ;;  %v13479_v6 = vld [vmem:[#allocation6 + $0x64c] ss:$16 sps:$4 sm:$0xff]  }
 0x567   :  { %11104 = vmatpush2.bf16.msra.mxu0 %v13414_v14  ;;  %v13474_v14 = vld [vmem:[#allocation6 + $0x448] ss:$16 sps:$4 sm:$0xff]  }
 0x568   :  { %11145 = vmatpush2.bf16.msra.mxu1 %v13417_v61  ;;  %11105 = vmatprep.subr.bf16.mxu0 %v13422_v46  ;;  %v13477_v61 = vld [vmem:[#allocation6 + $0x648] ss:$16 sps:$4 sm:$0xff]   ;;  %v13482_v46 = vld [vmem:[#allocation6 + $0x42c] ss:$16 sps:$4 sm:$0xff]  }
 0x569   :  { %11146 = vmatprep.subr.bf16.mxu1 %v13425_v13  ;;  %v13485_v13 = vld [vmem:[#allocation6 + $0x62c] ss:$16 sps:$4 sm:$0xff]  }
 0x56b   :  { %11106 = vmatpush2.bf16.msra.mxu0 %v13420_v2  ;;  %v13480_v2 = vld [vmem:[#allocation6 + $0x428] ss:$16 sps:$4 sm:$0xff]  }
 0x56c   :  { %11147 = vmatpush2.bf16.msra.mxu1 %v13423_v25  ;;  %11107 = vmatprep.subr.bf16.mxu0 %v13428_v22  ;;  %v13483_v25 = vld [vmem:[#allocation6 + $0x628] ss:$16 sps:$4 sm:$0xff]   ;;  %v13488_v22 = vld [vmem:[#allocation6 + $0x40c] ss:$16 sps:$4 sm:$0xff]  }
 0x56d   :  { %11148 = vmatprep.subr.bf16.mxu1 %v13431_v34  ;;  %v13491_v34 = vld [vmem:[#allocation6 + $0x60c] ss:$16 sps:$4 sm:$0xff]  }
 0x56f   :  { %11108 = vmatpush2.bf16.msra.mxu0 %v13426_v9  ;;  %v13486_v9 = vld [vmem:[#allocation6 + $0x408] ss:$16 sps:$4 sm:$0xff]  }
 0x570   :  { %11149 = vmatpush2.bf16.msra.mxu1 %v13429_v27  ;;  %11109 = vmatprep.subr.bf16.mxu0 %v13434_v8  ;;  %v13489_v27 = vld [vmem:[#allocation6 + $0x608] ss:$16 sps:$4 sm:$0xff]   ;;  %v13494_v8 = vld [vmem:[#allocation6 + $0x5ec] ss:$16 sps:$4 sm:$0xff]  }
 0x571   :  { %11150 = vmatprep.subr.bf16.mxu1 %v13437_v5  ;;  %v13497_v5 = vld [vmem:[#allocation6 + $0x7ec] ss:$16 sps:$4 sm:$0xff]  }
 0x573   :  { %11110 = vmatpush2.bf16.msra.mxu0 %v13432_v17  ;;  %v13492_v17 = vld [vmem:[#allocation6 + $0x5e8] ss:$16 sps:$4 sm:$0xff]  }
 0x574   :  { %11151 = vmatpush2.bf16.msra.mxu1 %v13435_v7  ;;  %11111 = vmatprep.subr.bf16.mxu0 %v13440_v30  ;;  %v13495_v7 = vld [vmem:[#allocation6 + $0x7e8] ss:$16 sps:$4 sm:$0xff]   ;;  %v13500_v30 = vld [vmem:[#allocation6 + $0x5cc] ss:$16 sps:$4 sm:$0xff]  }
 0x575   :  { %11152 = vmatprep.subr.bf16.mxu1 %v13443_v21  ;;  %v13503_v21 = vld [vmem:[#allocation6 + $0x7cc] ss:$16 sps:$4 sm:$0xff]  }
 0x577   :  { %11112 = vmatpush2.bf16.msra.mxu0 %v13438_v41  ;;  %v13498_v41 = vld [vmem:[#allocation6 + $0x5c8] ss:$16 sps:$4 sm:$0xff]  }
 0x578   :  { %11153 = vmatpush2.bf16.msra.mxu1 %v13441_v26  ;;  %11163 = vmatprep.subr.bf16.mxu0 %v13446_v19  ;;  %v13501_v26 = vld [vmem:[#allocation6 + $0x7c8] ss:$16 sps:$4 sm:$0xff]   ;;  %v13506_v19 = vld [vmem:[#allocation6 + $0x5ac] ss:$16 sps:$4 sm:$0xff]  }
 0x579   :  { %11204 = vmatprep.subr.bf16.mxu1 %v13449_v50  ;;  %v13509_v50 = vld [vmem:[#allocation6 + $0x7ac] ss:$16 sps:$4 sm:$0xff]  }
 0x57a   :  { %v10869_v23 = vpop.f32.mrf.mxu0  ;;  %11114 = vmatmul.mubr.bf16.vlgmr.msra.gmra.mxu0 %v14106_v11 }
 0x57b   :  { %v10870_v33 = vadd.f32 %v10869_v23, %v14186_v1  ;;  %v10910_v62 = vpop.f32.mrf.mxu1  ;;  %11155 = vmatmul.mubr.bf16.vlgmr.msra.gmra.mxu1 %v14108_v18  ;;  %11164 = vmatpush1.bf16.msra.mxu0 %v13444_v40  ;;  %v13461_v1 = vld [vmem:[#allocation6 + $0x6ac] ss:$16 sps:$4 sm:$0xff]   ;;  %v13504_v40 = vld [vmem:[#allocation6 + $0x5a8] ss:$16 sps:$4 sm:$0xff]  }
 0x57c   :  { %11195 = vmatprep.mubr.bf16.mxu0 %v14110_v15  ;;  %11205 = vmatpush1.bf16.msra.mxu1 %v13447_v20  ;;  %v10871_v39 = vpop.f32.mrf.mxu0  ;;  %v13456_v15 = vld [vmem:[#allocation6 + $0x4a8] ss:$16 sps:$4 sm:$0xff]   ;;  %v13515_v23 = vld [vmem:[#allocation6 + $0x78c] ss:$16 sps:$4 sm:$0xff]  }
 0x57d   :  { %v14195_v44 = vadd.f32 %v10910_v62, %v10870_v33  ;;  %11236 = vmatprep.mubr.bf16.mxu1 %v14113_v36  ;;  %v10872_v11 = vadd.f32 %v10871_v39, %v14189_v0  ;;  %v10912_v47 = vpop.f32.mrf.mxu1  ;;  %11165 = vmatprep.subr.bf16.mxu0 %v13452_v48  ;;  %v13467_v36 = vld [vmem:[#allocation6 + $0x68c] ss:$16 sps:$4 sm:$0xff]   ;;  %v13462_v0 = vld [vmem:[#allocation6 + $0x488] ss:$16 sps:$4 sm:$0xff]  }
 0x57e   :  { %v10873_v29 = vpop.f32.mrf.mxu0  ;;  %11206 = vmatprep.subr.bf16.mxu1 %v13455_v38  ;;  %v13507_v20 = vld [vmem:[#allocation6 + $0x7a8] ss:$16 sps:$4 sm:$0xff]   ;;  %v13512_v48 = vld [vmem:[#allocation6 + $0x58c] ss:$16 sps:$4 sm:$0xff]  }
 0x57f   :  { %v14199_v18 = vadd.f32 %v10912_v47, %v10872_v11  ;;  %v10914_v24 = vpop.f32.mrf.mxu1  ;;  %11166 = vmatpush1.bf16.msra.mxu0 %v13450_v37  ;;  %v13510_v38 = vld [vmem:[#allocation6 + $0x588] ss:$16 sps:$4 sm:$0xff]   ;;  %v13518_v62 = vld [vmem:[#allocation6 + $0x56c] ss:$16 sps:$4 sm:$0xff]  }
 0x580   :  { %11207 = vmatpush1.bf16.msra.mxu1 %v13453_v56  ;;  %v10874_v45 = vpop.f32.mrf.mxu0  ;;  %11167 = vmatprep.subr.bf16.mxu0 %v13458_v43  ;;  %v13513_v33 = vld [vmem:[#allocation6 + $0x788] ss:$16 sps:$4 sm:$0xff]   ;;  %v13521_v37 = vld [vmem:[#allocation6 + $0x76c] ss:$16 sps:$4 sm:$0xff]  }
 0x581   :  { %v10915_v59 = vpop.f32.mrf.mxu1  ;;  %11208 = vmatprep.subr.bf16.mxu1 %v13461_v1  ;;  %v13516_v39 = vld [vmem:[#allocation6 + $0x568] ss:$16 sps:$4 sm:$0xff]   ;;  %v13524_v43 = vld [vmem:[#allocation6 + $0x54c] ss:$16 sps:$4 sm:$0xff]  }
 0x582   :  { %v13519_v56 = vld [vmem:[#allocation6 + $0x768] ss:$16 sps:$4 sm:$0xff]   ;;  %v13527_v11 = vld [vmem:[#allocation6 + $0x74c] ss:$16 sps:$4 sm:$0xff]  }
 0x583   :  { %11168 = vmatpush1.bf16.msra.mxu0 %v13456_v15  ;;  %v13522_v47 = vld [vmem:[#allocation6 + $0x548] ss:$16 sps:$4 sm:$0xff]   ;;  %v13530_v29 = vld [vmem:[#allocation6 + $0x52c] ss:$16 sps:$4 sm:$0xff]  }
 0x584   :  { %11209 = vmatpush1.bf16.msra.mxu1 %v13459_v49  ;;  %11169 = vmatprep.subr.bf16.mxu0 %v13464_v28  ;;  %v13525_v1 = vld [vmem:[#allocation6 + $0x748] ss:$16 sps:$4 sm:$0xff]   ;;  %v13533_v24 = vld [vmem:[#allocation6 + $0x72c] ss:$16 sps:$4 sm:$0xff]  }
 0x585   :  { %11210 = vmatprep.subr.bf16.mxu1 %v13467_v36  ;;  %v13528_v15 = vld [vmem:[#allocation6 + $0x528] ss:$16 sps:$4 sm:$0xff]   ;;  %v13536_v49 = vld [vmem:[#allocation6 + $0x50c] ss:$16 sps:$4 sm:$0xff]  }
 0x586   :  { %v13531_v45 = vld [vmem:[#allocation6 + $0x728] ss:$16 sps:$4 sm:$0xff]   ;;  %v13539_v28 = vld [vmem:[#allocation6 + $0x70c] ss:$16 sps:$4 sm:$0xff]  }
 0x587   :  { %11170 = vmatpush1.bf16.msra.mxu0 %v13462_v0  ;;  %v13534_v59 = vld [vmem:[#allocation6 + $0x508] ss:$16 sps:$4 sm:$0xff]   ;;  %v13542_v0 = vld [vmem:[#allocation6 + $0x8ec] ss:$16 sps:$4 sm:$0xff]  }
 0x588   :  { %11211 = vmatpush1.bf16.msra.mxu1 %v13465_v53  ;;  %11171 = vmatprep.subr.bf16.mxu0 %v13470_v54  ;;  %v13537_v36 = vld [vmem:[#allocation6 + $0x708] ss:$16 sps:$4 sm:$0xff]   ;;  %v13545_v53 = vld [vmem:[#allocation6 + $0xaec] ss:$16 sps:$4 sm:$0xff]  }
 0x589   :  { %11212 = vmatprep.subr.bf16.mxu1 %v13473_v31  ;;  %v13540_v54 = vld [vmem:[#allocation6 + $0x8e8] ss:$16 sps:$4 sm:$0xff]  }
 0x58a   :  { %v13543_v31 = vld [vmem:[#allocation6 + $0xae8] ss:$16 sps:$4 sm:$0xff]  }
 0x58b   :  { %11172 = vmatpush1.bf16.msra.mxu0 %v13468_v55  ;;  %v13548_v55 = vld [vmem:[#allocation6 + $0x8cc] ss:$16 sps:$4 sm:$0xff]  }
 0x58c   :  { %11213 = vmatpush1.bf16.msra.mxu1 %v13471_v60  ;;  %11173 = vmatprep.subr.bf16.mxu0 %v13476_v12  ;;  %v13551_v12 = vld [vmem:[#allocation6 + $0xacc] ss:$16 sps:$4 sm:$0xff]  }
 0x58d   :  { %11214 = vmatprep.subr.bf16.mxu1 %v13479_v6 }
 0x58f   :  { %11174 = vmatpush1.bf16.msra.mxu0 %v13474_v14  ;;  %v13546_v14 = vld [vmem:[#allocation6 + $0x8c8] ss:$16 sps:$4 sm:$0xff]  }
 0x590   :  { %11215 = vmatpush1.bf16.msra.mxu1 %v13477_v61  ;;  %11175 = vmatprep.subr.bf16.mxu0 %v13482_v46  ;;  %v13549_v46 = vld [vmem:[#allocation6 + $0xac8] ss:$16 sps:$4 sm:$0xff]  }
 0x591   :  { %11216 = vmatprep.subr.bf16.mxu1 %v13485_v13  ;;  %v13554_v13 = vld [vmem:[#allocation6 + $0x8ac] ss:$16 sps:$4 sm:$0xff]  }
 0x593   :  { %11176 = vmatpush1.bf16.msra.mxu0 %v13480_v2 }
 0x594   :  { %11217 = vmatpush1.bf16.msra.mxu1 %v13483_v25  ;;  %11177 = vmatprep.subr.bf16.mxu0 %v13488_v22 }
 0x595   :  { %11218 = vmatprep.subr.bf16.mxu1 %v13491_v34 }
 0x597   :  { %11178 = vmatpush1.bf16.msra.mxu0 %v13486_v9  ;;  %v13560_v9 = vld [vmem:[#allocation6 + $0x88c] ss:$16 sps:$4 sm:$0xff]  }
 0x598   :  { %11219 = vmatpush1.bf16.msra.mxu1 %v13489_v27  ;;  %11179 = vmatprep.subr.bf16.mxu0 %v13494_v8  ;;  %v13563_v8 = vld [vmem:[#allocation6 + $0xa8c] ss:$16 sps:$4 sm:$0xff]  }
 0x599   :  { %11220 = vmatprep.subr.bf16.mxu1 %v13497_v5  ;;  %v13558_v5 = vld [vmem:[#allocation6 + $0x888] ss:$16 sps:$4 sm:$0xff]  }
 0x59b   :  { %11180 = vmatpush2.bf16.msra.mxu0 %v13492_v17  ;;  %v13566_v17 = vld [vmem:[#allocation6 + $0x86c] ss:$16 sps:$4 sm:$0xff]  }
 0x59c   :  { %11221 = vmatpush2.bf16.msra.mxu1 %v13495_v7  ;;  %11181 = vmatprep.subr.bf16.mxu0 %v13500_v30  ;;  %v13569_v7 = vld [vmem:[#allocation6 + $0xa6c] ss:$16 sps:$4 sm:$0xff]   ;;  %v13564_v30 = vld [vmem:[#allocation6 + $0x868] ss:$16 sps:$4 sm:$0xff]  }
 0x59d   :  { %11222 = vmatprep.subr.bf16.mxu1 %v13503_v21  ;;  %v13567_v21 = vld [vmem:[#allocation6 + $0xa68] ss:$16 sps:$4 sm:$0xff]  }
 0x59f   :  { %11182 = vmatpush2.bf16.msra.mxu0 %v13498_v41  ;;  %v13572_v41 = vld [vmem:[#allocation6 + $0x84c] ss:$16 sps:$4 sm:$0xff]  }
 0x5a0   :  { %11223 = vmatpush2.bf16.msra.mxu1 %v13501_v26  ;;  %11183 = vmatprep.subr.bf16.mxu0 %v13506_v19  ;;  %v13575_v26 = vld [vmem:[#allocation6 + $0xa4c] ss:$16 sps:$4 sm:$0xff]   ;;  %v13570_v19 = vld [vmem:[#allocation6 + $0x848] ss:$16 sps:$4 sm:$0xff]  }
 0x5a1   :  { %11224 = vmatprep.subr.bf16.mxu1 %v13509_v50  ;;  %v13573_v50 = vld [vmem:[#allocation6 + $0xa48] ss:$16 sps:$4 sm:$0xff]  }
 0x5a3   :  { %11184 = vmatpush2.bf16.msra.mxu0 %v13504_v40  ;;  %v13578_v40 = vld [vmem:[#allocation6 + $0x82c] ss:$16 sps:$4 sm:$0xff]  }
 0x5a4   :  { %11225 = vmatpush2.bf16.msra.mxu1 %v13507_v20  ;;  %11185 = vmatprep.subr.bf16.mxu0 %v13512_v48  ;;  %v13581_v20 = vld [vmem:[#allocation6 + $0xa2c] ss:$16 sps:$4 sm:$0xff]   ;;  %v13576_v48 = vld [vmem:[#allocation6 + $0x828] ss:$16 sps:$4 sm:$0xff]  }
 0x5a5   :  { %11226 = vmatprep.subr.bf16.mxu1 %v13515_v23  ;;  %v13579_v23 = vld [vmem:[#allocation6 + $0xa28] ss:$16 sps:$4 sm:$0xff]  }
 0x5a7   :  { %11186 = vmatpush2.bf16.msra.mxu0 %v13510_v38  ;;  %v13584_v38 = vld [vmem:[#allocation6 + $0x80c] ss:$16 sps:$4 sm:$0xff]  }
 0x5a8   :  { %11227 = vmatpush2.bf16.msra.mxu1 %v13513_v33  ;;  %11187 = vmatprep.subr.bf16.mxu0 %v13518_v62  ;;  %v13587_v33 = vld [vmem:[#allocation6 + $0xa0c] ss:$16 sps:$4 sm:$0xff]   ;;  %v13582_v62 = vld [vmem:[#allocation6 + $0x808] ss:$16 sps:$4 sm:$0xff]  }
 0x5a9   :  { %11228 = vmatprep.subr.bf16.mxu1 %v13521_v37  ;;  %v13585_v37 = vld [vmem:[#allocation6 + $0xa08] ss:$16 sps:$4 sm:$0xff]  }
 0x5ab   :  { %11188 = vmatpush2.bf16.msra.mxu0 %v13516_v39  ;;  %v13590_v39 = vld [vmem:[#allocation6 + $0x9ec] ss:$16 sps:$4 sm:$0xff]  }
 0x5ac   :  { %11229 = vmatpush2.bf16.msra.mxu1 %v13519_v56  ;;  %11189 = vmatprep.subr.bf16.mxu0 %v13524_v43  ;;  %v13593_v56 = vld [vmem:[#allocation6 + $0xbec] ss:$16 sps:$4 sm:$0xff]   ;;  %v13588_v43 = vld [vmem:[#allocation6 + $0x9e8] ss:$16 sps:$4 sm:$0xff]  }
 0x5ad   :  { %11230 = vmatprep.subr.bf16.mxu1 %v13527_v11  ;;  %v13591_v11 = vld [vmem:[#allocation6 + $0xbe8] ss:$16 sps:$4 sm:$0xff]  }
 0x5af   :  { %11190 = vmatpush2.bf16.msra.mxu0 %v13522_v47  ;;  %v13596_v47 = vld [vmem:[#allocation6 + $0x9cc] ss:$16 sps:$4 sm:$0xff]  }
 0x5b0   :  { %11231 = vmatpush2.bf16.msra.mxu1 %v13525_v1  ;;  %11191 = vmatprep.subr.bf16.mxu0 %v13530_v29  ;;  %v13599_v1 = vld [vmem:[#allocation6 + $0xbcc] ss:$16 sps:$4 sm:$0xff]   ;;  %v13594_v29 = vld [vmem:[#allocation6 + $0x9c8] ss:$16 sps:$4 sm:$0xff]  }
 0x5b1   :  { %11232 = vmatprep.subr.bf16.mxu1 %v13533_v24  ;;  %v13597_v24 = vld [vmem:[#allocation6 + $0xbc8] ss:$16 sps:$4 sm:$0xff]  }
 0x5b3   :  { %11192 = vmatpush2.bf16.msra.mxu0 %v13528_v15  ;;  %v13602_v15 = vld [vmem:[#allocation6 + $0x9ac] ss:$16 sps:$4 sm:$0xff]  }
 0x5b4   :  { %11233 = vmatpush2.bf16.msra.mxu1 %v13531_v45  ;;  %11193 = vmatprep.subr.bf16.mxu0 %v13536_v49  ;;  %v13605_v45 = vld [vmem:[#allocation6 + $0xbac] ss:$16 sps:$4 sm:$0xff]   ;;  %v13600_v49 = vld [vmem:[#allocation6 + $0x9a8] ss:$16 sps:$4 sm:$0xff]  }
 0x5b5   :  { %11234 = vmatprep.subr.bf16.mxu1 %v13539_v28  ;;  %v13603_v28 = vld [vmem:[#allocation6 + $0xba8] ss:$16 sps:$4 sm:$0xff]  }
 0x5b7   :  { %11194 = vmatpush2.bf16.msra.mxu0 %v13534_v59  ;;  %v13608_v59 = vld [vmem:[#allocation6 + $0x98c] ss:$16 sps:$4 sm:$0xff]  }
 0x5b8   :  { %11235 = vmatpush2.bf16.msra.mxu1 %v13537_v36  ;;  %11245 = vmatprep.subr.bf16.mxu0 %v13542_v0  ;;  %v13611_v36 = vld [vmem:[#allocation6 + $0xb8c] ss:$16 sps:$4 sm:$0xff]   ;;  %v13606_v0 = vld [vmem:[#allocation6 + $0x988] ss:$16 sps:$4 sm:$0xff]  }
 0x5b9   :  { %11286 = vmatprep.subr.bf16.mxu1 %v13545_v53  ;;  %v13609_v53 = vld [vmem:[#allocation6 + $0xb88] ss:$16 sps:$4 sm:$0xff]  }
 0x5ba   :  { %v14201_v60 = vpop.f32.mrf.mxu0  ;;  %11196 = vmatmul.mubr.bf16.vlgmr.msra.gmra.mxu0 %v14131_v3  ;;  %v13557_v3 = vld [vmem:[#allocation6 + $0xaac] ss:$16 sps:$4 sm:$0xff]  }
 0x5bb   :  { %v14204_v6 = vpop.f32.mrf.mxu1  ;;  %11237 = vmatmul.mubr.bf16.vlgmr.msra.gmra.mxu1 %v14133_v10  ;;  %11246 = vmatpush1.bf16.msra.mxu0 %v13540_v54  ;;  %v13552_v10 = vld [vmem:[#allocation6 + $0x8a8] ss:$16 sps:$4 sm:$0xff]   ;;  %v13614_v54 = vld [vmem:[#allocation6 + $0x96c] ss:$16 sps:$4 sm:$0xff]  }
 0x5bc   :  { %11277 = vmatprep.mubr.bf16.mxu0 %v14135_v4  ;;  %11287 = vmatpush1.bf16.msra.mxu1 %v13543_v31  ;;  %v14208_v61 = vpop.f32.mrf.mxu0  ;;  %v13555_v4 = vld [vmem:[#allocation6 + $0xaa8] ss:$16 sps:$4 sm:$0xff]   ;;  %v13617_v31 = vld [vmem:[#allocation6 + $0xb6c] ss:$16 sps:$4 sm:$0xff]  }
 0x5bd   :  { %11318 = vmatprep.mubr.bf16.mxu1 %v14138_v58  ;;  %v14211_v2 = vpop.f32.mrf.mxu1  ;;  %11247 = vmatprep.subr.bf16.mxu0 %v13548_v55  ;;  %v13561_v58 = vld [vmem:[#allocation6 + $0xa88] ss:$16 sps:$4 sm:$0xff]  }
 0x5be   :  { %v10955_v25 = vpop.f32.mrf.mxu0  ;;  %11288 = vmatprep.subr.bf16.mxu1 %v13551_v12  ;;  %v13612_v55 = vld [vmem:[#allocation6 + $0x968] ss:$16 sps:$4 sm:$0xff]  }
 0x5bf   :  { %v10996_v22 = vpop.f32.mrf.mxu1  ;;  %11248 = vmatpush1.bf16.msra.mxu0 %v13546_v14  ;;  %v13615_v12 = vld [vmem:[#allocation6 + $0xb68] ss:$16 sps:$4 sm:$0xff]   ;;  %v13620_v14 = vld [vmem:[#allocation6 + $0x94c] ss:$16 sps:$4 sm:$0xff]  }
 0x5c0   :  { %11289 = vmatpush1.bf16.msra.mxu1 %v13549_v46  ;;  %v10956_v34 = vpop.f32.mrf.mxu0  ;;  %11249 = vmatprep.subr.bf16.mxu0 %v13554_v13  ;;  %v13623_v46 = vld [vmem:[#allocation6 + $0xb4c] ss:$16 sps:$4 sm:$0xff]   ;;  %v13618_v13 = vld [vmem:[#allocation6 + $0x948] ss:$16 sps:$4 sm:$0xff]  }
 0x5c1   :  { %v10997_v27 = vpop.f32.mrf.mxu1  ;;  %11290 = vmatprep.subr.bf16.mxu1 %v13557_v3  ;;  %v13621_v3 = vld [vmem:[#allocation6 + $0xb48] ss:$16 sps:$4 sm:$0xff]   ;;  %v13626_v25 = vld [vmem:[#allocation6 + $0x92c] ss:$16 sps:$4 sm:$0xff]  }
 0x5c2   :  { %v13629_v22 = vld [vmem:[#allocation6 + $0xb2c] ss:$16 sps:$4 sm:$0xff]   ;;  %v13627_v34 = vld [vmem:[#allocation6 + $0xb28] ss:$16 sps:$4 sm:$0xff]  }
 0x5c3   :  { %11250 = vmatpush1.bf16.msra.mxu0 %v13552_v10  ;;  %v13624_v10 = vld [vmem:[#allocation6 + $0x928] ss:$16 sps:$4 sm:$0xff]  }
 0x5c4   :  { %11291 = vmatpush1.bf16.msra.mxu1 %v13555_v4  ;;  %11251 = vmatprep.subr.bf16.mxu0 %v13560_v9  ;;  %v13632_v4 = vld [vmem:[#allocation6 + $0x90c] ss:$16 sps:$4 sm:$0xff]   ;;  %v13630_v27 = vld [vmem:[#allocation6 + $0x908] ss:$16 sps:$4 sm:$0xff]  }
 0x5c5   :  { %11292 = vmatprep.subr.bf16.mxu1 %v13563_v8  ;;  %v13635_v9 = vld [vmem:[#allocation6 + $0xb0c] ss:$16 sps:$4 sm:$0xff]   ;;  %v13633_v8 = vld [vmem:[#allocation6 + $0xb08] ss:$16 sps:$4 sm:$0xff]  }
 0x5c7   :  { %11252 = vmatpush1.bf16.msra.mxu0 %v13558_v5  ;;  %v13638_v5 = vld [vmem:[#allocation6 + $0xcec] ss:$16 sps:$4 sm:$0xff]  }
 0x5c8   :  { %11293 = vmatpush1.bf16.msra.mxu1 %v13561_v58  ;;  %11253 = vmatprep.subr.bf16.mxu0 %v13566_v17  ;;  %v10952_v58 = vadd.f32 %v14201_v60, %v14195_v44  ;;  %v13641_v17 = vld [vmem:[#allocation6 + $0xeec] ss:$16 sps:$4 sm:$0xff]  }
 0x5c9   :  { %11294 = vmatprep.subr.bf16.mxu1 %v13569_v7  ;;  %v10954_v7 = vadd.f32 %v14208_v61, %v14199_v18  ;;  %v13642_v18 = vld [vmem:[#allocation6 + $0xcc8] ss:$16 sps:$4 sm:$0xff]  }
 0x5cb   :  { %11254 = vmatpush1.bf16.msra.mxu0 %v13564_v30  ;;  %v13636_v30 = vld [vmem:[#allocation6 + $0xce8] ss:$16 sps:$4 sm:$0xff]   ;;  %v10995_v44 = vadd.f32 %v14211_v2, %v10954_v7 }
 0x5cc   :  { %11295 = vmatpush1.bf16.msra.mxu1 %v13567_v21  ;;  %11255 = vmatprep.subr.bf16.mxu0 %v13572_v41  ;;  %v13639_v21 = vld [vmem:[#allocation6 + $0xee8] ss:$16 sps:$4 sm:$0xff]   ;;  %v10993_v41 = vadd.f32 %v14204_v6, %v10952_v58  ;;  %v13650_v6 = vld [vmem:[#allocation6 + $0xcac] ss:$16 sps:$4 sm:$0xff]  }
 0x5cd   :  { %11296 = vmatprep.subr.bf16.mxu1 %v13575_v26  ;;  %v13644_v26 = vld [vmem:[#allocation6 + $0xccc] ss:$16 sps:$4 sm:$0xff]   ;;  %v13705_v7 = vld [vmem:[#allocation6 + $0xf88] ss:$16 sps:$4 sm:$0xff]  }
 0x5ce   :  { %v13707_v58 = vld [vmem:[#allocation6 + $0xf8c] ss:$16 sps:$4 sm:$0xff]  }
 0x5cf   :  { %11256 = vmatpush1.bf16.msra.mxu0 %v13570_v19 }
 0x5d0   :  { %11297 = vmatpush1.bf16.msra.mxu1 %v13573_v50  ;;  %11257 = vmatprep.subr.bf16.mxu0 %v13578_v40  ;;  %v13647_v50 = vld [vmem:[#allocation6 + $0xecc] ss:$16 sps:$4 sm:$0xff]  }
 0x5d1   :  { %11298 = vmatprep.subr.bf16.mxu1 %v13581_v20  ;;  %v13645_v20 = vld [vmem:[#allocation6 + $0xec8] ss:$16 sps:$4 sm:$0xff]  }
 0x5d3   :  { %11258 = vmatpush1.bf16.msra.mxu0 %v13576_v48 }
 0x5d4   :  { %11299 = vmatpush1.bf16.msra.mxu1 %v13579_v23  ;;  %11259 = vmatprep.subr.bf16.mxu0 %v13584_v38  ;;  %v13653_v38 = vld [vmem:[#allocation6 + $0xeac] ss:$16 sps:$4 sm:$0xff]  }
 0x5d5   :  { %11300 = vmatprep.subr.bf16.mxu1 %v13587_v33 }
 0x5d7   :  { %11260 = vmatpush1.bf16.msra.mxu0 %v13582_v62 }
 0x5d8   :  { %11301 = vmatpush1.bf16.msra.mxu1 %v13585_v37  ;;  %11261 = vmatprep.subr.bf16.mxu0 %v13590_v39  ;;  %v13651_v37 = vld [vmem:[#allocation6 + $0xea8] ss:$16 sps:$4 sm:$0xff]   ;;  %v13656_v39 = vld [vmem:[#allocation6 + $0xc8c] ss:$16 sps:$4 sm:$0xff]  }
 0x5d9   :  { %11302 = vmatprep.subr.bf16.mxu1 %v13593_v56  ;;  %v13659_v56 = vld [vmem:[#allocation6 + $0xe8c] ss:$16 sps:$4 sm:$0xff]  }
 0x5db   :  { %11262 = vmatpush2.bf16.msra.mxu0 %v13588_v43  ;;  %v13654_v43 = vld [vmem:[#allocation6 + $0xc88] ss:$16 sps:$4 sm:$0xff]  }
 0x5dc   :  { %11303 = vmatpush2.bf16.msra.mxu1 %v13591_v11  ;;  %11263 = vmatprep.subr.bf16.mxu0 %v13596_v47  ;;  %v13657_v11 = vld [vmem:[#allocation6 + $0xe88] ss:$16 sps:$4 sm:$0xff]   ;;  %v13662_v47 = vld [vmem:[#allocation6 + $0xc6c] ss:$16 sps:$4 sm:$0xff]  }
 0x5dd   :  { %11304 = vmatprep.subr.bf16.mxu1 %v13599_v1  ;;  %v13665_v1 = vld [vmem:[#allocation6 + $0xe6c] ss:$16 sps:$4 sm:$0xff]  }
 0x5df   :  { %11264 = vmatpush2.bf16.msra.mxu0 %v13594_v29  ;;  %v13660_v29 = vld [vmem:[#allocation6 + $0xc68] ss:$16 sps:$4 sm:$0xff]  }
 0x5e0   :  { %11305 = vmatpush2.bf16.msra.mxu1 %v13597_v24  ;;  %11265 = vmatprep.subr.bf16.mxu0 %v13602_v15  ;;  %v13663_v24 = vld [vmem:[#allocation6 + $0xe68] ss:$16 sps:$4 sm:$0xff]   ;;  %v13668_v15 = vld [vmem:[#allocation6 + $0xc4c] ss:$16 sps:$4 sm:$0xff]  }
 0x5e1   :  { %11306 = vmatprep.subr.bf16.mxu1 %v13605_v45  ;;  %v13671_v45 = vld [vmem:[#allocation6 + $0xe4c] ss:$16 sps:$4 sm:$0xff]  }
 0x5e3   :  { %11266 = vmatpush2.bf16.msra.mxu0 %v13600_v49  ;;  %v13666_v49 = vld [vmem:[#allocation6 + $0xc48] ss:$16 sps:$4 sm:$0xff]  }
 0x5e4   :  { %11307 = vmatpush2.bf16.msra.mxu1 %v13603_v28  ;;  %11267 = vmatprep.subr.bf16.mxu0 %v13608_v59  ;;  %v13669_v28 = vld [vmem:[#allocation6 + $0xe48] ss:$16 sps:$4 sm:$0xff]   ;;  %v13674_v59 = vld [vmem:[#allocation6 + $0xc2c] ss:$16 sps:$4 sm:$0xff]  }
 0x5e5   :  { %11308 = vmatprep.subr.bf16.mxu1 %v13611_v36  ;;  %v13677_v36 = vld [vmem:[#allocation6 + $0xe2c] ss:$16 sps:$4 sm:$0xff]  }
 0x5e7   :  { %11268 = vmatpush2.bf16.msra.mxu0 %v13606_v0  ;;  %v13672_v0 = vld [vmem:[#allocation6 + $0xc28] ss:$16 sps:$4 sm:$0xff]  }
 0x5e8   :  { %11309 = vmatpush2.bf16.msra.mxu1 %v13609_v53  ;;  %11269 = vmatprep.subr.bf16.mxu0 %v13614_v54  ;;  %v13675_v53 = vld [vmem:[#allocation6 + $0xe28] ss:$16 sps:$4 sm:$0xff]   ;;  %v13680_v54 = vld [vmem:[#allocation6 + $0xc0c] ss:$16 sps:$4 sm:$0xff]  }
 0x5e9   :  { %11310 = vmatprep.subr.bf16.mxu1 %v13617_v31  ;;  %v13683_v31 = vld [vmem:[#allocation6 + $0xe0c] ss:$16 sps:$4 sm:$0xff]  }
 0x5eb   :  { %11270 = vmatpush2.bf16.msra.mxu0 %v13612_v55  ;;  %v13678_v55 = vld [vmem:[#allocation6 + $0xc08] ss:$16 sps:$4 sm:$0xff]  }
 0x5ec   :  { %11311 = vmatpush2.bf16.msra.mxu1 %v13615_v12  ;;  %11271 = vmatprep.subr.bf16.mxu0 %v13620_v14  ;;  %v13681_v12 = vld [vmem:[#allocation6 + $0xe08] ss:$16 sps:$4 sm:$0xff]   ;;  %v13686_v14 = vld [vmem:[#allocation6 + $0xdec] ss:$16 sps:$4 sm:$0xff]  }
 0x5ed   :  { %11312 = vmatprep.subr.bf16.mxu1 %v13623_v46  ;;  %v13689_v46 = vld [vmem:[#allocation6 + $0xfec] ss:$16 sps:$4 sm:$0xff]  }
 0x5ef   :  { %11272 = vmatpush2.bf16.msra.mxu0 %v13618_v13  ;;  %v13684_v13 = vld [vmem:[#allocation6 + $0xde8] ss:$16 sps:$4 sm:$0xff]  }
 0x5f0   :  { %11313 = vmatpush2.bf16.msra.mxu1 %v13621_v3  ;;  %11273 = vmatprep.subr.bf16.mxu0 %v13626_v25  ;;  %v13687_v3 = vld [vmem:[#allocation6 + $0xfe8] ss:$16 sps:$4 sm:$0xff]   ;;  %v13692_v25 = vld [vmem:[#allocation6 + $0xdcc] ss:$16 sps:$4 sm:$0xff]  }
 0x5f1   :  { %11314 = vmatprep.subr.bf16.mxu1 %v13629_v22  ;;  %v13695_v22 = vld [vmem:[#allocation6 + $0xfcc] ss:$16 sps:$4 sm:$0xff]  }
 0x5f3   :  { %11274 = vmatpush2.bf16.msra.mxu0 %v13624_v10  ;;  %v13690_v10 = vld [vmem:[#allocation6 + $0xdc8] ss:$16 sps:$4 sm:$0xff]  }
 0x5f4   :  { %11315 = vmatpush2.bf16.msra.mxu1 %v13627_v34  ;;  %11275 = vmatprep.subr.bf16.mxu0 %v13632_v4  ;;  %v13693_v34 = vld [vmem:[#allocation6 + $0xfc8] ss:$16 sps:$4 sm:$0xff]   ;;  %v13698_v4 = vld [vmem:[#allocation6 + $0xdac] ss:$16 sps:$4 sm:$0xff]  }
 0x5f5   :  { %11316 = vmatprep.subr.bf16.mxu1 %v13635_v9  ;;  %v13701_v9 = vld [vmem:[#allocation6 + $0xfac] ss:$16 sps:$4 sm:$0xff]  }
 0x5f7   :  { %11276 = vmatpush2.bf16.msra.mxu0 %v13630_v27  ;;  %v13696_v27 = vld [vmem:[#allocation6 + $0xda8] ss:$16 sps:$4 sm:$0xff]  }
 0x5f8   :  { %11317 = vmatpush2.bf16.msra.mxu1 %v13633_v8  ;;  %11327 = vmatprep.subr.bf16.mxu0 %v13638_v5  ;;  %v13699_v8 = vld [vmem:[#allocation6 + $0xfa8] ss:$16 sps:$4 sm:$0xff]   ;;  %v13704_v5 = vld [vmem:[#allocation6 + $0xd8c] ss:$16 sps:$4 sm:$0xff]  }
 0x5f9   :  { %11368 = vmatprep.subr.bf16.mxu1 %v13641_v17  ;;  %v13702_v17 = vld [vmem:[#allocation6 + $0xd88] ss:$16 sps:$4 sm:$0xff]  }
 0x5fa   :  { %v11033_v19 = vpop.f32.mrf.mxu0  ;;  %11278 = vmatmul.mubr.bf16.vlgmr.msra.gmra.mxu0 %v14156_v57 }
 0x5fb   :  { %v11034_v60 = vadd.f32 %v11033_v19, %v10993_v41  ;;  %v11074_v40 = vpop.f32.mrf.mxu1  ;;  %11319 = vmatmul.mubr.bf16.vlgmr.msra.gmra.mxu1 %v14158_v51  ;;  %11328 = vmatpush1.bf16.msra.mxu0 %v13636_v30  ;;  %v13710_v30 = vld [vmem:[#allocation6 + $0xd6c] ss:$16 sps:$4 sm:$0xff]   ;;  %v13708_v41 = vld [vmem:[#allocation6 + $0xd68] ss:$16 sps:$4 sm:$0xff]  }
 0x5fc   :  { %11359 = vmatprep.mubr.bf16.mxu0 %v14160_v63  ;;  %11369 = vmatpush1.bf16.msra.mxu1 %v13639_v21  ;;  %v11035_v61 = vpop.f32.mrf.mxu0  ;;  %v13648_v63 = vld [vmem:[#allocation6 + $0xca8] ss:$16 sps:$4 sm:$0xff]   ;;  %v13713_v21 = vld [vmem:[#allocation6 + $0xf6c] ss:$16 sps:$4 sm:$0xff]  }
 0x5fd   :  { %v11075_v48 = vadd.f32 %v11074_v40, %v11034_v60  ;;  %11400 = vmatprep.mubr.bf16.mxu1 %v14170_v32  ;;  %v11036_v23 = vadd.f32 %v11035_v61, %v10995_v44  ;;  %v11076_v57 = vpop.f32.mrf.mxu1  ;;  %11329 = vmatprep.subr.bf16.mxu0 %v13644_v26  ;;  %v13711_v26 = vld [vmem:[#allocation6 + $0xf68] ss:$16 sps:$4 sm:$0xff]   ;;  %v13716_v19 = vld [vmem:[#allocation6 + $0xd4c] ss:$16 sps:$4 sm:$0xff]  }
 0x5fe   :  { %v11037_v2 = vpop.f32.mrf.mxu0  ;;  %11370 = vmatprep.subr.bf16.mxu1 %v13647_v50  ;;  %v13719_v50 = vld [vmem:[#allocation6 + $0xf4c] ss:$16 sps:$4 sm:$0xff]   ;;  %v13714_v44 = vld [vmem:[#allocation6 + $0xd48] ss:$16 sps:$4 sm:$0xff]  }
 0x5ff   :  { %11409 = vst [vmem:[%s14244_s5] sm:$0xff] %v11075_v48  ;;  %v11077_v51 = vadd.f32 %v11076_v57, %v11036_v23  ;;  %v11078_v33 = vpop.f32.mrf.mxu1  ;;  %11330 = vmatpush1.bf16.msra.mxu0 %v13642_v18  ;;  %v13717_v60 = vld [vmem:[#allocation6 + $0xf48] ss:$16 sps:$4 sm:$0xff]   ;;  %v13722_v40 = vld [vmem:[#allocation6 + $0xd2c] ss:$16 sps:$4 sm:$0xff]  }
 0x600   :  { %11371 = vmatpush1.bf16.msra.mxu1 %v13645_v20  ;;  %v11038_v62 = vpop.f32.mrf.mxu0  ;;  %11331 = vmatprep.subr.bf16.mxu0 %v13650_v6  ;;  %v13725_v18 = vld [vmem:[#allocation6 + $0xf2c] ss:$16 sps:$4 sm:$0xff]   ;;  %v13720_v61 = vld [vmem:[#allocation6 + $0xd28] ss:$16 sps:$4 sm:$0xff]  }
 0x601   :  { %11410 = vst [vmem:[%s14244_s5 + $0x8] sm:$0xff] %v11077_v51  ;;  %v11079_v32 = vpop.f32.mrf.mxu1  ;;  %11372 = vmatprep.subr.bf16.mxu1 %v13653_v38  ;;  %v13723_v20 = vld [vmem:[#allocation6 + $0xf28] ss:$16 sps:$4 sm:$0xff]   ;;  %v13728_v6 = vld [vmem:[#allocation6 + $0xd0c] ss:$16 sps:$4 sm:$0xff]  }
 0x602   :  { %v13731_v48 = vld [vmem:[#allocation6 + $0xf0c] ss:$16 sps:$4 sm:$0xff]   ;;  %v13726_v23 = vld [vmem:[#allocation6 + $0xd08] ss:$16 sps:$4 sm:$0xff]   ;;  %v13735_v38 = vld [vmem:[#allocation7] sm:$0xf] }
 0x603   :  { %11332 = vmatpush1.bf16.msra.mxu0 %v13648_v63  ;;  %v13729_v57 = vld [vmem:[#allocation6 + $0xf08] ss:$16 sps:$4 sm:$0xff]   ;;  %v8184_v2 = vrot.slane %v13735_v38, %v13955_v35  ;;  %v8188_v51 = vrot.slane %v13735_v38, %v13958_v42 }
 0x604   :  { %11373 = vmatpush1.bf16.msra.mxu1 %v13651_v37  ;;  %11333 = vmatprep.subr.bf16.mxu0 %v13656_v39 }
 0x605   :  { %11374 = vmatprep.subr.bf16.mxu1 %v13659_v56 }
 0x607   :  { %11334 = vmatpush1.bf16.msra.mxu0 %v13654_v43 }
 0x608   :  { %11375 = vmatpush1.bf16.msra.mxu1 %v13657_v11  ;;  %11335 = vmatprep.subr.bf16.mxu0 %v13662_v47 }
 0x609   :  { %11376 = vmatprep.subr.bf16.mxu1 %v13665_v1 }
 0x60b   :  { %11336 = vmatpush1.bf16.msra.mxu0 %v13660_v29 }
 0x60c   :  { %11377 = vmatpush1.bf16.msra.mxu1 %v13663_v24  ;;  %11337 = vmatprep.subr.bf16.mxu0 %v13668_v15 }
 0x60d   :  { %11378 = vmatprep.subr.bf16.mxu1 %v13671_v45 }
 0x60f   :  { %11338 = vmatpush1.bf16.msra.mxu0 %v13666_v49 }
 0x610   :  { %11379 = vmatpush1.bf16.msra.mxu1 %v13669_v28  ;;  %11339 = vmatprep.subr.bf16.mxu0 %v13674_v59 }
 0x611   :  { %11380 = vmatprep.subr.bf16.mxu1 %v13677_v36 }
 0x613   :  { %11340 = vmatpush1.bf16.msra.mxu0 %v13672_v0 }
 0x614   :  { %11381 = vmatpush1.bf16.msra.mxu1 %v13675_v53  ;;  %11341 = vmatprep.subr.bf16.mxu0 %v13680_v54 }
 0x615   :  { %11382 = vmatprep.subr.bf16.mxu1 %v13683_v31 }
 0x617   :  { %11342 = vmatpush1.bf16.msra.mxu0 %v13678_v55 }
 0x618   :  { %11383 = vmatpush1.bf16.msra.mxu1 %v13681_v12  ;;  %11343 = vmatprep.subr.bf16.mxu0 %v13686_v14 }
 0x619   :  { %11384 = vmatprep.subr.bf16.mxu1 %v13689_v46 }
 0x61b   :  { %11344 = vmatpush2.bf16.msra.mxu0 %v13684_v13 }
 0x61c   :  { %11385 = vmatpush2.bf16.msra.mxu1 %v13687_v3  ;;  %11345 = vmatprep.subr.bf16.mxu0 %v13692_v25 }
 0x61d   :  { %11386 = vmatprep.subr.bf16.mxu1 %v13695_v22 }
 0x61f   :  { %11346 = vmatpush2.bf16.msra.mxu0 %v13690_v10 }
 0x620   :  { %11387 = vmatpush2.bf16.msra.mxu1 %v13693_v34  ;;  %11347 = vmatprep.subr.bf16.mxu0 %v13698_v4 }
 0x621   :  { %11388 = vmatprep.subr.bf16.mxu1 %v13701_v9 }
 0x623   :  { %11348 = vmatpush2.bf16.msra.mxu0 %v13696_v27 }
 0x624   :  { %11389 = vmatpush2.bf16.msra.mxu1 %v13699_v8  ;;  %11349 = vmatprep.subr.bf16.mxu0 %v13704_v5 }
 0x625   :  { %11390 = vmatprep.subr.bf16.mxu1 %v13707_v58 }
 0x627   :  { %11350 = vmatpush2.bf16.msra.mxu0 %v13702_v17 }
 0x628   :  { %11391 = vmatpush2.bf16.msra.mxu1 %v13705_v7  ;;  %11351 = vmatprep.subr.bf16.mxu0 %v13710_v30 }
 0x629   :  { %11392 = vmatprep.subr.bf16.mxu1 %v13713_v21 }
 0x62b   :  { %11352 = vmatpush2.bf16.msra.mxu0 %v13708_v41 }
 0x62c   :  { %11393 = vmatpush2.bf16.msra.mxu1 %v13711_v26  ;;  %11353 = vmatprep.subr.bf16.mxu0 %v13716_v19 }
 0x62d   :  { %11394 = vmatprep.subr.bf16.mxu1 %v13719_v50 }
 0x62f   :  { %11354 = vmatpush2.bf16.msra.mxu0 %v13714_v44 }
 0x630   :  { %11395 = vmatpush2.bf16.msra.mxu1 %v13717_v60  ;;  %11355 = vmatprep.subr.bf16.mxu0 %v13722_v40 }
 0x631   :  { %11396 = vmatprep.subr.bf16.mxu1 %v13725_v18 }
 0x633   :  { %11356 = vmatpush2.bf16.msra.mxu0 %v13720_v61 }
 0x634   :  { %11397 = vmatpush2.bf16.msra.mxu1 %v13723_v20  ;;  %11357 = vmatprep.subr.bf16.mxu0 %v13728_v6 }
 0x635   :  { %11398 = vmatprep.subr.bf16.mxu1 %v13731_v48 }
 0x637   :  { %11358 = vmatpush2.bf16.msra.mxu0 %v13726_v23 }
 0x638   :  { %11399 = vmatpush2.bf16.msra.mxu1 %v13729_v57 }
 0x63a   :  { %v11115_v33 = vpop.f32.mrf.mxu0  ;;  %11360 = vmatmul.mubr.bf16.vlgmr.msra.gmra.mxu0 %v14178_v52 }
 0x63b   :  { %v11116_v63 = vadd.f32 %v11115_v33, %v8184_v2  ;;  %v11156_v62 = vpop.f32.mrf.mxu1  ;;  %11401 = vmatmul.mubr.bf16.vlgmr.msra.gmra.mxu1 %v14180_v16 }
 0x63c   :  { %v11117_v37 = vpop.f32.mrf.mxu0 }
 0x63d   :  { %v11157_v39 = vadd.f32 %v11156_v62, %v11116_v63  ;;  %v11118_v32 = vadd.f32 %v11117_v37, %v8188_v51  ;;  %v11158_v56 = vpop.f32.mrf.mxu1 }
 0x63e   :  { %v11119_v43 = vpop.f32.mrf.mxu0 }
 0x63f   :  { %v11159_v11 = vadd.f32 %v11158_v56, %v11118_v32  ;;  %v11160_v47 = vpop.f32.mrf.mxu1 }
 0x640   :  { %v11120_v1 = vpop.f32.mrf.mxu0 }
 0x641   :  { %v11161_v29 = vpop.f32.mrf.mxu1 }
 0x67a   :  { %v11197_v35 = vpop.f32.mrf.mxu0 }
 0x67b   :  { %v11198_v24 = vadd.f32 %v11197_v35, %v11157_v39  ;;  %v11238_v15 = vpop.f32.mrf.mxu1 }
 0x67c   :  { %v11199_v42 = vpop.f32.mrf.mxu0 }
 0x67d   :  { %v11239_v45 = vadd.f32 %v11238_v15, %v11198_v24  ;;  %v11200_v49 = vadd.f32 %v11199_v42, %v11159_v11  ;;  %v11240_v52 = vpop.f32.mrf.mxu1 }
 0x67e   :  { %v11201_v28 = vpop.f32.mrf.mxu0 }
 0x67f   :  { %v11241_v59 = vadd.f32 %v11240_v52, %v11200_v49  ;;  %v11242_v36 = vpop.f32.mrf.mxu1 }
 0x680   :  { %v11202_v16 = vpop.f32.mrf.mxu0 }
 0x681   :  { %v11243_v0 = vpop.f32.mrf.mxu1 }
 0x6ba   :  { %v11279_v53 = vpop.f32.mrf.mxu0 }
 0x6bb   :  { %v11320_v54 = vpop.f32.mrf.mxu1  ;;  %v11280_v3 = vadd.f32 %v11279_v53, %v11239_v45 }
 0x6bc   :  { %v11281_v31 = vpop.f32.mrf.mxu0 }
 0x6bd   :  { %v11322_v55 = vpop.f32.mrf.mxu1  ;;  %v11282_v25 = vadd.f32 %v11281_v31, %v11241_v59  ;;  %v11321_v22 = vadd.f32 %v11320_v54, %v11280_v3 }
 0x6be   :  { %v11283_v12 = vpop.f32.mrf.mxu0 }
 0x6bf   :  { %v11324_v14 = vpop.f32.mrf.mxu1  ;;  %v11323_v34 = vadd.f32 %v11322_v55, %v11282_v25 }
 0x6c0   :  { %v11284_v46 = vpop.f32.mrf.mxu0 }
 0x6c1   :  { %v11325_v13 = vpop.f32.mrf.mxu1 }
 0x6fa   :  { %v11361_v10 = vpop.f32.mrf.mxu0 }
 0x6fb   :  { %v11362_v4 = vadd.f32 %v11361_v10, %v11321_v22  ;;  %v11402_v9 = vpop.f32.mrf.mxu1 }
 0x6fc   :  { %v11363_v27 = vpop.f32.mrf.mxu0 }
 0x6fd   :  { %v11403_v8 = vadd.f32 %v11402_v9, %v11362_v4  ;;  %v11364_v5 = vadd.f32 %v11363_v27, %v11323_v34  ;;  %v11404_v58 = vpop.f32.mrf.mxu1 }
 0x6fe   :  { %v11365_v17 = vpop.f32.mrf.mxu0 }
 0x6ff   :  { %11411 = vst [vmem:[%s14244_s5 + $0x10] sm:$0xff] %v11403_v8  ;;  %v11405_v7 = vadd.f32 %v11404_v58, %v11364_v5  ;;  %v11406_v30 = vpop.f32.mrf.mxu1 }
 0x700   :  { %v11366_v21 = vpop.f32.mrf.mxu0 }
 0x701   :  { %11412 = vst [vmem:[%s14244_s5 + $0x18] sm:$0xff] %v11405_v7  ;;  %v11407_v41 = vpop.f32.mrf.mxu1 }
 0x702   :  { %11417 = vsyncpa [#allocation3], 1 }
 0x703   :  { %11418 = vsyncpa [#allocation5], 1 }
 0x704   :  { %11419 = vsyncpa [#allocation8], 1 }

</bundles_post_ra>
